<compile_context>
chip_gen: v7x
topology: tpu7x:2x2x1
jax: 0.10.0
libtpu: 0.0.40
codegen_flags: <defaults>
</compile_context>

<pallas_src>
import functools

import jax
import jax.numpy as jnp
import numpy as np
from jax import lax
from jax.experimental import pallas as pl
from jax.experimental.pallas import tpu as pltpu


def _elu(x):
    # exp() only sees non-positive arguments (no inf generated then discarded).
    return jnp.where(x > 0, x, jnp.exp(jnp.minimum(x, 0.0)) - 1.0)


# ------------------------------ fused kernel -------------------------------


def _pack_block_kernel(x_ref, w1_ref, g1_ref, b1_ref, m1cg_ref, m1gc_ref,
                       w3e2_ref, b3_ref, w2f_ref, g2_ref, b2_ref, m2cg_ref,
                       m2gc_ref, o_ref, y3s_ref, zs_ref, acc_ref, *,
                       h2, w2, cds, k3, cout, cin2, mrows, rpad, bsz, eps,
                       use_conv3d, need_last_nolin):
    """One grid step = `bsz` batch samples, everything fused in VMEM."""
    w2p = w2 + 2
    R = bsz * mrows
    nvalid = h2 * w2
    cpg1 = cds // 16
    cpg2 = cout // 16

    def gnorm(v, gamma, beta, cpg, m_cg, m_gc, vm):
        """GroupNorm(16) over (in-group channels, valid pixels) for 1 sample.

        Assumes invalid rows of `v` are exactly zero (stage 1) or that all
        rows are valid pixels (stage 3, cropped).  Two-pass variance."""
        cnt = float(nvalid * cpg)
        s1 = jnp.sum(v, axis=0, keepdims=True)                     # (1, C)
        if cpg > 1:
            s1 = jnp.dot(jnp.dot(s1, m_cg), m_gc)                  # group sum
        mean = s1 * (1.0 / cnt)
        d = v - mean
        if vm is not None:
            d = d * vm                                             # mask border
        s2 = jnp.sum(d * d, axis=0, keepdims=True)
        if cpg > 1:
            s2 = jnp.dot(jnp.dot(s2, m_cg), m_gc)
        var = s2 * (1.0 / cnt)
        return d * (lax.rsqrt(var + eps) * gamma) + beta

    # ---- valid-pixel mask (per sample), built in-kernel (no div/mod, no DMA)
    rl = lax.broadcasted_iota(jnp.int32, (mrows, 1), 0)
    valid = None
    for i in range(1, h2 + 1):
        st = i * w2p + 1
        hit = (rl >= st) & (rl < st + w2)
        valid = hit if valid is None else (valid | hit)
    vm1 = valid.astype(jnp.float32)                                # (mrows, 1)
    vm_blk = vm1 if bsz == 1 else jnp.concatenate([vm1] * bsz, axis=0)

    # ---- stage 1: 1x1 conv (bf16 MXU) + per-sample GroupNorm(16) + ELU -----
    y = jnp.dot(x_ref[...], w1_ref[...], preferred_element_type=jnp.float32)
    g1, b1 = g1_ref[...], b1_ref[...]
    m1cg = m1cg_ref[...] if cpg1 > 1 else None
    m1gc = m1gc_ref[...] if cpg1 > 1 else None
    parts = []
    for s in range(bsz):
        y_s = y[s * mrows:(s + 1) * mrows, :]        # border rows are exact 0
        o1 = gnorm(y_s, g1, b1, cpg1, m1cg, m1gc, vm1)
        parts.append(_elu(o1) * vm1)                 # re-zero spatial border
    y1 = parts[0] if bsz == 1 else jnp.concatenate(parts, axis=0)   # (R, cds)

    # ---- stage 2: ConstantPad3d(1)+Conv3d(1,k3,3)+bias+ELU on the VPU ------
    if use_conv3d:
        kc = k3 * cds
        zcol = jnp.zeros((R, 1), jnp.float32)
        y1m = jnp.concatenate([zcol, y1[:, :cds - 1]], axis=1)      # depth d-1
        y1p = jnp.concatenate([y1[:, 1:], zcol], axis=1)            # depth d+1
        # one lane-replicated slab, lane = kd*(k3*cds) + k*cds + d
        yrep = jnp.concatenate([y1m] * k3 + [y1] * k3 + [y1p] * k3, axis=1)
        y3s_ref[0:rpad, :] = jnp.zeros((rpad, 3 * kc), jnp.float32)
        y3s_ref[rpad + R:rpad + R + rpad, :] = jnp.zeros((rpad, 3 * kc),
                                                         jnp.float32)
        y3s_ref[rpad:rpad + R, :] = yrep
        acc3 = None
        for t in range(9):                           # 9 wide FMAs, no tiles
            kh, kw = t // 3, t % 3
            dr = (kh - 1) * w2p + (kw - 1)
            term = y3s_ref[rpad + dr:rpad + dr + R, :] * w3e2_ref[t:t + 1, :]
            acc3 = term if acc3 is None else acc3 + term
        pre = acc3[:, 0:kc] + acc3[:, kc:2 * kc] + acc3[:, 2 * kc:3 * kc]
        z = _elu(pre + b3_ref[...]) * vm_blk         # channel order k*cds + d
    else:
        z = y1

    # ---- stage 3: ZeroPad2d(1)+Conv2d(.,out,3) as ONE bf16 MXU matmul ------
    # bf16 staging scratch: bank 0 = z, bank 1 = z shifted down by one row so
    # every packed read below uses an even sublane offset.
    zs_ref[0:rpad, :] = jnp.zeros((rpad, 2 * cin2), jnp.bfloat16)
    zs_ref[rpad + R:rpad + R + rpad, :] = jnp.zeros((rpad, 2 * cin2),
                                                    jnp.bfloat16)
    zs_ref[rpad:rpad + R, 0:cin2] = z.astype(jnp.bfloat16)
    z_dn = jnp.concatenate([jnp.zeros((1, cin2), jnp.float32), z[:R - 1, :]],
                           axis=0)
    zs_ref[rpad:rpad + R, cin2:2 * cin2] = z_dn.astype(jnp.bfloat16)
    taps = []
    for t in range(9):
        kh, kw = t // 3, t % 3
        dr = (kh - 1) * w2p + (kw - 1)
        if dr % 2 == 0:
            taps.append(zs_ref[rpad + dr:rpad + dr + R, 0:cin2])
        else:
            taps.append(zs_ref[rpad + dr + 1:rpad + dr + 1 + R,
                               cin2:2 * cin2])
    op = jnp.concatenate(taps, axis=1)               # (R, 9*cin2) bf16 im2col
    acc_ref[...] = jnp.dot(op, w2f_ref[...],
                           preferred_element_type=jnp.float32)      # (R,cout)

    # ---- crop valid pixels, GroupNorm(16) [+ELU], store NCHW-ordered -------
    g2, b2 = g2_ref[...], b2_ref[...]
    m2cg = m2cg_ref[...] if cpg2 > 1 else None
    m2gc = m2gc_ref[...] if cpg2 > 1 else None
    for s in range(bsz):
        base = s * mrows
        rows = [acc_ref[base + (i + 1) * w2p + 1:
                        base + (i + 1) * w2p + 1 + w2, :]
                for i in range(h2)]
        v = jnp.concatenate(rows, axis=0)            # (h2*w2, cout), valid px
        o = gnorm(v, g2, b2, cpg2, m2cg, m2gc, None)
        if need_last_nolin:
            o = _elu(o)
        o_ref[s] = o.T                               # (cout, h2*w2)


# ----------------------------- wrapper (glue) -------------------------------


def pack_block_forward(x, params, *, use_conv3d=True, use_refl=False,
                       need_last_nolin=True, eps=1e-10, max_batch_block=8):
    if use_refl:
        # TODO(synk): ReflectionPad2d / ReplicationPad3d branch not implemented.
        raise NotImplementedError("use_refl=True is not supported")
    n, c, h, w = x.shape
    h2, w2 = h // 2, w // 2
    w2p = w2 + 2
    mfull = (h2 + 2) * w2p
    mrows = -(-mfull // 8) * 8                  # per-sample rows, 8-aligned
    rpad = -(-(w2p + 1) // 8) * 8               # zero guard rows >= max shift
    cds = c // 2                                # downscaled_channel
    k3 = params['w3d'].shape[0] if use_conv3d else 1
    cin2 = k3 * cds if use_conv3d else cds
    cout = params['w2'].shape[0]

    # samples per grid step: amortize per-step overhead / DMAs, but keep >= 2
    # grid steps when possible so both v7x TensorCores get work.
    bsz = 1
    for b in range(1, min(n, max_batch_block) + 1):
        if n % b == 0 and n // b >= 2:
            bsz = b
    R = bsz * mrows

    # SpaceToDepth(2) -> channels-last (bh, bw, c) -> zero pad -> padded-flat.
    xs = x.reshape(n, c, h2, 2, w2, 2).transpose(0, 2, 4, 3, 5, 1)
    xs = xs.reshape(n, h2, w2, 4 * c)
    xs = jnp.pad(xs, ((0, 0), (1, 1), (1, 1), (0, 0))).reshape(n, mfull, 4 * c)
    xs = jnp.pad(xs, ((0, 0), (0, mrows - mfull), (0, 0)))
    xs = xs.reshape(n * mrows, 4 * c).astype(jnp.bfloat16)

    # Conv weights as (single-) matmul operands, bf16 for the native MXU path.
    w1 = params['w1'].reshape(cds, 4 * c).T.astype(jnp.bfloat16)    # (4C,Cds)
    w2f = params['w2'].transpose(2, 3, 1, 0).reshape(9 * cin2, cout)
    w2f = w2f.astype(jnp.bfloat16)                                  # (9*Cin2,Co)
    g1 = params['g1'].reshape(1, cds).astype(jnp.float32)
    b1 = params['b1'].reshape(1, cds).astype(jnp.float32)
    g2 = params['g2'].reshape(1, cout).astype(jnp.float32)
    b2 = params['b2'].reshape(1, cout).astype(jnp.float32)

    def gmask(ch):
        return jnp.asarray((np.arange(ch)[:, None] // (ch // 16)
                            == np.arange(16)[None, :]).astype(np.float32))
    m1cg, m2cg = gmask(cds), gmask(cout)        # used only if channels/grp > 1

    if use_conv3d:
        # per-lane conv3d weights: lane = kd*(k3*cds) + k*cds + d
        w3 = params['w3d'][:, 0]                                  # (k,kd,kh,kw)
        w3t = jnp.transpose(w3, (2, 3, 1, 0)).reshape(9, 3, k3, 1)
        w3e2 = jnp.repeat(w3t, cds, axis=3).reshape(9, 3 * k3 * cds)
        w3e2 = w3e2.astype(jnp.float32)
        b3row = jnp.repeat(params['b3d'].reshape(k3, 1), cds, axis=1)
        b3row = b3row.reshape(1, k3 * cds).astype(jnp.float32)
        y3s_shape = (R + 2 * rpad, 3 * k3 * cds)
    else:
        w3e2 = jnp.zeros((9, 3 * cds), jnp.float32)
        b3row = jnp.zeros((1, cds), jnp.float32)
        y3s_shape = (8, 128)

    kernel = functools.partial(
        _pack_block_kernel, h2=h2, w2=w2, cds=cds, k3=k3, cout=cout, cin2=cin2,
        mrows=mrows, rpad=rpad, bsz=bsz, eps=eps, use_conv3d=use_conv3d,
        need_last_nolin=need_last_nolin)

    out = pl.pallas_call(
        kernel,
        out_shape=jax.ShapeDtypeStruct((n, cout, h2 * w2), jnp.float32),
        grid=(n // bsz,),
        in_specs=[
            pl.BlockSpec((R, 4 * c), lambda i: (i, 0)),            # x (flat)
            pl.BlockSpec((4 * c, cds), lambda i: (0, 0)),          # w1
            pl.BlockSpec((1, cds), lambda i: (0, 0)),              # g1
            pl.BlockSpec((1, cds), lambda i: (0, 0)),              # b1
            pl.BlockSpec((cds, 16), lambda i: (0, 0)),             # m1 C->G
            pl.BlockSpec((16, cds), lambda i: (0, 0)),             # m1 G->C
            pl.BlockSpec(w3e2.shape, lambda i: (0, 0)),            # conv3d w
            pl.BlockSpec(b3row.shape, lambda i: (0, 0)),           # conv3d b
            pl.BlockSpec((9 * cin2, cout), lambda i: (0, 0)),      # conv2d w
            pl.BlockSpec((1, cout), lambda i: (0, 0)),             # g2
            pl.BlockSpec((1, cout), lambda i: (0, 0)),             # b2
            pl.BlockSpec((cout, 16), lambda i: (0, 0)),            # m2 C->G
            pl.BlockSpec((16, cout), lambda i: (0, 0)),            # m2 G->C
        ],
        out_specs=pl.BlockSpec((bsz, cout, h2 * w2), lambda i: (i, 0, 0)),
        scratch_shapes=[
            pltpu.VMEM(y3s_shape, jnp.float32),                    # conv3d slab
            pltpu.VMEM((R + 2 * rpad, 2 * cin2), jnp.bfloat16),    # conv2d slab
            pltpu.VMEM((R, cout), jnp.float32),                    # conv2d out
        ],
        compiler_params=pltpu.CompilerParams(
            dimension_semantics=("parallel",),
            # ~1 MB used per step; well under the 16/32/32 MiB default scoped
            # VMEM of v5e/v6e/v7x even at max_batch_block samples per step.
            vmem_limit_bytes=32 * 1024 * 1024),
    )(xs, w1, g1, b1, m1cg, m1cg.T, w3e2, b3row, w2f, g2, b2, m2cg, m2cg.T)

    # Kernel already emits valid pixels in NCHW order; this reshape is free.
    return out.reshape(n, cout, h2, w2)


# --------------------------- pure-JAX reference -----------------------------


def space_to_depth(x, bs=2):
    n, c, h, w = x.shape
    x = x.reshape(n, c, h // bs, bs, w // bs, bs)
    x = x.transpose(0, 3, 5, 1, 2, 4)
    return x.reshape(n, c * bs * bs, h // bs, w // bs)


def _group_norm_ref(x, groups, gamma, beta, eps):
    n, c, h, w = x.shape
    xg = x.reshape(n, groups, c // groups, h, w)
    mean = xg.mean(axis=(2, 3, 4), keepdims=True)
    var = ((xg - mean) ** 2).mean(axis=(2, 3, 4), keepdims=True)
    xn = ((xg - mean) / jnp.sqrt(var + eps)).reshape(n, c, h, w)
    return xn * gamma.reshape(1, c, 1, 1) + beta.reshape(1, c, 1, 1)


def ref_forward(x, params, *, need_last_nolin=True):
    n, c, h, w = x.shape
    xs = space_to_depth(x, 2)
    y = lax.conv_general_dilated(
        xs, params['w1'], (1, 1), 'VALID',
        dimension_numbers=('NCHW', 'OIHW', 'NCHW'),
        precision=lax.Precision.HIGHEST)
    y = _group_norm_ref(y, 16, params['g1'], params['b1'], 1e-10)
    y = jax.nn.elu(y)
    cds, h2, w2 = y.shape[1], y.shape[2], y.shape[3]
    y3 = jnp.pad(y[:, None], ((0, 0), (0, 0), (1, 1), (1, 1), (1, 1)))
    y3 = lax.conv_general_dilated(
        y3, params['w3d'], (1, 1, 1), 'VALID',
        dimension_numbers=('NCDHW', 'OIDHW', 'NCDHW'),
        precision=lax.Precision.HIGHEST)
    y3 = y3 + params['b3d'].reshape(1, -1, 1, 1, 1)
    y3 = jax.nn.elu(y3)
    y2 = y3.reshape(n, 4 * cds, h2, w2)
    y2 = jnp.pad(y2, ((0, 0), (0, 0), (1, 1), (1, 1)))
    y2 = lax.conv_general_dilated(
        y2, params['w2'], (1, 1), 'VALID',
        dimension_numbers=('NCHW', 'OIHW', 'NCHW'),
        precision=lax.Precision.HIGHEST)
    y2 = _group_norm_ref(y2, 16, params['g2'], params['b2'], 1e-10)
    if need_last_nolin:
        y2 = jax.nn.elu(y2)
    return y2


# ------------------------------------ main ----------------------------------


if __name__ == "__main__":
    # GroupNorm(16, C) requires in_channels//2 % 16 == 0 and out_channels % 16
    # == 0, so the smallest sensible config is in_channels=32, out_channels=16.
    in_channels, out_channels = 32, 16
    N, H, W = 4, 16, 16
    cds = in_channels // 2

    key = jax.random.PRNGKey(0)
    keys = jax.random.split(key, 9)
    x = jax.random.normal(keys[0], (N, in_channels, H, W), jnp.float32)

    params = {
        # Conv2d(in*4, in//2, 1, bias=False)
        'w1': 0.1 * jax.random.normal(keys[1], (cds, 4 * in_channels, 1, 1),
                                      jnp.float32),
        # GroupNorm(16, in//2)
        'g1': 1.0 + 0.1 * jax.random.normal(keys[2], (cds,), jnp.float32),
        'b1': 0.1 * jax.random.normal(keys[3], (cds,), jnp.float32),
        # Conv3d(1, 4, 3, bias=True)
        'w3d': 0.1 * jax.random.normal(keys[4], (4, 1, 3, 3, 3), jnp.float32),
        'b3d': 0.1 * jax.random.normal(keys[5], (4,), jnp.float32),
        # Conv2d(4 * in//2, out, 3, bias=False)
        'w2': 0.05 * jax.random.normal(keys[6], (out_channels, 4 * cds, 3, 3),
                                       jnp.float32),
        # GroupNorm(16, out)
        'g2': 1.0 + 0.1 * jax.random.normal(keys[7], (out_channels,),
                                            jnp.float32),
        'b2': 0.1 * jax.random.normal(keys[8], (out_channels,), jnp.float32),
    }

    fwd = jax.jit(lambda inp: pack_block_forward(inp, params))
    out = jax.block_until_ready(fwd(x))

    assert out.shape == (N, out_channels, H // 2, W // 2), out.shape
    ref = jax.block_until_ready(ref_forward(x, params))
    np.testing.assert_allclose(np.asarray(out), np.asarray(ref),
                               rtol=2e-2, atol=2e-2)
    print("KERNEL_OK")
</pallas_src>

<mosaic_0001>
module attributes {stable_mosaic.version = 11 : i64} {
  func.func @_pack_block_kernel(%arg0: i32, %arg1: memref<208x128xbf16, #tpu.memory_space<vmem>>, %arg2: memref<128x16xbf16, #tpu.memory_space<vmem>>, %arg3: memref<1x16xf32, #tpu.memory_space<vmem>>, %arg4: memref<1x16xf32, #tpu.memory_space<vmem>>, %arg5: memref<16x16xf32, #tpu.memory_space<vmem>>, %arg6: memref<16x16xf32, #tpu.memory_space<vmem>>, %arg7: memref<9x192xf32, #tpu.memory_space<vmem>>, %arg8: memref<1x64xf32, #tpu.memory_space<vmem>>, %arg9: memref<576x16xbf16, #tpu.memory_space<vmem>>, %arg10: memref<1x16xf32, #tpu.memory_space<vmem>>, %arg11: memref<1x16xf32, #tpu.memory_space<vmem>>, %arg12: memref<16x16xf32, #tpu.memory_space<vmem>>, %arg13: memref<16x16xf32, #tpu.memory_space<vmem>>, %arg14: memref<2x16x64xf32, #tpu.memory_space<vmem>>, %arg15: memref<240x192xf32, #tpu.memory_space<vmem>>, %arg16: memref<240x128xbf16, #tpu.memory_space<vmem>>, %arg17: memref<208x16xf32, #tpu.memory_space<vmem>>) attributes {dimension_semantics = [#tpu.dimension_semantics<parallel>], iteration_bounds = array<i64: 2>, scalar_prefetch = 0 : i64, scratch_operands = 3 : i64, tpu.core_type = #tpu.core_type<tc>, window_params = [{transform_indices = @transform_0, window_bounds = array<i64: 208, 128>}, {pipeline_mode = #tpu.pipeline_mode<synchronous>, transform_indices = @transform_1, window_bounds = array<i64: 128, 16>}, {pipeline_mode = #tpu.pipeline_mode<synchronous>, transform_indices = @transform_2, window_bounds = array<i64: 1, 16>}, {pipeline_mode = #tpu.pipeline_mode<synchronous>, transform_indices = @transform_3, window_bounds = array<i64: 1, 16>}, {pipeline_mode = #tpu.pipeline_mode<synchronous>, transform_indices = @transform_4, window_bounds = array<i64: 16, 16>}, {pipeline_mode = #tpu.pipeline_mode<synchronous>, transform_indices = @transform_5, window_bounds = array<i64: 16, 16>}, {pipeline_mode = #tpu.pipeline_mode<synchronous>, transform_indices = @transform_6, window_bounds = array<i64: 9, 192>}, {pipeline_mode = #tpu.pipeline_mode<synchronous>, transform_indices = @transform_7, window_bounds = array<i64: 1, 64>}, {pipeline_mode = #tpu.pipeline_mode<synchronous>, transform_indices = @transform_8, window_bounds = array<i64: 576, 16>}, {pipeline_mode = #tpu.pipeline_mode<synchronous>, transform_indices = @transform_9, window_bounds = array<i64: 1, 16>}, {pipeline_mode = #tpu.pipeline_mode<synchronous>, transform_indices = @transform_10, window_bounds = array<i64: 1, 16>}, {pipeline_mode = #tpu.pipeline_mode<synchronous>, transform_indices = @transform_11, window_bounds = array<i64: 16, 16>}, {pipeline_mode = #tpu.pipeline_mode<synchronous>, transform_indices = @transform_12, window_bounds = array<i64: 16, 16>}, {transform_indices = @transform_13, window_bounds = array<i64: 2, 16, 64>}]} {
    %0 = tpu.iota {dimensions = array<i32: 0>} : vector<104x1xi32>
    %c11_i32 = arith.constant 11 : i32
    %1 = vector.broadcast %c11_i32 : i32 to vector<104x1xi32>
    %2 = arith.cmpi sge, %0, %1 : vector<104x1xi32>
    %c19_i32 = arith.constant 19 : i32
    %3 = vector.broadcast %c19_i32 : i32 to vector<104x1xi32>
    %4 = arith.cmpi slt, %0, %3 : vector<104x1xi32>
    %5 = arith.andi %2, %4 : vector<104x1xi1>
    %c21_i32 = arith.constant 21 : i32
    %6 = vector.broadcast %c21_i32 : i32 to vector<104x1xi32>
    %7 = arith.cmpi sge, %0, %6 : vector<104x1xi32>
    %c29_i32 = arith.constant 29 : i32
    %8 = vector.broadcast %c29_i32 : i32 to vector<104x1xi32>
    %9 = arith.cmpi slt, %0, %8 : vector<104x1xi32>
    %10 = arith.andi %7, %9 : vector<104x1xi1>
    %11 = arith.ori %5, %10 : vector<104x1xi1>
    %c31_i32 = arith.constant 31 : i32
    %12 = vector.broadcast %c31_i32 : i32 to vector<104x1xi32>
    %13 = arith.cmpi sge, %0, %12 : vector<104x1xi32>
    %c39_i32 = arith.constant 39 : i32
    %14 = vector.broadcast %c39_i32 : i32 to vector<104x1xi32>
    %15 = arith.cmpi slt, %0, %14 : vector<104x1xi32>
    %16 = arith.andi %13, %15 : vector<104x1xi1>
    %17 = arith.ori %11, %16 : vector<104x1xi1>
    %c41_i32 = arith.constant 41 : i32
    %18 = vector.broadcast %c41_i32 : i32 to vector<104x1xi32>
    %19 = arith.cmpi sge, %0, %18 : vector<104x1xi32>
    %c49_i32 = arith.constant 49 : i32
    %20 = vector.broadcast %c49_i32 : i32 to vector<104x1xi32>
    %21 = arith.cmpi slt, %0, %20 : vector<104x1xi32>
    %22 = arith.andi %19, %21 : vector<104x1xi1>
    %23 = arith.ori %17, %22 : vector<104x1xi1>
    %c51_i32 = arith.constant 51 : i32
    %24 = vector.broadcast %c51_i32 : i32 to vector<104x1xi32>
    %25 = arith.cmpi sge, %0, %24 : vector<104x1xi32>
    %c59_i32 = arith.constant 59 : i32
    %26 = vector.broadcast %c59_i32 : i32 to vector<104x1xi32>
    %27 = arith.cmpi slt, %0, %26 : vector<104x1xi32>
    %28 = arith.andi %25, %27 : vector<104x1xi1>
    %29 = arith.ori %23, %28 : vector<104x1xi1>
    %c61_i32 = arith.constant 61 : i32
    %30 = vector.broadcast %c61_i32 : i32 to vector<104x1xi32>
    %31 = arith.cmpi sge, %0, %30 : vector<104x1xi32>
    %c69_i32 = arith.constant 69 : i32
    %32 = vector.broadcast %c69_i32 : i32 to vector<104x1xi32>
    %33 = arith.cmpi slt, %0, %32 : vector<104x1xi32>
    %34 = arith.andi %31, %33 : vector<104x1xi1>
    %35 = arith.ori %29, %34 : vector<104x1xi1>
    %c71_i32 = arith.constant 71 : i32
    %36 = vector.broadcast %c71_i32 : i32 to vector<104x1xi32>
    %37 = arith.cmpi sge, %0, %36 : vector<104x1xi32>
    %c79_i32 = arith.constant 79 : i32
    %38 = vector.broadcast %c79_i32 : i32 to vector<104x1xi32>
    %39 = arith.cmpi slt, %0, %38 : vector<104x1xi32>
    %40 = arith.andi %37, %39 : vector<104x1xi1>
    %41 = arith.ori %35, %40 : vector<104x1xi1>
    %c81_i32 = arith.constant 81 : i32
    %42 = vector.broadcast %c81_i32 : i32 to vector<104x1xi32>
    %43 = arith.cmpi sge, %0, %42 : vector<104x1xi32>
    %c89_i32 = arith.constant 89 : i32
    %44 = vector.broadcast %c89_i32 : i32 to vector<104x1xi32>
    %45 = arith.cmpi slt, %0, %44 : vector<104x1xi32>
    %46 = arith.andi %43, %45 : vector<104x1xi1>
    %47 = arith.ori %41, %46 : vector<104x1xi1>
    %48 = arith.extui %47 : vector<104x1xi1> to vector<104x1xi32>
    %49 = arith.sitofp %48 : vector<104x1xi32> to vector<104x1xf32>
    %50 = tpu.concatenate %49, %49 in 0 : vector<104x1xf32>, vector<104x1xf32> -> vector<208x1xf32>
    %c0 = arith.constant 0 : index
    %c0_0 = arith.constant 0 : index
    %51 = vector.load %arg1[%c0, %c0_0] : memref<208x128xbf16, #tpu.memory_space<vmem>>, vector<208x128xbf16>
    %c0_1 = arith.constant 0 : index
    %c0_2 = arith.constant 0 : index
    %52 = vector.load %arg2[%c0_1, %c0_2] : memref<128x16xbf16, #tpu.memory_space<vmem>>, vector<128x16xbf16>
    %cst = arith.constant dense<0.000000e+00> : vector<208x16xf32>
    %53 = tpu.matmul %51, %52, %cst {dimension_numbers = #tpu.dot_dimension_numbers<[1], [0], [0], [1], [0, 0, 1, 1], [], []>} : vector<208x128xbf16>, vector<128x16xbf16>, vector<208x16xf32> -> vector<208x16xf32>
    %c0_3 = arith.constant 0 : index
    %c0_4 = arith.constant 0 : index
    %54 = vector.load %arg3[%c0_3, %c0_4] : memref<1x16xf32, #tpu.memory_space<vmem>>, vector<1x16xf32>
    %c0_5 = arith.constant 0 : index
    %c0_6 = arith.constant 0 : index
    %55 = vector.load %arg4[%c0_5, %c0_6] : memref<1x16xf32, #tpu.memory_space<vmem>>, vector<1x16xf32>
    %56 = vector.extract_strided_slice %53 {offsets = [0, 0], sizes = [104, 16], strides = [1, 1]} : vector<208x16xf32> to vector<104x16xf32>
    %cst_7 = arith.constant dense<0.000000e+00> : vector<16xf32>
    %57 = vector.multi_reduction <add>, %56, %cst_7 [0] : vector<104x16xf32> to vector<16xf32>
    %58 = vector.shape_cast %57 : vector<16xf32> to vector<1x16xf32>
    %cst_8 = arith.constant 1.562500e-02 : f32
    %59 = vector.broadcast %cst_8 : f32 to vector<1x16xf32>
    %60 = arith.mulf %58, %59 : vector<1x16xf32>
    %61 = vector.broadcast %60 : vector<1x16xf32> to vector<104x16xf32>
    %62 = arith.subf %56, %61 : vector<104x16xf32>
    %63 = vector.broadcast %49 : vector<104x1xf32> to vector<104x16xf32>
    %64 = arith.mulf %62, %63 : vector<104x16xf32>
    %65 = arith.mulf %64, %64 : vector<104x16xf32>
    %cst_9 = arith.constant dense<0.000000e+00> : vector<16xf32>
    %66 = vector.multi_reduction <add>, %65, %cst_9 [0] : vector<104x16xf32> to vector<16xf32>
    %67 = vector.shape_cast %66 : vector<16xf32> to vector<1x16xf32>
    %cst_10 = arith.constant 1.562500e-02 : f32
    %68 = vector.broadcast %cst_10 : f32 to vector<1x16xf32>
    %69 = arith.mulf %67, %68 : vector<1x16xf32>
    %cst_11 = arith.constant 1.000000e-10 : f32
    %70 = vector.broadcast %cst_11 : f32 to vector<1x16xf32>
    %71 = arith.addf %69, %70 : vector<1x16xf32>
    %72 = math.rsqrt %71 : vector<1x16xf32>
    %73 = arith.mulf %72, %54 : vector<1x16xf32>
    %74 = vector.broadcast %73 : vector<1x16xf32> to vector<104x16xf32>
    %75 = arith.mulf %64, %74 : vector<104x16xf32>
    %76 = vector.broadcast %55 : vector<1x16xf32> to vector<104x16xf32>
    %77 = arith.addf %75, %76 : vector<104x16xf32>
    %cst_12 = arith.constant 0.000000e+00 : f32
    %78 = vector.broadcast %cst_12 : f32 to vector<104x16xf32>
    %79 = arith.cmpf ogt, %77, %78 : vector<104x16xf32>
    %cst_13 = arith.constant 0.000000e+00 : f32
    %80 = vector.broadcast %cst_13 : f32 to vector<104x16xf32>
    %81 = arith.minimumf %77, %80 : vector<104x16xf32>
    %82 = math.exp %81 : vector<104x16xf32>
    %cst_14 = arith.constant 1.000000e+00 : f32
    %83 = vector.broadcast %cst_14 : f32 to vector<104x16xf32>
    %84 = arith.subf %82, %83 : vector<104x16xf32>
    %85 = arith.select %79, %77, %84 : vector<104x16xi1>, vector<104x16xf32>
    %86 = vector.broadcast %49 : vector<104x1xf32> to vector<104x16xf32>
    %87 = arith.mulf %85, %86 : vector<104x16xf32>
    %88 = vector.extract_strided_slice %53 {offsets = [104, 0], sizes = [104, 16], strides = [1, 1]} : vector<208x16xf32> to vector<104x16xf32>
    %cst_15 = arith.constant dense<0.000000e+00> : vector<16xf32>
    %89 = vector.multi_reduction <add>, %88, %cst_15 [0] : vector<104x16xf32> to vector<16xf32>
    %90 = vector.shape_cast %89 : vector<16xf32> to vector<1x16xf32>
    %cst_16 = arith.constant 1.562500e-02 : f32
    %91 = vector.broadcast %cst_16 : f32 to vector<1x16xf32>
    %92 = arith.mulf %90, %91 : vector<1x16xf32>
    %93 = vector.broadcast %92 : vector<1x16xf32> to vector<104x16xf32>
    %94 = arith.subf %88, %93 : vector<104x16xf32>
    %95 = vector.broadcast %49 : vector<104x1xf32> to vector<104x16xf32>
    %96 = arith.mulf %94, %95 : vector<104x16xf32>
    %97 = arith.mulf %96, %96 : vector<104x16xf32>
    %cst_17 = arith.constant dense<0.000000e+00> : vector<16xf32>
    %98 = vector.multi_reduction <add>, %97, %cst_17 [0] : vector<104x16xf32> to vector<16xf32>
    %99 = vector.shape_cast %98 : vector<16xf32> to vector<1x16xf32>
    %cst_18 = arith.constant 1.562500e-02 : f32
    %100 = vector.broadcast %cst_18 : f32 to vector<1x16xf32>
    %101 = arith.mulf %99, %100 : vector<1x16xf32>
    %cst_19 = arith.constant 1.000000e-10 : f32
    %102 = vector.broadcast %cst_19 : f32 to vector<1x16xf32>
    %103 = arith.addf %101, %102 : vector<1x16xf32>
    %104 = math.rsqrt %103 : vector<1x16xf32>
    %105 = arith.mulf %104, %54 : vector<1x16xf32>
    %106 = vector.broadcast %105 : vector<1x16xf32> to vector<104x16xf32>
    %107 = arith.mulf %96, %106 : vector<104x16xf32>
    %108 = vector.broadcast %55 : vector<1x16xf32> to vector<104x16xf32>
    %109 = arith.addf %107, %108 : vector<104x16xf32>
    %cst_20 = arith.constant 0.000000e+00 : f32
    %110 = vector.broadcast %cst_20 : f32 to vector<104x16xf32>
    %111 = arith.cmpf ogt, %109, %110 : vector<104x16xf32>
    %cst_21 = arith.constant 0.000000e+00 : f32
    %112 = vector.broadcast %cst_21 : f32 to vector<104x16xf32>
    %113 = arith.minimumf %109, %112 : vector<104x16xf32>
    %114 = math.exp %113 : vector<104x16xf32>
    %cst_22 = arith.constant 1.000000e+00 : f32
    %115 = vector.broadcast %cst_22 : f32 to vector<104x16xf32>
    %116 = arith.subf %114, %115 : vector<104x16xf32>
    %117 = arith.select %111, %109, %116 : vector<104x16xi1>, vector<104x16xf32>
    %118 = vector.broadcast %49 : vector<104x1xf32> to vector<104x16xf32>
    %119 = arith.mulf %117, %118 : vector<104x16xf32>
    %120 = tpu.concatenate %87, %119 in 0 : vector<104x16xf32>, vector<104x16xf32> -> vector<208x16xf32>
    %cst_23 = arith.constant 0.000000e+00 : f32
    %121 = vector.broadcast %cst_23 : f32 to vector<208x1xf32>
    %122 = vector.extract_strided_slice %120 {offsets = [0, 0], sizes = [208, 15], strides = [1, 1]} : vector<208x16xf32> to vector<208x15xf32>
    %123 = tpu.concatenate %121, %122 in 1 : vector<208x1xf32>, vector<208x15xf32> -> vector<208x16xf32>
    %124 = vector.extract_strided_slice %120 {offsets = [0, 1], sizes = [208, 15], strides = [1, 1]} : vector<208x16xf32> to vector<208x15xf32>
    %125 = tpu.concatenate %124, %121 in 1 : vector<208x15xf32>, vector<208x1xf32> -> vector<208x16xf32>
    %126 = tpu.concatenate %123, %123, %123, %123, %120, %120, %120, %120, %125, %125, %125, %125 in 1 : vector<208x16xf32>, vector<208x16xf32>, vector<208x16xf32>, vector<208x16xf32>, vector<208x16xf32>, vector<208x16xf32>, vector<208x16xf32>, vector<208x16xf32>, vector<208x16xf32>, vector<208x16xf32>, vector<208x16xf32>, vector<208x16xf32> -> vector<208x192xf32>
    %cst_24 = arith.constant 0.000000e+00 : f32
    %127 = vector.broadcast %cst_24 : f32 to vector<16x192xf32>
    %c0_25 = arith.constant 0 : index
    %c0_26 = arith.constant 0 : index
    %128 = vector.load %arg15[%c0_25, %c0_26] : memref<240x192xf32, #tpu.memory_space<vmem>>, vector<16x192xf32>
    tpu.vector_store %arg15[%c0_25, %c0_26], %127 {strides = array<i32>} : memref<240x192xf32, #tpu.memory_space<vmem>>, vector<16x192xf32>,
    %cst_27 = arith.constant 0.000000e+00 : f32
    %129 = vector.broadcast %cst_27 : f32 to vector<16x192xf32>
    %c224 = arith.constant 224 : index
    %c0_28 = arith.constant 0 : index
    %130 = vector.load %arg15[%c224, %c0_28] : memref<240x192xf32, #tpu.memory_space<vmem>>, vector<16x192xf32>
    tpu.vector_store %arg15[%c224, %c0_28], %129 {strides = array<i32>} : memref<240x192xf32, #tpu.memory_space<vmem>>, vector<16x192xf32>,
    %c16 = arith.constant 16 : index
    %c0_29 = arith.constant 0 : index
    %131 = vector.load %arg15[%c16, %c0_29] : memref<240x192xf32, #tpu.memory_space<vmem>>, vector<208x192xf32>
    tpu.vector_store %arg15[%c16, %c0_29], %126 {strides = array<i32>} : memref<240x192xf32, #tpu.memory_space<vmem>>, vector<208x192xf32>,
    %c5 = arith.constant 5 : index
    %c0_30 = arith.constant 0 : index
    %132 = vector.load %arg15[%c5, %c0_30] : memref<240x192xf32, #tpu.memory_space<vmem>>, vector<208x192xf32>
    %c0_31 = arith.constant 0 : index
    %c0_32 = arith.constant 0 : index
    %133 = vector.load %arg7[%c0_31, %c0_32] : memref<9x192xf32, #tpu.memory_space<vmem>>, vector<1x192xf32>
    %134 = vector.broadcast %133 : vector<1x192xf32> to vector<208x192xf32>
    %135 = arith.mulf %132, %134 : vector<208x192xf32>
    %c6 = arith.constant 6 : index
    %c0_33 = arith.constant 0 : index
    %136 = vector.load %arg15[%c6, %c0_33] : memref<240x192xf32, #tpu.memory_space<vmem>>, vector<208x192xf32>
    %c1 = arith.constant 1 : index
    %c0_34 = arith.constant 0 : index
    %137 = vector.load %arg7[%c1, %c0_34] : memref<9x192xf32, #tpu.memory_space<vmem>>, vector<1x192xf32>
    %138 = vector.broadcast %137 : vector<1x192xf32> to vector<208x192xf32>
    %139 = arith.mulf %136, %138 : vector<208x192xf32>
    %140 = arith.addf %135, %139 : vector<208x192xf32>
    %c7 = arith.constant 7 : index
    %c0_35 = arith.constant 0 : index
    %141 = vector.load %arg15[%c7, %c0_35] : memref<240x192xf32, #tpu.memory_space<vmem>>, vector<208x192xf32>
    %c2 = arith.constant 2 : index
    %c0_36 = arith.constant 0 : index
    %142 = vector.load %arg7[%c2, %c0_36] : memref<9x192xf32, #tpu.memory_space<vmem>>, vector<1x192xf32>
    %143 = vector.broadcast %142 : vector<1x192xf32> to vector<208x192xf32>
    %144 = arith.mulf %141, %143 : vector<208x192xf32>
    %145 = arith.addf %140, %144 : vector<208x192xf32>
    %c15 = arith.constant 15 : index
    %c0_37 = arith.constant 0 : index
    %146 = vector.load %arg15[%c15, %c0_37] : memref<240x192xf32, #tpu.memory_space<vmem>>, vector<208x192xf32>
    %c3 = arith.constant 3 : index
    %c0_38 = arith.constant 0 : index
    %147 = vector.load %arg7[%c3, %c0_38] : memref<9x192xf32, #tpu.memory_space<vmem>>, vector<1x192xf32>
    %148 = vector.broadcast %147 : vector<1x192xf32> to vector<208x192xf32>
    %149 = arith.mulf %146, %148 : vector<208x192xf32>
    %150 = arith.addf %145, %149 : vector<208x192xf32>
    %c16_39 = arith.constant 16 : index
    %c0_40 = arith.constant 0 : index
    %151 = vector.load %arg15[%c16_39, %c0_40] : memref<240x192xf32, #tpu.memory_space<vmem>>, vector<208x192xf32>
    %c4 = arith.constant 4 : index
    %c0_41 = arith.constant 0 : index
    %152 = vector.load %arg7[%c4, %c0_41] : memref<9x192xf32, #tpu.memory_space<vmem>>, vector<1x192xf32>
    %153 = vector.broadcast %152 : vector<1x192xf32> to vector<208x192xf32>
    %154 = arith.mulf %151, %153 : vector<208x192xf32>
    %155 = arith.addf %150, %154 : vector<208x192xf32>
    %c17 = arith.constant 17 : index
    %c0_42 = arith.constant 0 : index
    %156 = vector.load %arg15[%c17, %c0_42] : memref<240x192xf32, #tpu.memory_space<vmem>>, vector<208x192xf32>
    %c5_43 = arith.constant 5 : index
    %c0_44 = arith.constant 0 : index
    %157 = vector.load %arg7[%c5_43, %c0_44] : memref<9x192xf32, #tpu.memory_space<vmem>>, vector<1x192xf32>
    %158 = vector.broadcast %157 : vector<1x192xf32> to vector<208x192xf32>
    %159 = arith.mulf %156, %158 : vector<208x192xf32>
    %160 = arith.addf %155, %159 : vector<208x192xf32>
    %c25 = arith.constant 25 : index
    %c0_45 = arith.constant 0 : index
    %161 = vector.load %arg15[%c25, %c0_45] : memref<240x192xf32, #tpu.memory_space<vmem>>, vector<208x192xf32>
    %c6_46 = arith.constant 6 : index
    %c0_47 = arith.constant 0 : index
    %162 = vector.load %arg7[%c6_46, %c0_47] : memref<9x192xf32, #tpu.memory_space<vmem>>, vector<1x192xf32>
    %163 = vector.broadcast %162 : vector<1x192xf32> to vector<208x192xf32>
    %164 = arith.mulf %161, %163 : vector<208x192xf32>
    %165 = arith.addf %160, %164 : vector<208x192xf32>
    %c26 = arith.constant 26 : index
    %c0_48 = arith.constant 0 : index
    %166 = vector.load %arg15[%c26, %c0_48] : memref<240x192xf32, #tpu.memory_space<vmem>>, vector<208x192xf32>
    %c7_49 = arith.constant 7 : index
    %c0_50 = arith.constant 0 : index
    %167 = vector.load %arg7[%c7_49, %c0_50] : memref<9x192xf32, #tpu.memory_space<vmem>>, vector<1x192xf32>
    %168 = vector.broadcast %167 : vector<1x192xf32> to vector<208x192xf32>
    %169 = arith.mulf %166, %168 : vector<208x192xf32>
    %170 = arith.addf %165, %169 : vector<208x192xf32>
    %c27 = arith.constant 27 : index
    %c0_51 = arith.constant 0 : index
    %171 = vector.load %arg15[%c27, %c0_51] : memref<240x192xf32, #tpu.memory_space<vmem>>, vector<208x192xf32>
    %c8 = arith.constant 8 : index
    %c0_52 = arith.constant 0 : index
    %172 = vector.load %arg7[%c8, %c0_52] : memref<9x192xf32, #tpu.memory_space<vmem>>, vector<1x192xf32>
    %173 = vector.broadcast %172 : vector<1x192xf32> to vector<208x192xf32>
    %174 = arith.mulf %171, %173 : vector<208x192xf32>
    %175 = arith.addf %170, %174 : vector<208x192xf32>
    %176 = vector.extract_strided_slice %175 {offsets = [0, 0], sizes = [208, 64], strides = [1, 1]} : vector<208x192xf32> to vector<208x64xf32>
    %177 = vector.extract_strided_slice %175 {offsets = [0, 64], sizes = [208, 64], strides = [1, 1]} : vector<208x192xf32> to vector<208x64xf32>
    %178 = arith.addf %176, %177 : vector<208x64xf32>
    %179 = vector.extract_strided_slice %175 {offsets = [0, 128], sizes = [208, 64], strides = [1, 1]} : vector<208x192xf32> to vector<208x64xf32>
    %180 = arith.addf %178, %179 : vector<208x64xf32>
    %c0_53 = arith.constant 0 : index
    %c0_54 = arith.constant 0 : index
    %181 = vector.load %arg8[%c0_53, %c0_54] : memref<1x64xf32, #tpu.memory_space<vmem>>, vector<1x64xf32>
    %182 = vector.broadcast %181 : vector<1x64xf32> to vector<208x64xf32>
    %183 = arith.addf %180, %182 : vector<208x64xf32>
    %cst_55 = arith.constant 0.000000e+00 : f32
    %184 = vector.broadcast %cst_55 : f32 to vector<208x64xf32>
    %185 = arith.cmpf ogt, %183, %184 : vector<208x64xf32>
    %cst_56 = arith.constant 0.000000e+00 : f32
    %186 = vector.broadcast %cst_56 : f32 to vector<208x64xf32>
    %187 = arith.minimumf %183, %186 : vector<208x64xf32>
    %188 = math.exp %187 : vector<208x64xf32>
    %cst_57 = arith.constant 1.000000e+00 : f32
    %189 = vector.broadcast %cst_57 : f32 to vector<208x64xf32>
    %190 = arith.subf %188, %189 : vector<208x64xf32>
    %191 = arith.select %185, %183, %190 : vector<208x64xi1>, vector<208x64xf32>
    %192 = vector.broadcast %50 : vector<208x1xf32> to vector<208x64xf32>
    %193 = arith.mulf %191, %192 : vector<208x64xf32>
    %cst_58 = arith.constant 0.000000e+00 : bf16
    %194 = vector.broadcast %cst_58 : bf16 to vector<16x128xbf16>
    %c0_59 = arith.constant 0 : index
    %c0_60 = arith.constant 0 : index
    %195 = vector.load %arg16[%c0_59, %c0_60] : memref<240x128xbf16, #tpu.memory_space<vmem>>, vector<16x128xbf16>
    tpu.vector_store %arg16[%c0_59, %c0_60], %194 {strides = array<i32>} : memref<240x128xbf16, #tpu.memory_space<vmem>>, vector<16x128xbf16>,
    %cst_61 = arith.constant 0.000000e+00 : bf16
    %196 = vector.broadcast %cst_61 : bf16 to vector<16x128xbf16>
    %c224_62 = arith.constant 224 : index
    %c0_63 = arith.constant 0 : index
    %197 = vector.load %arg16[%c224_62, %c0_63] : memref<240x128xbf16, #tpu.memory_space<vmem>>, vector<16x128xbf16>
    tpu.vector_store %arg16[%c224_62, %c0_63], %196 {strides = array<i32>} : memref<240x128xbf16, #tpu.memory_space<vmem>>, vector<16x128xbf16>,
    %198 = arith.truncf %193 : vector<208x64xf32> to vector<208x64xbf16>
    %c16_64 = arith.constant 16 : index
    %c0_65 = arith.constant 0 : index
    %199 = vector.load %arg16[%c16_64, %c0_65] : memref<240x128xbf16, #tpu.memory_space<vmem>>, vector<208x64xbf16>
    tpu.vector_store %arg16[%c16_64, %c0_65], %198 {strides = array<i32>} : memref<240x128xbf16, #tpu.memory_space<vmem>>, vector<208x64xbf16>,
    %cst_66 = arith.constant 0.000000e+00 : f32
    %200 = vector.broadcast %cst_66 : f32 to vector<1x64xf32>
    %201 = vector.extract_strided_slice %193 {offsets = [0, 0], sizes = [207, 64], strides = [1, 1]} : vector<208x64xf32> to vector<207x64xf32>
    %202 = tpu.concatenate %200, %201 in 0 : vector<1x64xf32>, vector<207x64xf32> -> vector<208x64xf32>
    %203 = arith.truncf %202 : vector<208x64xf32> to vector<208x64xbf16>
    %c16_67 = arith.constant 16 : index
    %c64 = arith.constant 64 : index
    %204 = vector.load %arg16[%c16_67, %c64] : memref<240x128xbf16, #tpu.memory_space<vmem>>, vector<208x64xbf16>
    tpu.vector_store %arg16[%c16_67, %c64], %203 {strides = array<i32>} : memref<240x128xbf16, #tpu.memory_space<vmem>>, vector<208x64xbf16>,
    %c6_68 = arith.constant 6 : index
    %c64_69 = arith.constant 64 : index
    %205 = vector.load %arg16[%c6_68, %c64_69] : memref<240x128xbf16, #tpu.memory_space<vmem>>, vector<208x64xbf16>
    %c6_70 = arith.constant 6 : index
    %c0_71 = arith.constant 0 : index
    %206 = vector.load %arg16[%c6_70, %c0_71] : memref<240x128xbf16, #tpu.memory_space<vmem>>, vector<208x64xbf16>
    %c8_72 = arith.constant 8 : index
    %c64_73 = arith.constant 64 : index
    %207 = vector.load %arg16[%c8_72, %c64_73] : memref<240x128xbf16, #tpu.memory_space<vmem>>, vector<208x64xbf16>
    %c16_74 = arith.constant 16 : index
    %c64_75 = arith.constant 64 : index
    %208 = vector.load %arg16[%c16_74, %c64_75] : memref<240x128xbf16, #tpu.memory_space<vmem>>, vector<208x64xbf16>
    %c16_76 = arith.constant 16 : index
    %c0_77 = arith.constant 0 : index
    %209 = vector.load %arg16[%c16_76, %c0_77] : memref<240x128xbf16, #tpu.memory_space<vmem>>, vector<208x64xbf16>
    %c18 = arith.constant 18 : index
    %c64_78 = arith.constant 64 : index
    %210 = vector.load %arg16[%c18, %c64_78] : memref<240x128xbf16, #tpu.memory_space<vmem>>, vector<208x64xbf16>
    %c26_79 = arith.constant 26 : index
    %c64_80 = arith.constant 64 : index
    %211 = vector.load %arg16[%c26_79, %c64_80] : memref<240x128xbf16, #tpu.memory_space<vmem>>, vector<208x64xbf16>
    %c26_81 = arith.constant 26 : index
    %c0_82 = arith.constant 0 : index
    %212 = vector.load %arg16[%c26_81, %c0_82] : memref<240x128xbf16, #tpu.memory_space<vmem>>, vector<208x64xbf16>
    %c28 = arith.constant 28 : index
    %c64_83 = arith.constant 64 : index
    %213 = vector.load %arg16[%c28, %c64_83] : memref<240x128xbf16, #tpu.memory_space<vmem>>, vector<208x64xbf16>
    %214 = tpu.concatenate %205, %206, %207, %208, %209, %210, %211, %212, %213 in 1 : vector<208x64xbf16>, vector<208x64xbf16>, vector<208x64xbf16>, vector<208x64xbf16>, vector<208x64xbf16>, vector<208x64xbf16>, vector<208x64xbf16>, vector<208x64xbf16>, vector<208x64xbf16> -> vector<208x576xbf16>
    %c0_84 = arith.constant 0 : index
    %c0_85 = arith.constant 0 : index
    %215 = vector.load %arg9[%c0_84, %c0_85] : memref<576x16xbf16, #tpu.memory_space<vmem>>, vector<576x16xbf16>
    %cst_86 = arith.constant dense<0.000000e+00> : vector<208x16xf32>
    %216 = tpu.matmul %214, %215, %cst_86 {dimension_numbers = #tpu.dot_dimension_numbers<[1], [0], [0], [1], [0, 0, 1, 1], [], []>} : vector<208x576xbf16>, vector<576x16xbf16>, vector<208x16xf32> -> vector<208x16xf32>
    %c0_87 = arith.constant 0 : index
    %c0_88 = arith.constant 0 : index
    %217 = vector.load %arg17[%c0_87, %c0_88] : memref<208x16xf32, #tpu.memory_space<vmem>>, vector<208x16xf32>
    tpu.vector_store %arg17[%c0_87, %c0_88], %216 {strides = array<i32>} : memref<208x16xf32, #tpu.memory_space<vmem>>, vector<208x16xf32>,
    %c0_89 = arith.constant 0 : index
    %c0_90 = arith.constant 0 : index
    %218 = vector.load %arg10[%c0_89, %c0_90] : memref<1x16xf32, #tpu.memory_space<vmem>>, vector<1x16xf32>
    %c0_91 = arith.constant 0 : index
    %c0_92 = arith.constant 0 : index
    %219 = vector.load %arg11[%c0_91, %c0_92] : memref<1x16xf32, #tpu.memory_space<vmem>>, vector<1x16xf32>
    %c11 = arith.constant 11 : index
    %c0_93 = arith.constant 0 : index
    %220 = vector.load %arg17[%c11, %c0_93] : memref<208x16xf32, #tpu.memory_space<vmem>>, vector<8x16xf32>
    %c21 = arith.constant 21 : index
    %c0_94 = arith.constant 0 : index
    %221 = vector.load %arg17[%c21, %c0_94] : memref<208x16xf32, #tpu.memory_space<vmem>>, vector<8x16xf32>
    %c31 = arith.constant 31 : index
    %c0_95 = arith.constant 0 : index
    %222 = vector.load %arg17[%c31, %c0_95] : memref<208x16xf32, #tpu.memory_space<vmem>>, vector<8x16xf32>
    %c41 = arith.constant 41 : index
    %c0_96 = arith.constant 0 : index
    %223 = vector.load %arg17[%c41, %c0_96] : memref<208x16xf32, #tpu.memory_space<vmem>>, vector<8x16xf32>
    %c51 = arith.constant 51 : index
    %c0_97 = arith.constant 0 : index
    %224 = vector.load %arg17[%c51, %c0_97] : memref<208x16xf32, #tpu.memory_space<vmem>>, vector<8x16xf32>
    %c61 = arith.constant 61 : index
    %c0_98 = arith.constant 0 : index
    %225 = vector.load %arg17[%c61, %c0_98] : memref<208x16xf32, #tpu.memory_space<vmem>>, vector<8x16xf32>
    %c71 = arith.constant 71 : index
    %c0_99 = arith.constant 0 : index
    %226 = vector.load %arg17[%c71, %c0_99] : memref<208x16xf32, #tpu.memory_space<vmem>>, vector<8x16xf32>
    %c81 = arith.constant 81 : index
    %c0_100 = arith.constant 0 : index
    %227 = vector.load %arg17[%c81, %c0_100] : memref<208x16xf32, #tpu.memory_space<vmem>>, vector<8x16xf32>
    %228 = tpu.concatenate %220, %221, %222, %223, %224, %225, %226, %227 in 0 : vector<8x16xf32>, vector<8x16xf32>, vector<8x16xf32>, vector<8x16xf32>, vector<8x16xf32>, vector<8x16xf32>, vector<8x16xf32>, vector<8x16xf32> -> vector<64x16xf32>
    %cst_101 = arith.constant dense<0.000000e+00> : vector<16xf32>
    %229 = vector.multi_reduction <add>, %228, %cst_101 [0] : vector<64x16xf32> to vector<16xf32>
    %230 = vector.shape_cast %229 : vector<16xf32> to vector<1x16xf32>
    %cst_102 = arith.constant 1.562500e-02 : f32
    %231 = vector.broadcast %cst_102 : f32 to vector<1x16xf32>
    %232 = arith.mulf %230, %231 : vector<1x16xf32>
    %233 = vector.broadcast %232 : vector<1x16xf32> to vector<64x16xf32>
    %234 = arith.subf %228, %233 : vector<64x16xf32>
    %235 = arith.mulf %234, %234 : vector<64x16xf32>
    %cst_103 = arith.constant dense<0.000000e+00> : vector<16xf32>
    %236 = vector.multi_reduction <add>, %235, %cst_103 [0] : vector<64x16xf32> to vector<16xf32>
    %237 = vector.shape_cast %236 : vector<16xf32> to vector<1x16xf32>
    %cst_104 = arith.constant 1.562500e-02 : f32
    %238 = vector.broadcast %cst_104 : f32 to vector<1x16xf32>
    %239 = arith.mulf %237, %238 : vector<1x16xf32>
    %cst_105 = arith.constant 1.000000e-10 : f32
    %240 = vector.broadcast %cst_105 : f32 to vector<1x16xf32>
    %241 = arith.addf %239, %240 : vector<1x16xf32>
    %242 = math.rsqrt %241 : vector<1x16xf32>
    %243 = arith.mulf %242, %218 : vector<1x16xf32>
    %244 = vector.broadcast %243 : vector<1x16xf32> to vector<64x16xf32>
    %245 = arith.mulf %234, %244 : vector<64x16xf32>
    %246 = vector.broadcast %219 : vector<1x16xf32> to vector<64x16xf32>
    %247 = arith.addf %245, %246 : vector<64x16xf32>
    %cst_106 = arith.constant 0.000000e+00 : f32
    %248 = vector.broadcast %cst_106 : f32 to vector<64x16xf32>
    %249 = arith.cmpf ogt, %247, %248 : vector<64x16xf32>
    %cst_107 = arith.constant 0.000000e+00 : f32
    %250 = vector.broadcast %cst_107 : f32 to vector<64x16xf32>
    %251 = arith.minimumf %247, %250 : vector<64x16xf32>
    %252 = math.exp %251 : vector<64x16xf32>
    %cst_108 = arith.constant 1.000000e+00 : f32
    %253 = vector.broadcast %cst_108 : f32 to vector<64x16xf32>
    %254 = arith.subf %252, %253 : vector<64x16xf32>
    %255 = arith.select %249, %247, %254 : vector<64x16xi1>, vector<64x16xf32>
    %256 = tpu.transpose %255, [1, 0] : vector<64x16xf32> -> vector<16x64xf32>
    %c0_109 = arith.constant 0 : index
    %c0_110 = arith.constant 0 : index
    %c0_111 = arith.constant 0 : index
    %257 = vector.load %arg14[%c0_109, %c0_110, %c0_111] : memref<2x16x64xf32, #tpu.memory_space<vmem>>, vector<1x16x64xf32>
    %258 = vector.shape_cast %257 : vector<1x16x64xf32> to vector<16x64xf32>
    %259 = vector.shape_cast %256 : vector<16x64xf32> to vector<1x16x64xf32>
    tpu.vector_store %arg14[%c0_109, %c0_110, %c0_111], %259 {strides = array<i32>} : memref<2x16x64xf32, #tpu.memory_space<vmem>>, vector<1x16x64xf32>,
    %c115 = arith.constant 115 : index
    %c0_112 = arith.constant 0 : index
    %260 = vector.load %arg17[%c115, %c0_112] : memref<208x16xf32, #tpu.memory_space<vmem>>, vector<8x16xf32>
    %c125 = arith.constant 125 : index
    %c0_113 = arith.constant 0 : index
    %261 = vector.load %arg17[%c125, %c0_113] : memref<208x16xf32, #tpu.memory_space<vmem>>, vector<8x16xf32>
    %c135 = arith.constant 135 : index
    %c0_114 = arith.constant 0 : index
    %262 = vector.load %arg17[%c135, %c0_114] : memref<208x16xf32, #tpu.memory_space<vmem>>, vector<8x16xf32>
    %c145 = arith.constant 145 : index
    %c0_115 = arith.constant 0 : index
    %263 = vector.load %arg17[%c145, %c0_115] : memref<208x16xf32, #tpu.memory_space<vmem>>, vector<8x16xf32>
    %c155 = arith.constant 155 : index
    %c0_116 = arith.constant 0 : index
    %264 = vector.load %arg17[%c155, %c0_116] : memref<208x16xf32, #tpu.memory_space<vmem>>, vector<8x16xf32>
    %c165 = arith.constant 165 : index
    %c0_117 = arith.constant 0 : index
    %265 = vector.load %arg17[%c165, %c0_117] : memref<208x16xf32, #tpu.memory_space<vmem>>, vector<8x16xf32>
    %c175 = arith.constant 175 : index
    %c0_118 = arith.constant 0 : index
    %266 = vector.load %arg17[%c175, %c0_118] : memref<208x16xf32, #tpu.memory_space<vmem>>, vector<8x16xf32>
    %c185 = arith.constant 185 : index
    %c0_119 = arith.constant 0 : index
    %267 = vector.load %arg17[%c185, %c0_119] : memref<208x16xf32, #tpu.memory_space<vmem>>, vector<8x16xf32>
    %268 = tpu.concatenate %260, %261, %262, %263, %264, %265, %266, %267 in 0 : vector<8x16xf32>, vector<8x16xf32>, vector<8x16xf32>, vector<8x16xf32>, vector<8x16xf32>, vector<8x16xf32>, vector<8x16xf32>, vector<8x16xf32> -> vector<64x16xf32>
    %cst_120 = arith.constant dense<0.000000e+00> : vector<16xf32>
    %269 = vector.multi_reduction <add>, %268, %cst_120 [0] : vector<64x16xf32> to vector<16xf32>
    %270 = vector.shape_cast %269 : vector<16xf32> to vector<1x16xf32>
    %cst_121 = arith.constant 1.562500e-02 : f32
    %271 = vector.broadcast %cst_121 : f32 to vector<1x16xf32>
    %272 = arith.mulf %270, %271 : vector<1x16xf32>
    %273 = vector.broadcast %272 : vector<1x16xf32> to vector<64x16xf32>
    %274 = arith.subf %268, %273 : vector<64x16xf32>
    %275 = arith.mulf %274, %274 : vector<64x16xf32>
    %cst_122 = arith.constant dense<0.000000e+00> : vector<16xf32>
    %276 = vector.multi_reduction <add>, %275, %cst_122 [0] : vector<64x16xf32> to vector<16xf32>
    %277 = vector.shape_cast %276 : vector<16xf32> to vector<1x16xf32>
    %cst_123 = arith.constant 1.562500e-02 : f32
    %278 = vector.broadcast %cst_123 : f32 to vector<1x16xf32>
    %279 = arith.mulf %277, %278 : vector<1x16xf32>
    %cst_124 = arith.constant 1.000000e-10 : f32
    %280 = vector.broadcast %cst_124 : f32 to vector<1x16xf32>
    %281 = arith.addf %279, %280 : vector<1x16xf32>
    %282 = math.rsqrt %281 : vector<1x16xf32>
    %283 = arith.mulf %282, %218 : vector<1x16xf32>
    %284 = vector.broadcast %283 : vector<1x16xf32> to vector<64x16xf32>
    %285 = arith.mulf %274, %284 : vector<64x16xf32>
    %286 = vector.broadcast %219 : vector<1x16xf32> to vector<64x16xf32>
    %287 = arith.addf %285, %286 : vector<64x16xf32>
    %cst_125 = arith.constant 0.000000e+00 : f32
    %288 = vector.broadcast %cst_125 : f32 to vector<64x16xf32>
    %289 = arith.cmpf ogt, %287, %288 : vector<64x16xf32>
    %cst_126 = arith.constant 0.000000e+00 : f32
    %290 = vector.broadcast %cst_126 : f32 to vector<64x16xf32>
    %291 = arith.minimumf %287, %290 : vector<64x16xf32>
    %292 = math.exp %291 : vector<64x16xf32>
    %cst_127 = arith.constant 1.000000e+00 : f32
    %293 = vector.broadcast %cst_127 : f32 to vector<64x16xf32>
    %294 = arith.subf %292, %293 : vector<64x16xf32>
    %295 = arith.select %289, %287, %294 : vector<64x16xi1>, vector<64x16xf32>
    %296 = tpu.transpose %295, [1, 0] : vector<64x16xf32> -> vector<16x64xf32>
    %c1_128 = arith.constant 1 : index
    %c0_129 = arith.constant 0 : index
    %c0_130 = arith.constant 0 : index
    %297 = vector.load %arg14[%c1_128, %c0_129, %c0_130] : memref<2x16x64xf32, #tpu.memory_space<vmem>>, vector<1x16x64xf32>
    %298 = vector.shape_cast %297 : vector<1x16x64xf32> to vector<16x64xf32>
    %299 = vector.shape_cast %296 : vector<16x64xf32> to vector<1x16x64xf32>
    tpu.vector_store %arg14[%c1_128, %c0_129, %c0_130], %299 {strides = array<i32>} : memref<2x16x64xf32, #tpu.memory_space<vmem>>, vector<1x16x64xf32>,
    return
  }
  func.func @transform_0(%arg0: i32) -> (i32, i32) {
    %c0_i32 = arith.constant 0 : i32
    %c0_i32_0 = arith.constant 0 : i32
    return %arg0, %c0_i32 : i32, i32
  }
  func.func @transform_1(%arg0: i32) -> (i32, i32) {
    %c0_i32 = arith.constant 0 : i32
    %c0_i32_0 = arith.constant 0 : i32
    %c0_i32_1 = arith.constant 0 : i32
    return %c0_i32, %c0_i32_0 : i32, i32
  }
  func.func @transform_2(%arg0: i32) -> (i32, i32) {
    %c0_i32 = arith.constant 0 : i32
    %c0_i32_0 = arith.constant 0 : i32
    %c0_i32_1 = arith.constant 0 : i32
    return %c0_i32, %c0_i32_0 : i32, i32
  }
  func.func @transform_3(%arg0: i32) -> (i32, i32) {
    %c0_i32 = arith.constant 0 : i32
    %c0_i32_0 = arith.constant 0 : i32
    %c0_i32_1 = arith.constant 0 : i32
    return %c0_i32, %c0_i32_0 : i32, i32
  }
  func.func @transform_4(%arg0: i32) -> (i32, i32) {
    %c0_i32 = arith.constant 0 : i32
    %c0_i32_0 = arith.constant 0 : i32
    %c0_i32_1 = arith.constant 0 : i32
    return %c0_i32, %c0_i32_0 : i32, i32
  }
  func.func @transform_5(%arg0: i32) -> (i32, i32) {
    %c0_i32 = arith.constant 0 : i32
    %c0_i32_0 = arith.constant 0 : i32
    %c0_i32_1 = arith.constant 0 : i32
    return %c0_i32, %c0_i32_0 : i32, i32
  }
  func.func @transform_6(%arg0: i32) -> (i32, i32) {
    %c0_i32 = arith.constant 0 : i32
    %c0_i32_0 = arith.constant 0 : i32
    %c0_i32_1 = arith.constant 0 : i32
    return %c0_i32, %c0_i32_0 : i32, i32
  }
  func.func @transform_7(%arg0: i32) -> (i32, i32) {
    %c0_i32 = arith.constant 0 : i32
    %c0_i32_0 = arith.constant 0 : i32
    %c0_i32_1 = arith.constant 0 : i32
    return %c0_i32, %c0_i32_0 : i32, i32
  }
  func.func @transform_8(%arg0: i32) -> (i32, i32) {
    %c0_i32 = arith.constant 0 : i32
    %c0_i32_0 = arith.constant 0 : i32
    %c0_i32_1 = arith.constant 0 : i32
    return %c0_i32, %c0_i32_0 : i32, i32
  }
  func.func @transform_9(%arg0: i32) -> (i32, i32) {
    %c0_i32 = arith.constant 0 : i32
    %c0_i32_0 = arith.constant 0 : i32
    %c0_i32_1 = arith.constant 0 : i32
    return %c0_i32, %c0_i32_0 : i32, i32
  }
  func.func @transform_10(%arg0: i32) -> (i32, i32) {
    %c0_i32 = arith.constant 0 : i32
    %c0_i32_0 = arith.constant 0 : i32
    %c0_i32_1 = arith.constant 0 : i32
    return %c0_i32, %c0_i32_0 : i32, i32
  }
  func.func @transform_11(%arg0: i32) -> (i32, i32) {
    %c0_i32 = arith.constant 0 : i32
    %c0_i32_0 = arith.constant 0 : i32
    %c0_i32_1 = arith.constant 0 : i32
    return %c0_i32, %c0_i32_0 : i32, i32
  }
  func.func @transform_12(%arg0: i32) -> (i32, i32) {
    %c0_i32 = arith.constant 0 : i32
    %c0_i32_0 = arith.constant 0 : i32
    %c0_i32_1 = arith.constant 0 : i32
    return %c0_i32, %c0_i32_0 : i32, i32
  }
  func.func @transform_13(%arg0: i32) -> (i32, i32, i32) {
    %c0_i32 = arith.constant 0 : i32
    %c0_i32_0 = arith.constant 0 : i32
    %c0_i32_1 = arith.constant 0 : i32
    return %arg0, %c0_i32, %c0_i32_0 : i32, i32, i32
  }
}

</mosaic_0001>

<bundles_post_ra>
// kernel: _lambda_.1
= control target key start
LH: loop header
LB: loop body
LE: loop exit
PB: predicated region body
PF: predicated region fallthrough
CT: control target
= control target key end

     0   :  { %s9437_s23 = smov 0   ;;  %s17426_s0 = inlined_call_operand.vmem [shape: bf16[416,128], index: 0, kind: input, shape index: {}]   ;;  %s17427_s1 = inlined_call_operand.vmem [shape: bf16[128,16], index: 1, kind: input, shape index: {}]   ;;  %s17428_s2 = inlined_call_operand.vmem [shape: f32[1,16], index: 2, kind: input, shape index: {}]   ;;  %s17429_s3 = inlined_call_operand.vmem [shape: f32[1,16], index: 3, kind: input, shape index: {}]   ;;  %s17430_s4 = inlined_call_operand.vmem [shape: f32[16,16], index: 4, kind: input, shape index: {}, may-alias: {4,5,11,12}]   ;;  %s17431_s5 = inlined_call_operand.vmem [shape: f32[16,16], index: 5, kind: input, shape index: {}, may-alias: {4,5,11,12}]   ;;  %s17432_s6 = inlined_call_operand.vmem [shape: f32[9,192], index: 6, kind: input, shape index: {}]   ;;  %s17433_s7 = inlined_call_operand.vmem [shape: f32[1,64], index: 7, kind: input, shape index: {}]   ;;  %s17434_s8 = inlined_call_operand.vmem [shape: bf16[576,16], index: 8, kind: input, shape index: {}]   ;;  %s17435_s9 = inlined_call_operand.vmem [shape: f32[1,16], index: 9, kind: input, shape index: {}]   ;;  %s17436_s10 = inlined_call_operand.vmem [shape: f32[1,16], index: 10, kind: input, shape index: {}]   ;;  %s17437_s11 = inlined_call_operand.vmem [shape: f32[16,16], index: 11, kind: input, shape index: {}, may-alias: {4,5,11,12}]   ;;  %s17438_s12 = inlined_call_operand.vmem [shape: f32[16,16], index: 12, kind: input, shape index: {}, may-alias: {4,5,11,12}]   ;;  %s17439_s13 = inlined_call_operand.vmem [shape: f32[4,16,64], index: 13, kind: output, shape index: {}]  }
   0x1 LB: > { %s8555_s24 = sadd.s32 4294967295, %s9353_s23   ;;  %p8559_p0 = scmp.ge.s32.totalorder %s9353_s23, 1  ;;  %s9353_s23 = sphi %s9437_s23, %s23_s23  }
   0x2   : > { %p388_p1 = scmp.lt.s32.totalorder %s9353_s23, 3 }
   0x4   : > { %p389_p2 = pnand %p8559_p0, %p388_p1 }
   0x6   : > { %392 = sbr.rel (%p389_p2) target bundleno = 2353 (0x931), region = 72 }
   0xd   : > { %v9136_v0 = vld [vmem:[%s17427_s1] sm:$0xff]   ;;  %v9355_v1 = vmov 0.0   ;;  %v9137_v2 = vld [vmem:[%s17427_s1 + $0x8] sm:$0xff]   ;;  %vm9356_vm0 = vmmov 0   ;;  %s433_s27 = smul.u32 26, %s8555_s24  ;;  %v9138_v3 = vld [vmem:[%s17427_s1 + $0x10] sm:$0xff]   ;;  %v447_v22 = vlaneseq }
   0xe   : > { %8956 = vmatprep.subr.bf16.mxu0 %v9355_v1  ;;  %2992 = vst [vmem:[#allocation2] sm:$0xff] %v9355_v1  ;;  %2994 = vst [vmem:[#allocation2 + $0x10] sm:$0xff] %v9355_v1  ;;  %8972 = vmatprep.mubr.msk.bf16.mxu0 %vm9356_vm0, %v9355_v1  ;;  %v9139_v4 = vld [vmem:[%s17427_s1 + $0x18] sm:$0xff]   ;;  %v9140_v5 = vld [vmem:[%s17427_s1 + $0x20] sm:$0xff]   ;;  %vm1197_vm1 = vcmask 130048   ;;  %v9357_v45 = vmov 0  }
   0xf   : > { %2996 = vst [vmem:[#allocation2 + $0x1c0] sm:$0xff] %v9355_v1  ;;  %2998 = vst [vmem:[#allocation2 + $0x1d0] sm:$0xff] %v9355_v1  ;;  %8957 = vmatpush3.bf16.msra.mxu0 %v9136_v0  ;;  %p434_p3 = scmp.lt.s32.totalorder %s433_s27, 51  ;;  %v9141_v6 = vld [vmem:[%s17427_s1 + $0x28] sm:$0xff]   ;;  %v9142_v7 = vld [vmem:[%s17427_s1 + $0x30] sm:$0xff]   ;;  %v9531_v26 = vshrl.u32 %v447_v22, 7  ;;  %9104 = vset.pattern.permute.xlu1 %v9357_v45 }
  0x10   : > { %8958 = vmatprep.subr.bf16.mxu0 %v9355_v1  ;;  %v9143_v8 = vld [vmem:[%s17427_s1 + $0x38] sm:$0xff]   ;;  %6362 = vst [vmem:[#allocation3] sm:$0xff] %v9357_v45  ;;  %6363 = vst [vmem:[#allocation3 + $0x70] sm:$0xff] %v9357_v45  ;;  %9110 = vset.pattern.permute.xlu0 %v9357_v45  ;;  %s9358_s29 = smov 1   ;;  %s9360_s14 = smov 80  }
  0x11   : > { %s18599_s27 = smov (!%p434_p3, %s433_s27), 51  ;;  %v449_v31 = vadd.s32 8, %v9531_v26  ;;  %v450_v32 = vadd.s32 16, %v9531_v26  ;;  %v451_v33 = vadd.s32 24, %v9531_v26  ;;  %v452_v37 = vadd.s32 32, %v9531_v26  ;;  %s9361_s15 = smov 127  }
  0x12   : > { %s8560_s30 = sshll.u32 %s18599_s27, 2  ;;  %v453_v38 = vadd.s32 40, %v9531_v26  ;;  %s9363_s17 = smov 112  }
  0x13   : > { %8959 = vmatpush3.bf16.msra.mxu0 %v9137_v2  ;;  %s9468_s16 = scalar_lea.vmem %s17426_s0, %s8560_s30  ;;  %vm462_vm2 = vcmp.ge.s32.totalorder %v449_v31, 11  ;;  %vm476_vm3 = vcmp.lt.s32.totalorder %v450_v32, 19  ;;  %vm502_vm4 = vcmp.ge.s32.totalorder %v450_v32, 21  ;;  %vm516_vm5 = vcmp.lt.s32.totalorder %v451_v33, 29  ;;  %s9359_s30 = smov 64  }
  0x14   : > { %8960 = vmatprep.subr.bf16.mxu0 %v9355_v1  ;;  %v9144_v9 = vld [vmem:[%s9468_s16] sm:$0xff]   ;;  %v9145_v10 = vld [vmem:[%s9468_s16 + $0x8] sm:$0xff]   ;;  %v9146_v11 = vld [vmem:[%s9468_s16 + $0x10] sm:$0xff]   ;;  %vm555_vm6 = vcmp.ge.s32.totalorder %v451_v33, 31  ;;  %v9551_v44 = vsel %vm462_vm2, 1.0, %v9355_v1  ;;  %vm569_vm8 = vcmp.lt.s32.totalorder %v452_v37, 39 }
  0x15   : > { %v9147_v12 = vld [vmem:[%s9468_s16 + $0x18] sm:$0xff]   ;;  %v9148_v13 = vld [vmem:[%s9468_s16 + $0x20] sm:$0xff]   ;;  %v9149_v14 = vld [vmem:[%s9468_s16 + $0x28] sm:$0xff]   ;;  %vm609_vm10 = vcmp.ge.s32.totalorder %v453_v38, 41  ;;  %9106 = vperm.xlu1 %9104, %v9551_v44   ;;  %v9565_v51 = vsel %vm569_vm8, 1.0, %v9355_v1  ;;  %s9364_s18 = smov 16  }
  0x16   : > { %v9150_v15 = vld [vmem:[%s9468_s16 + $0x30] sm:$0xff]   ;;  %v9151_v16 = vld [vmem:[%s9468_s16 + $0x38] sm:$0xff]   ;;  %v9152_v17 = vld [vmem:[%s9468_s16 + $0x40] sm:$0xff]   ;;  %v9568_v52 = vsel %vm609_vm10, 1.0, %v9355_v1  ;;  %s9365_s19 = smov 32   ;;  %s9366_s4 = smov 48  }
  0x17   : > { %8961 = vmatpush3.bf16.msra.mxu0 %v9138_v3  ;;  %v9153_v18 = vld [vmem:[%s9468_s16 + $0x48] sm:$0xff]   ;;  %v9154_v19 = vld [vmem:[%s9468_s16 + $0x50] sm:$0xff]   ;;  %v9155_v20 = vld [vmem:[%s9468_s16 + $0x58] sm:$0xff]   ;;  %v9111_v55 = vpack.i.bf16 %v9568_v52, %v9565_v51  ;;  %s8561_s28 = sshll.u32 %s8555_s24, 1 }
  0x18   : > { %8962 = vmatprep.subr.bf16.mxu0 %v9355_v1  ;;  %v9156_v21 = vld [vmem:[%s9468_s16 + $0x60] sm:$0xff]   ;;  %vm541_vm7 = vmor %vm476_vm3, %vm502_vm4  ;;  %s9362_s16 = smov 96   ;;  %p440_p4 = scmp.lt.s32.totalorder %s8561_s28, 3 }
  0x19   : > { %vm594_vm9 = vmor %vm516_vm5, %vm555_vm6  ;;  %v9556_v47 = vsel %vm541_vm7, 1.0, %v9355_v1  ;;  %9112 = vperm.xlu0 %9110, %v9111_v55  }
  0x1a   : > { %v9562_v50 = vsel %vm594_vm9, 1.0, %v9355_v1  ;;  %s18601_s28 = smov (!%p440_p4, %s8561_s28), 3 }
  0x1b   : > { %8963 = vmatpush3.bf16.msra.mxu0 %v9139_v4  ;;  %v9116_v56 = vpack.i.bf16 %v9562_v50, %v9556_v47 }
  0x1c   : > { %8964 = vmatprep.subr.bf16.mxu0 %v9355_v1 }
  0x1d   : > { %9117 = vperm.xlu1 %9104, %v9116_v56  }
  0x1f   : > { %8965 = vmatpush3.bf16.msra.mxu0 %v9140_v5 }
  0x20   : > { %8966 = vmatprep.subr.bf16.mxu0 %v9355_v1 }
  0x23   : > { %8967 = vmatpush3.bf16.msra.mxu0 %v9141_v6 }
  0x24   : > { %8968 = vmatprep.subr.bf16.mxu0 %v9355_v1 }
  0x27   : > { %8969 = vmatpush3.bf16.msra.mxu0 %v9142_v7 }
  0x28   : > { %8970 = vmatprep.subr.bf16.mxu0 %v9355_v1 }
  0x2b   : > { %8971 = vmatpush3.bf16.msra.mxu0 %v9143_v8 }
  0x2e   : > { %8973 = vmatmul.mubr.bf16.vlgmr.msra.gmra.mrb[0].mxu0 %v9144_v9 }
  0x2f   : > { %8976 = vmatprep.mubr.msk.bf16.mxu0 %vm9356_vm0, %v9355_v1 }
  0x36   : > { %8977 = vmatmul.mubr.bf16.gmra.mrb[4].mxu0 %v9145_v10 }
  0x37   : > { %8980 = vmatprep.mubr.msk.bf16.mxu0 %vm9356_vm0, %v9355_v1 }
  0x3e   : > { %8981 = vmatmul.mubr.bf16.gmra.mrb[8].mxu0 %v9146_v11 }
  0x3f   : > { %8984 = vmatprep.mubr.msk.bf16.mxu0 %vm9356_vm0, %v9355_v1 }
  0x46   : > { %8985 = vmatmul.mubr.bf16.gmra.mrb[12].mxu0 %v9147_v12 }
  0x47   : > { %8988 = vmatprep.mubr.msk.bf16.mxu0 %vm9356_vm0, %v9355_v1 }
  0x4e   : > { %8989 = vmatmul.mubr.bf16.gmra.mrb[16].mxu0 %v9148_v13 }
  0x4f   : > { %8992 = vmatprep.mubr.msk.bf16.mxu0 %vm9356_vm0, %v9355_v1 }
  0x56   : > { %8993 = vmatmul.mubr.bf16.gmra.mrb[20].mxu0 %v9149_v14 }
  0x57   : > { %8996 = vmatprep.mubr.msk.bf16.mxu0 %vm9356_vm0, %v9355_v1 }
  0x5e   : > { %8997 = vmatmul.mubr.bf16.gmra.mrb[24].mxu0 %v9150_v15 }
  0x5f   : > { %9000 = vmatprep.mubr.msk.bf16.mxu0 %vm9356_vm0, %v9355_v1 }
  0x66   : > { %9001 = vmatmul.mubr.bf16.gmra.mrb[28].mxu0 %v9151_v16 }
  0x67   : > { %9004 = vmatprep.mubr.msk.bf16.mxu0 %vm9356_vm0, %v9355_v1 }
  0x6e   : > { %9005 = vmatmul.mubr.bf16.gmra.mrb[32].mxu0 %v9152_v17 }
  0x6f   : > { %9008 = vmatprep.mubr.msk.bf16.mxu0 %vm9356_vm0, %v9355_v1 }
  0x76   : > { %9009 = vmatmul.mubr.bf16.gmra.mrb[36].mxu0 %v9153_v18 }
  0x77   : > { %9012 = vmatprep.mubr.msk.bf16.mxu0 %vm9356_vm0, %v9355_v1 }
  0x7e   : > { %9013 = vmatmul.mubr.bf16.gmra.mrb[40].mxu0 %v9154_v19 }
  0x7f   : > { %9016 = vmatprep.mubr.msk.bf16.mxu0 %vm9356_vm0, %v9355_v1 }
  0x86   : > { %9017 = vmatmul.mubr.bf16.gmra.mrb[44].mxu0 %v9155_v20 }
  0x87   : > { %9020 = vmatprep.mubr.msk.bf16.mxu0 %vm9356_vm0, %v9355_v1 }
  0x8e   : > { %9021 = vmatmul.mubr.bf16.gmra.mrb[48].mxu0 %v9156_v21 }
 0x101   : > { %v9527_v23 = vpop.f32.mrb[0].mxu0 }
 0x102   : > { %v8974_v24 = vpop.f32.mrb[1].mxu0  ;;  %v1198_v27 = vsel %vm1197_vm1, %v9527_v23, 0.0 }
 0x103   : > { %v9529_v25 = vpop.f32.mrb[2].mxu0 }
 0x104   : > { %v1199_v28 = vsel %vm1197_vm1, %v9529_v25, 0.0  ;;  %v8975_v29 = vpop.f32.mrb[3].mxu0 }
 0x105   : > { %v1200_v30 = vadd.f32 %v1199_v28, %v1198_v27 }
 0x109   : > { %v9540_v34 = vpop.f32.mrb[4].mxu0 }
 0x10a   : > { %v1201_v35 = vsel %vm1197_vm1, %v9540_v34, 0.0  ;;  %v8978_v36 = vpop.f32.mrb[5].mxu0 }
 0x10b   : > { %v1202_v39 = vadd.f32 %v1201_v35, %v1200_v30  ;;  %v9546_v40 = vpop.f32.mrb[6].mxu0 }
 0x10c   : > { %v1203_v41 = vsel %vm1197_vm1, %v9546_v40, 0.0  ;;  %v8979_v42 = vpop.f32.mrb[7].mxu0 }
 0x10d   : > { %v1204_v43 = vadd.f32 %v1203_v41, %v1202_v39 }
 0x111   : > { %v9553_v46 = vpop.f32.mrb[8].mxu0 }
 0x112   : > { %v1205_v48 = vsel %vm1197_vm1, %v9553_v46, 0.0  ;;  %v8982_v49 = vpop.f32.mrb[9].mxu0 }
 0x113   : > { %v1206_v53 = vadd.f32 %v1205_v48, %v1204_v43  ;;  %v9570_v54 = vpop.f32.mrb[10].mxu0  ;;  %v454_v49 = vadd.s32 48, %v9531_v26 }
 0x114   : > { %v1207_v57 = vsel %vm1197_vm1, %v9570_v54, 0.0  ;;  %v8983_v58 = vpop.f32.mrb[11].mxu0 }
 0x115   : > { %v1208_v59 = vadd.f32 %v1207_v57, %v1206_v53  ;;  %v455_v57 = vadd.s32 56, %v9531_v26  ;;  %v456_v58 = vadd.s32 64, %v9531_v26  ;;  %vm623_vm11 = vcmp.lt.s32.totalorder %v454_v49, 49 }
 0x116   : > { %vm662_vm12 = vcmp.ge.s32.totalorder %v454_v49, 51 }
 0x117   : > { %vm676_vm13 = vcmp.lt.s32.totalorder %v455_v57, 59  ;;  %vm715_vm14 = vcmp.ge.s32.totalorder %v455_v57, 61  ;;  %vm701_vm15 = vmor %vm623_vm11, %vm662_vm12  ;;  %vm729_vm2 = vcmp.lt.s32.totalorder %v456_v58, 69  ;;  %vm768_vm3 = vcmp.ge.s32.totalorder %v456_v58, 71 }
 0x118   : > { %vm754_vm4 = vmor %vm676_vm13, %vm715_vm14 }
 0x119   : > { %v9578_v60 = vpop.f32.mrb[12].mxu0  ;;  %vm807_vm5 = vmor %vm729_vm2, %vm768_vm3 }
 0x11a   : > { %v1209_v61 = vsel %vm1197_vm1, %v9578_v60, 0.0  ;;  %v8986_v62 = vpop.f32.mrb[13].mxu0 }
 0x11b   : > { %v1210_v63 = vadd.f32 %v1209_v61, %v1208_v59  ;;  %v9582_v0 = vpop.f32.mrb[14].mxu0 }
 0x11c   : > { %v1211_v2 = vsel %vm1197_vm1, %v9582_v0, 0.0  ;;  %v8987_v3 = vpop.f32.mrb[15].mxu0 }
 0x11d   : > { %v1212_v4 = vadd.f32 %v1211_v2, %v1210_v63 }
 0x121   : > { %v9586_v5 = vpop.f32.mrb[16].mxu0 }
 0x122   : > { %v1213_v6 = vsel %vm1197_vm1, %v9586_v5, 0.0  ;;  %v8990_v7 = vpop.f32.mrb[17].mxu0 }
 0x123   : > { %v1214_v8 = vadd.f32 %v1213_v6, %v1212_v4  ;;  %v9590_v9 = vpop.f32.mrb[18].mxu0 }
 0x124   : > { %v1215_v10 = vsel %vm1197_vm1, %v9590_v9, 0.0  ;;  %v8991_v11 = vpop.f32.mrb[19].mxu0 }
 0x125   : > { %v1216_v12 = vadd.f32 %v1215_v10, %v1214_v8 }
 0x129   : > { %v9594_v13 = vpop.f32.mrb[20].mxu0 }
 0x12a   : > { %v1217_v14 = vsel %vm1197_vm1, %v9594_v13, 0.0  ;;  %v8994_v15 = vpop.f32.mrb[21].mxu0 }
 0x12b   : > { %v1218_v16 = vadd.f32 %v1217_v14, %v1216_v12  ;;  %v9598_v17 = vpop.f32.mrb[22].mxu0  ;;  %v457_v15 = vadd.s32 72, %v9531_v26 }
 0x12c   : > { %v1219_v18 = vsel %vm1197_vm1, %v9598_v17, 0.0  ;;  %v8995_v19 = vpop.f32.mrb[23].mxu0 }
 0x12d   : > { %v1220_v20 = vadd.f32 %v1219_v18, %v1218_v16  ;;  %v458_v18 = vadd.s32 80, %v9531_v26  ;;  %vm782_vm6 = vcmp.lt.s32.totalorder %v457_v15, 79 }
 0x12f   : > { %vm822_vm7 = vcmp.ge.s32.totalorder %v458_v18, 81 }
 0x130   : > { %v9733_v15 = vsel %vm822_vm7, 1.0, %v9355_v1 }
 0x131   : > { %v9602_v21 = vpop.f32.mrb[24].mxu0  ;;  %17758 = vst [vmem:[#allocation9_spill] sm:$0xff] %v9733_v15 }
 0x132   : > { %v1221_v22 = vsel %vm1197_vm1, %v9602_v21, 0.0  ;;  %v8998_v24 = vpop.f32.mrb[25].mxu0 }
 0x133   : > { %v1222_v27 = vadd.f32 %v1221_v22, %v1220_v20  ;;  %v9606_v28 = vpop.f32.mrb[26].mxu0  ;;  %v9681_v24 = vsel %vm701_vm15, 1.0, %v9355_v1 }
 0x134   : > { %v8999_v29 = vpop.f32.mrb[27].mxu0  ;;  %v1431_v35 = vsel %vm1197_vm1, %v9606_v28, 0.0  ;;  %17754 = vst [vmem:[#allocation5_spill] sm:$0xff] %v9681_v24 }
 0x135   : > { %v1223_v30 = vrot.slane %v1222_v27, 4 }
 0x137   : > { %v1224_v31 = vadd.f32 %v1223_v30, %v1222_v27 }
 0x139   : > { %v1225_v32 = vrot.slane %v1224_v31, 2  ;;  %v9608_v33 = vpop.f32.mrb[28].mxu0 }
 0x13a   : > { %v1432_v36 = vsel %vm1197_vm1, %v9608_v33, 0.0  ;;  %v9002_v37 = vpop.f32.mrb[29].mxu0 }
 0x13b   : > { %v1226_v38 = vadd.f32 %v1225_v32, %v1224_v31  ;;  %v1433_v39 = vadd.f32 %v1432_v36, %v1431_v35  ;;  %v9614_v41 = vpop.f32.mrb[30].mxu0  ;;  %v459_v36 = vadd.s32 88, %v9531_v26  ;;  %v9694_v37 = vsel %vm754_vm4, 1.0, %v9355_v1 }
 0x13c   : > { %v1434_v42 = vsel %vm1197_vm1, %v9614_v41, 0.0  ;;  %v9003_v43 = vpop.f32.mrb[31].mxu0  ;;  %17755 = vst [vmem:[#allocation6_spill] sm:$0xff] %v9694_v37 }
 0x13d   : > { %v1227_v45 = vrot.slane %v1226_v38, 1  ;;  %v1435_v48 = vadd.f32 %v1434_v42, %v1433_v39  ;;  %vm836_vm8 = vcmp.lt.s32.totalorder %v459_v36, 89 }
 0x13e   : > { %v9748_v18 = vsel %vm836_vm8, 1.0, %v9355_v1 }
 0x13f   : > { %v1228_v53 = vadd.f32 %v1227_v45, %v1226_v38  ;;  %v9703_v45 = vsel %vm807_vm5, 1.0, %v9355_v1  ;;  %17759 = vst [vmem:[#allocation10_spill] sm:$0xff] %v9748_v18 }
 0x140   : > { %17756 = vst [vmem:[#allocation7_spill] sm:$0xff] %v9703_v45 }
 0x141   : > { %v9619_v55 = vmul.f32 0.015625, %v1228_v53  ;;  %v9621_v56 = vpop.f32.mrb[32].mxu0 }
 0x142   : > { %v9006_v59 = vpop.f32.mrb[33].mxu0  ;;  %v1436_v35 = vsel %vm1197_vm1, %v9621_v56, 0.0 }
 0x143   : > { %v1230_v61 = vsub.f32 %v9527_v23, %v9619_v55  ;;  %v1231_v62 = vsub.f32 %v9529_v25, %v9619_v55  ;;  %v1232_v63 = vsub.f32 %v9540_v34, %v9619_v55  ;;  %v1233_v2 = vsub.f32 %v9546_v40, %v9619_v55  ;;  %v9633_v3 = vpop.f32.mrb[34].mxu0 }
 0x144   : > { %v1234_v4 = vsub.f32 %v9553_v46, %v9619_v55  ;;  %v1235_v6 = vsub.f32 %v9570_v54, %v9619_v55  ;;  %v1236_v23 = vsub.f32 %v9578_v60, %v9619_v55  ;;  %v1237_v25 = vsub.f32 %v9582_v0, %v9619_v55  ;;  %v9007_v7 = vpop.f32.mrb[35].mxu0 }
 0x145   : > { %v1238_v34 = vsub.f32 %v9586_v5, %v9619_v55  ;;  %v1239_v40 = vsub.f32 %v9590_v9, %v9619_v55  ;;  %v1240_v8 = vsub.f32 %v9594_v13, %v9619_v55  ;;  %v1241_v46 = vsub.f32 %v9598_v17, %v9619_v55 }
 0x146   : > { %v1242_v54 = vsub.f32 %v9602_v21, %v9619_v55  ;;  %v9653_v60 = vmul.f32 0.0, %v1230_v61  ;;  %v9656_v0 = vmul.f32 %v9551_v44, %v1231_v62  ;;  %v9659_v5 = vmul.f32 %v9556_v47, %v1232_v63 }
 0x147   : > { %v9663_v10 = vmul.f32 %v9562_v50, %v1233_v2  ;;  %v9674_v19 = vmul.f32 %v9565_v51, %v1234_v4  ;;  %v9685_v30 = vmul.f32 %v9568_v52, %v1235_v6  ;;  %v9697_v39 = vmul.f32 %v9681_v24, %v1236_v23 }
 0x148   : > { %v1256_v11 = vmul.f32 %v9653_v60, %v9653_v60  ;;  %v1257_v12 = vmul.f32 %v9656_v0, %v9656_v0  ;;  %v1258_v20 = vmul.f32 %v9659_v5, %v9659_v5  ;;  %v1437_v53 = vadd.f32 %v1436_v35, %v1435_v48 }
 0x149   : > { %v9669_v14 = vpop.f32.mrb[36].mxu0  ;;  %v1259_v31 = vmul.f32 %v9663_v10, %v9663_v10  ;;  %v1260_v42 = vmul.f32 %v9674_v19, %v9674_v19  ;;  %v1438_v57 = vsel %vm1197_vm1, %v9633_v3, 0.0  ;;  %v9708_v58 = vmul.f32 %v9694_v37, %v1237_v25 }
 0x14a   : > { %v9010_v16 = vpop.f32.mrb[37].mxu0  ;;  %v1269_v27 = vsel %vm1197_vm1, %v1256_v11, 0.0  ;;  %v1270_v32 = vsel %vm1197_vm1, %v1257_v12, 0.0  ;;  %v1272_v43 = vsel %vm1197_vm1, %v1258_v20, 0.0  ;;  %v1261_v59 = vmul.f32 %v9685_v30, %v9685_v30 }
 0x14b   : > { %v9678_v22 = vpop.f32.mrb[38].mxu0  ;;  %v1271_v38 = vadd.f32 %v1270_v32, %v1269_v27  ;;  %v1274_v61 = vsel %vm1197_vm1, %v1259_v31, 0.0  ;;  %v1440_v62 = vsel %vm1197_vm1, %v9669_v14, 0.0  ;;  %v9719_v48 = vsel %vm782_vm6, 1.0, %v9355_v1 }
 0x14c   : > { %v9011_v29 = vpop.f32.mrb[39].mxu0  ;;  %17757 = vst [vmem:[#allocation8_spill] sm:$0xff] %v9719_v48  ;;  %v1439_v4 = vadd.f32 %v1438_v57, %v1437_v53  ;;  %v9722_v23 = vmul.f32 %v9703_v45, %v1238_v34  ;;  %v1262_v25 = vmul.f32 %v9697_v39, %v9697_v39  ;;  %v1276_v7 = vsel %vm1197_vm1, %v1260_v42, 0.0 }
 0x14d   : > { %v1273_v49 = vadd.f32 %v1272_v43, %v1271_v38  ;;  %v1442_v11 = vsel %vm1197_vm1, %v9678_v22, 0.0  ;;  %v9739_v34 = vmul.f32 %v9719_v48, %v1239_v40  ;;  %v1263_v29 = vmul.f32 %v9708_v58, %v9708_v58 }
 0x14e   : > { %v1441_v20 = vadd.f32 %v1440_v62, %v1439_v4  ;;  %v1278_v31 = vsel %vm1197_vm1, %v1261_v59, 0.0  ;;  %v9754_v9 = vmul.f32 %v9733_v15, %v1240_v8  ;;  %v1264_v40 = vmul.f32 %v9722_v23, %v9722_v23 }
 0x14f   : > { %v1275_v2 = vadd.f32 %v1274_v61, %v1273_v49  ;;  %v1280_v42 = vsel %vm1197_vm1, %v1262_v25, 0.0  ;;  %v9765_v1 = vmul.f32 %v9748_v18, %v1241_v46  ;;  %v1265_v13 = vmul.f32 %v9739_v34, %v9739_v34 }
 0x150   : > { %v1443_v38 = vadd.f32 %v1442_v11, %v1441_v20  ;;  %v1282_v8 = vsel %vm1197_vm1, %v1263_v29, 0.0  ;;  %v9777_v17 = vmul.f32 0.0, %v1242_v54  ;;  %v1266_v46 = vmul.f32 %v9754_v9, %v9754_v9 }
 0x151   : > { %v9715_v63 = vpop.f32.mrb[40].mxu0  ;;  %v1277_v16 = vadd.f32 %v1276_v7, %v1275_v2  ;;  %v1284_v2 = vsel %vm1197_vm1, %v1264_v40, 0.0  ;;  %v1286_v21 = vsel %vm1197_vm1, %v1265_v13, 0.0 }
 0x152   : > { %v9014_v6 = vpop.f32.mrb[41].mxu0  ;;  %v1444_v32 = vsel %vm1197_vm1, %v9715_v63, 0.0  ;;  %v1268_v20 = vmul.f32 %v9777_v17, %v9777_v17 }
 0x153   : > { %v9729_v12 = vpop.f32.mrb[42].mxu0  ;;  %v1279_v35 = vadd.f32 %v1278_v31, %v1277_v16  ;;  %v1445_v36 = vadd.f32 %v1444_v32, %v1443_v38  ;;  %v1267_v16 = vmul.f32 %v9765_v1, %v9765_v1 }
 0x154   : > { %v9015_v27 = vpop.f32.mrb[43].mxu0  ;;  %v1446_v43 = vsel %vm1197_vm1, %v9729_v12, 0.0 }
 0x155   : > { %v1281_v49 = vadd.f32 %v1280_v42, %v1279_v35  ;;  %v1447_v59 = vadd.f32 %v1446_v43, %v1445_v36  ;;  %v1288_v27 = vsel %vm1197_vm1, %v1266_v46, 0.0  ;;  %v1290_v31 = vsel %vm1197_vm1, %v1267_v16, 0.0 }
 0x156   : > { %v1292_v42 = vsel %vm1197_vm1, %v1268_v20, 0.0 }
 0x157   : > { %v1283_v57 = vadd.f32 %v1282_v8, %v1281_v49 }
 0x159   : > { %v9770_v53 = vpop.f32.mrb[44].mxu0  ;;  %v1285_v6 = vadd.f32 %v1284_v2, %v1283_v57 }
 0x15a   : > { %v1448_v61 = vsel %vm1197_vm1, %v9770_v53, 0.0  ;;  %v9018_v62 = vpop.f32.mrb[45].mxu0 }
 0x15b   : > { %v9782_v4 = vpop.f32.mrb[46].mxu0  ;;  %v1449_v25 = vadd.f32 %v1448_v61, %v1447_v59  ;;  %v1287_v55 = vadd.f32 %v1286_v21, %v1285_v6 }
 0x15c   : > { %v1450_v7 = vsel %vm1197_vm1, %v9782_v4, 0.0  ;;  %v9019_v11 = vpop.f32.mrb[47].mxu0 }
 0x15d   : > { %v1451_v54 = vadd.f32 %v1450_v7, %v1449_v25  ;;  %v1289_v29 = vadd.f32 %v1288_v27, %v1287_v55 }
 0x15f   : > { %v1291_v35 = vadd.f32 %v1290_v31, %v1289_v29 }
 0x161   : > { %v9793_v32 = vpop.f32.mrb[48].mxu0  ;;  %v1293_v36 = vadd.f32 %v1292_v42, %v1291_v35 }
 0x162   : > { %v1452_v38 = vsel %vm1197_vm1, %v9793_v32, 0.0  ;;  %v9022_v40 = vpop.f32.mrb[49].mxu0 }
 0x163   : > { %v1453_v43 = vadd.f32 %v1452_v38, %v1451_v54  ;;  %v1191_v49 = vpop.f32.mrb[50].mxu0  ;;  %v1294_v59 = vrot.slane %v1293_v36, 4 }
 0x164   : > { %v1454_v13 = vsel %vm1197_vm1, %v1191_v49, 0.0  ;;  %v9023_v8 = vpop.f32.mrb[51].mxu0 }
 0x165   : > { %v1455_v57 = vadd.f32 %v1454_v13, %v1453_v43  ;;  %v1295_v62 = vadd.f32 %v1294_v59, %v1293_v36 }
 0x167   : > { %v1456_v61 = vrot.slane %v1455_v57, 4  ;;  %v1296_v2 = vrot.slane %v1295_v62, 2 }
 0x169   : > { %v1457_v46 = vadd.f32 %v1456_v61, %v1455_v57  ;;  %v1297_v25 = vadd.f32 %v1296_v2, %v1295_v62 }
 0x16b   : > { %v1458_v6 = vrot.slane %v1457_v46, 2  ;;  %v1298_v11 = vrot.slane %v1297_v25, 1 }
 0x16d   : > { %v1459_v7 = vadd.f32 %v1458_v6, %v1457_v46  ;;  %v1299_v21 = vadd.f32 %v1298_v11, %v1297_v25 }
 0x16f   : > { %v1460_v16 = vrot.slane %v1459_v7, 1  ;;  %v1300_v20 = vmul.f32 0.015625, %v1299_v21 }
 0x171   : > { %v1461_v55 = vadd.f32 %v1460_v16, %v1459_v7  ;;  %v1301_v27 = vadd.f32 1e-10, %v1300_v20 }
 0x173   : > { %v1462_v54 = vmul.f32 0.015625, %v1461_v55  ;;  %9193 = vrsqrt.f32 %v1301_v27 }
 0x175   : > { %v1463_v29 = vsub.f32 %v9606_v28, %v1462_v54  ;;  %v1464_v31 = vsub.f32 %v9608_v33, %v1462_v54  ;;  %v1465_v35 = vsub.f32 %v9614_v41, %v1462_v54  ;;  %v1466_v38 = vsub.f32 %v9621_v56, %v1462_v54 }
 0x176   : > { %v1467_v40 = vsub.f32 %v9633_v3, %v1462_v54  ;;  %v1468_v42 = vsub.f32 %v9669_v14, %v1462_v54  ;;  %v1469_v43 = vsub.f32 %v9678_v22, %v1462_v54  ;;  %v1470_v36 = vsub.f32 %v9715_v63, %v1462_v54 }
 0x177   : > { %v1471_v13 = vsub.f32 %v9729_v12, %v1462_v54  ;;  %v1472_v8 = vsub.f32 %v9770_v53, %v1462_v54  ;;  %v1473_v28 = vsub.f32 %v9782_v4, %v1462_v54  ;;  %v1474_v33 = vsub.f32 %v9793_v32, %v1462_v54  ;;  %v9834_v4 = vld [vmem:[%s17428_s2] sm:$0x1] }
 0x178   : > { %v1475_v41 = vsub.f32 %v1191_v49, %v1462_v54  ;;  %v9811_v57 = vmul.f32 0.0, %v1463_v29  ;;  %v9814_v56 = vmul.f32 %v9551_v44, %v1464_v31  ;;  %v9817_v3 = vmul.f32 %v9556_v47, %v1465_v35 }
 0x179   : > { %v9820_v14 = vmul.f32 %v9562_v50, %v1466_v38  ;;  %v9825_v63 = vmul.f32 %v9565_v51, %v1467_v40  ;;  %v9837_v32 = vsub.s32 0, %v9531_v26  ;;  %v9840_v49 = vmul.f32 %v9568_v52, %v1468_v42 }
 0x17a   : > { %v1489_v22 = vmul.f32 %v9811_v57, %v9811_v57  ;;  %v1490_v12 = vmul.f32 %v9814_v56, %v9814_v56  ;;  %v1491_v53 = vmul.f32 %v9817_v3, %v9817_v3  ;;  %v9847_v2 = vmul.f32 %v9681_v24, %v1469_v43 }
 0x17b   : > { %17760 = vst [vmem:[#allocation11_spill] sm:$0xff] %v9837_v32  ;;  %v1492_v59 = vmul.f32 %v9820_v14, %v9820_v14  ;;  %v9850_v6 = vmul.f32 %v9694_v37, %v1470_v36  ;;  %v1493_v25 = vmul.f32 %v9825_v63, %v9825_v63  ;;  %v9856_v16 = vmul.f32 %v9703_v45, %v1471_v13  ;;  %v9882_v13 = vld [vmem:[%s17429_s3] ss:$0 sm:$0xff] }
 0x17c   : > { %v1502_v61 = vsel %vm1197_vm1, %v1489_v22, 0.0  ;;  %v1503_v62 = vsel %vm1197_vm1, %v1490_v12, 0.0  ;;  %v1505_v21 = vsel %vm1197_vm1, %v1491_v53, 0.0  ;;  %v9860_v55 = vmul.f32 %v9719_v48, %v1472_v8 }
 0x17d   : > { %v9194_v46 = vpop.eup %9193  ;;  %v1504_v7 = vadd.f32 %v1503_v62, %v1502_v61  ;;  %v9863_v20 = vmul.f32 %v9733_v15, %v1473_v28  ;;  %v9866_v54 = vmul.f32 %v9748_v18, %v1474_v33  ;;  %v9869_v31 = vmul.f32 0.0, %v1475_v41 }
 0x17e   : > { %v1303_v11 = vmul.f32 %v9194_v46, %v9834_v4  ;;  %v1494_v35 = vmul.f32 %v9840_v49, %v9840_v49  ;;  %v1507_v38 = vsel %vm1197_vm1, %v1492_v59, 0.0  ;;  %v1495_v40 = vmul.f32 %v9847_v2, %v9847_v2 }
 0x17f   : > { %v1506_v27 = vadd.f32 %v1505_v21, %v1504_v7  ;;  %v1496_v42 = vmul.f32 %v9850_v6, %v9850_v6  ;;  %v1509_v36 = vsel %vm1197_vm1, %v1493_v25, 0.0  ;;  %v1497_v61 = vmul.f32 %v9856_v16, %v9856_v16 }
 0x180   : > { %v1307_v29 = vrot.slane %v1303_v11, %v9837_v32  ;;  %v1511_v62 = vsel %vm1197_vm1, %v1494_v35, 0.0  ;;  %v1501_v11 = vmul.f32 %v9869_v31, %v9869_v31 }
 0x181   : > { %v1508_v43 = vadd.f32 %v1507_v38, %v1506_v27  ;;  %v1515_v21 = vsel %vm1197_vm1, %v1496_v42, 0.0  ;;  %v1517_v38 = vsel %vm1197_vm1, %v1497_v61, 0.0 }
 0x182   : > { %v1315_v8 = vmul.f32 %v1307_v29, %v9708_v58  ;;  %v9886_v28 = vmul.f32 %v1307_v29, %v9722_v23  ;;  %v1317_v33 = vmul.f32 %v1307_v29, %v9739_v34  ;;  %v1318_v41 = vmul.f32 %v1307_v29, %v9754_v9 }
 0x183   : > { %v1319_v22 = vmul.f32 %v1307_v29, %v9765_v1  ;;  %v1320_v12 = vmul.f32 %v1307_v29, %v9777_v17  ;;  %v1510_v53 = vadd.f32 %v1509_v36, %v1508_v43  ;;  %v1310_v59 = vmul.f32 %v1307_v29, %v9659_v5 }
 0x184   : > { %v1308_v58 = vmul.f32 %v1307_v29, %v9653_v60  ;;  %v1311_v23 = vmul.f32 %v1307_v29, %v9663_v10  ;;  %v1498_v34 = vmul.f32 %v9860_v55, %v9860_v55  ;;  %v1499_v9 = vmul.f32 %v9863_v20, %v9863_v20 }
 0x185   : > { %v1512_v1 = vadd.f32 %v1511_v62, %v1510_v53  ;;  %v9903_v17 = vadd.f32 %v9882_v13, %v1310_v59  ;;  %v1513_v5 = vsel %vm1197_vm1, %v1495_v40, 0.0  ;;  %v1309_v60 = vmul.f32 %v1307_v29, %v9656_v0 }
 0x186   : > { %v9907_v46 = vadd.f32 %v9882_v13, %v1308_v58  ;;  %v9910_v25 = vadd.f32 %v9882_v13, %v1311_v23  ;;  %v1500_v10 = vmul.f32 %v9866_v54, %v9866_v54  ;;  %v1519_v40 = vsel %vm1197_vm1, %v1498_v34, 0.0 }
 0x187   : > { %v1514_v7 = vadd.f32 %v1513_v5, %v1512_v1  ;;  %v1355_v27 = vmin.f32 %v9903_v17, 0.0  ;;  %v1521_v0 = vsel %vm1197_vm1, %v1499_v9, 0.0  ;;  %v9925_v59 = vadd.f32 %v9882_v13, %v1309_v60 }
 0x188   : > { %v1353_v43 = vmin.f32 %v9907_v46, 0.0  ;;  %v1356_v53 = vmin.f32 %v9910_v25, 0.0  ;;  %v1523_v42 = vsel %vm1197_vm1, %v1500_v10, 0.0  ;;  %v1313_v23 = vmul.f32 %v1307_v29, %v9685_v30 }
 0x189   : > { %v1516_v35 = vadd.f32 %v1515_v21, %v1514_v7  ;;  %v1370_v36 = vmul.f32 1.442695, %v1355_v27  ;;  %v9930_v61 = vadd.f32 %v9882_v13, %v1317_v33  ;;  %v9933_v34 = vadd.f32 %v9882_v13, %v1319_v22 }
 0x18a   : > { %v1366_v58 = vmul.f32 1.442695, %v1353_v43  ;;  %v1372_v1 = vmul.f32 1.442695, %v1356_v53  ;;  %v1354_v9 = vmin.f32 %v9925_v59, 0.0  ;;  %v9937_v60 = vadd.f32 %v9882_v13, %v1313_v23 }
 0x18b   : > { %v1518_v62 = vadd.f32 %v1517_v38, %v1516_v35  ;;  %9195 = vpow2.f32 %v1370_v36  ;;  %v1312_v7 = vmul.f32 %v1307_v29, %v9674_v19  ;;  %v9941_v30 = vadd.f32 %v9882_v13, %v1315_v8 }
 0x18c   : > { %9197 = vpow2.f32 %v1366_v58  ;;  %v1368_v10 = vmul.f32 1.442695, %v1354_v9  ;;  %v1314_v33 = vmul.f32 %v1307_v29, %v9697_v39  ;;  %v9945_v22 = vadd.f32 %v9882_v13, %v1318_v41 }
 0x18d   : > { %v1520_v5 = vadd.f32 %v1519_v40, %v1518_v62  ;;  %9199 = vpow2.f32 %v1372_v1  ;;  %v1358_v27 = vmin.f32 %v9937_v60, 0.0  ;;  %v9949_v35 = vadd.f32 %v9882_v13, %v1320_v12 }
 0x18e   : > { %9201 = vpow2.f32 %v1368_v10  ;;  %v9952_v19 = vadd.f32 %v9882_v13, %v1312_v7  ;;  %v1360_v38 = vmin.f32 %v9941_v30, 0.0  ;;  %v1364_v8 = vmin.f32 %v9933_v34, 0.0 }
 0x18f   : > { %v1522_v21 = vadd.f32 %v1521_v0, %v1520_v5  ;;  %v1376_v39 = vmul.f32 1.442695, %v1358_v27  ;;  %v9957_v29 = vadd.f32 %v9882_v13, %v1314_v33  ;;  %v1525_v41 = vsel %vm1197_vm1, %v1501_v11, 0.0 }
 0x190   : > { %v1357_v43 = vmin.f32 %v9952_v19, 0.0  ;;  %v1380_v0 = vmul.f32 1.442695, %v1360_v38  ;;  %v1362_v12 = vmin.f32 %v9930_v61, 0.0  ;;  %v1363_v36 = vmin.f32 %v9945_v22, 0.0 }
 0x191   : > { %v1524_v40 = vadd.f32 %v1523_v42, %v1522_v21  ;;  %9203 = vpow2.f32 %v1376_v39  ;;  %v1359_v62 = vmin.f32 %v9957_v29, 0.0  ;;  %v9966_v23 = vadd.f32 %v9882_v13, %v9886_v28 }
 0x192   : > { %v1374_v58 = vmul.f32 1.442695, %v1357_v43  ;;  %9205 = vpow2.f32 %v1380_v0  ;;  %v1384_v42 = vmul.f32 1.442695, %v1362_v12  ;;  %v1365_v11 = vmin.f32 %v9949_v35, 0.0 }
 0x193   : > { %v1526_v53 = vadd.f32 %v1525_v41, %v1524_v40  ;;  %v1388_v1 = vmul.f32 1.442695, %v1364_v8  ;;  %v1378_v5 = vmul.f32 1.442695, %v1359_v62  ;;  %v1361_v7 = vmin.f32 %v9966_v23, 0.0 }
 0x194   : > { %9207 = vpow2.f32 %v1374_v58  ;;  %v1386_v33 = vmul.f32 1.442695, %v1363_v36  ;;  %vm1342_vm9 = vcmp.gt.f32.partialorder %v9903_v17, 0.0  ;;  %vm1340_vm10 = vcmp.gt.f32.partialorder %v9907_v46, 0.0 }
 0x195   : > { %v1527_v9 = vrot.slane %v1526_v53, 4  ;;  %v9196_v10 = vpop.eup %9195  ;;  %9209 = vpow2.f32 %v1378_v5  ;;  %v1382_v28 = vmul.f32 1.442695, %v1361_v7  ;;  %v1390_v8 = vmul.f32 1.442695, %v1365_v11 }
 0x196   : > { %v9198_v27 = vpop.eup %9197  ;;  %v8599_v38 = vadd.f32 -1.0, %v9196_v10  ;;  %9211 = vpow2.f32 %v1384_v42  ;;  %vm1343_vm11 = vcmp.gt.f32.partialorder %v9910_v25, 0.0  ;;  %vm1341_vm12 = vcmp.gt.f32.partialorder %v9925_v59, 0.0 }
 0x197   : > { %v1528_v21 = vadd.f32 %v1527_v9, %v1526_v53  ;;  %v9200_v40 = vpop.eup %9199  ;;  %9213 = vpow2.f32 %v1388_v1  ;;  %v8597_v41 = vadd.f32 -1.0, %v9198_v27  ;;  %vm1345_vm13 = vcmp.gt.f32.partialorder %v9937_v60, 0.0 }
 0x198   : > { %v9202_v43 = vpop.eup %9201  ;;  %v1407_v0 = vsel %vm1342_vm9, %v9903_v17, %v8599_v38  ;;  %v8600_v12 = vadd.f32 -1.0, %v9200_v40  ;;  %9215 = vpow2.f32 %v1382_v28  ;;  %vm1344_vm14 = vcmp.gt.f32.partialorder %v9952_v19, 0.0 }
 0x199   : > { %v1529_v39 = vrot.slane %v1528_v21, 2  ;;  %v9975_v53 = vmul.f32 %v9556_v47, %v1407_v0  ;;  %v1405_v62 = vsel %vm1340_vm10, %v9907_v46, %v8597_v41  ;;  %v8598_v58 = vadd.f32 -1.0, %v9202_v43 }
 0x19a   : > { %v9978_v42 = vmul.f32 0.0, %v1405_v62  ;;  %v1408_v11 = vsel %vm1343_vm11, %v9910_v25, %v8600_v12  ;;  %9217 = vpow2.f32 %v1386_v33  ;;  %vm1347_vm15 = vcmp.gt.f32.partialorder %v9941_v30, 0.0 }
 0x19b   : > { %v1530_v36 = vadd.f32 %v1529_v39, %v1528_v21  ;;  %v9204_v1 = vpop.eup %9203  ;;  %1688 = vrot.lane.b32.xlu1 %v9975_v53, %s9358_s29  ;;  %v1406_v9 = vsel %vm1341_vm12, %v9925_v59, %v8598_v58  ;;  %9219 = vpow2.f32 %v1390_v8  ;;  %v9988_v25 = vmul.f32 %v9562_v50, %v1408_v11 }
 0x19c   : > { %v9206_v5 = vpop.eup %9205  ;;  %1684 = vrot.lane.b32.xlu0 %v9978_v42, %s9358_s29  ;;  %v8602_v46 = vadd.f32 -1.0, %v9204_v1  ;;  %v9992_v33 = vmul.f32 %v9551_v44, %v1406_v9  ;;  %vm1346_vm2 = vcmp.gt.f32.partialorder %v9957_v29, 0.0  ;;  %vm1349_vm3 = vcmp.gt.f32.partialorder %v9930_v61, 0.0 }
 0x19d   : > { %v1531_v17 = vrot.slane %v1530_v36, 1  ;;  %v8604_v27 = vadd.f32 -1.0, %v9206_v5  ;;  %vm1348_vm4 = vcmp.gt.f32.partialorder %v9966_v23, 0.0  ;;  %vm1351_vm5 = vcmp.gt.f32.partialorder %v9933_v34, 0.0 }
 0x19e   : > { %v9208_v10 = vpop.eup %9207  ;;  %v1410_v21 = vsel %vm1345_vm13, %v9937_v60, %v8602_v46  ;;  %vm1350_vm6 = vcmp.gt.f32.partialorder %v9945_v22, 0.0  ;;  %vm1352_vm7 = vcmp.gt.f32.partialorder %v9949_v35, 0.0 }
 0x19f   : > { %v1532_v7 = vadd.f32 %v1531_v17, %v1530_v36  ;;  %v9210_v59 = vpop.eup %9209  ;;  %1690 = vrot.lane.b32.xlu1 %v9988_v25, %s9358_s29  ;;  %v8601_v28 = vadd.f32 -1.0, %v9208_v10  ;;  %v10001_v43 = vmul.f32 %v9568_v52, %v1410_v21  ;;  %v1412_v36 = vsel %vm1347_vm15, %v9941_v30, %v8604_v27 }
 0x1a0   : > { %v9212_v40 = vpop.eup %9211  ;;  %1686 = vrot.lane.b32.xlu0 %v9992_v33, %s9358_s29  ;;  %v8603_v8 = vadd.f32 -1.0, %v9210_v59 }
 0x1a1   : > { %v1533_v38 = vmul.f32 0.015625, %v1532_v7  ;;  %v9214_v39 = vpop.eup %9213  ;;  %v1409_v60 = vsel %vm1344_vm14, %v9952_v19, %v8601_v28  ;;  %v8606_v62 = vadd.f32 -1.0, %v9212_v40  ;;  %v10016_v19 = vmul.f32 %v9694_v37, %v1412_v36 }
 0x1a2   : > { %v9216_v0 = vpop.eup %9215  ;;  %v10006_v12 = vmul.f32 %v9565_v51, %v1409_v60  ;;  %v1411_v58 = vsel %vm1346_vm2, %v9957_v29, %v8603_v8  ;;  %v8608_v9 = vadd.f32 -1.0, %v9214_v39 }
 0x1a3   : > { %v1534_v41 = vadd.f32 1e-10, %v1533_v38  ;;  %1694 = vrot.lane.b32.xlu1 %v10001_v43, %s9358_s29  ;;  %v8605_v11 = vadd.f32 -1.0, %v9216_v0  ;;  %v10020_v30 = vmul.f32 %v9681_v24, %v1411_v58  ;;  %v1414_v17 = vsel %vm1349_vm3, %v9930_v61, %v8606_v62 }
 0x1a4   : > { %v9218_v1 = vpop.eup %9217  ;;  %1692 = vrot.lane.b32.xlu0 %v10006_v12, %s9358_s29  ;;  %v10030_v7 = vmul.f32 %v9719_v48, %v1414_v17  ;;  %v1416_v21 = vsel %vm1351_vm5, %v9933_v34, %v8608_v9 }
 0x1a5   : > { %9221 = vrsqrt.f32 %v1534_v41  ;;  %v9220_v5 = vpop.eup %9219  ;;  %v1413_v29 = vsel %vm1348_vm4, %v9966_v23, %v8605_v11  ;;  %v8607_v46 = vadd.f32 -1.0, %v9218_v1  ;;  %v10045_v59 = vmul.f32 %v9748_v18, %v1416_v21 }
 0x1a6   : > { %v8609_v10 = vadd.f32 -1.0, %v9220_v5  ;;  %v10034_v61 = vmul.f32 %v9703_v45, %v1413_v29 }
 0x1a7   : > { %1698 = vrot.lane.b32.xlu1 %v10016_v19, %s9358_s29  ;;  %v1415_v23 = vsel %vm1350_vm6, %v9945_v22, %v8607_v46 }
 0x1a8   : > { %1696 = vrot.lane.b32.xlu0 %v10020_v30, %s9358_s29  ;;  %v1417_v38 = vsel %vm1352_vm7, %v9949_v35, %v8609_v10  ;;  %v10050_v28 = vmul.f32 %v9733_v15, %v1415_v23  ;;  %vm1762_vm7 = vcmask 7168  }
 0x1a9   : > { %v10057_v40 = vmul.f32 0.0, %v1417_v38 }
 0x1ab   : > { %1702 = vrot.lane.b32.xlu1 %v10030_v7, %s9358_s29 }
 0x1ac   : > { %1700 = vrot.lane.b32.xlu0 %v10034_v61, %s9358_s29 }
 0x1af   : > { %v9222_v27 = vpop.eup %9221  ;;  %1706 = vrot.lane.b32.xlu1 %v10045_v59, %s9358_s29 }
 0x1b0   : > { %v1536_v34 = vmul.f32 %v9222_v27, %v9834_v4  ;;  %1704 = vrot.lane.b32.xlu0 %v10050_v28, %s9358_s29 }
 0x1b2   : > { %v1540_v22 = vrot.slane %v1536_v34, %v9837_v32 }
 0x1b3   : > { %2154 = vrot.lane.b32.xlu1 %v9978_v42, %s9359_s30 }
 0x1b4   : > { %v1548_v8 = vmul.f32 %v1540_v22, %v9850_v6  ;;  %v1549_v39 = vmul.f32 %v1540_v22, %v9856_v16  ;;  %v1550_v35 = vmul.f32 %v1540_v22, %v9860_v55  ;;  %v1551_v4 = vmul.f32 %v1540_v22, %v9863_v20  ;;  %1708 = vrot.lane.b32.xlu0 %v10057_v40, %s9358_s29 }
 0x1b5   : > { %v1552_v41 = vmul.f32 %v1540_v22, %v9866_v54  ;;  %v1553_v60 = vmul.f32 %v1540_v22, %v9869_v31  ;;  %v1542_v0 = vmul.f32 %v1540_v22, %v9814_v56  ;;  %v1544_v36 = vmul.f32 %v1540_v22, %v9820_v14 }
 0x1b6   : > { %v10070_v6 = vadd.f32 %v9882_v13, %v1550_v35  ;;  %v10073_v16 = vadd.f32 %v9882_v13, %v1551_v4  ;;  %v1547_v55 = vmul.f32 %v1540_v22, %v9847_v2  ;;  %v1541_v20 = vmul.f32 %v1540_v22, %v9811_v57 }
 0x1b7   : > { %v10080_v54 = vadd.f32 %v9882_v13, %v1552_v41  ;;  %v10083_v56 = vadd.f32 %v9882_v13, %v1553_v60  ;;  %v10086_v14 = vadd.f32 %v9882_v13, %v1542_v0  ;;  %v10089_v31 = vadd.f32 %v9882_v13, %v1544_v36  ;;  %2158 = vrot.lane.b32.xlu1 %v9975_v53, %s9359_s30 }
 0x1b8   : > { %v10092_v62 = vadd.f32 %v9882_v13, %v1547_v55  ;;  %v10095_v58 = vadd.f32 %v9882_v13, %v1541_v20  ;;  %v10098_v57 = vadd.f32 %v9882_v13, %v1548_v8  ;;  %2156 = vrot.lane.b32.xlu0 %v9992_v33, %s9359_s30  ;;  %v1543_v2 = vmul.f32 %v1540_v22, %v9817_v3 }
 0x1b9   : > { %v1545_v11 = vmul.f32 %v1540_v22, %v9825_v63  ;;  %v1546_v17 = vmul.f32 %v1540_v22, %v9840_v49  ;;  %v10120_v5 = vadd.f32 %v9882_v13, %v1549_v39  ;;  %v10191_v63 = vpop.permute.xlu1 %9106  ;;  %v1583_v10 = vmin.f32 %v10089_v31, 0.0 }
 0x1ba   : > { %v10111_v1 = vadd.f32 %v9882_v13, %v1543_v2  ;;  %v1580_v21 = vmin.f32 %v10095_v58, 0.0  ;;  %v1586_v38 = vmin.f32 %v10092_v62, 0.0  ;;  %v1587_v4 = vmin.f32 %v10098_v57, 0.0 }
 0x1bb   : > { %2232 = vrot.lane.b32.xlu1 %v9978_v42, %s9360_s14  ;;  %v10117_v9 = vadd.f32 %v9882_v13, %v1545_v11  ;;  %v10125_v3 = vadd.f32 %v9882_v13, %v1546_v17  ;;  %v10203_v13 = vpop.permute.xlu0 %9112  ;;  %v1599_v27 = vmul.f32 1.442695, %v1583_v10  ;;  %v1589_v55 = vmin.f32 %v10070_v6, 0.0 }
 0x1bc   : > { %2160 = vrot.lane.b32.xlu0 %v9988_v25, %s9359_s30  ;;  %v1593_v22 = vmul.f32 1.442695, %v1580_v21  ;;  %v1582_v8 = vmin.f32 %v10111_v1, 0.0  ;;  %v1605_v35 = vmul.f32 1.442695, %v1586_v38  ;;  %vm1568_vm8 = vcmp.gt.f32.partialorder %v10086_v14, 0.0 }
 0x1bd   : > { %v10199_v49 = vpop.permute.xlu1 %9117  ;;  %v1584_v60 = vmin.f32 %v10117_v9, 0.0  ;;  %v1607_v36 = vmul.f32 1.442695, %v1587_v4  ;;  %v1585_v17 = vmin.f32 %v10125_v3, 0.0  ;;  %v1611_v10 = vmul.f32 1.442695, %v1589_v55 }
 0x1be   : > { %v1597_v41 = vmul.f32 1.442695, %v1582_v8  ;;  %v1592_v8 = vmin.f32 %v10083_v56, 0.0  ;;  %vm1570_vm9 = vcmp.gt.f32.partialorder %v10089_v31, 0.0  ;;  %vm1573_vm10 = vcmp.gt.f32.partialorder %v10092_v62, 0.0 }
 0x1bf   : > { %2236 = vrot.lane.b32.xlu1 %v9975_v53, %s9360_s14  ;;  %v1601_v11 = vmul.f32 1.442695, %v1584_v60  ;;  %v1603_v38 = vmul.f32 1.442695, %v1585_v17  ;;  %vm1567_vm11 = vcmp.gt.f32.partialorder %v10095_v58, 0.0  ;;  %vm1569_vm12 = vcmp.gt.f32.partialorder %v10111_v1, 0.0 }
 0x1c0   : > { %1789 = vrot.lane.b32.xlu0 %v9978_v42, %s9361_s15  ;;  %vm1574_vm13 = vcmp.gt.f32.partialorder %v10098_v57, 0.0  ;;  %vm1571_vm14 = vcmp.gt.f32.partialorder %v10117_v9, 0.0  ;;  %vm1576_vm15 = vcmp.gt.f32.partialorder %v10070_v6, 0.0  ;;  %vm1572_vm2 = vcmp.gt.f32.partialorder %v10125_v3, 0.0 }
 0x1c1   : > { %vm1578_vm3 = vcmp.gt.f32.partialorder %v10080_v54, 0.0  ;;  %vm1575_vm4 = vcmp.gt.f32.partialorder %v10120_v5, 0.0  ;;  %vm1579_vm5 = vcmp.gt.f32.partialorder %v10083_v56, 0.0  ;;  %vm1577_vm6 = vcmp.gt.f32.partialorder %v10073_v16, 0.0 }
 0x1c3   : > { %2310 = vrot.lane.b32.xlu1 %v9978_v42, %s9362_s16 }
 0x1c4   : > { %2234 = vrot.lane.b32.xlu0 %v9992_v33, %s9360_s14 }
 0x1c7   : > { %1791 = vrot.lane.b32.xlu1 %v9992_v33, %s9361_s15 }
 0x1c8   : > { %2238 = vrot.lane.b32.xlu0 %v9988_v25, %s9360_s14 }
 0x1cb   : > { %1795 = vrot.lane.b32.xlu1 %v9988_v25, %s9361_s15 }
 0x1cc   : > { %1793 = vrot.lane.b32.xlu0 %v9975_v53, %s9361_s15 }
 0x1cf   : > { %2312 = vrot.lane.b32.xlu1 %v9992_v33, %s9362_s16 }
 0x1d0   : > { %2314 = vrot.lane.b32.xlu0 %v9975_v53, %s9362_s16 }
 0x1d3   : > { %2316 = vrot.lane.b32.xlu1 %v9988_v25, %s9362_s16 }
 0x1d4   : > { %2388 = vrot.lane.b32.xlu0 %v9978_v42, %s9363_s17 }
 0x1d7   : > { %2392 = vrot.lane.b32.xlu1 %v9975_v53, %s9363_s17 }
 0x1d8   : > { %2390 = vrot.lane.b32.xlu0 %v9992_v33, %s9363_s17 }
 0x1db   : > { %2162 = vrot.lane.b32.xlu1 %v10006_v12, %s9359_s30 }
 0x1dc   : > { %2394 = vrot.lane.b32.xlu0 %v9988_v25, %s9363_s17 }
 0x1df   : > { %2240 = vrot.lane.b32.xlu1 %v10006_v12, %s9360_s14 }
 0x1e0   : > { %2164 = vrot.lane.b32.xlu0 %v10001_v43, %s9359_s30 }
 0x1e3   : > { %1797 = vrot.lane.b32.xlu1 %v10006_v12, %s9361_s15 }
 0x1e4   : > { %2242 = vrot.lane.b32.xlu0 %v10001_v43, %s9360_s14 }
 0x1e7   : > { %2318 = vrot.lane.b32.xlu1 %v10006_v12, %s9362_s16 }
 0x1e8   : > { %1799 = vrot.lane.b32.xlu0 %v10001_v43, %s9361_s15 }
 0x1eb   : > { %2396 = vrot.lane.b32.xlu1 %v10006_v12, %s9363_s17 }
 0x1ec   : > { %2320 = vrot.lane.b32.xlu0 %v10001_v43, %s9362_s16 }
 0x1ef   : > { %2166 = vrot.lane.b32.xlu1 %v10020_v30, %s9359_s30 }
 0x1f0   : > { %2398 = vrot.lane.b32.xlu0 %v10001_v43, %s9363_s17 }
 0x1f3   : > { %2244 = vrot.lane.b32.xlu1 %v10020_v30, %s9360_s14 }
 0x1f4   : > { %2168 = vrot.lane.b32.xlu0 %v10016_v19, %s9359_s30 }
 0x1f7   : > { %1801 = vrot.lane.b32.xlu1 %v10020_v30, %s9361_s15 }
 0x1f8   : > { %2246 = vrot.lane.b32.xlu0 %v10016_v19, %s9360_s14 }
 0x1fb   : > { %2322 = vrot.lane.b32.xlu1 %v10020_v30, %s9362_s16 }
 0x1fc   : > { %1803 = vrot.lane.b32.xlu0 %v10016_v19, %s9361_s15 }
 0x1ff   : > { %2400 = vrot.lane.b32.xlu1 %v10020_v30, %s9363_s17 }
 0x200   : > { %2324 = vrot.lane.b32.xlu0 %v10016_v19, %s9362_s16 }
 0x203   : > { %2170 = vrot.lane.b32.xlu1 %v10034_v61, %s9359_s30 }
 0x204   : > { %2402 = vrot.lane.b32.xlu0 %v10016_v19, %s9363_s17  ;;  %v1581_v19 = vmin.f32 %v10086_v14, 0.0 }
 0x206   : > { %v1595_v46 = vmul.f32 1.442695, %v1581_v19  ;;  %v1591_v19 = vmin.f32 %v10080_v54, 0.0 }
 0x207   : > { %2248 = vrot.lane.b32.xlu1 %v10034_v61, %s9360_s14 }
 0x208   : > { %2172 = vrot.lane.b32.xlu0 %v10030_v7, %s9359_s30  ;;  %9223 = vpow2.f32 %v1595_v46 }
 0x209   : > { %9225 = vpow2.f32 %v1599_v27 }
 0x20a   : > { %9227 = vpow2.f32 %v1593_v22  ;;  %v1588_v22 = vmin.f32 %v10120_v5, 0.0 }
 0x20b   : > { %1805 = vrot.lane.b32.xlu1 %v10034_v61, %s9361_s15  ;;  %9229 = vpow2.f32 %v1605_v35  ;;  %v1615_v35 = vmul.f32 1.442695, %v1591_v19  ;;  %v1617_v19 = vmul.f32 1.442695, %v1592_v8 }
 0x20c   : > { %2250 = vrot.lane.b32.xlu0 %v10030_v7, %s9360_s14  ;;  %9231 = vpow2.f32 %v1597_v41  ;;  %v1609_v17 = vmul.f32 1.442695, %v1588_v22 }
 0x20d   : > { %v10209_v53 = vpop.permute.xlu1 %1688  ;;  %9233 = vpow2.f32 %v1607_v36 }
 0x20e   : > { %v10211_v42 = vpop.permute.xlu0 %1684  ;;  %9235 = vpow2.f32 %v1601_v11 }
 0x20f   : > { %2326 = vrot.lane.b32.xlu1 %v10034_v61, %s9362_s16  ;;  %9237 = vpow2.f32 %v1611_v10 }
 0x210   : > { %1809 = vrot.lane.b32.xlu0 %v10050_v28, %s9361_s15  ;;  %9239 = vpow2.f32 %v1603_v38 }
 0x211   : > { %v10217_v25 = vpop.permute.xlu1 %1690  ;;  %9241 = vpow2.f32 %v1615_v35 }
 0x212   : > { %v10219_v33 = vpop.permute.xlu0 %1686  ;;  %v9224_v20 = vpop.eup %9223  ;;  %9243 = vpow2.f32 %v1609_v17 }
 0x213   : > { %2404 = vrot.lane.b32.xlu1 %v10034_v61, %s9363_s17  ;;  %v9226_v21 = vpop.eup %9225  ;;  %9245 = vpow2.f32 %v1617_v19 }
 0x214   : > { %2330 = vrot.lane.b32.xlu0 %v10050_v28, %s9362_s16  ;;  %v9228_v41 = vpop.eup %9227  ;;  %v8613_v36 = vadd.f32 -1.0, %v9226_v21 }
 0x215   : > { %v10225_v43 = vpop.permute.xlu1 %1694  ;;  %v9230_v55 = vpop.eup %9229 }
 0x216   : > { %v10227_v12 = vpop.permute.xlu0 %1692  ;;  %v1635_v21 = vsel %vm1570_vm9, %v10089_v31, %v8613_v36  ;;  %vm1867_vm9 = vcmask 121856  }
 0x217   : > { %1807 = vrot.lane.b32.xlu1 %v10030_v7, %s9361_s15  ;;  %v10316_v8 = vmul.f32 %v9562_v50, %v1635_v21 }
 0x218   : > { %2408 = vrot.lane.b32.xlu0 %v10050_v28, %s9363_s17 }
 0x219   : > { %v10234_v30 = vpop.permute.xlu1 %1698 }
 0x21a   : > { %v10236_v29 = vpop.permute.xlu0 %1696 }
 0x21b   : > { %2328 = vrot.lane.b32.xlu1 %v10030_v7, %s9362_s16 }
 0x21c   : > { %1811 = vrot.lane.b32.xlu0 %v10045_v59, %s9361_s15 }
 0x21d   : > { %v10243_v61 = vpop.permute.xlu1 %1702 }
 0x21e   : > { %v10246_v23 = vpop.permute.xlu0 %1700 }
 0x21f   : > { %2406 = vrot.lane.b32.xlu1 %v10030_v7, %s9363_s17 }
 0x220   : > { %2332 = vrot.lane.b32.xlu0 %v10045_v59, %s9362_s16 }
 0x221   : > { %v10253_v34 = vpop.permute.xlu1 %1706 }
 0x222   : > { %v10256_v39 = vpop.permute.xlu0 %1704 }
 0x223   : > { %2174 = vrot.lane.b32.xlu1 %v10050_v28, %s9359_s30 }
 0x224   : > { %2410 = vrot.lane.b32.xlu0 %v10045_v59, %s9363_s17 }
 0x225   : > { %v10263_v7 = vpop.permute.xlu1 %2154 }
 0x226   : > { %v10266_v0 = vpop.permute.xlu0 %1708 }
 0x227   : > { %2252 = vrot.lane.b32.xlu1 %v10050_v28, %s9360_s14  ;;  %v8611_v28 = vadd.f32 -1.0, %v9224_v20  ;;  %v1590_v20 = vmin.f32 %v10073_v16, 0.0 }
 0x228   : > { %1813 = vrot.lane.b32.xlu0 %v10057_v40, %s9361_s15 }
 0x229   : > { %v10273_v2 = vpop.permute.xlu1 %2158  ;;  %v1633_v60 = vsel %vm1568_vm8, %v10086_v14, %v8611_v28  ;;  %v8610_v14 = vadd.f32 -1.0, %v9228_v41  ;;  %v9232_v28 = vpop.eup %9231  ;;  %v1613_v38 = vmul.f32 1.442695, %v1590_v20  ;;  %vm2806_vm8 = vcmask 523264  }
 0x22a   : > { %v10277_v46 = vpop.permute.xlu0 %2156  ;;  %v8612_v35 = vadd.f32 -1.0, %v9232_v28 }
 0x22b   : > { %2176 = vrot.lane.b32.xlu1 %v10045_v59, %s9359_s30  ;;  %v1632_v31 = vsel %vm1567_vm11, %v10095_v58, %v8610_v14  ;;  %9247 = vpow2.f32 %v1613_v38  ;;  %vm2752_vm11 = vcmask 261120  }
 0x22c   : > { %2334 = vrot.lane.b32.xlu0 %v10057_v40, %s9362_s16  ;;  %v10326_v17 = vmul.f32 0.0, %v1632_v31 }
 0x22d   : > { %v10283_v27 = vpop.permute.xlu1 %2232 }
 0x22e   : > { %v10287_v4 = vpop.permute.xlu0 %2160 }
 0x22f   : > { %17761 = vst [vmem:[#allocation12_spill] sm:$0xff] %v10287_v4  ;;  %2254 = vrot.lane.b32.xlu1 %v10045_v59, %s9360_s14  ;;  %v10302_v59 = vmul.f32 %v9551_v44, %v1633_v60  ;;  %v8616_v4 = vadd.f32 -1.0, %v9230_v55 }
 0x230   : > { %2412 = vrot.lane.b32.xlu0 %v10057_v40, %s9363_s17 }
 0x231   : > { %v10296_v11 = vpop.permute.xlu1 %2236  ;;  %v1638_v60 = vsel %vm1573_vm10, %v10092_v62, %v8616_v4  ;;  %vm4312_vm10 = vcmask 1044480  }
 0x232   : > { %17762 = vst [vmem:[#allocation13_spill] sm:$0xff] %v10296_v11  ;;  %v10299_v10 = vpop.permute.xlu0 %1789  ;;  %v9234_v11 = vpop.eup %9233  ;;  %v10332_v58 = vmul.f32 %v9681_v24, %v1638_v60 }
 0x233   : > { %2178 = vrot.lane.b32.xlu1 %v10057_v40, %s9359_s30  ;;  %v9236_v41 = vpop.eup %9235  ;;  %v8617_v36 = vadd.f32 -1.0, %v9234_v11 }
 0x234   : > { %1712 = vrot.lane.b32.xlu0 %v10302_v59, %s9358_s29  ;;  %v9238_v55 = vpop.eup %9237  ;;  %v8614_v62 = vadd.f32 -1.0, %v9236_v41 }
 0x235   : > { %v10309_v22 = vpop.permute.xlu1 %2310  ;;  %v9240_v4 = vpop.eup %9239  ;;  %v1639_v11 = vsel %vm1574_vm13, %v10098_v57, %v8617_v36  ;;  %v8619_v19 = vadd.f32 -1.0, %v9238_v55  ;;  %vm2833_vm13 = vcmask 654336  }
 0x236   : > { %v10313_v44 = vpop.permute.xlu0 %2234  ;;  %v9242_v14 = vpop.eup %9241  ;;  %v10350_v38 = vmul.f32 %v9694_v37, %v1639_v11  ;;  %v1636_v57 = vsel %vm1571_vm14, %v10117_v9, %v8614_v62  ;;  %v8615_v31 = vadd.f32 -1.0, %v9240_v4  ;;  %vm2860_vm14 = vcmask 785408  }
 0x237   : > { %2256 = vrot.lane.b32.xlu1 %v10057_v40, %s9360_s14  ;;  %v1634_v40 = vsel %vm1569_vm12, %v10111_v1, %v8612_v35  ;;  %v9244_v35 = vpop.eup %9243  ;;  %v1641_v41 = vsel %vm1576_vm15, %v10070_v6, %v8619_v19  ;;  %v10362_v55 = vmul.f32 %v9565_v51, %v1636_v57  ;;  %vm2779_vm12 = vcmask 392192  }
 0x238   : > { %1716 = vrot.lane.b32.xlu0 %v10316_v8, %s9358_s29  ;;  %v10344_v21 = vmul.f32 %v9556_v47, %v1634_v40  ;;  %v8621_v47 = vadd.f32 -1.0, %v9242_v14  ;;  %v9246_v60 = vpop.eup %9245  ;;  %v10368_v40 = vmul.f32 %v9719_v48, %v1641_v41  ;;  %v1637_v6 = vsel %vm1572_vm2, %v10125_v3, %v8615_v31 }
 0x239   : > { %v10324_v20 = vpop.permute.xlu1 %1791  ;;  %v8618_v62 = vadd.f32 -1.0, %v9244_v35  ;;  %v9248_v4 = vpop.eup %9247  ;;  %v8622_v11 = vadd.f32 -1.0, %v9246_v60  ;;  %v10380_v14 = vmul.f32 %v9568_v52, %v1637_v6  ;;  %vm2887_vm15 = vcmask 916480  }
 0x23a   : > { %v10329_v50 = vpop.permute.xlu0 %2238  ;;  %v1643_v51 = vsel %vm1578_vm3, %v10080_v54, %v8621_v47  ;;  %v8620_v54 = vadd.f32 -1.0, %v9248_v4  ;;  %vm3297_vm2 = vcmask 1046528   ;;  %vm3637_vm3 = vcmask 1045504  }
 0x23b   : > { %1710 = vrot.lane.b32.xlu1 %v10326_v17, %s9358_s29  ;;  %v10387_v57 = vmul.f32 %v9748_v18, %v1643_v51  ;;  %v1640_v31 = vsel %vm1575_vm4, %v10120_v5, %v8618_v62  ;;  %v1644_v35 = vsel %vm1579_vm5, %v10083_v56, %v8622_v11  ;;  %vm4648_vm4 = vcmask 1043456  }
 0x23c   : > { %1722 = vrot.lane.b32.xlu0 %v10332_v58, %s9358_s29  ;;  %v10398_v41 = vmul.f32 %v9703_v45, %v1640_v31  ;;  %v10401_v47 = vmul.f32 0.0, %v1644_v35  ;;  %v1642_v5 = vsel %vm1577_vm6, %v10073_v16, %v8620_v54  ;;  %vm5329_vm5 = vcmask 1042432  }
 0x23d   : > { %v10341_v28 = vpop.permute.xlu1 %1795  ;;  %v10413_v6 = vmul.f32 %v9733_v15, %v1642_v5  ;;  %vm5669_vm6 = vcmask 1041408  }
 0x23e   : > { %v10347_v1 = vpop.permute.xlu0 %1793 }
 0x23f   : > { %1714 = vrot.lane.b32.xlu1 %v10344_v21, %s9358_s29 }
 0x240   : > { %1724 = vrot.lane.b32.xlu0 %v10350_v38, %s9358_s29 }
 0x241   : > { %v10359_v36 = vpop.permute.xlu1 %2312 }
 0x242   : > { %v10365_v9 = vpop.permute.xlu0 %2314 }
 0x243   : > { %1718 = vrot.lane.b32.xlu1 %v10362_v55, %s9358_s29 }
 0x244   : > { %1728 = vrot.lane.b32.xlu0 %v10368_v40, %s9358_s29 }
 0x245   : > { %v10377_v19 = vpop.permute.xlu1 %2316 }
 0x246   : > { %17763 = vst [vmem:[#allocation14_spill] sm:$0xff] %v10377_v19  ;;  %v10384_v3 = vpop.permute.xlu0 %2388 }
 0x247   : > { %1720 = vrot.lane.b32.xlu1 %v10380_v14, %s9358_s29 }
 0x248   : > { %1732 = vrot.lane.b32.xlu0 %v10387_v57, %s9358_s29 }
 0x249   : > { %v10395_v52 = vpop.permute.xlu1 %2392 }
 0x24a   : > { %17764 = vst [vmem:[#allocation15_spill] sm:$0xff] %v10395_v52  ;;  %v10403_v60 = vpop.permute.xlu0 %2390 }
 0x24b   : > { %1726 = vrot.lane.b32.xlu1 %v10398_v41, %s9358_s29 }
 0x24c   : > { %1734 = vrot.lane.b32.xlu0 %v10401_v47, %s9358_s29 }
 0x24d   : > { %v10410_v56 = vpop.permute.xlu1 %2162 }
 0x24e   : > { %17765 = vst [vmem:[#allocation16_spill] sm:$0xff] %v10410_v56  ;;  %v10415_v62 = vpop.permute.xlu0 %2394 }
 0x24f   : > { %17766 = vst [vmem:[#allocation17_spill] sm:$0xff] %v10415_v62  ;;  %1730 = vrot.lane.b32.xlu1 %v10413_v6, %s9358_s29  ;;  %v9120_v62 = vunpack.i.h.bf16 %v10199_v49  ;;  %s8729_s29 = sshll.u32 %s18601_s28, 4 }
 0x250   : > { %1815 = vrot.lane.b32.xlu0 %v10326_v17, %s9361_s15 }
 0x251   : > { %v10421_v16 = vpop.permute.xlu1 %2240 }
 0x252   : > { %17767 = vst [vmem:[#allocation18_spill] sm:$0xff] %v10421_v16  ;;  %v10423_v4 = vpop.permute.xlu0 %2164 }
 0x253   : > { %17768 = vst [vmem:[#allocation19_spill] sm:$0xff] %v10423_v4  ;;  %2180 = vrot.lane.b32.xlu1 %v10326_v17, %s9359_s30 }
 0x254   : > { %2336 = vrot.lane.b32.xlu0 %v10326_v17, %s9362_s16 }
 0x255   : > { %v10429_v11 = vpop.permute.xlu1 %1797 }
 0x256   : > { %v10431_v51 = vpop.permute.xlu0 %2242 }
 0x257   : > { %17769 = vst [vmem:[#allocation20_spill] sm:$0xff] %v10431_v51  ;;  %2258 = vrot.lane.b32.xlu1 %v10326_v17, %s9360_s14 }
 0x258   : > { %2414 = vrot.lane.b32.xlu0 %v10326_v17, %s9363_s17 }
 0x259   : > { %v10437_v31 = vpop.permute.xlu1 %2318 }
 0x25a   : > { %17770 = vst [vmem:[#allocation21_spill] sm:$0xff] %v10437_v31  ;;  %v10439_v54 = vpop.permute.xlu0 %1799 }
 0x25b   : > { %2182 = vrot.lane.b32.xlu1 %v10302_v59, %s9359_s30 }
 0x25c   : > { %1817 = vrot.lane.b32.xlu0 %v10302_v59, %s9361_s15 }
 0x25d   : > { %v10445_v35 = vpop.permute.xlu1 %2396 }
 0x25e   : > { %17771 = vst [vmem:[#allocation22_spill] sm:$0xff] %v10445_v35  ;;  %v10447_v5 = vpop.permute.xlu0 %2320 }
 0x25f   : > { %17772 = vst [vmem:[#allocation23_spill] sm:$0xff] %v10447_v5  ;;  %2260 = vrot.lane.b32.xlu1 %v10302_v59, %s9360_s14 }
 0x260   : > { %2338 = vrot.lane.b32.xlu0 %v10302_v59, %s9362_s16 }
 0x261   : > { %v10453_v17 = vpop.permute.xlu1 %2166 }
 0x262   : > { %17773 = vst [vmem:[#allocation24_spill] sm:$0xff] %v10453_v17  ;;  %v10455_v18 = vpop.permute.xlu0 %2398 }
 0x263   : > { %17774 = vst [vmem:[#allocation25_spill] sm:$0xff] %v10455_v18  ;;  %2184 = vrot.lane.b32.xlu1 %v10344_v21, %s9359_s30 }
 0x264   : > { %2416 = vrot.lane.b32.xlu0 %v10302_v59, %s9363_s17 }
 0x265   : > { %v10461_v15 = vpop.permute.xlu1 %2244 }
 0x266   : > { %17775 = vst [vmem:[#allocation26_spill] sm:$0xff] %v10461_v15  ;;  %v10463_v48 = vpop.permute.xlu0 %2168 }
 0x267   : > { %17776 = vst [vmem:[#allocation27_spill] sm:$0xff] %v10463_v48  ;;  %2262 = vrot.lane.b32.xlu1 %v10344_v21, %s9360_s14 }
 0x268   : > { %1819 = vrot.lane.b32.xlu0 %v10344_v21, %s9361_s15 }
 0x269   : > { %v10469_v45 = vpop.permute.xlu1 %1801 }
 0x26a   : > { %v10471_v37 = vpop.permute.xlu0 %2246 }
 0x26b   : > { %17777 = vst [vmem:[#allocation28_spill] sm:$0xff] %v10471_v37  ;;  %2186 = vrot.lane.b32.xlu1 %v10316_v8, %s9359_s30 }
 0x26c   : > { %2340 = vrot.lane.b32.xlu0 %v10344_v21, %s9362_s16 }
 0x26d   : > { %v10477_v59 = vpop.permute.xlu1 %2322 }
 0x26e   : > { %17778 = vst [vmem:[#allocation29_spill] sm:$0xff] %v10477_v59  ;;  %v10479_v24 = vpop.permute.xlu0 %1803 }
 0x26f   : > { %2264 = vrot.lane.b32.xlu1 %v10316_v8, %s9360_s14 }
 0x270   : > { %2418 = vrot.lane.b32.xlu0 %v10344_v21, %s9363_s17 }
 0x271   : > { %v10485_v48 = vpop.permute.xlu1 %2400 }
 0x272   : > { %17779 = vst [vmem:[#allocation30_spill] sm:$0xff] %v10485_v48  ;;  %v10487_v15 = vpop.permute.xlu0 %2324 }
 0x273   : > { %17780 = vst [vmem:[#allocation31_spill] sm:$0xff] %v10487_v15  ;;  %2188 = vrot.lane.b32.xlu1 %v10362_v55, %s9359_s30 }
 0x274   : > { %1821 = vrot.lane.b32.xlu0 %v10316_v8, %s9361_s15 }
 0x275   : > { %v10493_v37 = vpop.permute.xlu1 %2170 }
 0x276   : > { %17781 = vst [vmem:[#allocation32_spill] sm:$0xff] %v10493_v37  ;;  %v10495_v59 = vpop.permute.xlu0 %2402 }
 0x277   : > { %17782 = vst [vmem:[#allocation33_spill] sm:$0xff] %v10495_v59  ;;  %2266 = vrot.lane.b32.xlu1 %v10362_v55, %s9360_s14 }
 0x278   : > { %2342 = vrot.lane.b32.xlu0 %v10316_v8, %s9362_s16 }
 0x279   : > { %v10501_v21 = vpop.permute.xlu1 %2248 }
 0x27a   : > { %17783 = vst [vmem:[#allocation34_spill] sm:$0xff] %v10501_v21  ;;  %v10503_v48 = vpop.permute.xlu0 %2172 }
 0x27b   : > { %17784 = vst [vmem:[#allocation35_spill] sm:$0xff] %v10503_v48  ;;  %2190 = vrot.lane.b32.xlu1 %v10380_v14, %s9359_s30 }
 0x27c   : > { %2420 = vrot.lane.b32.xlu0 %v10316_v8, %s9363_s17 }
 0x27d   : > { %v10509_v15 = vpop.permute.xlu1 %1805 }
 0x27e   : > { %v10511_v37 = vpop.permute.xlu0 %2250 }
 0x27f   : > { %17785 = vst [vmem:[#allocation36_spill] sm:$0xff] %v10511_v37  ;;  %1825 = vrot.lane.b32.xlu1 %v10380_v14, %s9361_s15 }
 0x280   : > { %1823 = vrot.lane.b32.xlu0 %v10362_v55, %s9361_s15 }
 0x281   : > { %v10517_v59 = vpop.permute.xlu1 %2326 }
 0x282   : > { %17786 = vst [vmem:[#allocation37_spill] sm:$0xff] %v10517_v59  ;;  %v10519_v21 = vpop.permute.xlu0 %1809 }
 0x283   : > { %2346 = vrot.lane.b32.xlu1 %v10380_v14, %s9362_s16 }
 0x284   : > { %2344 = vrot.lane.b32.xlu0 %v10362_v55, %s9362_s16 }
 0x285   : > { %v10525_v8 = vpop.permute.xlu1 %2404 }
 0x286   : > { %17787 = vst [vmem:[#allocation38_spill] sm:$0xff] %v10525_v8  ;;  %v10527_v48 = vpop.permute.xlu0 %2330 }
 0x287   : > { %17788 = vst [vmem:[#allocation39_spill] sm:$0xff] %v10527_v48  ;;  %2424 = vrot.lane.b32.xlu1 %v10380_v14, %s9363_s17 }
 0x288   : > { %2422 = vrot.lane.b32.xlu0 %v10362_v55, %s9363_s17 }
 0x289   : > { %v10533_v37 = vpop.permute.xlu1 %1807 }
 0x28a   : > { %v10535_v59 = vpop.permute.xlu0 %2408 }
 0x28b   : > { %17789 = vst [vmem:[#allocation40_spill] sm:$0xff] %v10535_v59  ;;  %2192 = vrot.lane.b32.xlu1 %v10332_v58, %s9359_s30 }
 0x28c   : > { %2268 = vrot.lane.b32.xlu0 %v10380_v14, %s9360_s14 }
 0x28d   : > { %v10541_v17 = vpop.permute.xlu1 %2328 }
 0x28e   : > { %17790 = vst [vmem:[#allocation41_spill] sm:$0xff] %v10541_v17  ;;  %v10543_v8 = vpop.permute.xlu0 %1811 }
 0x28f   : > { %2270 = vrot.lane.b32.xlu1 %v10332_v58, %s9360_s14 }
 0x290   : > { %2426 = vrot.lane.b32.xlu0 %v10332_v58, %s9363_s17 }
 0x291   : > { %v10549_v55 = vpop.permute.xlu1 %2406 }
 0x292   : > { %17791 = vst [vmem:[#allocation42_spill] sm:$0xff] %v10549_v55  ;;  %v10551_v48 = vpop.permute.xlu0 %2332 }
 0x293   : > { %17792 = vst [vmem:[#allocation43_spill] sm:$0xff] %v10551_v48  ;;  %1827 = vrot.lane.b32.xlu1 %v10332_v58, %s9361_s15 }
 0x294   : > { %2194 = vrot.lane.b32.xlu0 %v10350_v38, %s9359_s30 }
 0x295   : > { %v10557_v14 = vpop.permute.xlu1 %2174 }
 0x296   : > { %17793 = vst [vmem:[#allocation44_spill] sm:$0xff] %v10557_v14  ;;  %v10559_v59 = vpop.permute.xlu0 %2410 }
 0x297   : > { %17794 = vst [vmem:[#allocation45_spill] sm:$0xff] %v10559_v59  ;;  %2348 = vrot.lane.b32.xlu1 %v10332_v58, %s9362_s16 }
 0x298   : > { %2272 = vrot.lane.b32.xlu0 %v10350_v38, %s9360_s14 }
 0x299   : > { %v10565_v17 = vpop.permute.xlu1 %2252 }
 0x29a   : > { %17795 = vst [vmem:[#allocation46_spill] sm:$0xff] %v10565_v17  ;;  %v10567_v55 = vpop.permute.xlu0 %1813 }
 0x29b   : > { %2428 = vrot.lane.b32.xlu1 %v10350_v38, %s9363_s17 }
 0x29c   : > { %1829 = vrot.lane.b32.xlu0 %v10350_v38, %s9361_s15 }
 0x29d   : > { %v10573_v48 = vpop.permute.xlu1 %2176 }
 0x29e   : > { %17796 = vst [vmem:[#allocation47_spill] sm:$0xff] %v10573_v48  ;;  %v10575_v14 = vpop.permute.xlu0 %2334 }
 0x29f   : > { %17797 = vst [vmem:[#allocation48_spill] sm:$0xff] %v10575_v14  ;;  %2196 = vrot.lane.b32.xlu1 %v10398_v41, %s9359_s30 }
 0x2a0   : > { %2350 = vrot.lane.b32.xlu0 %v10350_v38, %s9362_s16 }
 0x2a1   : > { %v10581_v58 = vpop.permute.xlu1 %2254 }
 0x2a2   : > { %17798 = vst [vmem:[#allocation49_spill] sm:$0xff] %v10581_v58  ;;  %v10583_v59 = vpop.permute.xlu0 %2412 }
 0x2a3   : > { %17799 = vst [vmem:[#allocation50_spill] sm:$0xff] %v10583_v59  ;;  %2274 = vrot.lane.b32.xlu1 %v10398_v41, %s9360_s14 }
 0x2a4   : > { %2430 = vrot.lane.b32.xlu0 %v10398_v41, %s9363_s17 }
 0x2a5   : > { %v10589_v17 = vpop.permute.xlu1 %2178 }
 0x2a6   : > { %17800 = vst [vmem:[#allocation51_spill] sm:$0xff] %v10589_v17  ;;  %v10591_v48 = vpop.permute.xlu0 %1712 }
 0x2a7   : > { %1831 = vrot.lane.b32.xlu1 %v10398_v41, %s9361_s15 }
 0x2a8   : > { %2198 = vrot.lane.b32.xlu0 %v10368_v40, %s9359_s30 }
 0x2a9   : > { %v10597_v38 = vpop.permute.xlu1 %2256 }
 0x2aa   : > { %17801 = vst [vmem:[#allocation52_spill] sm:$0xff] %v10597_v38  ;;  %v10599_v14 = vpop.permute.xlu0 %1716 }
 0x2ab   : > { %2352 = vrot.lane.b32.xlu1 %v10398_v41, %s9362_s16 }
 0x2ac   : > { %2276 = vrot.lane.b32.xlu0 %v10368_v40, %s9360_s14 }
 0x2ad   : > { %v10605_v59 = vpop.permute.xlu1 %1710 }
 0x2ae   : > { %v10607_v17 = vpop.permute.xlu0 %1722 }
 0x2af   : > { %2432 = vrot.lane.b32.xlu1 %v10368_v40, %s9363_s17 }
 0x2b0   : > { %1833 = vrot.lane.b32.xlu0 %v10368_v40, %s9361_s15 }
 0x2b1   : > { %v10613_v58 = vpop.permute.xlu1 %1714 }
 0x2b2   : > { %v10615_v38 = vpop.permute.xlu0 %1724 }
 0x2b3   : > { %2200 = vrot.lane.b32.xlu1 %v10413_v6, %s9359_s30 }
 0x2b4   : > { %2354 = vrot.lane.b32.xlu0 %v10368_v40, %s9362_s16 }
 0x2b5   : > { %v10621_v41 = vpop.permute.xlu1 %1718 }
 0x2b6   : > { %v10623_v18 = vpop.permute.xlu0 %1728 }
 0x2b7   : > { %2278 = vrot.lane.b32.xlu1 %v10413_v6, %s9360_s14 }
 0x2b8   : > { %2434 = vrot.lane.b32.xlu0 %v10413_v6, %s9363_s17 }
 0x2b9   : > { %v10629_v5 = vpop.permute.xlu1 %1720 }
 0x2ba   : > { %v10631_v51 = vpop.permute.xlu0 %1732 }
 0x2bb   : > { %1835 = vrot.lane.b32.xlu1 %v10413_v6, %s9361_s15 }
 0x2bc   : > { %2202 = vrot.lane.b32.xlu0 %v10387_v57, %s9359_s30 }
 0x2bd   : > { %v10637_v40 = vpop.permute.xlu1 %1726 }
 0x2be   : > { %v10639_v4 = vpop.permute.xlu0 %1734 }
 0x2bf   : > { %17802 = vst [vmem:[#allocation53_spill] sm:$0xff] %v10639_v4  ;;  %2356 = vrot.lane.b32.xlu1 %v10413_v6, %s9362_s16 }
 0x2c0   : > { %2358 = vrot.lane.b32.xlu0 %v10387_v57, %s9362_s16 }
 0x2c1   : > { %v10645_v35 = vpop.permute.xlu1 %1730 }
 0x2c2   : > { %v10647_v31 = vpop.permute.xlu0 %1815 }
 0x2c3   : > { %17803 = vst [vmem:[#allocation54_spill] sm:$0xff] %v10647_v31  ;;  %2280 = vrot.lane.b32.xlu1 %v10387_v57, %s9360_s14  ;;  %v10675_v31 = vsel %vm1762_vm7, 0.0, %v10211_v42 }
 0x2c4   : > { %2204 = vrot.lane.b32.xlu0 %v10401_v47, %s9359_s30 }
 0x2c5   : > { %v10653_v16 = vpop.permute.xlu1 %2180 }
 0x2c6   : > { %17804 = vst [vmem:[#allocation55_spill] sm:$0xff] %v10653_v16  ;;  %v10655_v56 = vpop.permute.xlu0 %2336 }
 0x2c7   : > { %17805 = vst [vmem:[#allocation56_spill] sm:$0xff] %v10655_v56  ;;  %1837 = vrot.lane.b32.xlu1 %v10387_v57, %s9361_s15 }
 0x2c8   : > { %2282 = vrot.lane.b32.xlu0 %v10401_v47, %s9360_s14 }
 0x2c9   : > { %v10661_v6 = vpop.permute.xlu1 %2258 }
 0x2ca   : > { %17806 = vst [vmem:[#allocation57_spill] sm:$0xff] %v10661_v6  ;;  %v10663_v4 = vpop.permute.xlu0 %2414  ;;  %v10695_v6 = vld [vmem:[#allocation2] sm:$0xff] }
 0x2cb   : > { %17807 = vst [vmem:[#allocation58_spill] sm:$0xff] %v10663_v4  ;;  %2436 = vrot.lane.b32.xlu1 %v10387_v57, %s9363_s17  ;;  %2993 = vst.msk [vmem:[#allocation2 + $0x8] sm:$0xff] %vm2806_vm8, %v10695_v6 }
 0x2cc   : > { %2360 = vrot.lane.b32.xlu0 %v10401_v47, %s9362_s16  ;;  %2995 = vst.msk [vmem:[#allocation2 + $0x18] sm:$0xff] %vm2806_vm8, %v10695_v6  ;;  %2997 = vst.msk [vmem:[#allocation2 + $0x1c8] sm:$0xff] %vm2806_vm8, %v10695_v6  ;;  %s444_s16 = scalar_lea.vmem %s17439_s13, %s8729_s29 }
 0x2cd   : > { %v10669_v16 = vpop.permute.xlu1 %2182  ;;  %2999 = vst.msk [vmem:[#allocation2 + $0x1d8] sm:$0xff] %vm2806_vm8, %v10695_v6 }
 0x2ce   : > { %17808 = vst [vmem:[#allocation59_spill] sm:$0xff] %v10669_v16  ;;  %v10671_v56 = vpop.permute.xlu0 %1817  ;;  %v10687_v16 = vsel %vm1762_vm7, 0.0, %v10209_v53  ;;  %v10707_v53 = vsel %vm1762_vm7, 0.0, %v10219_v33 }
 0x2cf   : > { %17809 = vst [vmem:[#allocation60_spill] sm:$0xff] %v10671_v56  ;;  %1839 = vrot.lane.b32.xlu1 %v10401_v47, %s9361_s15  ;;  %v10769_v56 = vsel %vm1762_vm7, 0.0, %v10225_v43 }
 0x2d0   : > { %1920 = vrot.lane.b32.xlu0 %v10675_v31, %s9364_s18  ;;  %17827 = vst [vmem:[#allocation78_spill] sm:$0xff] %v10769_v56 }
 0x2d1   : > { %v10681_v57 = vpop.permute.xlu1 %2260 }
 0x2d2   : > { %17810 = vst [vmem:[#allocation61_spill] sm:$0xff] %v10681_v57  ;;  %v10683_v4 = vpop.permute.xlu0 %2338 }
 0x2d3   : > { %17811 = vst [vmem:[#allocation62_spill] sm:$0xff] %v10683_v4  ;;  %2438 = vrot.lane.b32.xlu1 %v10401_v47, %s9363_s17  ;;  %v10719_v4 = vsel %vm1762_vm7, 0.0, %v10217_v25 }
 0x2d4   : > { %1924 = vrot.lane.b32.xlu0 %v10687_v16, %s9364_s18 }
 0x2d5   : > { %v10693_v42 = vpop.permute.xlu1 %2184 }
 0x2d6   : > { %17812 = vst [vmem:[#allocation63_spill] sm:$0xff] %v10693_v42  ;;  %v10709_v47 = vpop.permute.xlu0 %2416 }
 0x2d7   : > { %17813 = vst [vmem:[#allocation64_spill] sm:$0xff] %v10709_v47  ;;  %1922 = vrot.lane.b32.xlu1 %v10707_v53, %s9364_s18 }
 0x2d8   : > { %1998 = vrot.lane.b32.xlu0 %v10675_v31, %s9365_s19 }
 0x2d9   : > { %v10715_v42 = vpop.permute.xlu1 %2262 }
 0x2da   : > { %17814 = vst [vmem:[#allocation65_spill] sm:$0xff] %v10715_v42  ;;  %v10721_v57 = vpop.permute.xlu0 %1819 }
 0x2db   : > { %17815 = vst [vmem:[#allocation66_spill] sm:$0xff] %v10721_v57  ;;  %1926 = vrot.lane.b32.xlu1 %v10719_v4, %s9364_s18 }
 0x2dc   : > { %2000 = vrot.lane.b32.xlu0 %v10707_v53, %s9365_s19 }
 0x2dd   : > { %v10727_v33 = vpop.permute.xlu1 %2186 }
 0x2de   : > { %17816 = vst [vmem:[#allocation67_spill] sm:$0xff] %v10727_v33  ;;  %v10729_v47 = vpop.permute.xlu0 %2340 }
 0x2df   : > { %17817 = vst [vmem:[#allocation68_spill] sm:$0xff] %v10729_v47  ;;  %2002 = vrot.lane.b32.xlu1 %v10687_v16, %s9365_s19 }
 0x2e0   : > { %2004 = vrot.lane.b32.xlu0 %v10719_v4, %s9365_s19 }
 0x2e1   : > { %v10735_v25 = vpop.permute.xlu1 %2264 }
 0x2e2   : > { %17818 = vst [vmem:[#allocation69_spill] sm:$0xff] %v10735_v25  ;;  %v10737_v42 = vpop.permute.xlu0 %2418 }
 0x2e3   : > { %17819 = vst [vmem:[#allocation70_spill] sm:$0xff] %v10737_v42  ;;  %2076 = vrot.lane.b32.xlu1 %v10675_v31, %s9366_s4  ;;  %v10755_v42 = vsel %vm1762_vm7, 0.0, %v10227_v12 }
 0x2e4   : > { %2078 = vrot.lane.b32.xlu0 %v10707_v53, %s9366_s4  ;;  %17823 = vst [vmem:[#allocation74_spill] sm:$0xff] %v10755_v42 }
 0x2e5   : > { %v10743_v33 = vpop.permute.xlu1 %2188 }
 0x2e6   : > { %17820 = vst [vmem:[#allocation71_spill] sm:$0xff] %v10743_v33  ;;  %v10745_v47 = vpop.permute.xlu0 %1821 }
 0x2e7   : > { %17821 = vst [vmem:[#allocation72_spill] sm:$0xff] %v10745_v47  ;;  %2080 = vrot.lane.b32.xlu1 %v10687_v16, %s9366_s4 }
 0x2e8   : > { %2082 = vrot.lane.b32.xlu0 %v10719_v4, %s9366_s4 }
 0x2e9   : > { %v10751_v25 = vpop.permute.xlu1 %2266 }
 0x2ea   : > { %17822 = vst [vmem:[#allocation73_spill] sm:$0xff] %v10751_v25  ;;  %v10757_v57 = vpop.permute.xlu0 %2342  ;;  %v10779_v25 = vsel %vm1762_vm7, 0.0, %v10236_v29 }
 0x2eb   : > { %17824 = vst [vmem:[#allocation75_spill] sm:$0xff] %v10757_v57  ;;  %1928 = vrot.lane.b32.xlu1 %v10755_v42, %s9364_s18  ;;  %17829 = vst [vmem:[#allocation80_spill] sm:$0xff] %v10779_v25 }
 0x2ec   : > { %2006 = vrot.lane.b32.xlu0 %v10755_v42, %s9365_s19 }
 0x2ed   : > { %v10763_v33 = vpop.permute.xlu1 %2190 }
 0x2ee   : > { %17825 = vst [vmem:[#allocation76_spill] sm:$0xff] %v10763_v33  ;;  %v10765_v47 = vpop.permute.xlu0 %2420 }
 0x2ef   : > { %17826 = vst [vmem:[#allocation77_spill] sm:$0xff] %v10765_v47  ;;  %2084 = vrot.lane.b32.xlu1 %v10755_v42, %s9366_s4 }
 0x2f0   : > { %1930 = vrot.lane.b32.xlu0 %v10769_v56, %s9364_s18 }
 0x2f1   : > { %v10775_v12 = vpop.permute.xlu1 %1825 }
 0x2f2   : > { %17828 = vst [vmem:[#allocation79_spill] sm:$0xff] %v10775_v12  ;;  %v10781_v57 = vpop.permute.xlu0 %1823 }
 0x2f3   : > { %17830 = vst [vmem:[#allocation81_spill] sm:$0xff] %v10781_v57  ;;  %1932 = vrot.lane.b32.xlu1 %v10779_v25, %s9364_s18  ;;  %v10801_v57 = vsel %vm1762_vm7, 0.0, %v10234_v30 }
 0x2f4   : > { %2008 = vrot.lane.b32.xlu0 %v10769_v56, %s9365_s19  ;;  %17835 = vst [vmem:[#allocation86_spill] sm:$0xff] %v10801_v57 }
 0x2f5   : > { %v10787_v43 = vpop.permute.xlu1 %2346 }
 0x2f6   : > { %17831 = vst [vmem:[#allocation82_spill] sm:$0xff] %v10787_v43  ;;  %v10789_v33 = vpop.permute.xlu0 %2344 }
 0x2f7   : > { %17832 = vst [vmem:[#allocation83_spill] sm:$0xff] %v10789_v33  ;;  %2010 = vrot.lane.b32.xlu1 %v10779_v25, %s9365_s19  ;;  %v10811_v33 = vsel %vm1762_vm7, 0.0, %v10246_v23 }
 0x2f8   : > { %2086 = vrot.lane.b32.xlu0 %v10769_v56, %s9366_s4  ;;  %17837 = vst [vmem:[#allocation88_spill] sm:$0xff] %v10811_v33 }
 0x2f9   : > { %v10795_v29 = vpop.permute.xlu1 %2424 }
 0x2fa   : > { %17833 = vst [vmem:[#allocation84_spill] sm:$0xff] %v10795_v29  ;;  %v10797_v47 = vpop.permute.xlu0 %2422 }
 0x2fb   : > { %17834 = vst [vmem:[#allocation85_spill] sm:$0xff] %v10797_v47  ;;  %2088 = vrot.lane.b32.xlu1 %v10779_v25, %s9366_s4 }
 0x2fc   : > { %1934 = vrot.lane.b32.xlu0 %v10801_v57, %s9364_s18 }
 0x2fd   : > { %v10807_v43 = vpop.permute.xlu1 %2192 }
 0x2fe   : > { %17836 = vst [vmem:[#allocation87_spill] sm:$0xff] %v10807_v43  ;;  %v10813_v12 = vpop.permute.xlu0 %2268 }
 0x2ff   : > { %17838 = vst [vmem:[#allocation89_spill] sm:$0xff] %v10813_v12  ;;  %1936 = vrot.lane.b32.xlu1 %v10811_v33, %s9364_s18  ;;  %v10833_v12 = vsel %vm1762_vm7, 0.0, %v10243_v61 }
 0x300   : > { %2012 = vrot.lane.b32.xlu0 %v10801_v57, %s9365_s19  ;;  %17843 = vst [vmem:[#allocation94_spill] sm:$0xff] %v10833_v12 }
 0x301   : > { %v10819_v30 = vpop.permute.xlu1 %2270 }
 0x302   : > { %17839 = vst [vmem:[#allocation90_spill] sm:$0xff] %v10819_v30  ;;  %v10821_v29 = vpop.permute.xlu0 %2426  ;;  %v10843_v30 = vsel %vm1762_vm7, 0.0, %v10256_v39 }
 0x303   : > { %17840 = vst [vmem:[#allocation91_spill] sm:$0xff] %v10821_v29  ;;  %2014 = vrot.lane.b32.xlu1 %v10811_v33, %s9365_s19  ;;  %17845 = vst [vmem:[#allocation96_spill] sm:$0xff] %v10843_v30 }
 0x304   : > { %2090 = vrot.lane.b32.xlu0 %v10801_v57, %s9366_s4 }
 0x305   : > { %v10827_v23 = vpop.permute.xlu1 %1827 }
 0x306   : > { %17841 = vst [vmem:[#allocation92_spill] sm:$0xff] %v10827_v23  ;;  %v10829_v43 = vpop.permute.xlu0 %2194 }
 0x307   : > { %17842 = vst [vmem:[#allocation93_spill] sm:$0xff] %v10829_v43  ;;  %2092 = vrot.lane.b32.xlu1 %v10811_v33, %s9366_s4  ;;  %v10855_v43 = vsel %vm1762_vm7, 0.0, %v10253_v34  ;;  %v8629_v33 = vld [vmem:[%s17432_s6 + $0x7] ss:$8 sm:$0x3] }
 0x308   : > { %1938 = vrot.lane.b32.xlu0 %v10833_v12, %s9364_s18  ;;  %17848 = vst [vmem:[#allocation99_spill] sm:$0xff] %v10855_v43 }
 0x309   : > { %v10839_v29 = vpop.permute.xlu1 %2348 }
 0x30a   : > { %17844 = vst [vmem:[#allocation95_spill] sm:$0xff] %v10839_v29  ;;  %v10845_v47 = vpop.permute.xlu0 %2272 }
 0x30b   : > { %17846 = vst [vmem:[#allocation97_spill] sm:$0xff] %v10845_v47  ;;  %1940 = vrot.lane.b32.xlu1 %v10843_v30, %s9364_s18 }
 0x30c   : > { %2016 = vrot.lane.b32.xlu0 %v10833_v12, %s9365_s19 }
 0x30d   : > { %v10851_v61 = vpop.permute.xlu1 %2428 }
 0x30e   : > { %17847 = vst [vmem:[#allocation98_spill] sm:$0xff] %v10851_v61  ;;  %v10857_v23 = vpop.permute.xlu0 %1829  ;;  %v10875_v61 = vsel %vm1762_vm7, 0.0, %v10266_v0 }
 0x30f   : > { %17849 = vst [vmem:[#allocation100_spill] sm:$0xff] %v10857_v23  ;;  %2020 = vrot.lane.b32.xlu1 %v10855_v43, %s9365_s19  ;;  %17853 = vst [vmem:[#allocation104_spill] sm:$0xff] %v10875_v61 }
 0x310   : > { %2094 = vrot.lane.b32.xlu0 %v10833_v12, %s9366_s4 }
 0x311   : > { %v10863_v39 = vpop.permute.xlu1 %2196 }
 0x312   : > { %17850 = vst [vmem:[#allocation101_spill] sm:$0xff] %v10863_v39  ;;  %v10865_v47 = vpop.permute.xlu0 %2350 }
 0x313   : > { %17851 = vst [vmem:[#allocation102_spill] sm:$0xff] %v10865_v47  ;;  %2098 = vrot.lane.b32.xlu1 %v10855_v43, %s9366_s4 }
 0x314   : > { %2018 = vrot.lane.b32.xlu0 %v10843_v30, %s9365_s19 }
 0x315   : > { %v10871_v34 = vpop.permute.xlu1 %2274 }
 0x316   : > { %17852 = vst [vmem:[#allocation103_spill] sm:$0xff] %v10871_v34  ;;  %v10877_v29 = vpop.permute.xlu0 %2430 }
 0x317   : > { %17854 = vst [vmem:[#allocation105_spill] sm:$0xff] %v10877_v29  ;;  %2022 = vrot.lane.b32.xlu1 %v10875_v61, %s9365_s19  ;;  %v10895_v29 = vsel %vm1867_vm9, %v10324_v20, 0.0  ;;  %v10913_v20 = vsel %vm1867_vm9, %v10299_v10, 0.0 }
 0x318   : > { %2096 = vrot.lane.b32.xlu0 %v10843_v30, %s9366_s4  ;;  %17858 = vst [vmem:[#allocation109_spill] sm:$0xff] %v10895_v29  ;;  %17863 = vst [vmem:[#allocation114_spill] sm:$0xff] %v10913_v20 }
 0x319   : > { %v10883_v39 = vpop.permute.xlu1 %1831 }
 0x31a   : > { %17855 = vst [vmem:[#allocation106_spill] sm:$0xff] %v10883_v39  ;;  %v10885_v47 = vpop.permute.xlu0 %2198  ;;  %v10907_v39 = vsel %vm1867_vm9, %v10341_v28, 0.0 }
 0x31b   : > { %17856 = vst [vmem:[#allocation107_spill] sm:$0xff] %v10885_v47  ;;  %2100 = vrot.lane.b32.xlu1 %v10875_v61, %s9366_s4  ;;  %17861 = vst [vmem:[#allocation112_spill] sm:$0xff] %v10907_v39 }
 0x31c   : > { %1942 = vrot.lane.b32.xlu0 %v10855_v43, %s9364_s18 }
 0x31d   : > { %v10891_v0 = vpop.permute.xlu1 %2352 }
 0x31e   : > { %17857 = vst [vmem:[#allocation108_spill] sm:$0xff] %v10891_v0  ;;  %v10897_v34 = vpop.permute.xlu0 %2276 }
 0x31f   : > { %17859 = vst [vmem:[#allocation110_spill] sm:$0xff] %v10897_v34  ;;  %2494 = vrot.lane.b32.xlu1 %v10895_v29, %s9364_s18 }
 0x320   : > { %1944 = vrot.lane.b32.xlu0 %v10875_v61, %s9364_s18 }
 0x321   : > { %v10903_v47 = vpop.permute.xlu1 %2432 }
 0x322   : > { %17860 = vst [vmem:[#allocation111_spill] sm:$0xff] %v10903_v47  ;;  %v10909_v23 = vpop.permute.xlu0 %1833  ;;  %v10923_v47 = vsel %vm1867_vm9, %v10347_v1, 0.0 }
 0x323   : > { %17862 = vst [vmem:[#allocation113_spill] sm:$0xff] %v10909_v23  ;;  %2498 = vrot.lane.b32.xlu1 %v10907_v39, %s9364_s18  ;;  %17865 = vst [vmem:[#allocation116_spill] sm:$0xff] %v10923_v47 }
 0x324   : > { %2492 = vrot.lane.b32.xlu0 %v10913_v20, %s9364_s18 }
 0x325   : > { %v10919_v34 = vpop.permute.xlu1 %2200 }
 0x326   : > { %17864 = vst [vmem:[#allocation115_spill] sm:$0xff] %v10919_v34  ;;  %v10925_v28 = vpop.permute.xlu0 %2354 }
 0x327   : > { %17866 = vst [vmem:[#allocation117_spill] sm:$0xff] %v10925_v28  ;;  %2574 = vrot.lane.b32.xlu1 %v10923_v47, %s9365_s19 }
 0x328   : > { %2496 = vrot.lane.b32.xlu0 %v10923_v47, %s9364_s18 }
 0x329   : > { %v10931_v10 = vpop.permute.xlu1 %2278 }
 0x32a   : > { %17867 = vst [vmem:[#allocation118_spill] sm:$0xff] %v10931_v10  ;;  %v10933_v0 = vpop.permute.xlu0 %2434 }
 0x32b   : > { %17868 = vst [vmem:[#allocation119_spill] sm:$0xff] %v10933_v0  ;;  %2648 = vrot.lane.b32.xlu1 %v10913_v20, %s9366_s4  ;;  %v10951_v0 = vsel %vm1867_vm9, %v10429_v11, 0.0 }
 0x32c   : > { %2570 = vrot.lane.b32.xlu0 %v10913_v20, %s9365_s19  ;;  %17872 = vst [vmem:[#allocation123_spill] sm:$0xff] %v10951_v0  ;;  %v9114_v20 = vunpack.i.l.bf16 %v10203_v13 }
 0x32d   : > { %v10939_v1 = vpop.permute.xlu1 %1835 }
 0x32e   : > { %17869 = vst [vmem:[#allocation120_spill] sm:$0xff] %v10939_v1  ;;  %v10941_v34 = vpop.permute.xlu0 %2202  ;;  %v10963_v1 = vsel %vm1867_vm9, %v10439_v54, 0.0  ;;  %v11073_v56 = vrot.slane %v9114_v20, 3  ;;  %v11097_v20 = vrot.slane %v8629_v33, %v9837_v32 }
 0x32f   : > { %17870 = vst [vmem:[#allocation121_spill] sm:$0xff] %v10941_v34  ;;  %2652 = vrot.lane.b32.xlu1 %v10923_v47, %s9366_s4  ;;  %17875 = vst [vmem:[#allocation126_spill] sm:$0xff] %v10963_v1  ;;  %v9115_v47 = vunpack.i.h.bf16 %v10203_v13  ;;  %v8627_v13 = vld [vmem:[%s17432_s6 + $0x5] ss:$8 sm:$0x3] }
 0x330   : > { %2572 = vrot.lane.b32.xlu0 %v10895_v29, %s9365_s19  ;;  %v11085_v42 = vrot.slane %v8627_v13, %v9837_v32 }
 0x331   : > { %v10947_v28 = vpop.permute.xlu1 %2356 }
 0x332   : > { %17871 = vst [vmem:[#allocation122_spill] sm:$0xff] %v10947_v28  ;;  %v10953_v10 = vpop.permute.xlu0 %2358  ;;  %v10995_v28 = vsel %vm1867_vm9, %v10479_v24, 0.0  ;;  %17894 = vst [vmem:[#allocation145_spill] sm:$0xff] %v11085_v42 }
 0x333   : > { %17873 = vst [vmem:[#allocation124_spill] sm:$0xff] %v10953_v10  ;;  %2656 = vrot.lane.b32.xlu1 %v10951_v0, %s9366_s4  ;;  %17883 = vst [vmem:[#allocation134_spill] sm:$0xff] %v10995_v28 }
 0x334   : > { %2576 = vrot.lane.b32.xlu0 %v10907_v39, %s9365_s19 }
 0x335   : > { %v10959_v34 = vpop.permute.xlu1 %2280 }
 0x336   : > { %17874 = vst [vmem:[#allocation125_spill] sm:$0xff] %v10959_v34  ;;  %v10965_v23 = vpop.permute.xlu0 %2204 }
 0x337   : > { %17876 = vst [vmem:[#allocation127_spill] sm:$0xff] %v10965_v23  ;;  %2502 = vrot.lane.b32.xlu1 %v10963_v1, %s9364_s18  ;;  %v10983_v23 = vsel %vm1867_vm9, %v10469_v45, 0.0  ;;  %v3114_v45 = vsub.s32 1, %v9531_v26  ;;  %v8625_v26 = vld [vmem:[%s17432_s6 + $0x3] ss:$8 sm:$0x3] }
 0x338   : > { %2650 = vrot.lane.b32.xlu0 %v10895_v29, %s9366_s4  ;;  %17880 = vst [vmem:[#allocation131_spill] sm:$0xff] %v10983_v23 }
 0x339   : > { %v10971_v11 = vpop.permute.xlu1 %1837  ;;  %v11087_v52 = vrot.slane %v8627_v13, %v3114_v45  ;;  %v11099_v19 = vrot.slane %v8629_v33, %v3114_v45 }
 0x33a   : > { %17877 = vst [vmem:[#allocation128_spill] sm:$0xff] %v10971_v11  ;;  %v10973_v10 = vpop.permute.xlu0 %2282 }
 0x33b   : > { %17878 = vst [vmem:[#allocation129_spill] sm:$0xff] %v10973_v10  ;;  %2580 = vrot.lane.b32.xlu1 %v10963_v1, %s9365_s19  ;;  %17895 = vst [vmem:[#allocation146_spill] sm:$0xff] %v11087_v52 }
 0x33c   : > { %2654 = vrot.lane.b32.xlu0 %v10907_v39, %s9366_s4  ;;  %v9108_v39 = vunpack.i.l.bf16 %v10191_v63  ;;  %17897 = vst [vmem:[#allocation148_spill] sm:$0xff] %v11099_v19  ;;  %v11120_v19 = vrot.slane %v9120_v62, 3  ;;  %v11140_v62 = vsel %vm1762_vm7, 0.0, %v10591_v48  ;;  %v11162_v48 = vsel %vm1762_vm7, 0.0, %v10613_v58 }
 0x33d   : > { %v10979_v54 = vpop.permute.xlu1 %2436  ;;  %17908 = vst [vmem:[#allocation159_spill] sm:$0xff] %v11140_v62  ;;  %17913 = vst [vmem:[#allocation164_spill] sm:$0xff] %v11162_v48  ;;  %v11181_v58 = vsel %vm1762_vm7, 0.0, %v10631_v51 }
 0x33e   : > { %17879 = vst [vmem:[#allocation130_spill] sm:$0xff] %v10979_v54  ;;  %v10985_v34 = vpop.permute.xlu0 %2360  ;;  %v8623_v54 = vld [vmem:[%s17432_s6 + $0x1] ss:$8 sm:$0x3]  ;;  %v11062_v25 = vrot.slane %v9108_v39, 3  ;;  %17903 = vst [vmem:[#allocation154_spill] sm:$0xff] %v11120_v19 }
 0x33f   : > { %17881 = vst [vmem:[#allocation132_spill] sm:$0xff] %v10985_v34  ;;  %2660 = vrot.lane.b32.xlu1 %v10983_v23, %s9366_s4  ;;  %v3106_v34 = vld [vmem:[%s17432_s6] ss:$8 sm:$0x3]  ;;  %v11032_v43 = vrot.slane %v8623_v54, %v9837_v32  ;;  %v11034_v30 = vrot.slane %v8623_v54, %v3114_v45  ;;  %v11052_v54 = vrot.slane %v8625_v26, %v3114_v45  ;;  %17916 = vst [vmem:[#allocation167_spill] sm:$0xff] %v11181_v58 }
 0x340   : > { %2500 = vrot.lane.b32.xlu0 %v10951_v0, %s9364_s18  ;;  %v11029_v61 = vrot.slane %v3106_v34, %v3114_v45  ;;  %17890 = vst [vmem:[#allocation141_spill] sm:$0xff] %v11062_v25 }
 0x341   : > { %v10991_v10 = vpop.permute.xlu1 %1839  ;;  %17886 = vst [vmem:[#allocation137_spill] sm:$0xff] %v11034_v30  ;;  %17888 = vst [vmem:[#allocation139_spill] sm:$0xff] %v11052_v54  ;;  %v8628_v30 = vld [vmem:[%s17432_s6 + $0x6] ss:$8 sm:$0x3] }
 0x342   : > { %17882 = vst [vmem:[#allocation133_spill] sm:$0xff] %v10991_v10  ;;  %v10997_v11 = vpop.permute.xlu0 %1920  ;;  %v8624_v10 = vld [vmem:[%s17432_s6 + $0x2] ss:$8 sm:$0x3]  ;;  %17885 = vst [vmem:[#allocation136_spill] sm:$0xff] %v11029_v61  ;;  %v11050_v61 = vrot.slane %v8625_v26, %v9837_v32 }
 0x343   : > { %2506 = vrot.lane.b32.xlu1 %v10995_v28, %s9364_s18  ;;  %v11045_v12 = vrot.slane %v8624_v10, %v9837_v32  ;;  %v8630_v54 = vld [vmem:[%s17432_s6 + $0x10] ss:$8 sm:$0x3]  ;;  %v2726_v51 = vsel %vm1197_vm1, %v10675_v31, %v10997_v11 }
 0x344   : > { %2578 = vrot.lane.b32.xlu0 %v10951_v0, %s9365_s19  ;;  %v9109_v0 = vunpack.i.h.bf16 %v10191_v63  ;;  %v8626_v63 = vld [vmem:[%s17432_s6 + $0x4] ss:$8 sm:$0x3]  ;;  %v11104_v42 = vrot.slane %v8630_v54, %v3114_v45 }
 0x345   : > { %v11010_v24 = vpop.permute.xlu1 %2438  ;;  %v11080_v39 = vrot.slane %v8626_v63, %v9837_v32 }
 0x346   : > { %17884 = vst [vmem:[#allocation135_spill] sm:$0xff] %v11010_v24  ;;  %v11020_v29 = vpop.permute.xlu0 %1924  ;;  %v11027_v24 = vrot.slane %v3106_v34, %v9837_v32  ;;  %v11047_v34 = vrot.slane %v8624_v10, %v3114_v45  ;;  %v11066_v10 = vsel %vm1867_vm9, %v10509_v15, 0.0  ;;  %v11082_v15 = vrot.slane %v8626_v63, %v3114_v45  ;;  %17899 = vst [vmem:[#allocation150_spill] sm:$0xff] %v11104_v42 }
 0x347   : > { %2584 = vrot.lane.b32.xlu1 %v10995_v28, %s9365_s19  ;;  %17891 = vst [vmem:[#allocation142_spill] sm:$0xff] %v11066_v10 }
 0x348   : > { %2658 = vrot.lane.b32.xlu0 %v10963_v1, %s9366_s4  ;;  %17887 = vst [vmem:[#allocation138_spill] sm:$0xff] %v11047_v34  ;;  %v11060_v1 = vrot.slane %v9109_v0, 3  ;;  %v11071_v34 = vrot.slane %v9115_v47, 3  ;;  %v9119_v0 = vunpack.i.l.bf16 %v10199_v49  ;;  %17893 = vst [vmem:[#allocation144_spill] sm:$0xff] %v11082_v15  ;;  %v11092_v47 = vrot.slane %v8628_v30, %v9837_v32 }
 0x349   : > { %v1923_v57 = vpop.permute.xlu1 %1922  ;;  %v11094_v49 = vrot.slane %v8628_v30, %v3114_v45  ;;  %v11102_v15 = vrot.slane %v8630_v54, %v9837_v32  ;;  %v11113_v30 = vsel %vm1867_vm9, %v10533_v37, 0.0  ;;  %v11126_v45 = vsel %vm1867_vm9, %v10519_v21, 0.0  ;;  %v3172_v54 = vld [vmem:[#allocation2] sm:$0xc0] }
 0x34a   : > { %17889 = vst [vmem:[#allocation140_spill] sm:$0xff] %v11060_v1  ;;  %v1999_v26 = vpop.permute.xlu0 %1998  ;;  %17892 = vst [vmem:[#allocation143_spill] sm:$0xff] %v11071_v34  ;;  %v11109_v13 = vsel %vm4312_vm10, %v11062_v25, %v11060_v1  ;;  %v11118_v33 = vsel %vm4312_vm10, %v11073_v56, %v11071_v34  ;;  %v11122_v32 = vrot.slane %v9119_v0, 3  ;;  %v11132_v37 = vsel %vm1867_vm9, %v10543_v8, 0.0 }
 0x34b   : > { %2664 = vrot.lane.b32.xlu1 %v11066_v10, %s9366_s4  ;;  %17896 = vst [vmem:[#allocation147_spill] sm:$0xff] %v11094_v49  ;;  %17898 = vst [vmem:[#allocation149_spill] sm:$0xff] %v11102_v15  ;;  %v11144_v21 = vsel %vm1762_vm7, 0.0, %v10599_v14  ;;  %v11150_v0 = vsel %vm1762_vm7, 0.0, %v10607_v17  ;;  %v11154_v8 = vsel %vm1762_vm7, 0.0, %v10605_v59  ;;  %v11169_v25 = vmul.f32 %v11032_v43, %v3172_v54 }
 0x34c   : > { %2504 = vrot.lane.b32.xlu0 %v10983_v23, %s9364_s18  ;;  %17900 = vst [vmem:[#allocation151_spill] sm:$0xff] %v11109_v13  ;;  %17901 = vst [vmem:[#allocation152_spill] sm:$0xff] %v11113_v30  ;;  %v11136_v13 = vsel %vm1867_vm9, %v10567_v55, 0.0  ;;  %v11158_v55 = vsel %vm1762_vm7, 0.0, %v10615_v38  ;;  %v11173_v59 = vmul.f32 %v10695_v6, %v11032_v43  ;;  %v11177_v38 = vsel %vm1762_vm7, 0.0, %v10623_v18 }
 0x34d   : > { %v1927_v63 = vpop.permute.xlu1 %1926  ;;  %17902 = vst [vmem:[#allocation153_spill] sm:$0xff] %v11118_v33  ;;  %17904 = vst [vmem:[#allocation155_spill] sm:$0xff] %v11122_v32  ;;  %v11166_v33 = vsel %vm1762_vm7, 0.0, %v10621_v41  ;;  %v11185_v41 = vsel %vm1762_vm7, 0.0, %v10629_v5  ;;  %v11191_v54 = vsel %vm1762_vm7, 0.0, %v10637_v40  ;;  %v11195_v18 = vsel %vm1762_vm7, 0.0, %v10645_v35 }
 0x34e   : > { %v2001_v49 = vpop.permute.xlu0 %2000  ;;  %17905 = vst [vmem:[#allocation156_spill] sm:$0xff] %v11126_v45  ;;  %17906 = vst [vmem:[#allocation157_spill] sm:$0xff] %v11132_v37  ;;  %v3512_v5 = vld [vmem:[#allocation2] sm:$0x80]  ;;  %v2753_v34 = vsel %vm2752_vm11, %v2726_v51, %v1999_v26  ;;  %v2727_v1 = vsel %vm1197_vm1, %v10707_v53, %v1923_v57  ;;  %v3298_v31 = vrot.slane %v11169_v25, 1  ;;  %v3299_v11 = vrot.slane %v11173_v59, 1 }
 0x34f   : > { %2588 = vrot.lane.b32.xlu1 %v11113_v30, %s9365_s19  ;;  %17907 = vst [vmem:[#allocation158_spill] sm:$0xff] %v11136_v13  ;;  %17909 = vst [vmem:[#allocation160_spill] sm:$0xff] %v11144_v21  ;;  %v3052_v32 = vld [vmem:[#allocation2] sm:$0xe0]  ;;  %v2754_v35 = vsel %vm2752_vm11, %v2727_v1, %v2001_v49  ;;  %v11215_v57 = vmul.f32 %v11045_v12, %v3512_v5  ;;  %v11219_v53 = vmul.f32 %v10695_v6, %v11045_v12 }
 0x350   : > { %2582 = vrot.lane.b32.xlu0 %v10983_v23, %s9365_s19  ;;  %17910 = vst [vmem:[#allocation161_spill] sm:$0xff] %v11150_v0  ;;  %17911 = vst [vmem:[#allocation162_spill] sm:$0xff] %v11154_v8  ;;  %v2728_v25 = vsel %vm1197_vm1, %v10687_v16, %v11020_v29  ;;  %v2729_v1 = vsel %vm1197_vm1, %v10719_v4, %v1927_v63 }
 0x351   : > { %17912 = vst [vmem:[#allocation163_spill] sm:$0xff] %v11158_v55  ;;  %v2003_v14 = vpop.permute.xlu1 %2002  ;;  %17914 = vst [vmem:[#allocation165_spill] sm:$0xff] %v11166_v33 }
 0x352   : > { %v2005_v17 = vpop.permute.xlu0 %2004  ;;  %17915 = vst [vmem:[#allocation166_spill] sm:$0xff] %v11177_v38  ;;  %17917 = vst [vmem:[#allocation168_spill] sm:$0xff] %v11185_v41 }
 0x353   : > { %2512 = vrot.lane.b32.xlu1 %v11126_v45, %s9364_s18  ;;  %17918 = vst [vmem:[#allocation169_spill] sm:$0xff] %v11191_v54  ;;  %17919 = vst [vmem:[#allocation170_spill] sm:$0xff] %v11195_v18 }
 0x354   : > { %2662 = vrot.lane.b32.xlu0 %v10995_v28, %s9366_s4 }
 0x355   : > { %v2077_v40 = vpop.permute.xlu1 %2076 }
 0x356   : > { %v2079_v42 = vpop.permute.xlu0 %2078  ;;  %v2780_v52 = vsel %vm2779_vm12, %v2753_v34, %v2077_v40  ;;  %v2755_v34 = vsel %vm2752_vm11, %v2728_v25, %v2003_v14  ;;  %v17921_v14 = vld [vmem:[#allocation13_spill] sm:$0xff]  ;;  %v3852_v40 = vld [vmem:[#allocation2 + $0x10] sm:$0x80] }
 0x357   : > { %v2781_v28 = vsel %vm2779_vm12, %v2754_v35, %v2079_v42  ;;  %v2807_v26 = vsel %vm2806_vm8, %v2780_v52, %v10263_v7  ;;  %2590 = vrot.lane.b32.xlu1 %v11126_v45, %s9365_s19  ;;  %v11231_v52 = vmul.f32 %v11027_v24, %v3052_v32 }
 0x358   : > { %v2808_v42 = vsel %vm2806_vm8, %v2781_v28, %v10277_v46  ;;  %v2834_v7 = vsel %vm2833_vm13, %v2807_v26, %v10283_v27  ;;  %2508 = vrot.lane.b32.xlu0 %v11066_v10, %s9364_s18  ;;  %v2756_v27 = vsel %vm2752_vm11, %v2729_v1, %v2005_v17  ;;  %v3120_v17 = vmul.f32 %v10695_v6, %v11027_v24  ;;  %v17922_v6 = vld [vmem:[#allocation14_spill] sm:$0xff] }
 0x359   : > { %v2835_v16 = vsel %vm2833_vm13, %v2808_v42, %v10313_v44  ;;  %v2861_v46 = vsel %vm2860_vm14, %v2834_v7, %v10309_v22  ;;  %v2081_v29 = vpop.permute.xlu1 %2080  ;;  %v17923_v42 = vld [vmem:[#allocation15_spill] sm:$0xff]  ;;  %v17924_v1 = vld [vmem:[#allocation74_spill] sm:$0xff] }
 0x35a   : > { %v2862_v28 = vsel %vm2860_vm14, %v2835_v16, %v10359_v36  ;;  %v11245_v32 = vsel %vm2887_vm15, %v2861_v46, %v10384_v3  ;;  %v2083_v49 = vpop.permute.xlu0 %2082  ;;  %v2782_v4 = vsel %vm2779_vm12, %v2755_v34, %v2081_v29  ;;  %v17920_v36 = vld [vmem:[#allocation12_spill] sm:$0xff]  ;;  %v17926_v16 = vld [vmem:[#allocation17_spill] sm:$0xff]  ;;  %v11302_v29 = vsel %vm3297_vm2, %v3298_v31, %v3299_v11 }
 0x35b   : > { %v11250_v63 = vsel %vm2887_vm15, %v2862_v28, %v10403_v60  ;;  %3000 = vst [vmem:[#allocation2 + $0x20] sm:$0xff] %v11245_v32  ;;  %v2783_v22 = vsel %vm2779_vm12, %v2756_v27, %v2083_v49  ;;  %v2809_v44 = vsel %vm2806_vm8, %v2782_v4, %v10273_v2  ;;  %2668 = vrot.lane.b32.xlu1 %v11126_v45, %s9366_s4  ;;  %v17489_v49 = vrot.slane %v11219_v53, 2 }
 0x35c   : > { %3002 = vst [vmem:[#allocation2 + $0x30] sm:$0xff] %v11250_v63  ;;  %v2810_v3 = vsel %vm2806_vm8, %v2783_v22, %v17920_v36  ;;  %v2836_v60 = vsel %vm2833_vm13, %v2809_v44, %v17921_v14  ;;  %2586 = vrot.lane.b32.xlu0 %v11066_v10, %s9365_s19  ;;  %v11269_v2 = vmul.f32 %v11032_v43, %v11245_v32 }
 0x35d   : > { %v2837_v59 = vsel %vm2833_vm13, %v2810_v3, %v10329_v50  ;;  %v2863_v51 = vsel %vm2860_vm14, %v2836_v60, %v10365_v9  ;;  %v1929_v5 = vpop.permute.xlu1 %1928  ;;  %v11277_v35 = vmul.f32 %v11050_v61, %v11245_v32  ;;  %v11281_v26 = vmul.f32 %v11045_v12, %v11245_v32 }
 0x35e   : > { %v2864_v25 = vsel %vm2860_vm14, %v2837_v59, %v17922_v6  ;;  %v11287_v7 = vsel %vm2887_vm15, %v2863_v51, %v17923_v42  ;;  %v2007_v50 = vpop.permute.xlu0 %2006  ;;  %v2730_v9 = vsel %vm1197_vm1, %v17924_v1, %v1929_v5  ;;  %v11293_v34 = vmul.f32 %v11080_v39, %v11245_v32  ;;  %v17927_v6 = vld [vmem:[#allocation16_spill] sm:$0xff]  ;;  %v17935_v51 = vld [vmem:[#allocation22_spill] sm:$0xff] }
 0x35f   : > { %v11297_v46 = vsel %vm2887_vm15, %v2864_v25, %v17926_v16  ;;  %2592 = vrot.lane.b32.xlu1 %v11132_v37, %s9365_s19  ;;  %v17487_v28 = vrot.slane %v11269_v2, 1  ;;  %v11310_v4 = vmul.f32 %v11050_v61, %v3852_v40  ;;  %v17490_v22 = vrot.slane %v11281_v26, 2 }
 0x360   : > { %17925 = vst [vmem:[#allocation12_spill] sm:$0xff] %v11293_v34  ;;  %2510 = vrot.lane.b32.xlu0 %v11113_v30, %s9364_s18  ;;  %v2757_v44 = vsel %vm2752_vm11, %v2730_v9, %v2007_v50  ;;  %v11319_v3 = vmul.f32 %v11050_v61, %v11250_v63  ;;  %v11333_v16 = vmul.f32 %v11080_v39, %v11250_v63 }
 0x361   : > { %v2085_v36 = vpop.permute.xlu1 %2084  ;;  %v3305_v31 = vsel %vm3297_vm2, %v3299_v11, %v17487_v28  ;;  %v17928_v11 = vld [vmem:[#allocation145_spill] sm:$0xff] }
 0x362   : > { %v1931_v14 = vpop.permute.xlu0 %1930  ;;  %v2784_v60 = vsel %vm2779_vm12, %v2757_v44, %v2085_v36  ;;  %v4523_v5 = vld [vmem:[#allocation2 + $0x20] sm:$0xfe]  ;;  %v3460_v40 = vadd.f32 %v3305_v31, %v3120_v17  ;;  %v11337_v44 = vmul.f32 %v17928_v11, %v11250_v63  ;;  %v17930_v17 = vld [vmem:[#allocation18_spill] sm:$0xff] }
 0x363   : > { %v2811_v25 = vsel %vm2806_vm8, %v2784_v60, %v17927_v6  ;;  %2516 = vrot.lane.b32.xlu1 %v11136_v13, %s9364_s18  ;;  %v11329_v42 = vmul.f32 %v17928_v11, %v4523_v5  ;;  %v4863_v50 = vld [vmem:[#allocation2 + $0x30] sm:$0xfe]  ;;  %v3645_v5 = vsel %vm3637_vm3, %v17489_v49, %v17490_v22  ;;  %v17933_v6 = vld [vmem:[#allocation21_spill] sm:$0xff]  ;;  %v11367_v49 = vmul.f32 %v11092_v47, %v11287_v7 }
 0x364   : > { %v5204_v1 = vld [vmem:[#allocation2 + $0x30] sm:$0xfc]  ;;  %v2838_v36 = vsel %vm2833_vm13, %v2811_v25, %v17930_v17  ;;  %2666 = vrot.lane.b32.xlu0 %v11113_v30, %s9366_s4  ;;  %v11344_v31 = vmul.f32 %v11092_v47, %v4863_v50  ;;  %v3800_v17 = vadd.f32 %v3645_v5, %v3460_v40  ;;  %v17493_v50 = vrot.slane %v11319_v3, 2  ;;  %v17937_v5 = vld [vmem:[#allocation80_spill] sm:$0xff] }
 0x365   : > { %17929 = vst [vmem:[#allocation13_spill] sm:$0xff] %v11329_v42  ;;  %v5544_v9 = vld [vmem:[#allocation2 + $0x30] sm:$0xf8]  ;;  %v11347_v60 = vmul.f32 %v11097_v20, %v5204_v1  ;;  %v2865_v27 = vsel %vm2860_vm14, %v2838_v36, %v17933_v6  ;;  %v1933_v28 = vpop.permute.xlu1 %1932  ;;  %v11371_v36 = vmul.f32 %v11097_v20, %v11287_v7  ;;  %v17498_v10 = vrot.slane %v11367_v49, 4 }
 0x366   : > { %17931 = vst [vmem:[#allocation14_spill] sm:$0xff] %v11344_v31  ;;  %v11357_v25 = vmul.f32 %v11102_v15, %v5544_v9  ;;  %v11362_v1 = vsel %vm2887_vm15, %v2865_v27, %v17935_v51  ;;  %v2009_v59 = vpop.permute.xlu0 %2008  ;;  %v17936_v9 = vld [vmem:[#allocation78_spill] sm:$0xff]  ;;  %v2732_v6 = vsel %vm1197_vm1, %v17937_v5, %v1933_v28  ;;  %v17938_v27 = vrot.slane %v11277_v35, 2 }
 0x367   : > { %17932 = vst [vmem:[#allocation15_spill] sm:$0xff] %v11347_v60  ;;  %v2731_v40 = vsel %vm1197_vm1, %v17936_v9, %v1931_v14  ;;  %2672 = vrot.lane.b32.xlu1 %v11136_v13, %s9366_s4  ;;  %v17496_v14 = vrot.slane %v11333_v16, 3  ;;  %v17499_v28 = vrot.slane %v11337_v44, 4 }
 0x368   : > { %17934 = vst [vmem:[#allocation74_spill] sm:$0xff] %v11357_v25  ;;  %v3986_v51 = vsel %vm3637_vm3, %v17938_v27, %v17493_v50  ;;  %2514 = vrot.lane.b32.xlu0 %v11132_v37, %s9364_s18  ;;  %v2758_v9 = vsel %vm2752_vm11, %v2731_v40, %v2009_v59  ;;  %v11394_v27 = vmul.f32 %v11102_v15, %v11287_v7  ;;  %v17940_v59 = vrot.slane %v11329_v42, 4 }
 0x369   : > { %v4141_v30 = vadd.f32 %v3986_v51, %v3800_v17  ;;  %v2011_v5 = vpop.permute.xlu1 %2010  ;;  %v17939_v17 = vrot.slane %v11293_v34, 3 }
 0x36a   : > { %v2087_v50 = vpop.permute.xlu0 %2086  ;;  %v4652_v40 = vsel %vm4648_vm4, %v17940_v59, %v17499_v28  ;;  %v2759_v23 = vsel %vm2752_vm11, %v2732_v6, %v2011_v5  ;;  %v17942_v59 = vrot.slane %v11344_v31, 4  ;;  %v11425_v6 = vmul.f32 %v11032_v43, %v11250_v63 }
 0x36b   : > { %v4316_v51 = vsel %vm4312_vm10, %v17939_v17, %v17496_v14  ;;  %v2785_v22 = vsel %vm2779_vm12, %v2758_v9, %v2087_v50  ;;  %2024 = vrot.lane.b32.xlu1 %v11154_v8, %s9365_s19  ;;  %v3122_v17 = vmul.f32 %v11027_v24, %v11245_v32  ;;  %v17941_v14 = vld [vmem:[#allocation19_spill] sm:$0xff]  ;;  %v17943_v32 = vld [vmem:[#allocation20_spill] sm:$0xff]  ;;  %v5672_v5 = vrot.slane %v11394_v27, 6 }
 0x36c   : > { %v4471_v34 = vadd.f32 %v4316_v51, %v4141_v30  ;;  %v2812_v42 = vsel %vm2806_vm8, %v2785_v22, %v17941_v14  ;;  %2670 = vrot.lane.b32.xlu0 %v11132_v37, %s9366_s4  ;;  %v4993_v50 = vsel %vm4648_vm4, %v17942_v59, %v17498_v10  ;;  %v11429_v30 = vmul.f32 %v11045_v12, %v11250_v63  ;;  %v17944_v59 = vld [vmem:[#allocation23_spill] sm:$0xff] }
 0x36d   : > { %v2839_v22 = vsel %vm2833_vm13, %v2812_v42, %v17943_v32  ;;  %v2089_v14 = vpop.permute.xlu1 %2088  ;;  %v11436_v51 = vmul.f32 %v11050_v61, %v11287_v7  ;;  %v17945_v37 = vrot.slane %v11371_v36, 5  ;;  %v17946_v31 = vrot.slane %v11347_v60, 5  ;;  %v17948_v32 = vld [vmem:[#allocation24_spill] sm:$0xff] }
 0x36e   : > { %v4811_v9 = vadd.f32 %v4652_v40, %v4471_v34  ;;  %v2866_v10 = vsel %vm2860_vm14, %v2839_v22, %v17944_v59  ;;  %v1935_v28 = vpop.permute.xlu0 %1934  ;;  %v2786_v45 = vsel %vm2779_vm12, %v2759_v23, %v2089_v14  ;;  %v3308_v34 = vrot.slane %v11425_v6, 1  ;;  %v17947_v40 = vld [vmem:[#allocation25_spill] sm:$0xff]  ;;  %v17950_v59 = vld [vmem:[#allocation26_spill] sm:$0xff] }
 0x36f   : > { %v5333_v42 = vsel %vm5329_vm5, %v17946_v31, %v17945_v37  ;;  %v11449_v27 = vsel %vm2887_vm15, %v2866_v10, %v17947_v40  ;;  %v2813_v58 = vsel %vm2806_vm8, %v2786_v45, %v17948_v32  ;;  %2102 = vrot.lane.b32.xlu1 %v11154_v8, %s9366_s4  ;;  %v17949_v23 = vrot.slane %v11357_v25, 6  ;;  %v17952_v40 = vld [vmem:[#allocation29_spill] sm:$0xff]  ;;  %v17955_v25 = vld [vmem:[#allocation88_spill] sm:$0xff] }
 0x370   : > { %v5152_v22 = vadd.f32 %v4993_v50, %v4811_v9  ;;  %v2840_v37 = vsel %vm2833_vm13, %v2813_v58, %v17950_v59  ;;  %2594 = vrot.lane.b32.xlu0 %v11136_v13, %s9365_s19  ;;  %v17951_v10 = vrot.slane %v11269_v2, 1  ;;  %v11471_v58 = vmul.f32 %v11080_v39, %v11287_v7  ;;  %v17953_v59 = vld [vmem:[#allocation86_spill] sm:$0xff] }
 0x371   : > { %v5673_v14 = vsel %vm5669_vm6, %v17949_v23, %v5672_v5  ;;  %v2867_v50 = vsel %vm2860_vm14, %v2840_v37, %v17952_v40  ;;  %v1937_v9 = vpop.permute.xlu1 %1936  ;;  %v2733_v13 = vsel %vm1197_vm1, %v17953_v59, %v1935_v28  ;;  %v17954_v2 = vld [vmem:[#allocation30_spill] sm:$0xff]  ;;  %v17956_v37 = vrot.slane %v11429_v30, 2 }
 0x372   : > { %v3309_v31 = vsel %vm3297_vm2, %v17951_v10, %v3308_v34  ;;  %v5492_v32 = vadd.f32 %v5333_v42, %v5152_v22  ;;  %v11477_v10 = vsel %vm2887_vm15, %v2867_v50, %v17954_v2  ;;  %v2013_v45 = vpop.permute.xlu0 %2012  ;;  %v2734_v6 = vsel %vm1197_vm1, %v17955_v25, %v1937_v9 }
 0x373   : > { %v3462_v23 = vadd.f32 %v3309_v31, %v3122_v17  ;;  %v17957_v42 = vrot.slane %v11281_v26, 2  ;;  %v2760_v22 = vsel %vm2752_vm11, %v2733_v13, %v2013_v45  ;;  %2026 = vrot.lane.b32.xlu1 %v11140_v62, %s9365_s19  ;;  %v17959_v40 = vrot.slane %v11436_v51, 2 }
 0x374   : > { %v11489_v28 = vadd.f32 %v5673_v14, %v5492_v32  ;;  %v17960_v50 = vrot.slane %v11319_v3, 2  ;;  %1946 = vrot.lane.b32.xlu0 %v11154_v8, %s9364_s18  ;;  %v17506_v26 = vrot.slane %v11471_v58, 3  ;;  %v11501_v13 = vmul.f32 %v17928_v11, %v11287_v7 }
 0x375   : > { %v3649_v17 = vsel %vm3637_vm3, %v17957_v42, %v17956_v37  ;;  %v11505_v14 = vmul.f32 %v11092_v47, %v11297_v46  ;;  %v11509_v45 = vmul.f32 %v11097_v20, %v11297_v46  ;;  %v2015_v3 = vpop.permute.xlu1 %2014  ;;  %v11513_v32 = vmul.f32 %v11102_v15, %v11297_v46 }
 0x376   : > { %17958 = vst [vmem:[#allocation17_spill] sm:$0xff] %v11489_v28  ;;  %v3802_v31 = vadd.f32 %v3649_v17, %v3462_v23  ;;  %v3990_v25 = vsel %vm3637_vm3, %v17960_v50, %v17959_v40  ;;  %v3124_v23 = vmul.f32 %v11027_v24, %v11250_v63  ;;  %v11519_v59 = vmul.f32 %v11032_v43, %v11287_v7  ;;  %v2091_v2 = vpop.permute.xlu0 %2090 }
 0x377   : > { %v2761_v37 = vsel %vm2752_vm11, %v2734_v6, %v2015_v3  ;;  %v17961_v42 = vrot.slane %v11333_v16, 3  ;;  %v17507_v40 = vrot.slane %v11505_v14, 4  ;;  %v2787_v50 = vsel %vm2779_vm12, %v2760_v22, %v2091_v2  ;;  %2104 = vrot.lane.b32.xlu1 %v11140_v62, %s9366_s4  ;;  %v17962_v3 = vld [vmem:[#allocation27_spill] sm:$0xff] }
 0x378   : > { %v4143_v9 = vadd.f32 %v3990_v25, %v3802_v31  ;;  %v4655_v31 = vrot.slane %v11501_v13, 4  ;;  %v17509_v25 = vrot.slane %v11509_v45, 5  ;;  %v17508_v6 = vrot.slane %v11513_v32, 6  ;;  %1948 = vrot.lane.b32.xlu0 %v11140_v62, %s9364_s18 }
 0x379   : > { %v4320_v17 = vsel %vm4312_vm10, %v17961_v42, %v17506_v26  ;;  %v2814_v28 = vsel %vm2806_vm8, %v2787_v50, %v17962_v3  ;;  %v17963_v16 = vrot.slane %v11337_v44, 4  ;;  %v17964_v22 = vrot.slane %v11367_v49, 4  ;;  %v17965_v42 = vld [vmem:[#allocation28_spill] sm:$0xff]  ;;  %v2093_v26 = vpop.permute.xlu1 %2092  ;;  %v17967_v49 = vld [vmem:[#allocation31_spill] sm:$0xff] }
 0x37a   : > { %v4473_v63 = vadd.f32 %v4320_v17, %v4143_v9  ;;  %v2841_v17 = vsel %vm2833_vm13, %v2814_v28, %v17965_v42  ;;  %v17966_v3 = vrot.slane %v11371_v36, 5  ;;  %v2788_v2 = vsel %vm2779_vm12, %v2761_v37, %v2093_v26  ;;  %v17969_v36 = vld [vmem:[#allocation33_spill] sm:$0xff]  ;;  %v17972_v37 = vld [vmem:[#allocation34_spill] sm:$0xff] }
 0x37b   : > { %v4656_v13 = vsel %vm4648_vm4, %v17963_v16, %v4655_v31  ;;  %v4997_v9 = vsel %vm4648_vm4, %v17964_v22, %v17507_v40  ;;  %v5677_v16 = vsel %vm5669_vm6, %v5672_v5, %v17508_v6  ;;  %v2868_v22 = vsel %vm2860_vm14, %v2841_v17, %v17967_v49  ;;  %v1939_v40 = vpop.permute.xlu0 %1938  ;;  %v17971_v6 = vld [vmem:[#allocation32_spill] sm:$0xff]  ;;  %2028 = vrot.lane.b32.xlu1 %v11162_v48, %s9365_s19 }
 0x37c   : > { %v4813_v50 = vadd.f32 %v4656_v13, %v4473_v63  ;;  %v5337_v44 = vsel %vm5329_vm5, %v17966_v3, %v17509_v25  ;;  %v17968_v28 = vrot.slane %v11519_v59, 1  ;;  %v11565_v13 = vmul.f32 %v11045_v12, %v11287_v7  ;;  %v17970_v3 = vld [vmem:[#allocation94_spill] sm:$0xff]  ;;  %1950 = vrot.lane.b32.xlu0 %v11162_v48, %s9364_s18 }
 0x37d   : > { %v11569_v42 = vsel %vm2887_vm15, %v2868_v22, %v17969_v36  ;;  %v2735_v5 = vsel %vm1197_vm1, %v17970_v3, %v1939_v40  ;;  %v2815_v17 = vsel %vm2806_vm8, %v2788_v2, %v17971_v6  ;;  %v17973_v40 = vld [vmem:[#allocation37_spill] sm:$0xff]  ;;  %v1941_v2 = vpop.permute.xlu1 %1940  ;;  %v17975_v3 = vld [vmem:[#allocation96_spill] sm:$0xff] }
 0x37e   : > { %v3313_v63 = vsel %vm3297_vm2, %v3308_v34, %v17968_v28  ;;  %v5154_v26 = vadd.f32 %v4997_v9, %v4813_v50  ;;  %v2842_v34 = vsel %vm2833_vm13, %v2815_v17, %v17972_v37  ;;  %v3652_v22 = vrot.slane %v11565_v13, 2 }
 0x37f   : > { %v3464_v49 = vadd.f32 %v3313_v63, %v3124_v23  ;;  %v11584_v28 = vmul.f32 %v11050_v61, %v11297_v46  ;;  %v2869_v6 = vsel %vm2860_vm14, %v2842_v34, %v17973_v40  ;;  %v11590_v9 = vmul.f32 %v11080_v39, %v11297_v46  ;;  %v17974_v23 = vld [vmem:[#allocation38_spill] sm:$0xff]  ;;  %v2017_v13 = vpop.permute.xlu0 %2016  ;;  %2106 = vrot.lane.b32.xlu1 %v11162_v48, %s9366_s4 }
 0x380   : > { %v5494_v36 = vadd.f32 %v5337_v44, %v5154_v26  ;;  %v11594_v50 = vmul.f32 %v17928_v11, %v11297_v46  ;;  %v2896_v63 = vsel %vm2887_vm15, %v2869_v6, %v17974_v23  ;;  %v2736_v17 = vsel %vm1197_vm1, %v17975_v3, %v1941_v2  ;;  %1952 = vrot.lane.b32.xlu0 %v11144_v21, %s9364_s18 }
 0x381   : > { %v17976_v37 = vrot.slane %v11429_v30, 2  ;;  %v3993_v44 = vrot.slane %v11584_v28, 2  ;;  %3016 = vst [vmem:[#allocation2 + $0xa0] sm:$0xff] %v2896_v63  ;;  %v2762_v26 = vsel %vm2752_vm11, %v2735_v5, %v2017_v13  ;;  %v4323_v6 = vrot.slane %v11590_v9, 3 }
 0x382   : > { %v11607_v40 = vadd.f32 %v5677_v16, %v5494_v36  ;;  %v17978_v30 = vrot.slane %v11436_v51, 2  ;;  %v4659_v28 = vrot.slane %v11594_v50, 4  ;;  %v11618_v5 = vmul.f32 %v11092_v47, %v11362_v1 }
 0x383   : > { %v3653_v34 = vsel %vm3637_vm3, %v17976_v37, %v3652_v22  ;;  %v11622_v16 = vmul.f32 %v11097_v20, %v11362_v1  ;;  %v17979_v9 = vrot.slane %v11471_v58, 3  ;;  %v11631_v51 = vmul.f32 %v11102_v15, %v11362_v1  ;;  %v2095_v63 = vpop.permute.xlu0 %2094  ;;  %2030 = vrot.lane.b32.xlu1 %v11144_v21, %s9365_s19 }
 0x384   : > { %17977 = vst [vmem:[#allocation16_spill] sm:$0xff] %v11607_v40  ;;  %v3804_v25 = vadd.f32 %v3653_v34, %v3464_v49  ;;  %v3994_v2 = vsel %vm3637_vm3, %v17978_v30, %v3993_v44  ;;  %v11624_v49 = vpop.permute.xlu1 %2020  ;;  %v3126_v50 = vmul.f32 %v11027_v24, %v11287_v7  ;;  %v4660_v13 = vsel %vm4648_vm4, %v4655_v31, %v4659_v28  ;;  %v17980_v31 = vld [vmem:[#allocation35_spill] sm:$0xff] }
 0x385   : > { %v4324_v23 = vsel %vm4312_vm10, %v17979_v9, %v4323_v6  ;;  %v5000_v3 = vrot.slane %v11618_v5, 4  ;;  %v5340_v37 = vrot.slane %v11622_v16, 5  ;;  %v2789_v58 = vsel %vm2779_vm12, %v2762_v26, %v2095_v63  ;;  %1954 = vrot.lane.b32.xlu0 %v11166_v33, %s9364_s18 }
 0x386   : > { %v4145_v36 = vadd.f32 %v3994_v2, %v3804_v25  ;;  %v11640_v25 = vmul.f32 %v11032_v43, %v11297_v46  ;;  %v11648_v7 = vmul.f32 %v11045_v12, %v11297_v46  ;;  %v2816_v2 = vsel %vm2806_vm8, %v2789_v58, %v17980_v31 }
 0x387   : > { %v17981_v5 = vrot.slane %v11505_v14, 4  ;;  %v17982_v16 = vrot.slane %v11509_v45, 5  ;;  %v17984_v58 = vrot.slane %v11631_v51, 6  ;;  %v17985_v31 = vrot.slane %v11513_v32, 6  ;;  %v2019_v62 = vpop.permute.xlu0 %2018  ;;  %2108 = vrot.lane.b32.xlu1 %v11144_v21, %s9366_s4 }
 0x388   : > { %v4475_v34 = vadd.f32 %v4324_v23, %v4145_v36  ;;  %v17515_v9 = vrot.slane %v11640_v25, 1  ;;  %v17983_v23 = vld [vmem:[#allocation36_spill] sm:$0xff]  ;;  %v2099_v30 = vpop.permute.xlu1 %2098  ;;  %v17513_v14 = vrot.slane %v11648_v7, 2  ;;  %v11682_v32 = vmul.f32 %v11080_v39, %v11362_v1 }
 0x389   : > { %v5001_v26 = vsel %vm4648_vm4, %v17981_v5, %v5000_v3  ;;  %v5341_v36 = vsel %vm5329_vm5, %v17982_v16, %v5340_v37  ;;  %v2843_v63 = vsel %vm2833_vm13, %v2816_v2, %v17983_v23  ;;  %v5681_v48 = vsel %vm5669_vm6, %v17985_v31, %v17984_v58  ;;  %v17986_v5 = vld [vmem:[#allocation41_spill] sm:$0xff]  ;;  %1956 = vrot.lane.b32.xlu0 %v11185_v41, %s9364_s18 }
 0x38a   : > { %v4815_v40 = vadd.f32 %v4660_v13, %v4475_v34  ;;  %v2870_v45 = vsel %vm2860_vm14, %v2843_v63, %v17986_v5  ;;  %v17987_v16 = vrot.slane %v11519_v59, 1  ;;  %v11678_v13 = vmul.f32 %v11050_v61, %v11362_v1  ;;  %v17988_v34 = vld [vmem:[#allocation42_spill] sm:$0xff] }
 0x38b   : > { %v11686_v23 = vsel %vm2887_vm15, %v2870_v45, %v17988_v34  ;;  %v2763_v63 = vsel %vm2752_vm11, %v2736_v17, %v2019_v62  ;;  %v3657_v31 = vsel %vm3637_vm3, %v3652_v22, %v17513_v14  ;;  %v11700_v45 = vmul.f32 %v17928_v11, %v11362_v1  ;;  %v2097_v22 = vpop.permute.xlu0 %2096  ;;  %2032 = vrot.lane.b32.xlu1 %v11166_v33, %s9365_s19 }
 0x38c   : > { %v3317_v2 = vsel %vm3297_vm2, %v17987_v16, %v17515_v9  ;;  %17989 = vst [vmem:[#allocation145_spill] sm:$0xff] %v11686_v23  ;;  %v5156_v59 = vadd.f32 %v5001_v26, %v4815_v40  ;;  %v17514_v5 = vrot.slane %v11678_v13, 2  ;;  %v17516_v16 = vrot.slane %v11682_v32, 3  ;;  %v2023_v62 = vpop.permute.xlu1 %2022 }
 0x38d   : > { %v3466_v58 = vadd.f32 %v3317_v2, %v3126_v50  ;;  %v11704_v40 = vmul.f32 %v11092_v47, %v11449_v27  ;;  %v11708_v50 = vmul.f32 %v11097_v20, %v11449_v27  ;;  %2036 = vrot.lane.b32.xlu0 %v11150_v0, %s9365_s19  ;;  %v11908_v21 = vmul.f32 %v11102_v15, %v11477_v10 }
 0x38e   : > { %v5496_v17 = vadd.f32 %v5341_v36, %v5156_v59  ;;  %v3998_v26 = vsel %vm3637_vm3, %v3993_v44, %v17514_v5  ;;  %v4328_v2 = vsel %vm4312_vm10, %v4323_v6, %v17516_v16  ;;  %v17517_v36 = vrot.slane %v11700_v45, 4  ;;  %v17991_v5 = vld [vmem:[#allocation44_spill] sm:$0xff]  ;;  %v17992_v16 = vld [vmem:[#allocation46_spill] sm:$0xff] }
 0x38f   : > { %v3806_v34 = vadd.f32 %v3657_v31, %v3466_v58  ;;  %v11719_v59 = vmul.f32 %v11102_v15, %v11449_v27  ;;  %v2790_v58 = vsel %vm2779_vm12, %v2763_v63, %v2097_v22  ;;  %v17519_v44 = vrot.slane %v11704_v40, 4  ;;  %2110 = vrot.lane.b32.xlu1 %v11166_v33, %s9366_s4 }
 0x390   : > { %v11724_v31 = vadd.f32 %v5681_v48, %v5496_v17  ;;  %v2817_v9 = vsel %vm2806_vm8, %v2790_v58, %v17991_v5  ;;  %v4664_v6 = vsel %vm4648_vm4, %v4659_v28, %v17517_v36  ;;  %v17518_v63 = vrot.slane %v11708_v50, 5  ;;  %v2101_v17 = vpop.permute.xlu1 %2100  ;;  %v17993_v58 = vld [vmem:[#allocation39_spill] sm:$0xff]  ;;  %v1943_v36 = vpop.permute.xlu0 %1942 }
 0x391   : > { %v4147_v14 = vadd.f32 %v3998_v26, %v3806_v34  ;;  %v2844_v48 = vsel %vm2833_vm13, %v2817_v9, %v17992_v16  ;;  %v11740_v34 = vadd.f32 %v11302_v29, %v11231_v52  ;;  %v5005_v26 = vsel %vm4648_vm4, %v5000_v3, %v17519_v44  ;;  %v17994_v29 = vld [vmem:[#allocation40_spill] sm:$0xff]  ;;  %v17995_v16 = vld [vmem:[#allocation99_spill] sm:$0xff]  ;;  %2114 = vrot.lane.b32.xlu0 %v11150_v0, %s9366_s4 }
 0x392   : > { %17990 = vst [vmem:[#allocation18_spill] sm:$0xff] %v11724_v31  ;;  %v2871_v28 = vsel %vm2860_vm14, %v2844_v48, %v17993_v58  ;;  %v5345_v22 = vsel %vm5329_vm5, %v5340_v37, %v17518_v63  ;;  %v3130_v9 = vmul.f32 %v11027_v24, %v11362_v1  ;;  %v11754_v52 = vmul.f32 %v11032_v43, %v11362_v1  ;;  %v18014_v31 = vld [vmem:[#allocation116_spill] sm:$0xff] }
 0x393   : > { %v4477_v5 = vadd.f32 %v4328_v2, %v4147_v14  ;;  %v2898_v14 = vsel %vm2887_vm15, %v2871_v28, %v17994_v29  ;;  %v2737_v3 = vsel %vm1197_vm1, %v17995_v16, %v1943_v36  ;;  %v11764_v37 = vmul.f32 %v11032_v43, %v11449_v27  ;;  %2034 = vrot.lane.b32.xlu1 %v11185_v41, %s9365_s19 }
 0x394   : > { %3020 = vst [vmem:[#allocation2 + $0xc0] sm:$0xff] %v2898_v14  ;;  %v2764_v48 = vsel %vm2752_vm11, %v2737_v3, %v11624_v49  ;;  %v17996_v58 = vrot.slane %v11719_v59, 6  ;;  %v17997_v28 = vrot.slane %v11631_v51, 6  ;;  %v11784_v49 = vpop.permute.xlu1 %2494  ;;  %v17998_v51 = vld [vmem:[#allocation47_spill] sm:$0xff]  ;;  %v11794_v44 = vmul.f32 %v11050_v61, %v11449_v27 }
 0x395   : > { %v4817_v2 = vadd.f32 %v4664_v6, %v4477_v5  ;;  %v11777_v6 = vmul.f32 %v11045_v12, %v11362_v1  ;;  %v11781_v5 = vmul.f32 %v11045_v12, %v11449_v27  ;;  %v2791_v29 = vsel %vm2779_vm12, %v2764_v48, %v2099_v30  ;;  %v17999_v30 = vld [vmem:[#allocation49_spill] sm:$0xff]  ;;  %v18002_v1 = vld [vmem:[#allocation43_spill] sm:$0xff]  ;;  %1960 = vrot.lane.b32.xlu0 %v11158_v55, %s9364_s18 }
 0x396   : > { %v5685_v36 = vsel %vm5669_vm6, %v17997_v28, %v17996_v58  ;;  %v17521_v3 = vrot.slane %v11764_v37, 1  ;;  %v2818_v58 = vsel %vm2806_vm8, %v2791_v29, %v17998_v51  ;;  %v1945_v28 = vpop.permute.xlu0 %1944  ;;  %v18001_v29 = vrot.slane %v11754_v52, 1 }
 0x397   : > { %v5158_v14 = vadd.f32 %v5005_v26, %v4817_v2  ;;  %v2845_v48 = vsel %vm2833_vm13, %v2818_v58, %v17999_v30  ;;  %v18000_v26 = vld [vmem:[#allocation104_spill] sm:$0xff]  ;;  %v18004_v30 = vrot.slane %v11777_v6, 2  ;;  %2112 = vrot.lane.b32.xlu1 %v11185_v41, %s9366_s4  ;;  %v18022_v23 = vrot.slane %v11678_v13, 2 }
 0x398   : > { %v2738_v2 = vsel %vm1197_vm1, %v18000_v26, %v1945_v28  ;;  %v3325_v51 = vsel %vm3297_vm2, %v18001_v29, %v17521_v3  ;;  %v2872_v63 = vsel %vm2860_vm14, %v2845_v48, %v18002_v1  ;;  %v18003_v28 = vrot.slane %v11781_v5, 2  ;;  %v11820_v3 = vpop.permute.xlu1 %2498 }
 0x399   : > { %v5498_v16 = vadd.f32 %v5345_v22, %v5158_v14  ;;  %v2765_v33 = vsel %vm2752_vm11, %v2738_v2, %v2023_v62  ;;  %v3470_v58 = vadd.f32 %v3325_v51, %v3130_v9  ;;  %v18005_v14 = vld [vmem:[#allocation45_spill] sm:$0xff]  ;;  %v11826_v62 = vmul.f32 %v11050_v61, %v11477_v10  ;;  %v18007_v9 = vld [vmem:[#allocation51_spill] sm:$0xff]  ;;  %2038 = vrot.lane.b32.xlu0 %v11158_v55, %s9365_s19 }
 0x39a   : > { %v3665_v22 = vsel %vm3637_vm3, %v18004_v30, %v18003_v28  ;;  %v2899_v26 = vsel %vm2887_vm15, %v2872_v63, %v18005_v14  ;;  %v2792_v29 = vsel %vm2779_vm12, %v2765_v33, %v2101_v17  ;;  %v2493_v2 = vpop.permute.xlu0 %2492  ;;  %v18008_v51 = vrot.slane %v11219_v53, 2 }
 0x39b   : > { %v11822_v1 = vadd.f32 %v5685_v36, %v5498_v16  ;;  %3022 = vst [vmem:[#allocation2 + $0xd0] sm:$0xff] %v2899_v26  ;;  %v2819_v48 = vsel %vm2806_vm8, %v2792_v29, %v18007_v9  ;;  %v18009_v28 = vrot.slane %v11215_v57, 2  ;;  %v3810_v17 = vadd.f32 %v3665_v22, %v3470_v58  ;;  %v18010_v36 = vld [vmem:[#allocation52_spill] sm:$0xff]  ;;  %v18012_v29 = vld [vmem:[#allocation50_spill] sm:$0xff]  ;;  %1958 = vrot.lane.b32.xlu1 %v11150_v0, %s9364_s18 }
 0x39c   : > { %v2846_v16 = vsel %vm2833_vm13, %v2819_v48, %v18010_v36  ;;  %v4001_v30 = vrot.slane %v11794_v44, 2  ;;  %v17525_v14 = vrot.slane %v11826_v62, 2  ;;  %v11846_v53 = vmul.f32 %v11080_v39, %v11449_v27  ;;  %v18011_v57 = vld [vmem:[#allocation48_spill] sm:$0xff]  ;;  %v2575_v48 = vpop.permute.xlu1 %2574 }
 0x39d   : > { %18006 = vst [vmem:[#allocation21_spill] sm:$0xff] %v11822_v1  ;;  %v11835_v63 = vsel %vm3637_vm3, %v18009_v28, %v18008_v51  ;;  %v2873_v26 = vsel %vm2860_vm14, %v2846_v16, %v18011_v57  ;;  %v11854_v58 = vmul.f32 %v11080_v39, %v11477_v10  ;;  %v11858_v22 = vmul.f32 %v17928_v11, %v11449_v27 }
 0x39e   : > { %v11862_v44 = vmul.f32 %v17928_v11, %v11477_v10  ;;  %v2900_v9 = vsel %vm2887_vm15, %v2873_v26, %v18012_v29  ;;  %v4006_v51 = vsel %vm3637_vm3, %v4001_v30, %v17525_v14  ;;  %v4331_v28 = vrot.slane %v11846_v53, 3  ;;  %v2497_v16 = vpop.permute.xlu0 %2496  ;;  %v18013_v29 = vld [vmem:[#allocation114_spill] sm:$0xff]  ;;  %2118 = vrot.lane.b32.xlu0 %v11191_v54, %s9366_s4 }
 0x39f   : > { %v11872_v36 = vmul.f32 %v11092_v47, %v11477_v10  ;;  %3024 = vst [vmem:[#allocation2 + $0xe0] sm:$0xff] %v2900_v9  ;;  %v4151_v57 = vadd.f32 %v4006_v51, %v3810_v17  ;;  %v17528_v33 = vrot.slane %v11854_v58, 3  ;;  %v4667_v1 = vrot.slane %v11858_v22, 4  ;;  %2116 = vrot.lane.b32.xlu1 %v11158_v55, %s9366_s4 }
 0x3a0   : > { %v17530_v26 = vrot.slane %v11862_v44, 4  ;;  %v2914_v41 = vsel %vm1197_vm1, %v18013_v29, %v2493_v2  ;;  %v2916_v14 = vsel %vm1197_vm1, %v18014_v31, %v2497_v16  ;;  %v11885_v53 = vmul.f32 %v11092_v47, %v11569_v42  ;;  %v2649_v51 = vpop.permute.xlu1 %2648 }
 0x3a1   : > { %v11889_v17 = vmul.f32 %v11097_v20, %v11477_v10  ;;  %v4336_v2 = vsel %vm4312_vm10, %v4331_v28, %v17528_v33  ;;  %v5008_v22 = vrot.slane %v11872_v36, 4  ;;  %v11902_v9 = vmul.f32 %v11097_v20, %v11569_v42 }
 0x3a2   : > { %v4672_v31 = vsel %vm4648_vm4, %v4667_v1, %v17530_v26  ;;  %v4481_v16 = vadd.f32 %v4336_v2, %v4151_v57  ;;  %v2571_v33 = vpop.permute.xlu0 %2570  ;;  %v11913_v36 = vmul.f32 %v11102_v15, %v11569_v42  ;;  %v3128_v26 = vmul.f32 %v11027_v24, %v11297_v46  ;;  %1964 = vrot.lane.b32.xlu0 %v11177_v38, %s9364_s18 }
 0x3a3   : > { %v18015_v57 = vrot.slane %v11754_v52, 1  ;;  %v18016_v2 = vrot.slane %v11640_v25, 1  ;;  %v2940_v29 = vsel %vm2752_vm11, %v2914_v41, %v2571_v33  ;;  %v18017_v8 = vrot.slane %v11885_v53, 4  ;;  %1962 = vrot.lane.b32.xlu1 %v11191_v54, %s9364_s18 }
 0x3a4   : > { %v4821_v60 = vadd.f32 %v4672_v31, %v4481_v16  ;;  %v2966_v46 = vsel %vm2779_vm12, %v2940_v29, %v2649_v51  ;;  %v18018_v25 = vrot.slane %v11902_v9, 5  ;;  %v18019_v52 = vrot.slane %v11889_v17, 5 }
 0x3a5   : > { %v3321_v0 = vsel %vm3297_vm2, %v18016_v2, %v18015_v57  ;;  %v5013_v15 = vsel %vm4648_vm4, %v5008_v22, %v18017_v8  ;;  %v17537_v33 = vrot.slane %v11913_v36, 6  ;;  %v2942_v16 = vsel %vm2752_vm11, %v2916_v14, %v2575_v48  ;;  %3001 = vst.msk [vmem:[#allocation2 + $0x28] sm:$0xff] %vm2806_vm8, %v2966_v46  ;;  %v2653_v8 = vpop.permute.xlu1 %2652 }
 0x3a6   : > { %v5353_v41 = vsel %vm5329_vm5, %v18019_v52, %v18018_v25  ;;  %v3468_v31 = vadd.f32 %v3321_v0, %v3128_v26  ;;  %v5162_v57 = vadd.f32 %v5013_v15, %v4821_v60  ;;  %v18020_v51 = vrot.slane %v11777_v6, 2  ;;  %v2573_v25 = vpop.permute.xlu0 %2572  ;;  %v11970_v26 = vld [vmem:[#allocation2 + $0xa0] sm:$0xff]  ;;  %2042 = vrot.lane.b32.xlu0 %v11177_v38, %s9365_s19 }
 0x3a7   : > { %v18021_v29 = vrot.slane %v11648_v7, 2  ;;  %v4002_v55 = vsel %vm3637_vm3, %v18022_v23, %v4001_v30  ;;  %v2968_v52 = vsel %vm2779_vm12, %v2942_v16, %v2653_v8  ;;  %v3798_v0 = vadd.f32 %v11835_v63, %v11740_v34  ;;  %v18024_v7 = vld [vmem:[#allocation109_spill] sm:$0xff]  ;;  %2040 = vrot.lane.b32.xlu1 %v11191_v54, %s9365_s19 }
 0x3a8   : > { %v18023_v15 = vrot.slane %v11908_v21, 6  ;;  %v2915_v14 = vsel %vm1197_vm1, %v18024_v7, %v11784_v49  ;;  %3005 = vst.msk [vmem:[#allocation2 + $0x48] sm:$0xff] %vm2806_vm8, %v2968_v52  ;;  %v18025_v13 = vrot.slane %v11277_v35, 2  ;;  %v18026_v23 = vrot.slane %v11310_v4, 2 }
 0x3a9   : > { %v3661_v2 = vsel %vm3637_vm3, %v18021_v29, %v18020_v51  ;;  %v5502_v63 = vadd.f32 %v5353_v41, %v5162_v57  ;;  %v18027_v30 = vrot.slane %v11682_v32, 3  ;;  %v2941_v49 = vsel %vm2752_vm11, %v2915_v14, %v2573_v25  ;;  %v11982_v41 = vpop.permute.xlu1 %2656 }
 0x3aa   : > { %v5693_v60 = vsel %vm5669_vm6, %v18023_v15, %v17537_v33  ;;  %v3808_v6 = vadd.f32 %v3661_v2, %v3468_v31  ;;  %v3981_v34 = vsel %vm3637_vm3, %v18026_v23, %v18025_v13  ;;  %v18028_v31 = vrot.slane %v11700_v45, 4  ;;  %v2577_v45 = vpop.permute.xlu0 %2576  ;;  %2122 = vrot.lane.b32.xlu0 %v11195_v18, %s9366_s4 }
 0x3ab   : > { %v4332_v48 = vsel %vm4312_vm10, %v18027_v30, %v4331_v28  ;;  %v11980_v4 = vmul.f32 %v11032_v43, %v11477_v10  ;;  %v11984_v32 = vadd.f32 %v5693_v60, %v5502_v63  ;;  %v11988_v28 = vmul.f32 %v11032_v43, %v11569_v42  ;;  %2120 = vrot.lane.b32.xlu1 %v11177_v38, %s9366_s4 }
 0x3ac   : > { %v4149_v46 = vadd.f32 %v4002_v55, %v3808_v6  ;;  %v4668_v35 = vsel %vm4648_vm4, %v18028_v31, %v4667_v1  ;;  %v11992_v16 = vmul.f32 %v11045_v12, %v11477_v10  ;;  %v11996_v55 = vmul.f32 %v11045_v12, %v11569_v42 }
 0x3ad   : > { %18029 = vst [vmem:[#allocation22_spill] sm:$0xff] %v11984_v32  ;;  %v18030_v8 = vrot.slane %v11704_v40, 4  ;;  %v12003_v51 = vmul.f32 %v11050_v61, %v11569_v42  ;;  %v12007_v29 = vmul.f32 %v11050_v61, %v11970_v26  ;;  %v3328_v2 = vrot.slane %v11980_v4, 1  ;;  %v12021_v7 = vpop.permute.xlu1 %2502 }
 0x3ae   : > { %v4479_v1 = vadd.f32 %v4332_v48, %v4149_v46  ;;  %v17539_v25 = vrot.slane %v11988_v28, 1  ;;  %v3668_v52 = vrot.slane %v11992_v16, 2  ;;  %v17538_v40 = vrot.slane %v11996_v55, 2  ;;  %v2651_v63 = vpop.permute.xlu0 %2650 }
 0x3af   : > { %v5009_v57 = vsel %vm4648_vm4, %v18030_v8, %v5008_v22  ;;  %v3134_v15 = vmul.f32 %v11027_v24, %v11477_v10  ;;  %v4009_v60 = vrot.slane %v12003_v51, 2  ;;  %v17536_v6 = vrot.slane %v12007_v29, 2  ;;  %1966 = vrot.lane.b32.xlu1 %v11195_v18, %s9364_s18 }
 0x3b0   : > { %v4819_v22 = vadd.f32 %v4668_v35, %v4479_v1  ;;  %v3333_v14 = vsel %vm3297_vm2, %v3328_v2, %v17539_v25  ;;  %v3673_v13 = vsel %vm3637_vm3, %v3668_v52, %v17538_v40  ;;  %v4222_v23 = vmul.f32 %v11080_v39, %v11569_v42  ;;  %v18038_v40 = vld [vmem:[#allocation53_spill] sm:$0xff] }
 0x3b1   : > { %v12035_v10 = vmul.f32 %v11080_v39, %v11970_v26  ;;  %v18031_v48 = vrot.slane %v11889_v17, 5  ;;  %v18032_v46 = vrot.slane %v11708_v50, 5  ;;  %v3474_v35 = vadd.f32 %v3333_v14, %v3134_v15  ;;  %v18035_v14 = vld [vmem:[#allocation112_spill] sm:$0xff] }
 0x3b2   : > { %v5160_v30 = vadd.f32 %v5009_v57, %v4819_v22  ;;  %v4554_v4 = vmul.f32 %v17928_v11, %v11569_v42  ;;  %v2967_v1 = vsel %vm2779_vm12, %v2941_v49, %v2651_v63  ;;  %v4014_v8 = vsel %vm3637_vm3, %v4009_v60, %v17536_v6  ;;  %v18034_v49 = vld [vmem:[#allocation167_spill] sm:$0xff] }
 0x3b3   : > { %v5349_v31 = vsel %vm5329_vm5, %v18032_v46, %v18031_v48  ;;  %v17541_v57 = vrot.slane %v12035_v10, 3  ;;  %v12053_v50 = vmul.f32 %v17928_v11, %v11970_v26  ;;  %v12058_v17 = vsel %vm4312_vm10, %v11120_v19, %v11073_v56  ;;  %3003 = vst.msk [vmem:[#allocation2 + $0x38] sm:$0xff] %vm2806_vm8, %v2967_v1  ;;  %1968 = vrot.lane.b32.xlu0 %v18034_v49, %s9364_s18  ;;  %v2581_v48 = vpop.permute.xlu1 %2580 }
 0x3b4   : > { %18033 = vst [vmem:[#allocation78_spill] sm:$0xff] %v12058_v17  ;;  %v4139_v51 = vadd.f32 %v3981_v34, %v3798_v0  ;;  %v5500_v22 = vadd.f32 %v5349_v31, %v5160_v30  ;;  %v3814_v15 = vadd.f32 %v3673_v13, %v3474_v35  ;;  %v2917_v63 = vsel %vm1197_vm1, %v18035_v14, %v11820_v3  ;;  %v2655_v34 = vpop.permute.xlu0 %2654  ;;  %v18041_v30 = vld [vmem:[#allocation54_spill] sm:$0xff] }
 0x3b5   : > { %v18036_v46 = vrot.slane %v11908_v21, 6  ;;  %v18037_v6 = vrot.slane %v11719_v59, 6  ;;  %v4339_v33 = vrot.slane %v4222_v23, 3  ;;  %v17540_v1 = vrot.slane %v12053_v50, 4  ;;  %v18043_v23 = vld [vmem:[#allocation60_spill] sm:$0xff]  ;;  %v18045_v31 = vld [vmem:[#allocation66_spill] sm:$0xff]  ;;  %2044 = vrot.lane.b32.xlu1 %v11195_v18, %s9365_s19 }
 0x3b6   : > { %v12074_v25 = vsel %vm1762_vm7, 0.0, %v18038_v40  ;;  %v2943_v0 = vsel %vm2752_vm11, %v2917_v63, %v2577_v45  ;;  %v4155_v3 = vadd.f32 %v4014_v8, %v3814_v15  ;;  %v12081_v21 = vsel %vm1867_vm9, %v18041_v30, 0.0  ;;  %v18047_v8 = vld [vmem:[#allocation12_spill] sm:$0xff] }
 0x3b7   : > { %v5689_v56 = vsel %vm5669_vm6, %v18037_v6, %v18036_v46  ;;  %18039 = vst [vmem:[#allocation80_spill] sm:$0xff] %v12074_v25  ;;  %18042 = vst [vmem:[#allocation20_spill] sm:$0xff] %v12081_v21  ;;  %v2969_v59 = vsel %vm2779_vm12, %v2943_v0, %v2655_v34  ;;  %v4344_v40 = vsel %vm4312_vm10, %v4339_v33, %v17541_v57  ;;  %v4675_v6 = vrot.slane %v4554_v4, 4  ;;  %v18049_v63 = vld [vmem:[#allocation72_spill] sm:$0xff]  ;;  %v12106_v46 = vpop.permute.xlu1 %2660 }
 0x3b8   : > { %v12077_v13 = vadd.f32 %v5689_v56, %v5500_v22  ;;  %v12091_v45 = vsel %vm1867_vm9, %v18043_v23, 0.0  ;;  %v12095_v35 = vsel %vm1867_vm9, %v18045_v31, 0.0  ;;  %3007 = vst.msk [vmem:[#allocation2 + $0x58] sm:$0xff] %vm2806_vm8, %v2969_v59  ;;  %2046 = vrot.lane.b32.xlu0 %v18034_v49, %s9365_s19  ;;  %v18048_v22 = vrot.slane %v18047_v8, 3  ;;  %v18052_v59 = vld [vmem:[#allocation79_spill] sm:$0xff] }
 0x3b9   : > { %18044 = vst [vmem:[#allocation23_spill] sm:$0xff] %v12091_v45  ;;  %18046 = vst [vmem:[#allocation25_spill] sm:$0xff] %v12095_v35  ;;  %v4485_v14 = vadd.f32 %v4344_v40, %v4155_v3  ;;  %v12104_v4 = vsel %vm1867_vm9, %v18049_v63, 0.0  ;;  %v4680_v56 = vsel %vm4648_vm4, %v4675_v6, %v17540_v1  ;;  %v3132_v0 = vmul.f32 %v11027_v24, %v11449_v27  ;;  %v2501_v3 = vpop.permute.xlu0 %2500  ;;  %v18054_v40 = vld [vmem:[#allocation13_spill] sm:$0xff] }
 0x3ba   : > { %18040 = vst [vmem:[#allocation19_spill] sm:$0xff] %v12077_v13  ;;  %v4469_v15 = vadd.f32 %v18048_v22, %v4139_v51  ;;  %18050 = vst [vmem:[#allocation24_spill] sm:$0xff] %v12104_v4  ;;  %v18051_v34 = vrot.slane %v11764_v37, 1  ;;  %v12118_v51 = vsel %vm1867_vm9, %v18052_v59, 0.0  ;;  %v18055_v23 = vrot.slane %v18054_v40, 4  ;;  %v18056_v63 = vld [vmem:[#allocation81_spill] sm:$0xff]  ;;  %2124 = vrot.lane.b32.xlu1 %v18034_v49, %s9366_s4 }
 0x3bb   : > { %18053 = vst [vmem:[#allocation26_spill] sm:$0xff] %v12118_v51  ;;  %v12122_v8 = vadd.f32 %v4680_v56, %v4485_v14  ;;  %v12126_v22 = vmul.f32 %v11092_v47, %v11970_v26  ;;  %v12130_v27 = vsel %vm1867_vm9, %v18056_v63, 0.0  ;;  %v18058_v37 = vld [vmem:[#allocation92_spill] sm:$0xff]  ;;  %v18063_v40 = vrot.slane %v11781_v5, 2  ;;  %v12166_v16 = vpop.permute.xlu1 %2506 }
 0x3bc   : > { %v3329_v30 = vsel %vm3297_vm2, %v18051_v34, %v3328_v2  ;;  %v4809_v31 = vadd.f32 %v18055_v23, %v4469_v15  ;;  %18057 = vst [vmem:[#allocation29_spill] sm:$0xff] %v12130_v27  ;;  %v12134_v2 = vsel %vm1867_vm9, %v18058_v37, 0.0  ;;  %v18060_v15 = vrot.slane %v11826_v62, 2  ;;  %v18061_v56 = vld [vmem:[#allocation100_spill] sm:$0xff]  ;;  %1970 = vrot.lane.b32.xlu0 %v12074_v25, %s9364_s18 }
 0x3bd   : > { %18059 = vst [vmem:[#allocation86_spill] sm:$0xff] %v12134_v2  ;;  %v3472_v34 = vadd.f32 %v3329_v30, %v3132_v0  ;;  %v12143_v59 = vsel %vm1867_vm9, %v18061_v56, 0.0  ;;  %v3669_v23 = vsel %vm3637_vm3, %v18063_v40, %v3668_v52  ;;  %v18064_v63 = vrot.slane %v11854_v58, 3  ;;  %v18066_v30 = vld [vmem:[#allocation106_spill] sm:$0xff]  ;;  %v2579_v52 = vpop.permute.xlu0 %2578 }
 0x3be   : > { %v4010_v14 = vsel %vm3637_vm3, %v18060_v15, %v4009_v60  ;;  %18062 = vst [vmem:[#allocation30_spill] sm:$0xff] %v12143_v59  ;;  %v18065_v62 = vrot.slane %v11862_v44, 4  ;;  %v12160_v37 = vsel %vm1867_vm9, %v18066_v30, 0.0  ;;  %v18068_v15 = vld [vmem:[#allocation113_spill] sm:$0xff]  ;;  %v12170_v5 = vmul.f32 %v11097_v20, %v11970_v26  ;;  %2048 = vrot.lane.b32.xlu1 %v12074_v25, %s9365_s19 }
 0x3bf   : > { %v4340_v0 = vsel %vm4312_vm10, %v18064_v63, %v4339_v33  ;;  %18067 = vst [vmem:[#allocation88_spill] sm:$0xff] %v12160_v37  ;;  %v12164_v56 = vsel %vm1867_vm9, %v18068_v15, 0.0  ;;  %v3812_v58 = vadd.f32 %v3669_v23, %v3472_v34  ;;  %v18070_v33 = vld [vmem:[#allocation123_spill] sm:$0xff]  ;;  %v12179_v30 = vmul.f32 %v11032_v43, %v11970_v26  ;;  %v18073_v15 = vld [vmem:[#allocation126_spill] sm:$0xff] }
 0x3c0   : > { %v4676_v60 = vsel %vm4648_vm4, %v18065_v62, %v4675_v6  ;;  %18069 = vst [vmem:[#allocation27_spill] sm:$0xff] %v12164_v56  ;;  %v2918_v44 = vsel %vm1197_vm1, %v18070_v33, %v2501_v3  ;;  %v18071_v6 = vld [vmem:[#allocation14_spill] sm:$0xff]  ;;  %v5016_v62 = vrot.slane %v12126_v22, 4  ;;  %v2919_v1 = vsel %vm1197_vm1, %v18073_v15, %v12021_v7  ;;  %2126 = vrot.lane.b32.xlu0 %v12074_v25, %s9366_s4  ;;  %v18074_v22 = vld [vmem:[#allocation145_spill] sm:$0xff] }
 0x3c1   : > { %v18072_v40 = vrot.slane %v18071_v6, 4  ;;  %v2944_v57 = vsel %vm2752_vm11, %v2918_v44, %v2579_v52  ;;  %v4153_v3 = vadd.f32 %v4010_v14, %v3812_v58  ;;  %v12189_v34 = vmul.f32 %v11045_v12, %v11970_v26  ;;  %v18075_v7 = vld [vmem:[#allocation149_spill] sm:$0xff]  ;;  %v12206_v44 = vpop.permute.xlu1 %2584  ;;  %v2659_v6 = vpop.permute.xlu0 %2658 }
 0x3c2   : > { %v12197_v23 = vmul.f32 %v11092_v47, %v18074_v22  ;;  %v12201_v33 = vmul.f32 %v18075_v7, %v11970_v26  ;;  %v3336_v14 = vrot.slane %v12179_v30, 1  ;;  %v2945_v58 = vsel %vm2752_vm11, %v2919_v1, %v2581_v48  ;;  %2596 = vrot.lane.b32.xlu1 %v12081_v21, %s9365_s19 }
 0x3c3   : > { %v5150_v63 = vadd.f32 %v18072_v40, %v4809_v31  ;;  %v2970_v31 = vsel %vm2779_vm12, %v2944_v57, %v11982_v41  ;;  %v4483_v57 = vadd.f32 %v4340_v0, %v4153_v3  ;;  %v3136_v52 = vmul.f32 %v11027_v24, %v11569_v42 }
 0x3c4   : > { %3009 = vst.msk [vmem:[#allocation2 + $0x68] sm:$0xff] %vm2806_vm8, %v2970_v31  ;;  %v18076_v40 = vrot.slane %v11885_v53, 4  ;;  %v18077_v17 = vrot.slane %v11988_v28, 1  ;;  %v12220_v1 = vmul.f32 %v11050_v61, %v18074_v22  ;;  %v18078_v31 = vld [vmem:[#allocation120_spill] sm:$0xff]  ;;  %v2971_v42 = vsel %vm2779_vm12, %v2945_v58, %v2659_v6  ;;  %2518 = vrot.lane.b32.xlu0 %v12081_v21, %s9364_s18  ;;  %v18085_v58 = vld [vmem:[#allocation6_spill] sm:$0xff] }
 0x3c5   : > { %v12224_v0 = vsel %vm1867_vm9, %v18078_v31, 0.0  ;;  %v4823_v53 = vadd.f32 %v4676_v60, %v4483_v57  ;;  %v18080_v28 = vld [vmem:[#allocation128_spill] sm:$0xff]  ;;  %3011 = vst.msk [vmem:[#allocation2 + $0x78] sm:$0xff] %vm2806_vm8, %v2971_v42  ;;  %v18084_v31 = vld [vmem:[#allocation5_spill] sm:$0xff]  ;;  %v12243_v60 = vpop.permute.xlu1 %2664  ;;  %v18086_v57 = vld [vmem:[#allocation15_spill] sm:$0xff]  ;;  %v12252_v42 = vmul.f32 %v11080_v39, %v18074_v22  ;;  %v18088_v25 = vrot.slane %v12170_v5, 5 }
 0x3c6   : > { %v5017_v15 = vsel %vm4648_vm4, %v18076_v40, %v5016_v62  ;;  %v3337_v30 = vsel %vm3297_vm2, %v18077_v17, %v3336_v14  ;;  %18079 = vst [vmem:[#allocation28_spill] sm:$0xff] %v12224_v0  ;;  %v12231_v17 = vsel %vm1867_vm9, %v18080_v28, 0.0  ;;  %v18082_v40 = vld [vmem:[#allocation133_spill] sm:$0xff]  ;;  %v18089_v6 = vrot.slane %v11902_v9, 5  ;;  %2598 = vrot.lane.b32.xlu1 %v12091_v45, %s9365_s19 }
 0x3c7   : > { %v3476_v3 = vadd.f32 %v3337_v30, %v3136_v52  ;;  %18081 = vst [vmem:[#allocation31_spill] sm:$0xff] %v12231_v17  ;;  %v12235_v48 = vsel %vm1867_vm9, %v18082_v40, 0.0  ;;  %v18087_v52 = vrot.slane %v18086_v57, 5  ;;  %v5164_v19 = vadd.f32 %v5017_v15, %v4823_v53  ;;  %v12248_v40 = vld [vmem:[#allocation2 + $0xc0] sm:$0xff] }
 0x3c8   : > { %18083 = vst [vmem:[#allocation33_spill] sm:$0xff] %v12235_v48  ;;  %v2505_v48 = vpop.permute.xlu0 %2504  ;;  %v5357_v41 = vsel %vm5329_vm5, %v18089_v6, %v18088_v25  ;;  %v18090_v17 = vrot.slane %v12189_v34, 2  ;;  %v4017_v15 = vrot.slane %v12220_v1, 2  ;;  %v12267_v53 = vmul.f32 %v11032_v43, %v18074_v22  ;;  %2674 = vrot.lane.b32.xlu0 %v12081_v21, %s9366_s4 }
 0x3c9   : > { %v5490_v30 = vadd.f32 %v18087_v52, %v5150_v63  ;;  %v18091_v63 = vrot.slane %v11996_v55, 2  ;;  %v12273_v9 = vmul.f32 %v11097_v20, %v18074_v22  ;;  %v12277_v25 = vmul.f32 %v18075_v7, %v18074_v22 }
 0x3ca   : > { %v5504_v55 = vadd.f32 %v5357_v41, %v5164_v19  ;;  %v18092_v1 = vrot.slane %v12201_v33, 6  ;;  %v12289_v28 = vmul.f32 %v11045_v12, %v18074_v22  ;;  %v12293_v18 = vmul.f32 %v11050_v61, %v12248_v40  ;;  %v12295_v19 = vpop.permute.xlu1 %2588  ;;  %2676 = vrot.lane.b32.xlu1 %v12091_v45, %s9366_s4 }
 0x3cb   : > { %v3677_v57 = vsel %vm3637_vm3, %v18091_v63, %v18090_v17  ;;  %v18093_v17 = vrot.slane %v11913_v36, 6  ;;  %v18094_v41 = vrot.slane %v12197_v23, 4  ;;  %v17552_v36 = vrot.slane %v12252_v42, 3 }
 0x3cc   : > { %v3816_v6 = vadd.f32 %v3677_v57, %v3476_v3  ;;  %v2583_v21 = vpop.permute.xlu0 %2582  ;;  %v18097_v49 = vrot.slane %v12007_v29, 2  ;;  %v12314_v54 = vmul.f32 %v11092_v47, %v12248_v40  ;;  %v3138_v29 = vmul.f32 %v11027_v24, %v11970_v26  ;;  %2520 = vrot.lane.b32.xlu0 %v12091_v45, %s9364_s18  ;;  %v18100_v26 = vld [vmem:[#allocation7_spill] sm:$0xff] }
 0x3cd   : > { %v5697_v52 = vsel %vm5669_vm6, %v18093_v17, %v18092_v1  ;;  %v5021_v3 = vsel %vm4648_vm4, %v5016_v62, %v18094_v41  ;;  %v12305_v1 = vmul.f32 %v17928_v11, %v18074_v22  ;;  %v18096_v17 = vld [vmem:[#allocation131_spill] sm:$0xff]  ;;  %v18098_v62 = vrot.slane %v12267_v53, 1 }
 0x3ce   : > { %v12300_v57 = vadd.f32 %v5697_v52, %v5504_v55  ;;  %v2920_v63 = vsel %vm1197_vm1, %v18096_v17, %v2505_v48  ;;  %v4018_v0 = vsel %vm3637_vm3, %v18097_v49, %v4017_v15  ;;  %v5166_v17 = vadd.f32 %v5021_v3, %v12122_v8  ;;  %v18112_v48 = vld [vmem:[#allocation10_spill] sm:$0xff]  ;;  %2600 = vrot.lane.b32.xlu1 %v12095_v35, %s9365_s19 }
 0x3cf   : > { %v3341_v55 = vsel %vm3297_vm2, %v3336_v14, %v18098_v62  ;;  %v2946_v52 = vsel %vm2752_vm11, %v2920_v63, %v2583_v21  ;;  %v4157_v41 = vadd.f32 %v4018_v0, %v3816_v6  ;;  %v18099_v63 = vld [vmem:[#allocation134_spill] sm:$0xff]  ;;  %v2513_v0 = vpop.permute.xlu1 %2512  ;;  %v18101_v6 = vld [vmem:[#allocation8_spill] sm:$0xff]  ;;  %v18102_v21 = vrot.slane %v12035_v10, 3 }
 0x3d0   : > { %18095 = vst [vmem:[#allocation94_spill] sm:$0xff] %v12300_v57  ;;  %v2972_v49 = vsel %vm2779_vm12, %v2946_v52, %v12106_v46  ;;  %v2921_v62 = vsel %vm1197_vm1, %v18099_v63, %v12166_v16  ;;  %v3478_v46 = vadd.f32 %v3341_v55, %v3138_v29  ;;  %v12340_v52 = vmul.f32 %v11080_v39, %v12248_v40  ;;  %v2663_v3 = vpop.permute.xlu0 %2662  ;;  %v12360_v14 = vld [vmem:[#allocation2 + $0xd0] sm:$0xff] }
 0x3d1   : > { %3013 = vst.msk [vmem:[#allocation2 + $0x88] sm:$0xff] %vm2806_vm8, %v2972_v49  ;;  %v2947_v8 = vsel %vm2752_vm11, %v2921_v62, %v12206_v44  ;;  %v4348_v16 = vsel %vm4312_vm10, %v18102_v21, %v17552_v36  ;;  %v18103_v29 = vrot.slane %v12273_v9, 5  ;;  %v18104_v44 = vrot.slane %v12170_v5, 5  ;;  %2522 = vrot.lane.b32.xlu0 %v12095_v35, %s9364_s18  ;;  %v18105_v21 = vld [vmem:[#allocation74_spill] sm:$0xff] }
 0x3d2   : > { %v2973_v55 = vsel %vm2779_vm12, %v2947_v8, %v2663_v3  ;;  %v4487_v10 = vadd.f32 %v4348_v16, %v4157_v41  ;;  %v18106_v8 = vrot.slane %v18105_v21, 6  ;;  %v18108_v63 = vrot.slane %v12289_v28, 2  ;;  %2524 = vrot.lane.b32.xlu1 %v12104_v4, %s9364_s18 }
 0x3d3   : > { %v5361_v62 = vsel %vm5329_vm5, %v18104_v44, %v18103_v29  ;;  %3015 = vst.msk [vmem:[#allocation2 + $0x98] sm:$0xff] %vm2806_vm8, %v2973_v55  ;;  %v18109_v5 = vrot.slane %v12189_v34, 2  ;;  %v18110_v41 = vrot.slane %v12293_v18, 2  ;;  %v2591_v44 = vpop.permute.xlu1 %2590  ;;  %v18111_v55 = vld [vmem:[#allocation9_spill] sm:$0xff]  ;;  %v12381_v21 = vmul.f32 %v11097_v20, %v12248_v40 }
 0x3d4   : > { %v12367_v3 = vadd.f32 %v18106_v8, %v5490_v30  ;;  %v5506_v36 = vadd.f32 %v5361_v62, %v5166_v17  ;;  %v2509_v62 = vpop.permute.xlu0 %2508  ;;  %v18113_v34 = vrot.slane %v12305_v1, 4  ;;  %v12396_v49 = vmul.f32 %v17928_v11, %v12248_v40 }
 0x3d5   : > { %v3681_v29 = vsel %vm3637_vm3, %v18109_v5, %v18108_v63  ;;  %v4022_v16 = vsel %vm3637_vm3, %v4017_v15, %v18110_v41  ;;  %v18114_v63 = vrot.slane %v12053_v50, 4  ;;  %v18115_v15 = vrot.slane %v12314_v54, 4  ;;  %2678 = vrot.lane.b32.xlu0 %v12095_v35, %s9366_s4 }
 0x3d6   : > { %18107 = vst [vmem:[#allocation32_spill] sm:$0xff] %v12367_v3  ;;  %v3818_v30 = vadd.f32 %v3681_v29, %v3478_v46  ;;  %v18116_v5 = vrot.slane %v12197_v23, 4  ;;  %v12400_v46 = vmul.f32 %v11032_v43, %v12360_v14  ;;  %v18117_v50 = vrot.slane %v12277_v25, 6  ;;  %2602 = vrot.lane.b32.xlu1 %v12104_v4, %s9365_s19 }
 0x3d7   : > { %v4684_v8 = vsel %vm4648_vm4, %v18114_v63, %v18113_v34  ;;  %v18118_v29 = vrot.slane %v12201_v33, 6  ;;  %v12421_v38 = vmul.f32 %v18075_v7, %v12248_v40  ;;  %v3213_v33 = vmul.f32 %v11032_v43, %v12248_v40 }
 0x3d8   : > { %v5025_v41 = vsel %vm4648_vm4, %v18116_v5, %v18115_v15  ;;  %v4827_v23 = vadd.f32 %v4684_v8, %v4487_v10  ;;  %v4159_v63 = vadd.f32 %v4022_v16, %v3818_v30  ;;  %v12411_v15 = vmul.f32 %v11092_v47, %v12360_v14  ;;  %v18119_v5 = vld [vmem:[#allocation156_spill] sm:$0xff]  ;;  %v2669_v16 = vpop.permute.xlu1 %2668 }
 0x3d9   : > { %v5701_v34 = vsel %vm5669_vm6, %v18118_v29, %v18117_v50  ;;  %v2924_v17 = vsel %vm1197_vm1, %v18119_v5, %v2513_v0  ;;  %v5364_v8 = vrot.slane %v12381_v21, 5  ;;  %v18121_v0 = vrot.slane %v12340_v52, 3  ;;  %v18123_v29 = vld [vmem:[#allocation142_spill] sm:$0xff]  ;;  %v2587_v5 = vpop.permute.xlu0 %2586 }
 0x3da   : > { %v12417_v45 = vadd.f32 %v5701_v34, %v5506_v36  ;;  %v2950_v10 = vsel %vm2752_vm11, %v2924_v17, %v2591_v44  ;;  %v5168_v30 = vadd.f32 %v5025_v41, %v4827_v23  ;;  %v18122_v50 = vrot.slane %v12252_v42, 3  ;;  %v12446_v41 = vld [vmem:[#allocation2 + $0xe0] sm:$0xff]  ;;  %2526 = vrot.lane.b32.xlu1 %v12130_v27, %s9364_s18 }
 0x3db   : > { %v2922_v34 = vsel %vm1197_vm1, %v18123_v29, %v2509_v62  ;;  %v2976_v35 = vsel %vm2779_vm12, %v2950_v10, %v2669_v16  ;;  %v17558_v57 = vrot.slane %v12396_v49, 4  ;;  %v17557_v44 = vrot.slane %v12400_v46, 1 }
 0x3dc   : > { %18120 = vst [vmem:[#allocation34_spill] sm:$0xff] %v12417_v45  ;;  %v4352_v36 = vsel %vm4312_vm10, %v18122_v50, %v18121_v0  ;;  %v2948_v17 = vsel %vm2752_vm11, %v2922_v34, %v2587_v5  ;;  %3021 = vst.msk [vmem:[#allocation2 + $0xc8] sm:$0xff] %vm2806_vm8, %v2976_v35  ;;  %v17559_v21 = vrot.slane %v12411_v15, 4  ;;  %v12444_v62 = vmul.f32 %v11097_v20, %v12360_v14  ;;  %v12460_v0 = vpop.permute.xlu1 %2592 }
 0x3dd   : > { %v4489_v42 = vadd.f32 %v4352_v36, %v4159_v63  ;;  %v2974_v23 = vsel %vm2779_vm12, %v2948_v17, %v12243_v60  ;;  %v18124_v10 = vpack.i.bf16 %v18085_v58, %v18084_v31  ;;  %v3344_v35 = vrot.slane %v3213_v33, 1  ;;  %v2511_v33 = vpop.permute.xlu0 %2510  ;;  %v18127_v17 = vld [vmem:[#allocation152_spill] sm:$0xff] }
 0x3de   : > { %v3553_v16 = vmul.f32 %v11045_v12, %v12248_v40  ;;  %v12457_v63 = vmul.f32 %v11045_v12, %v12360_v14  ;;  %3017 = vst.msk [vmem:[#allocation2 + $0xa8] sm:$0xff] %vm2806_vm8, %v2974_v23  ;;  %v18125_v50 = vrot.slane %v12273_v9, 5  ;;  %v5704_v36 = vrot.slane %v12421_v38, 6  ;;  %2682 = vrot.lane.b32.xlu1 %v12130_v27, %s9366_s4 }
 0x3df   : > { %9122 = vperm.xlu0 %9110, %v18124_v10   ;;  %v12468_v31 = vmul.f32 %v18075_v7, %v12360_v14  ;;  %v3895_v58 = vmul.f32 %v11050_v61, %v12360_v14  ;;  %v18126_v34 = vrot.slane %v12305_v1, 4  ;;  %v3349_v9 = vsel %vm3297_vm2, %v3344_v35, %v17557_v44 }
 0x3e0   : > { %v5365_v60 = vsel %vm5329_vm5, %v18125_v50, %v5364_v8  ;;  %v12482_v38 = vmul.f32 %v11050_v61, %v12446_v41  ;;  %v2923_v23 = vsel %vm1197_vm1, %v18127_v17, %v2511_v33  ;;  %v3142_v1 = vmul.f32 %v11027_v24, %v12248_v40  ;;  %v18137_v33 = vld [vmem:[#allocation157_spill] sm:$0xff] }
 0x3e1   : > { %v5508_v29 = vadd.f32 %v5365_v60, %v5168_v30  ;;  %v4688_v5 = vsel %vm4648_vm4, %v18126_v34, %v17558_v57  ;;  %v18128_v50 = vrot.slane %v12314_v54, 4  ;;  %v3684_v34 = vrot.slane %v3553_v16, 2  ;;  %v2667_v10 = vpop.permute.xlu0 %2666 }
 0x3e2   : > { %v4829_v30 = vadd.f32 %v4688_v5, %v4489_v42  ;;  %v12501_v42 = vmul.f32 %v11080_v39, %v12360_v14  ;;  %v12503_v5 = vpop.permute.xlu1 %2516  ;;  %v3482_v17 = vadd.f32 %v3349_v9, %v3142_v1  ;;  %v4025_v40 = vrot.slane %v3895_v58, 2 }
 0x3e3   : > { %2680 = vrot.lane.b32.xlu0 %v12104_v4, %s9366_s4  ;;  %v5029_v60 = vsel %vm4648_vm4, %v18128_v50, %v17559_v21  ;;  %v3140_v44 = vmul.f32 %v11027_v24, %v18074_v22  ;;  %v18129_v57 = vrot.slane %v12267_v53, 1  ;;  %v2949_v16 = vsel %vm2752_vm11, %v2923_v23, %v12295_v19  ;;  %v3053_v4 = vld [vmem:[#allocation2 + $0x8] sm:$0xe0] }
 0x3e4   : > { %v18130_v50 = vrot.slane %v12277_v25, 6  ;;  %v17560_v9 = vrot.slane %v12482_v38, 2  ;;  %v2975_v58 = vsel %vm2779_vm12, %v2949_v16, %v2667_v10  ;;  %v5170_v53 = vadd.f32 %v5029_v60, %v4829_v30 }
 0x3e5   : > { %v3345_v54 = vsel %vm3297_vm2, %v18129_v57, %v3344_v35  ;;  %v3173_v35 = vld [vmem:[#allocation2 + $0x8] sm:$0xc0]  ;;  %3019 = vst.msk [vmem:[#allocation2 + $0xb8] sm:$0xff] %vm2806_vm8, %v2975_v58  ;;  %v18132_v25 = vrot.slane %v12444_v62, 5  ;;  %v18133_v23 = vrot.slane %v12457_v63, 2  ;;  %v4562_v60 = vmul.f32 %v17928_v11, %v12360_v14  ;;  %v2515_v58 = vpop.permute.xlu0 %2514 }
 0x3e6   : > { %v5705_v21 = vsel %vm5669_vm6, %v18130_v50, %v5704_v36  ;;  %v3480_v57 = vadd.f32 %v3345_v54, %v3140_v44  ;;  %v4355_v44 = vrot.slane %v12501_v42, 3  ;;  %v2673_v30 = vpop.permute.xlu1 %2672  ;;  %v18134_v54 = vrot.slane %v12289_v28, 2 }
 0x3e7   : > { %v12520_v22 = vadd.f32 %v5705_v21, %v5508_v29  ;;  %2604 = vrot.lane.b32.xlu0 %v12130_v27, %s9365_s19  ;;  %v5369_v19 = vsel %vm5329_vm5, %v5364_v8, %v18132_v25  ;;  %v3689_v10 = vsel %vm3637_vm3, %v3684_v34, %v18133_v23  ;;  %v12533_v21 = vmul.f32 %v11080_v39, %v12446_v41  ;;  %v3055_v29 = vld [vmem:[#allocation2 + $0x18] sm:$0xff]  ;;  %v18136_v23 = vld [vmem:[#allocation137_spill] sm:$0xff] }
 0x3e8   : > { %v3822_v1 = vadd.f32 %v3689_v10, %v3482_v17  ;;  %v3685_v8 = vsel %vm3637_vm3, %v18134_v54, %v3684_v34  ;;  %v18135_v16 = vrot.slane %v12293_v18, 2  ;;  %v4030_v25 = vsel %vm3637_vm3, %v4025_v40, %v17560_v9 }
 0x3e9   : > { %18131 = vst [vmem:[#allocation37_spill] sm:$0xff] %v12520_v22  ;;  %v3820_v42 = vadd.f32 %v3685_v8, %v3480_v57  ;;  %v12549_v17 = vmul.f32 %v11032_v43, %v12446_v41  ;;  %v3190_v10 = vmul.f32 %v18136_v23, %v3173_v35  ;;  %v2925_v28 = vsel %vm1197_vm1, %v18137_v33, %v2515_v58  ;;  %v2671_v9 = vpop.permute.xlu0 %2670  ;;  %v18142_v22 = vld [vmem:[#allocation138_spill] sm:$0xff] }
 0x3ea   : > { %v4026_v50 = vsel %vm3637_vm3, %v18135_v16, %v4025_v40  ;;  %v5510_v18 = vadd.f32 %v5369_v19, %v5170_v53  ;;  %v18138_v34 = vrot.slane %v12468_v31, 6  ;;  %v12560_v40 = vmul.f32 %v18136_v23, %v3055_v29  ;;  %v3513_v19 = vld [vmem:[#allocation2 + $0x8] sm:$0x80]  ;;  %v12573_v8 = vpop.permute.xlu1 %2024 }
 0x3eb   : > { %2528 = vrot.lane.b32.xlu0 %v12118_v51, %s9364_s18  ;;  %v12567_v35 = vmul.f32 %v17928_v11, %v12446_v41  ;;  %v12571_v33 = vmul.f32 %v11092_v47, %v12446_v41  ;;  %v4161_v53 = vadd.f32 %v4026_v50, %v3820_v42  ;;  %v4691_v16 = vrot.slane %v4562_v60, 4 }
 0x3ec   : > { %v5709_v54 = vsel %vm5669_vm6, %v5704_v36, %v18138_v34  ;;  %18139 = vst [vmem:[#allocation38_spill] sm:$0xff] %v12560_v40  ;;  %v4163_v36 = vadd.f32 %v4030_v25, %v3822_v1  ;;  %v12577_v58 = vmul.f32 %v11097_v20, %v12446_v41  ;;  %v12581_v34 = vmul.f32 %v18075_v7, %v12446_v41 }
 0x3ed   : > { %v2951_v57 = vsel %vm2752_vm11, %v2925_v28, %v12460_v0  ;;  %v18140_v27 = vrot.slane %v12340_v52, 3  ;;  %v17567_v42 = vrot.slane %v12549_v17, 1  ;;  %v3301_v1 = vrot.slane %v3190_v10, 1 }
 0x3ee   : > { %v2977_v60 = vsel %vm2779_vm12, %v2951_v57, %v2671_v9  ;;  %v18141_v25 = vpack.i.bf16 %v18101_v6, %v18100_v26  ;;  %v17566_v23 = vrot.slane %v12560_v40, 1  ;;  %v3530_v56 = vmul.f32 %v18142_v22, %v3513_v19  ;;  %v2103_v10 = vpop.permute.xlu1 %2102  ;;  %v13033_v40 = vld [vmem:[#allocation2] sm:$0xff] }
 0x3ef   : > { %v4356_v50 = vsel %vm4312_vm10, %v18140_v27, %v4355_v44  ;;  %v12596_v0 = vmul.f32 %v18142_v22, %v3055_v29  ;;  %3023 = vst.msk [vmem:[#allocation2 + $0xd8] sm:$0xff] %vm2806_vm8, %v2977_v60  ;;  %2606 = vrot.lane.b32.xlu0 %v12118_v51, %s9365_s19  ;;  %v18144_v27 = vrot.slane %v12533_v21, 3  ;;  %v17568_v26 = vrot.slane %v12567_v35, 4  ;;  %v18145_v60 = vld [vmem:[#allocation158_spill] sm:$0xff]  ;;  %v18215_v22 = vld [vmem:[#allocation71_spill] sm:$0xff]  ;;  %18226 = vst [vmem:[#allocation99_spill] sm:$0xff] %v13033_v40 }
 0x3f0   : > { %9127 = vperm.xlu1 %9104, %v18141_v25   ;;  %v4491_v9 = vadd.f32 %v4356_v50, %v4161_v53  ;;  %v12610_v19 = vmul.f32 %v11045_v12, %v12446_v41  ;;  %v2926_v25 = vsel %vm1197_vm1, %v18145_v60, %v12503_v5  ;;  %v18147_v53 = vrot.slane %v12400_v46, 1  ;;  %v18148_v50 = vld [vmem:[#allocation136_spill] sm:$0xff]  ;;  %v18155_v60 = vld [vmem:[#allocation162_spill] sm:$0xff] }
 0x3f1   : > { %18143 = vst [vmem:[#allocation96_spill] sm:$0xff] %v12596_v0  ;;  %v4360_v52 = vsel %vm4312_vm10, %v4355_v44, %v18144_v27  ;;  %v2595_v44 = vpop.permute.xlu0 %2594  ;;  %v18146_v27 = vrot.slane %v12396_v49, 4  ;;  %v3303_v5 = vsel %vm3297_vm2, %v3301_v1, %v17566_v23  ;;  %v3641_v49 = vrot.slane %v3530_v56, 2 }
 0x3f2   : > { %v4493_v28 = vadd.f32 %v4360_v52, %v4163_v36  ;;  %v3353_v36 = vsel %vm3297_vm2, %v18147_v53, %v17567_v42  ;;  %v3119_v52 = vmul.f32 %v18148_v50, %v3053_v4  ;;  %v2952_v29 = vsel %vm2752_vm11, %v2926_v25, %v2595_v44  ;;  %v3057_v44 = vld [vmem:[#allocation2 + $0x28] sm:$0xff]  ;;  %v2027_v56 = vpop.permute.xlu1 %2026 }
 0x3f3   : > { %v4692_v6 = vsel %vm4648_vm4, %v18146_v27, %v4691_v16  ;;  %v3853_v27 = vld [vmem:[#allocation2 + $0x18] sm:$0x80]  ;;  %v2978_v57 = vsel %vm2779_vm12, %v2952_v29, %v2673_v30  ;;  %2530 = vrot.lane.b32.xlu0 %v12134_v2, %s9364_s18  ;;  %v4696_v4 = vsel %vm4648_vm4, %v4691_v16, %v17568_v26  ;;  %v3144_v25 = vmul.f32 %v11027_v24, %v12360_v14 }
 0x3f4   : > { %2684 = vrot.lane.b32.xlu1 %v12118_v51, %s9366_s4  ;;  %v4831_v46 = vadd.f32 %v4692_v6, %v4491_v9  ;;  %3025 = vst.msk [vmem:[#allocation2 + $0xe8] sm:$0xff] %vm2806_vm8, %v2978_v57  ;;  %v12640_v1 = vadd.f32 %v5709_v54, %v5510_v18  ;;  %v12642_v53 = vadd.f32 %v4696_v4, %v4493_v28  ;;  %v18150_v30 = vrot.slane %v12571_v33, 4  ;;  %v18154_v54 = vld [vmem:[#allocation139_spill] sm:$0xff]  ;;  %v4524_v4 = vld [vmem:[#allocation2 + $0x28] sm:$0xfe] }
 0x3f5   : > { %v18151_v29 = vrot.slane %v12411_v15, 4  ;;  %v17571_v16 = vrot.slane %v12610_v19, 2  ;;  %v1947_v6 = vpop.permute.xlu0 %1946  ;;  %v18152_v9 = vrot.slane %v12577_v58, 5  ;;  %v18153_v14 = vrot.slane %v12444_v62, 5  ;;  %v4864_v26 = vld [vmem:[#allocation2 + $0x38] sm:$0xfe] }
 0x3f6   : > { %18149 = vst [vmem:[#allocation35_spill] sm:$0xff] %v12640_v1  ;;  %v3484_v42 = vadd.f32 %v3353_v36, %v3144_v25  ;;  %v3459_v18 = vadd.f32 %v3303_v5, %v3119_v52  ;;  %v3872_v28 = vmul.f32 %v18154_v54, %v3853_v27  ;;  %v2739_v15 = vsel %vm1197_vm1, %v18155_v60, %v1947_v6  ;;  %v2105_v6 = vpop.permute.xlu1 %2104  ;;  %v18243_v51 = vld [vmem:[#allocation97_spill] sm:$0xff] }
 0x3f7   : > { %v5033_v23 = vsel %vm4648_vm4, %v18151_v29, %v18150_v30  ;;  %v5373_v57 = vsel %vm5329_vm5, %v18153_v14, %v18152_v9  ;;  %v18156_v30 = vrot.slane %v12596_v0, 2  ;;  %v12664_v62 = vmul.f32 %v18154_v54, %v3057_v44  ;;  %v18158_v9 = vld [vmem:[#allocation144_spill] sm:$0xff]  ;;  %2686 = vrot.lane.b32.xlu0 %v12134_v2, %s9366_s4  ;;  %v18167_v54 = vld [vmem:[#allocation159_spill] sm:$0xff] }
 0x3f8   : > { %2608 = vrot.lane.b32.xlu1 %v12134_v2, %s9365_s19  ;;  %v12667_v36 = vmul.f32 %v18158_v9, %v3057_v44  ;;  %v2766_v52 = vsel %vm2752_vm11, %v2739_v15, %v12573_v8  ;;  %v5172_v5 = vadd.f32 %v5033_v23, %v4831_v46  ;;  %v18159_v60 = vrot.slane %v12581_v34, 6  ;;  %v18162_v46 = vld [vmem:[#allocation146_spill] sm:$0xff]  ;;  %v18166_v9 = vld [vmem:[#allocation57_spill] sm:$0xff] }
 0x3f9   : > { %v3643_v29 = vsel %vm3637_vm3, %v3641_v49, %v18156_v30  ;;  %18157 = vst [vmem:[#allocation36_spill] sm:$0xff] %v12664_v62  ;;  %v18160_v27 = vrot.slane %v12468_v31, 6  ;;  %v12682_v49 = vmul.f32 %v11027_v24, %v12446_v41  ;;  %v2793_v44 = vsel %vm2779_vm12, %v2766_v52, %v2103_v10  ;;  %v18163_v31 = vld [vmem:[#allocation147_spill] sm:$0xff] }
 0x3fa   : > { %v18161_v8 = vrot.slane %v12457_v63, 2  ;;  %v12691_v14 = vmul.f32 %v18162_v46, %v4524_v4  ;;  %v12694_v15 = vmul.f32 %v18163_v31, %v4864_v26  ;;  %v5205_v30 = vld [vmem:[#allocation2 + $0x38] sm:$0xfc]  ;;  %v12698_v10 = vadd.f32 %v3643_v29, %v3459_v18  ;;  %v18170_v29 = vld [vmem:[#allocation148_spill] sm:$0xff] }
 0x3fb   : > { %v12678_v25 = vsel %vm5669_vm6, %v18160_v27, %v18159_v60  ;;  %v18165_v60 = vld [vmem:[#allocation55_spill] sm:$0xff]  ;;  %v1949_v27 = vpop.permute.xlu0 %1948  ;;  %v3982_v52 = vrot.slane %v3872_v28, 2  ;;  %v17573_v26 = vrot.slane %v12664_v62, 2  ;;  %v18169_v18 = vpack.i.bf16 %v18112_v48, %v18111_v55 }
 0x3fc   : > { %v3693_v23 = vsel %vm3637_vm3, %v18161_v8, %v17571_v16  ;;  %18164 = vst [vmem:[#allocation41_spill] sm:$0xff] %v12694_v15  ;;  %v2820_v41 = vsel %vm2806_vm8, %v2793_v44, %v18165_v60  ;;  %v2740_v8 = vsel %vm1197_vm1, %v18167_v54, %v1949_v27  ;;  %2532 = vrot.lane.b32.xlu1 %v12143_v59, %s9364_s18  ;;  %v18168_v16 = vld [vmem:[#allocation56_spill] sm:$0xff]  ;;  %v18172_v54 = vld [vmem:[#allocation58_spill] sm:$0xff]  ;;  %v18179_v62 = vrot.slane %v12571_v33, 4 }
 0x3fd   : > { %v3824_v0 = vadd.f32 %v3693_v23, %v3484_v42  ;;  %v2847_v63 = vsel %vm2833_vm13, %v2820_v41, %v18166_v9  ;;  %v2767_v42 = vsel %vm2752_vm11, %v2740_v8, %v2027_v56  ;;  %9132 = vperm.xlu0 %9110, %v18169_v18   ;;  %v5512_v28 = vadd.f32 %v5373_v57, %v5172_v5  ;;  %v2029_v41 = vpop.permute.xlu1 %2028  ;;  %v18173_v56 = vld [vmem:[#allocation59_spill] sm:$0xff]  ;;  %v18175_v8 = vld [vmem:[#allocation164_spill] sm:$0xff] }
 0x3fe   : > { %v2874_v44 = vsel %vm2860_vm14, %v2847_v63, %v18168_v16  ;;  %v12715_v9 = vmul.f32 %v18170_v29, %v5205_v30  ;;  %v2794_v60 = vsel %vm2779_vm12, %v2767_v42, %v2105_v6  ;;  %v18174_v6 = vld [vmem:[#allocation61_spill] sm:$0xff]  ;;  %v18249_v15 = vld [vmem:[#allocation28_spill] sm:$0xff] }
 0x3ff   : > { %v12719_v23 = vsel %vm2887_vm15, %v2874_v44, %v18172_v54  ;;  %v2821_v63 = vsel %vm2806_vm8, %v2794_v60, %v18173_v56  ;;  %v1951_v48 = vpop.permute.xlu0 %1950  ;;  %v18176_v54 = vld [vmem:[#allocation62_spill] sm:$0xff] }
 0x400   : > { %18171 = vst [vmem:[#allocation42_spill] sm:$0xff] %v12715_v9  ;;  %v12728_v55 = vmul.f32 %v11092_v47, %v12719_v23  ;;  %v12732_v57 = vmul.f32 %v11097_v20, %v12719_v23  ;;  %v12736_v5 = vmul.f32 %v18075_v7, %v12719_v23  ;;  %v2848_v30 = vsel %vm2833_vm13, %v2821_v63, %v18174_v6  ;;  %v5545_v6 = vld [vmem:[#allocation2 + $0x38] sm:$0xf8] }
 0x401   : > { %v2741_v44 = vsel %vm1197_vm1, %v18175_v8, %v1951_v48  ;;  %2610 = vrot.lane.b32.xlu1 %v12143_v59, %s9365_s19  ;;  %v12746_v42 = vmul.f32 %v11050_v61, %v12719_v23  ;;  %v12750_v18 = vmul.f32 %v11080_v39, %v12719_v23  ;;  %v2875_v60 = vsel %vm2860_vm14, %v2848_v30, %v18176_v54  ;;  %v18177_v8 = vld [vmem:[#allocation64_spill] sm:$0xff]  ;;  %v2107_v4 = vpop.permute.xlu1 %2106 }
 0x402   : > { %2688 = vrot.lane.b32.xlu0 %v12143_v59, %s9366_s4  ;;  %v3984_v48 = vsel %vm3637_vm3, %v3982_v52, %v17573_v26  ;;  %v2902_v16 = vsel %vm2887_vm15, %v2875_v60, %v18177_v8  ;;  %v2768_v27 = vsel %vm2752_vm11, %v2741_v44, %v2029_v41  ;;  %v18178_v63 = vrot.slane %v12728_v55, 4  ;;  %v18180_v44 = vld [vmem:[#allocation63_spill] sm:$0xff]  ;;  %v18182_v8 = vld [vmem:[#allocation150_spill] sm:$0xff]  ;;  %v18227_v59 = vld [vmem:[#allocation89_spill] sm:$0xff] }
 0x403   : > { %v17574_v30 = vrot.slane %v12746_v42, 2  ;;  %3028 = vst [vmem:[#allocation2 + $0x100] sm:$0xff] %v2902_v16  ;;  %v1953_v29 = vpop.permute.xlu0 %1952  ;;  %v2795_v56 = vsel %vm2779_vm12, %v2768_v27, %v2107_v4  ;;  %v12775_v41 = vmul.f32 %v17928_v11, %v12719_v23  ;;  %v18181_v16 = vld [vmem:[#allocation17_spill] sm:$0xff]  ;;  %v12784_v33 = vmul.f32 %v18182_v8, %v5545_v6  ;;  %v18188_v27 = vld [vmem:[#allocation68_spill] sm:$0xff] }
 0x404   : > { %v5037_v52 = vsel %vm4648_vm4, %v18179_v62, %v18178_v63  ;;  %v2822_v60 = vsel %vm2806_vm8, %v2795_v56, %v18180_v44  ;;  %v18184_v62 = vld [vmem:[#allocation65_spill] sm:$0xff]  ;;  %v18185_v54 = vrot.slane %v12732_v57, 5  ;;  %v18186_v56 = vrot.slane %v12577_v58, 5  ;;  %v18189_v58 = vld [vmem:[#allocation70_spill] sm:$0xff] }
 0x405   : > { %5913 = vrot.lane.b32.xlu1 %v18181_v16, %s9359_s30  ;;  %v5174_v4 = vadd.f32 %v5037_v52, %v12642_v53  ;;  %18183 = vst [vmem:[#allocation44_spill] sm:$0xff] %v12784_v33  ;;  %v2849_v63 = vsel %vm2833_vm13, %v2822_v60, %v18184_v62  ;;  %v18187_v53 = vrot.slane %v12482_v38, 2  ;;  %v17576_v6 = vrot.slane %v12775_v41, 4  ;;  %v2031_v62 = vpop.permute.xlu1 %2030 }
 0x406   : > { %5911 = vrot.lane.b32.xlu0 %v12367_v3, %s9359_s30  ;;  %v5377_v44 = vsel %vm5329_vm5, %v18186_v56, %v18185_v54  ;;  %v2876_v60 = vsel %vm2860_vm14, %v2849_v63, %v18188_v27  ;;  %v12805_v8 = vmul.f32 %v11032_v43, %v12719_v23  ;;  %v12810_v38 = vadd.f32 %v12678_v25, %v5512_v28 }
 0x407   : > { %v4034_v52 = vsel %vm3637_vm3, %v18187_v53, %v17574_v30  ;;  %v5514_v26 = vadd.f32 %v5377_v44, %v5174_v4  ;;  %v2903_v54 = vsel %vm2887_vm15, %v2876_v60, %v18189_v58  ;;  %v1955_v56 = vpop.permute.xlu0 %1954  ;;  %v18191_v53 = vrot.slane %v12750_v18, 3  ;;  %v18193_v4 = vld [vmem:[#allocation160_spill] sm:$0xff]  ;;  %v18194_v44 = vld [vmem:[#allocation18_spill] sm:$0xff] }
 0x408   : > { %v4165_v16 = vadd.f32 %v4034_v52, %v3824_v0  ;;  %18190 = vst [vmem:[#allocation46_spill] sm:$0xff] %v12810_v38  ;;  %v18192_v30 = vrot.slane %v12533_v21, 3  ;;  %v12819_v0 = vmul.f32 %v11045_v12, %v12719_v23  ;;  %v2742_v63 = vsel %vm1197_vm1, %v18193_v4, %v1953_v29  ;;  %3030 = vst [vmem:[#allocation2 + $0x110] sm:$0xff] %v2903_v54 }
 0x409   : > { %5917 = vrot.lane.b32.xlu1 %v18194_v44, %s9359_s30  ;;  %v17575_v25 = vrot.slane %v12805_v8, 1  ;;  %v12827_v28 = vadd.f32 %v3984_v48, %v12698_v10  ;;  %v2769_v21 = vsel %vm2752_vm11, %v2742_v63, %v2031_v62  ;;  %v18196_v60 = vrot.slane %v12736_v5, 6  ;;  %v18199_v48 = vld [vmem:[#allocation165_spill] sm:$0xff] }
 0x40a   : > { %v4364_v27 = vsel %vm4312_vm10, %v18192_v30, %v18191_v53  ;;  %v18195_v30 = vld [vmem:[#allocation16_spill] sm:$0xff]  ;;  %v18197_v58 = vrot.slane %v12581_v34, 6  ;;  %v2743_v62 = vsel %vm1197_vm1, %v18199_v48, %v1955_v56  ;;  %v2109_v53 = vpop.permute.xlu1 %2108  ;;  %v18201_v34 = vrot.slane %v12549_v17, 1  ;;  %v18203_v48 = vld [vmem:[#allocation67_spill] sm:$0xff] }
 0x40b   : > { %v4495_v52 = vadd.f32 %v4364_v27, %v4165_v16  ;;  %5915 = vrot.lane.b32.xlu0 %v18195_v30, %s9359_s30  ;;  %v18198_v16 = vrot.slane %v12567_v35, 4  ;;  %v12847_v4 = vld [vmem:[#allocation2 + $0x100] sm:$0xff]  ;;  %v12856_v35 = vmul.f32 %v11027_v24, %v12719_v23  ;;  %v18206_v30 = vrot.slane %v12819_v0, 2 }
 0x40c   : > { %v5717_v29 = vsel %vm5669_vm6, %v18197_v58, %v18196_v60  ;;  %v3357_v63 = vsel %vm3297_vm2, %v18201_v34, %v17575_v25  ;;  %v1957_v60 = vpop.permute.xlu0 %1956  ;;  %v2796_v58 = vsel %vm2779_vm12, %v2769_v21, %v2109_v53  ;;  %v4908_v56 = vmul.f32 %v11092_v47, %v12847_v4  ;;  %v18204_v53 = vld [vmem:[#allocation69_spill] sm:$0xff] }
 0x40d   : > { %v4700_v54 = vsel %vm4648_vm4, %v18198_v16, %v17576_v6  ;;  %v12845_v27 = vadd.f32 %v5717_v29, %v5514_v26  ;;  %v5247_v26 = vmul.f32 %v11097_v20, %v12847_v4  ;;  %v5587_v29 = vmul.f32 %v18075_v7, %v12847_v4  ;;  %v18202_v16 = vld [vmem:[#allocation168_spill] sm:$0xff]  ;;  %2534 = vrot.lane.b32.xlu1 %v12160_v37, %s9364_s18  ;;  %v18205_v6 = vld [vmem:[#allocation21_spill] sm:$0xff] }
 0x40e   : > { %v2744_v17 = vsel %vm1197_vm1, %v18202_v16, %v1957_v60  ;;  %v2823_v34 = vsel %vm2806_vm8, %v2796_v58, %v18203_v48  ;;  %v4835_v23 = vadd.f32 %v4700_v54, %v4495_v52  ;;  %v3486_v21 = vadd.f32 %v3357_v63, %v12682_v49  ;;  %v18208_v16 = vld [vmem:[#allocation75_spill] sm:$0xff]  ;;  %v2033_v52 = vpop.permute.xlu1 %2032 }
 0x40f   : > { %18200 = vst [vmem:[#allocation39_spill] sm:$0xff] %v12845_v27  ;;  %v2850_v25 = vsel %vm2833_vm13, %v2823_v34, %v18204_v53  ;;  %5919 = vrot.lane.b32.xlu0 %v18205_v6, %s9359_s30  ;;  %v5040_v10 = vrot.slane %v4908_v56, 4  ;;  %v5380_v44 = vrot.slane %v5247_v26, 5  ;;  %v18207_v60 = vrot.slane %v12610_v19, 2  ;;  %v18209_v56 = vld [vmem:[#allocation77_spill] sm:$0xff]  ;;  %v12901_v34 = vld [vmem:[#allocation2 + $0x110] sm:$0xff] }
 0x410   : > { %v2877_v48 = vsel %vm2860_vm14, %v2850_v25, %v18208_v16  ;;  %v5720_v54 = vrot.slane %v5587_v29, 6  ;;  %v12885_v49 = vmul.f32 %v11050_v61, %v12847_v4  ;;  %v12889_v63 = vmul.f32 %v11080_v39, %v12847_v4  ;;  %v12895_v19 = vpop.permute.xlu0 %2036 }
 0x411   : > { %v3697_v58 = vsel %vm3637_vm3, %v18207_v60, %v18206_v30  ;;  %v12893_v26 = vsel %vm2887_vm15, %v2877_v48, %v18209_v56  ;;  %v2770_v30 = vsel %vm2752_vm11, %v2743_v62, %v2033_v52  ;;  %v18210_v25 = vrot.slane %v12728_v55, 4  ;;  %5923 = vrot.lane.b32.xlu1 %v11984_v32, %s9359_s30 }
 0x412   : > { %v3826_v53 = vadd.f32 %v3697_v58, %v3486_v21  ;;  %v18211_v16 = vrot.slane %v12732_v57, 5  ;;  %v17580_v56 = vrot.slane %v12885_v49, 2  ;;  %v17579_v6 = vrot.slane %v12889_v63, 3  ;;  %v2111_v21 = vpop.permute.xlu1 %2110 }
 0x413   : > { %v5041_v29 = vsel %vm4648_vm4, %v18210_v25, %v5040_v10  ;;  %2612 = vrot.lane.b32.xlu0 %v12160_v37, %s9365_s19  ;;  %v12914_v55 = vmul.f32 %v17928_v11, %v12847_v4  ;;  %v12918_v62 = vmul.f32 %v11092_v47, %v12901_v34  ;;  %v12922_v57 = vmul.f32 %v11097_v20, %v12901_v34 }
 0x414   : > { %v5176_v60 = vadd.f32 %v5041_v29, %v4835_v23  ;;  %v5381_v48 = vsel %vm5329_vm5, %v18211_v16, %v5380_v44  ;;  %v12926_v23 = vmul.f32 %v18075_v7, %v12901_v34  ;;  %v18212_v52 = vrot.slane %v12736_v5, 6  ;;  %v12941_v46 = vpop.permute.xlu0 %2114 }
 0x415   : > { %v18213_v29 = vrot.slane %v12746_v42, 2  ;;  %v18214_v32 = vrot.slane %v12750_v18, 3  ;;  %v17583_v5 = vrot.slane %v12914_v55, 4  ;;  %2690 = vrot.lane.b32.xlu1 %v12160_v37, %s9366_s4  ;;  %v18225_v37 = vld [vmem:[#allocation76_spill] sm:$0xff] }
 0x416   : > { %v5516_v58 = vadd.f32 %v5381_v48, %v5176_v60  ;;  %v5721_v25 = vsel %vm5669_vm6, %v18212_v52, %v5720_v54  ;;  %v2797_v60 = vsel %vm2779_vm12, %v2770_v30, %v2111_v21  ;;  %v17582_v52 = vrot.slane %v12918_v62, 4  ;;  %v2035_v18 = vpop.permute.xlu1 %2034 }
 0x417   : > { %v4038_v16 = vsel %vm3637_vm3, %v18213_v29, %v17580_v56  ;;  %v4368_v31 = vsel %vm4312_vm10, %v18214_v32, %v17579_v6  ;;  %v2824_v42 = vsel %vm2806_vm8, %v2797_v60, %v18215_v22  ;;  %v17581_v29 = vrot.slane %v12922_v57, 5  ;;  %v18216_v6 = vld [vmem:[#allocation73_spill] sm:$0xff]  ;;  %5921 = vrot.lane.b32.xlu0 %v12077_v13, %s9359_s30  ;;  %v18219_v60 = vld [vmem:[#allocation83_spill] sm:$0xff] }
 0x418   : > { %v4167_v48 = vadd.f32 %v4038_v16, %v3826_v53  ;;  %v3150_v32 = vmul.f32 %v11027_v24, %v12847_v4  ;;  %v2851_v30 = vsel %vm2833_vm13, %v2824_v42, %v18216_v6  ;;  %v12958_v53 = vadd.f32 %v5721_v25, %v5516_v58  ;;  %v18220_v25 = vld [vmem:[#allocation85_spill] sm:$0xff] }
 0x419   : > { %v18218_v22 = vrot.slane %v12775_v41, 4  ;;  %v2878_v56 = vsel %vm2860_vm14, %v2851_v30, %v18219_v60  ;;  %v5045_v6 = vsel %vm4648_vm4, %v5040_v10, %v17582_v52  ;;  %v5385_v58 = vsel %vm5329_vm5, %v5380_v44, %v17581_v29  ;;  %5927 = vrot.lane.b32.xlu1 %v12417_v45, %s9359_s30 }
 0x41a   : > { %18217 = vst [vmem:[#allocation40_spill] sm:$0xff] %v12958_v53  ;;  %v4497_v21 = vadd.f32 %v4368_v31, %v4167_v48  ;;  %v12975_v31 = vmul.f32 %v11032_v43, %v12847_v4  ;;  %v12979_v41 = vsel %vm2887_vm15, %v2878_v56, %v18220_v25  ;;  %v1961_v48 = vpop.permute.xlu0 %1960  ;;  %v18221_v30 = vrot.slane %v12926_v23, 6  ;;  %v2113_v29 = vpop.permute.xlu1 %2112 }
 0x41b   : > { %v4704_v16 = vsel %vm4648_vm4, %v18218_v22, %v17583_v5  ;;  %v12986_v10 = vmul.f32 %v11032_v43, %v12901_v34  ;;  %v2771_v44 = vsel %vm2752_vm11, %v2744_v17, %v2035_v18  ;;  %v12994_v56 = vmul.f32 %v11045_v12, %v12847_v4  ;;  %v18223_v4 = vld [vmem:[#allocation163_spill] sm:$0xff] }
 0x41c   : > { %v4837_v42 = vadd.f32 %v4704_v16, %v4497_v21  ;;  %v5725_v22 = vsel %vm5669_vm6, %v5720_v54, %v18221_v30  ;;  %v12998_v21 = vmul.f32 %v11045_v12, %v12901_v34  ;;  %v18222_v54 = vld [vmem:[#allocation27_spill] sm:$0xff]  ;;  %v13005_v17 = vmul.f32 %v11050_v61, %v12901_v34 }
 0x41d   : > { %2536 = vrot.lane.b32.xlu0 %v18222_v54, %s9364_s18  ;;  %v17590_v25 = vrot.slane %v12986_v10, 1  ;;  %v13009_v18 = vmul.f32 %v11050_v61, %v12893_v26  ;;  %v2746_v30 = vsel %vm1197_vm1, %v18223_v4, %v1961_v48  ;;  %v13016_v5 = vmul.f32 %v11080_v39, %v12901_v34  ;;  %6292 = vperm.xlu1 %9104, %v13033_v40  }
 0x41e   : > { %v5178_v16 = vadd.f32 %v5045_v6, %v4837_v42  ;;  %v13020_v6 = vmul.f32 %v11080_v39, %v12893_v26  ;;  %v2039_v42 = vpop.permute.xlu0 %2038  ;;  %v2798_v60 = vsel %vm2779_vm12, %v2771_v44, %v2113_v29  ;;  %v18224_v45 = vrot.slane %v12975_v31, 1 }
 0x41f   : > { %v17591_v4 = vrot.slane %v12994_v56, 2  ;;  %v2773_v13 = vsel %vm2752_vm11, %v2746_v30, %v2039_v42  ;;  %v2825_v3 = vsel %vm2806_vm8, %v2798_v60, %v18225_v37  ;;  %v17592_v37 = vrot.slane %v13009_v18, 2  ;;  %v18230_v42 = vld [vmem:[#allocation82_spill] sm:$0xff] }
 0x420   : > { %v3365_v48 = vsel %vm3297_vm2, %v18224_v45, %v17590_v25  ;;  %v5518_v29 = vadd.f32 %v5385_v58, %v5178_v16  ;;  %v2852_v50 = vsel %vm2833_vm13, %v2825_v3, %v18227_v59  ;;  %v18228_v45 = vld [vmem:[#allocation94_spill] sm:$0xff]  ;;  %v18229_v25 = vrot.slane %v12998_v21, 2 }
 0x421   : > { %v3490_v44 = vadd.f32 %v3365_v48, %v3150_v32  ;;  %5925 = vrot.lane.b32.xlu0 %v18228_v45, %s9359_s30  ;;  %v17594_v60 = vrot.slane %v13016_v5, 3  ;;  %v2879_v58 = vsel %vm2860_vm14, %v2852_v50, %v18230_v42  ;;  %v1959_v32 = vpop.permute.xlu1 %1958  ;;  %v17593_v59 = vrot.slane %v13020_v6, 3  ;;  %v18231_v48 = vld [vmem:[#allocation84_spill] sm:$0xff] }
 0x422   : > { %v3705_v30 = vsel %vm3637_vm3, %v17591_v4, %v18229_v25  ;;  %v4570_v3 = vmul.f32 %v17928_v11, %v12901_v34  ;;  %v13054_v52 = vsel %vm2887_vm15, %v2879_v58, %v18231_v48  ;;  %v13056_v45 = vpop.permute.xlu0 %2118  ;;  %v18232_v25 = vld [vmem:[#allocation161_spill] sm:$0xff]  ;;  %v18233_v50 = vrot.slane %v13005_v17, 2 }
 0x423   : > { %v3830_v16 = vadd.f32 %v3705_v30, %v3490_v44  ;;  %v2745_v4 = vsel %vm1197_vm1, %v18232_v25, %v1959_v32  ;;  %v13067_v30 = vmul.f32 %v17928_v11, %v12893_v26  ;;  %v18234_v58 = vld [vmem:[#allocation37_spill] sm:$0xff]  ;;  %v4376_v32 = vsel %vm4312_vm10, %v17594_v60, %v17593_v59 }
 0x424   : > { %v4046_v44 = vsel %vm3637_vm3, %v18233_v50, %v17592_v37  ;;  %v2772_v42 = vsel %vm2752_vm11, %v2745_v4, %v12895_v19  ;;  %5929 = vrot.lane.b32.xlu1 %v18234_v58, %s9359_s30  ;;  %v4707_v25 = vrot.slane %v4570_v3, 4  ;;  %v4912_v19 = vmul.f32 %v11092_v47, %v12893_v26 }
 0x425   : > { %v4171_v48 = vadd.f32 %v4046_v44, %v3830_v16  ;;  %v2799_v50 = vsel %vm2779_vm12, %v2772_v42, %v12941_v46  ;;  %2614 = vrot.lane.b32.xlu0 %v18222_v54, %s9365_s19  ;;  %v13087_v4 = vmul.f32 %v11092_v47, %v12979_v41  ;;  %v18235_v16 = vld [vmem:[#allocation87_spill] sm:$0xff]  ;;  %v2117_v59 = vpop.permute.xlu1 %2116  ;;  %v13091_v3 = vadd.f32 %v5725_v22, %v5518_v29  ;;  %v18237_v42 = vld [vmem:[#allocation90_spill] sm:$0xff] }
 0x426   : > { %v2826_v44 = vsel %vm2806_vm8, %v2799_v50, %v18235_v16  ;;  %v13095_v46 = vmul.f32 %v11097_v20, %v12979_v41  ;;  %v1965_v58 = vpop.permute.xlu0 %1964  ;;  %v2800_v9 = vsel %vm2779_vm12, %v2773_v13, %v2117_v59  ;;  %v18238_v2 = vrot.slane %v13067_v30, 4  ;;  %v18239_v22 = vld [vmem:[#allocation95_spill] sm:$0xff]  ;;  %v18242_v59 = vld [vmem:[#allocation166_spill] sm:$0xff] }
 0x427   : > { %18236 = vst [vmem:[#allocation47_spill] sm:$0xff] %v13091_v3  ;;  %v4501_v60 = vadd.f32 %v4376_v32, %v4171_v48  ;;  %v2853_v37 = vsel %vm2833_vm13, %v2826_v44, %v18237_v42  ;;  %v5251_v50 = vmul.f32 %v11097_v20, %v12893_v26  ;;  %v18240_v48 = vld [vmem:[#allocation93_spill] sm:$0xff]  ;;  %v5048_v44 = vrot.slane %v4912_v19, 4  ;;  %v18241_v42 = vld [vmem:[#allocation91_spill] sm:$0xff] }
 0x428   : > { %v4712_v33 = vsel %vm4648_vm4, %v4707_v25, %v18238_v2  ;;  %v2880_v29 = vsel %vm2860_vm14, %v2853_v37, %v18239_v22  ;;  %v2827_v32 = vsel %vm2806_vm8, %v2800_v9, %v18240_v48  ;;  %2692 = vrot.lane.b32.xlu1 %v18222_v54, %s9366_s4  ;;  %v2748_v2 = vsel %vm1197_vm1, %v18242_v59, %v1965_v58  ;;  %v18244_v37 = vld [vmem:[#allocation102_spill] sm:$0xff] }
 0x429   : > { %v4841_v16 = vadd.f32 %v4712_v33, %v4501_v60  ;;  %v13113_v13 = vsel %vm2887_vm15, %v2880_v29, %v18241_v42  ;;  %v2854_v40 = vsel %vm2833_vm13, %v2827_v32, %v18243_v51  ;;  %5931 = vrot.lane.b32.xlu0 %v12640_v1, %s9359_s30  ;;  %v17606_v9 = vrot.slane %v13087_v4, 4  ;;  %v1963_v33 = vpop.permute.xlu1 %1962  ;;  %v18245_v29 = vld [vmem:[#allocation98_spill] sm:$0xff]  ;;  %v18248_v1 = vld [vmem:[#allocation169_spill] sm:$0xff] }
 0x42a   : > { %v2881_v22 = vsel %vm2860_vm14, %v2854_v40, %v18244_v37  ;;  %v5591_v19 = vmul.f32 %v18075_v7, %v12893_v26  ;;  %v13129_v58 = vmul.f32 %v18075_v7, %v12979_v41  ;;  %v2043_v48 = vpop.permute.xlu0 %2042  ;;  %v5388_v40 = vrot.slane %v5251_v50, 5 }
 0x42b   : > { %v13133_v51 = vsel %vm2887_vm15, %v2881_v22, %v18245_v29  ;;  %v5053_v32 = vsel %vm4648_vm4, %v5048_v44, %v17606_v9  ;;  %v18246_v42 = vrot.slane %v12975_v31, 1  ;;  %v18247_v59 = vrot.slane %v12805_v8, 1 }
 0x42c   : > { %v2775_v60 = vsel %vm2752_vm11, %v2748_v2, %v2043_v48  ;;  %v2747_v54 = vsel %vm1197_vm1, %v18248_v1, %v1963_v33  ;;  %5935 = vrot.lane.b32.xlu1 %v12845_v27, %s9359_s30  ;;  %v5182_v22 = vadd.f32 %v5053_v32, %v4841_v16  ;;  %v5728_v29 = vrot.slane %v5591_v19, 6  ;;  %v18336_v27 = vld [vmem:[#allocation24_spill] sm:$0xff] }
 0x42d   : > { %v3361_v37 = vsel %vm3297_vm2, %v18247_v59, %v18246_v42  ;;  %2538 = vrot.lane.b32.xlu0 %v18249_v15, %s9364_s18  ;;  %v18250_v50 = vrot.slane %v13095_v46, 5  ;;  %v17608_v8 = vrot.slane %v13129_v58, 6  ;;  %v18251_v2 = vrot.slane %v12994_v56, 2  ;;  %v2041_v48 = vpop.permute.xlu1 %2040 }
 0x42e   : > { %v3488_v42 = vadd.f32 %v3361_v37, %v12856_v35  ;;  %v18252_v1 = vrot.slane %v12819_v0, 2  ;;  %v18253_v19 = vrot.slane %v13005_v17, 2  ;;  %v18254_v32 = vrot.slane %v12885_v49, 2  ;;  %v13173_v37 = vpop.permute.xlu0 %2122 }
 0x42f   : > { %v5393_v31 = vsel %vm5329_vm5, %v5388_v40, %v18250_v50  ;;  %v18255_v50 = vrot.slane %v13016_v5, 3  ;;  %v18256_v9 = vrot.slane %v12889_v63, 3  ;;  %v18257_v56 = vrot.slane %v12914_v55, 4 }
 0x430   : > { %v3701_v33 = vsel %vm3637_vm3, %v18252_v1, %v18251_v2  ;;  %v5522_v16 = vadd.f32 %v5393_v31, %v5182_v22  ;;  %v4042_v59 = vsel %vm3637_vm3, %v18254_v32, %v18253_v19  ;;  %v2774_v22 = vsel %vm2752_vm11, %v2747_v54, %v2041_v48  ;;  %2616 = vrot.lane.b32.xlu1 %v18249_v15, %s9365_s19  ;;  %v18262_v2 = vld [vmem:[#allocation101_spill] sm:$0xff] }
 0x431   : > { %v4372_v35 = vsel %vm4312_vm10, %v18256_v9, %v18255_v50  ;;  %v4708_v0 = vsel %vm4648_vm4, %v18257_v56, %v4707_v25  ;;  %v5733_v49 = vsel %vm5669_vm6, %v5728_v29, %v17608_v8  ;;  %v3828_v17 = vadd.f32 %v3701_v33, %v3488_v42  ;;  %5933 = vrot.lane.b32.xlu0 %v12810_v38, %s9359_s30  ;;  %v2121_v1 = vpop.permute.xlu1 %2120 }
 0x432   : > { %v18258_v31 = vrot.slane %v12918_v62, 4  ;;  %v2801_v63 = vsel %vm2779_vm12, %v2774_v22, %v13056_v45  ;;  %v13186_v55 = vadd.f32 %v5733_v49, %v5522_v16  ;;  %v18260_v25 = vrot.slane %v12922_v57, 5  ;;  %v18264_v16 = vld [vmem:[#allocation108_spill] sm:$0xff]  ;;  %v1969_v32 = vpop.permute.xlu0 %1968  ;;  %v18265_v22 = vld [vmem:[#allocation105_spill] sm:$0xff] }
 0x433   : > { %v18261_v9 = vrot.slane %v12926_v23, 6  ;;  %v2828_v62 = vsel %vm2806_vm8, %v2801_v63, %v18262_v2  ;;  %v4169_v45 = vadd.f32 %v4042_v59, %v3828_v17  ;;  %v13204_v57 = vmul.f32 %v11032_v43, %v12979_v41 }
 0x434   : > { %v5049_v5 = vsel %vm4648_vm4, %v18258_v31, %v5048_v44  ;;  %18259 = vst [vmem:[#allocation49_spill] sm:$0xff] %v13186_v55  ;;  %v5389_v54 = vsel %vm5329_vm5, %v18260_v25, %v5388_v40  ;;  %v13200_v44 = vmul.f32 %v11032_v43, %v12893_v26  ;;  %v18263_v40 = vld [vmem:[#allocation103_spill] sm:$0xff]  ;;  %v13212_v33 = vmul.f32 %v11045_v12, %v12893_v26  ;;  %v18268_v25 = vld [vmem:[#allocation110_spill] sm:$0xff] }
 0x435   : > { %v5729_v42 = vsel %vm5669_vm6, %v18261_v9, %v5728_v29  ;;  %v2855_v23 = vsel %vm2833_vm13, %v2828_v62, %v18263_v40  ;;  %v3154_v29 = vmul.f32 %v11027_v24, %v12893_v26  ;;  %v13216_v48 = vmul.f32 %v11045_v12, %v12979_v41  ;;  %v18266_v26 = vld [vmem:[#allocation107_spill] sm:$0xff]  ;;  %5937 = vrot.lane.b32.xlu1 %v12958_v53, %s9359_s30 }
 0x436   : > { %v2882_v19 = vsel %vm2860_vm14, %v2855_v23, %v18264_v16  ;;  %v2802_v59 = vsel %vm2779_vm12, %v2775_v60, %v2121_v1  ;;  %v4499_v50 = vadd.f32 %v4372_v35, %v4169_v45  ;;  %v13223_v56 = vmul.f32 %v11050_v61, %v12979_v41  ;;  %v18267_v60 = vld [vmem:[#allocation167_spill] sm:$0xff]  ;;  %2694 = vrot.lane.b32.xlu0 %v18249_v15, %s9366_s4  ;;  %v18269_v45 = vld [vmem:[#allocation117_spill] sm:$0xff]  ;;  %v1967_v23 = vpop.permute.xlu1 %1966 }
 0x437   : > { %v13227_v49 = vsel %vm2887_vm15, %v2882_v19, %v18265_v22  ;;  %v2829_v17 = vsel %vm2806_vm8, %v2802_v59, %v18266_v26  ;;  %v17615_v31 = vrot.slane %v13200_v44, 1  ;;  %v17610_v63 = vrot.slane %v13204_v57, 1  ;;  %v2047_v59 = vpop.permute.xlu0 %2046 }
 0x438   : > { %v2750_v35 = vsel %vm1197_vm1, %v18267_v60, %v1969_v32  ;;  %v2856_v9 = vsel %vm2833_vm13, %v2829_v17, %v18268_v25  ;;  %v4839_v2 = vadd.f32 %v4708_v0, %v4499_v50  ;;  %v17607_v62 = vrot.slane %v13216_v48, 2  ;;  %v18270_v32 = vld [vmem:[#allocation111_spill] sm:$0xff]  ;;  %v18271_v17 = vld [vmem:[#allocation170_spill] sm:$0xff] }
 0x439   : > { %v2883_v40 = vsel %vm2860_vm14, %v2856_v9, %v18269_v45  ;;  %v3373_v1 = vsel %vm3297_vm2, %v17615_v31, %v17610_v63  ;;  %v17612_v16 = vrot.slane %v13212_v33, 2  ;;  %v13252_v19 = vmul.f32 %v11050_v61, %v13054_v52  ;;  %v18272_v25 = vld [vmem:[#allocation31_spill] sm:$0xff] }
 0x43a   : > { %v13256_v0 = vsel %vm2887_vm15, %v2883_v40, %v18270_v32  ;;  %v5180_v50 = vadd.f32 %v5049_v5, %v4839_v2  ;;  %v3494_v22 = vadd.f32 %v3373_v1, %v3154_v29  ;;  %v17611_v26 = vrot.slane %v13223_v56, 2  ;;  %2540 = vrot.lane.b32.xlu1 %v18272_v25, %s9364_s18  ;;  %5939 = vrot.lane.b32.xlu0 %v13091_v3, %s9359_s30  ;;  %v2045_v32 = vpop.permute.xlu1 %2044 }
 0x43b   : > { %v2749_v60 = vsel %vm1197_vm1, %v18271_v17, %v1967_v23  ;;  %v3713_v9 = vsel %vm3637_vm3, %v17612_v16, %v17607_v62  ;;  %v17609_v45 = vrot.slane %v13252_v19, 2  ;;  %v13271_v5 = vmul.f32 %v11080_v39, %v12979_v41  ;;  %v18274_v16 = vld [vmem:[#allocation115_spill] sm:$0xff] }
 0x43c   : > { %v5520_v29 = vadd.f32 %v5389_v54, %v5180_v50  ;;  %v3834_v2 = vadd.f32 %v3713_v9, %v3494_v22  ;;  %v13277_v40 = vmul.f32 %v11080_v39, %v13054_v52  ;;  %v13281_v23 = vmul.f32 %v17928_v11, %v12979_v41  ;;  %v1971_v22 = vpop.permute.xlu0 %1970 }
 0x43d   : > { %v2777_v1 = vsel %vm2752_vm11, %v2750_v35, %v2047_v59  ;;  %v4054_v17 = vsel %vm3637_vm3, %v17611_v26, %v17609_v45  ;;  %v13291_v54 = vmul.f32 %v17928_v11, %v13054_v52  ;;  %v13295_v50 = vmul.f32 %v11092_v47, %v13054_v52 }
 0x43e   : > { %v2776_v9 = vsel %vm2752_vm11, %v2749_v60, %v2045_v32  ;;  %v4175_v62 = vadd.f32 %v4054_v17, %v3834_v2  ;;  %v17614_v35 = vrot.slane %v13271_v5, 3  ;;  %v17613_v59 = vrot.slane %v13277_v40, 3  ;;  %5943 = vrot.lane.b32.xlu1 %v13186_v55, %s9359_s30  ;;  %2618 = vrot.lane.b32.xlu0 %v18272_v25, %s9365_s19  ;;  %v18275_v2 = vld [vmem:[#allocation118_spill] sm:$0xff]  ;;  %v2125_v17 = vpop.permute.xlu1 %2124 }
 0x43f   : > { %v2803_v8 = vsel %vm2779_vm12, %v2776_v9, %v13173_v37  ;;  %v13304_v45 = vadd.f32 %v5729_v42, %v5520_v29  ;;  %v17618_v63 = vrot.slane %v13281_v23, 4  ;;  %v17617_v26 = vrot.slane %v13291_v54, 4 }
 0x440   : > { %v2830_v60 = vsel %vm2806_vm8, %v2803_v8, %v18274_v16  ;;  %v4384_v37 = vsel %vm4312_vm10, %v17614_v35, %v17613_v59  ;;  %v13319_v42 = vmul.f32 %v11092_v47, %v13113_v13  ;;  %v5056_v29 = vrot.slane %v13295_v50, 4  ;;  %v18276_v59 = vld [vmem:[#allocation122_spill] sm:$0xff]  ;;  %v2127_v31 = vpop.permute.xlu0 %2126 }
 0x441   : > { %18273 = vst [vmem:[#allocation104_spill] sm:$0xff] %v13304_v45  ;;  %v2857_v32 = vsel %vm2833_vm13, %v2830_v60, %v18275_v2  ;;  %v4505_v8 = vadd.f32 %v4384_v37, %v4175_v62  ;;  %v4720_v16 = vsel %vm4648_vm4, %v17618_v63, %v17617_v26  ;;  %v5255_v9 = vmul.f32 %v11097_v20, %v13054_v52  ;;  %v18277_v60 = vld [vmem:[#allocation119_spill] sm:$0xff]  ;;  %v18278_v2 = vld [vmem:[#allocation121_spill] sm:$0xff] }
 0x442   : > { %v2884_v35 = vsel %vm2860_vm14, %v2857_v32, %v18276_v59  ;;  %v2804_v50 = vsel %vm2779_vm12, %v2777_v1, %v2125_v17  ;;  %v17620_v55 = vrot.slane %v13319_v42, 4  ;;  %v13337_v62 = vmul.f32 %v11097_v20, %v13113_v13  ;;  %2696 = vrot.lane.b32.xlu1 %v18272_v25, %s9366_s4  ;;  %v18279_v63 = vld [vmem:[#allocation125_spill] sm:$0xff]  ;;  %5941 = vrot.lane.b32.xlu0 %v13304_v45, %s9359_s30  ;;  %v18282_v45 = vld [vmem:[#allocation130_spill] sm:$0xff] }
 0x443   : > { %v13341_v37 = vsel %vm2887_vm15, %v2884_v35, %v18277_v60  ;;  %v2831_v26 = vsel %vm2806_vm8, %v2804_v50, %v18278_v2  ;;  %v4845_v59 = vadd.f32 %v4720_v16, %v4505_v8  ;;  %v5396_v32 = vrot.slane %v5255_v9, 5  ;;  %v18280_v60 = vld [vmem:[#allocation80_spill] sm:$0xff] }
 0x444   : > { %v2858_v1 = vsel %vm2833_vm13, %v2831_v26, %v18279_v63  ;;  %v5061_v17 = vsel %vm4648_vm4, %v5056_v29, %v17620_v55  ;;  %v13357_v50 = vmul.f32 %v18075_v7, %v13054_v52  ;;  %v2751_v8 = vsel %vm1197_vm1, %v18280_v60, %v1971_v22  ;;  %v18281_v16 = vld [vmem:[#allocation124_spill] sm:$0xff]  ;;  %v2049_v63 = vpop.permute.xlu1 %2048  ;;  %v2519_v35 = vpop.permute.xlu0 %2518 }
 0x445   : > { %v2885_v9 = vsel %vm2860_vm14, %v2858_v1, %v18281_v16  ;;  %v5186_v26 = vadd.f32 %v5061_v17, %v4845_v59  ;;  %v13365_v2 = vmul.f32 %v18075_v7, %v13113_v13  ;;  %v2778_v25 = vsel %vm2752_vm11, %v2751_v8, %v2049_v63  ;;  %v18284_v16 = vld [vmem:[#allocation20_spill] sm:$0xff]  ;;  %v18285_v8 = vld [vmem:[#allocation127_spill] sm:$0xff] }
 0x446   : > { %v13369_v55 = vsel %vm2887_vm15, %v2885_v9, %v18282_v45  ;;  %v18283_v3 = vrot.slane %v13337_v62, 5  ;;  %v3152_v1 = vmul.f32 %v11027_v24, %v12901_v34  ;;  %v2805_v59 = vsel %vm2779_vm12, %v2778_v25, %v2127_v31 }
 0x447   : > { %3048 = vst [vmem:[#allocation2 + $0x1a0] sm:$0xff] %v13369_v55  ;;  %v5736_v60 = vrot.slane %v13357_v50, 6  ;;  %v17624_v45 = vrot.slane %v13365_v2, 6  ;;  %v2927_v9 = vsel %vm1197_vm1, %v18284_v16, %v2519_v35  ;;  %v2832_v63 = vsel %vm2806_vm8, %v2805_v59, %v18285_v8  ;;  %v18293_v8 = vld [vmem:[#allocation132_spill] sm:$0xff] }
 0x448   : > { %v5401_v22 = vsel %vm5329_vm5, %v5396_v32, %v18283_v3  ;;  %v18286_v3 = vld [vmem:[#allocation33_spill] sm:$0xff]  ;;  %v18287_v34 = vrot.slane %v13200_v44, 1  ;;  %v18288_v53 = vrot.slane %v12986_v10, 1  ;;  %v18289_v25 = vrot.slane %v12667_v36, 3  ;;  %v2597_v59 = vpop.permute.xlu1 %2596 }
 0x449   : > { %v5526_v17 = vadd.f32 %v5401_v22, %v5186_v26  ;;  %2542 = vrot.lane.b32.xlu0 %v18286_v3, %s9364_s18  ;;  %v18290_v26 = vld [vmem:[#allocation129_spill] sm:$0xff]  ;;  %v5741_v22 = vsel %vm5669_vm6, %v5736_v60, %v17624_v45  ;;  %v18291_v44 = vrot.slane %v13212_v33, 2  ;;  %v18292_v10 = vrot.slane %v12998_v21, 2 }
 0x44a   : > { %v3369_v31 = vsel %vm3297_vm2, %v18288_v53, %v18287_v34  ;;  %v13395_v50 = vadd.f32 %v18289_v25, %v12827_v28  ;;  %v2859_v35 = vsel %vm2833_vm13, %v2832_v63, %v18290_v26  ;;  %v2675_v25 = vpop.permute.xlu0 %2674  ;;  %v2953_v63 = vsel %vm2752_vm11, %v2927_v9, %v2597_v59 }
 0x44b   : > { %v3492_v16 = vadd.f32 %v3369_v31, %v3152_v1  ;;  %v3709_v53 = vsel %vm3637_vm3, %v18292_v10, %v18291_v44  ;;  %v2886_v34 = vsel %vm2860_vm14, %v2859_v35, %v18293_v8  ;;  %v13409_v28 = vadd.f32 %v5741_v22, %v5526_v17  ;;  %v18297_v31 = vld [vmem:[#allocation135_spill] sm:$0xff] }
 0x44c   : > { %v18295_v26 = vrot.slane %v13223_v56, 2  ;;  %v18296_v45 = vrot.slane %v13009_v18, 2  ;;  %v13419_v33 = vsel %vm2887_vm15, %v2886_v34, %v18297_v31  ;;  %v2979_v21 = vsel %vm2779_vm12, %v2953_v63, %v2675_v25  ;;  %v18304_v63 = vld [vmem:[#allocation23_spill] sm:$0xff] }
 0x44d   : > { %18294 = vst [vmem:[#allocation43_spill] sm:$0xff] %v13409_v28  ;;  %v3832_v44 = vadd.f32 %v3709_v53, %v3492_v16  ;;  %v18298_v35 = vrot.slane %v13271_v5, 3  ;;  %v18299_v17 = vrot.slane %v13020_v6, 3  ;;  %3050 = vst [vmem:[#allocation2 + $0x1b0] sm:$0xff] %v13419_v33  ;;  %5947 = vrot.lane.b32.xlu1 %v13409_v28, %s9359_s30  ;;  %v18300_v18 = vrot.slane %v13281_v23, 4  ;;  %v2599_v53 = vpop.permute.xlu1 %2598 }
 0x44e   : > { %v4050_v1 = vsel %vm3637_vm3, %v18296_v45, %v18295_v26  ;;  %3027 = vst.msk [vmem:[#allocation2 + $0xf8] sm:$0xff] %vm2806_vm8, %v2979_v21  ;;  %v18301_v56 = vrot.slane %v13067_v30, 4  ;;  %v18302_v9 = vrot.slane %v13087_v4, 4  ;;  %v18303_v6 = vrot.slane %v13095_v46, 5 }
 0x44f   : > { %v4380_v22 = vsel %vm4312_vm10, %v18299_v17, %v18298_v35  ;;  %v3229_v16 = vmul.f32 %v11032_v43, %v13054_v52  ;;  %v4173_v10 = vadd.f32 %v4050_v1, %v3832_v44  ;;  %v3569_v23 = vmul.f32 %v11045_v12, %v13054_v52 }
 0x450   : > { %v4716_v45 = vsel %vm4648_vm4, %v18301_v56, %v18300_v18  ;;  %v5057_v5 = vsel %vm4648_vm4, %v18302_v9, %v5056_v29  ;;  %v5397_v59 = vsel %vm5329_vm5, %v18303_v6, %v5396_v32  ;;  %v13448_v30 = vmul.f32 %v11050_v61, %v13113_v13  ;;  %v2521_v29 = vpop.permute.xlu0 %2520 }
 0x451   : > { %v13452_v4 = vmul.f32 %v11080_v39, %v13113_v13  ;;  %v3156_v46 = vmul.f32 %v11027_v24, %v12979_v41  ;;  %v3376_v32 = vrot.slane %v3229_v16, 1  ;;  %v4578_v8 = vmul.f32 %v17928_v11, %v13113_v13  ;;  %2620 = vrot.lane.b32.xlu1 %v18286_v3, %s9365_s19  ;;  %v2677_v16 = vpop.permute.xlu1 %2676 }
 0x452   : > { %v13460_v34 = vmul.f32 %v11092_v47, %v13133_v51  ;;  %v4503_v25 = vadd.f32 %v4380_v22, %v4173_v10  ;;  %v2928_v26 = vsel %vm1197_vm1, %v18304_v63, %v2521_v29  ;;  %v3716_v1 = vrot.slane %v3569_v23, 2  ;;  %v18312_v63 = vld [vmem:[#allocation25_spill] sm:$0xff] }
 0x453   : > { %v4057_v31 = vrot.slane %v13448_v30, 2  ;;  %v18305_v41 = vrot.slane %v13204_v57, 1  ;;  %v4387_v44 = vrot.slane %v13452_v4, 3  ;;  %v4723_v35 = vrot.slane %v4578_v8, 4 }
 0x454   : > { %v13473_v17 = vmul.f32 %v11097_v20, %v13133_v51  ;;  %v4843_v22 = vadd.f32 %v4716_v45, %v4503_v25  ;;  %v18306_v18 = vrot.slane %v13129_v58, 6  ;;  %v2954_v9 = vsel %vm2752_vm11, %v2928_v26, %v2599_v53  ;;  %v2523_v29 = vpop.permute.xlu0 %2522 }
 0x455   : > { %v3377_v21 = vsel %vm3297_vm2, %v18305_v41, %v3376_v32  ;;  %v18307_v57 = vrot.slane %v13216_v48, 2  ;;  %v18308_v23 = vrot.slane %v13252_v19, 2  ;;  %v18309_v4 = vrot.slane %v13277_v40, 3 }
 0x456   : > { %v5737_v56 = vsel %vm5669_vm6, %v18306_v18, %v5736_v60  ;;  %v3496_v6 = vadd.f32 %v3377_v21, %v3156_v46  ;;  %v5064_v58 = vrot.slane %v13460_v34, 4  ;;  %v5184_v60 = vadd.f32 %v5057_v5, %v4843_v22 }
 0x457   : > { %v3717_v10 = vsel %vm3637_vm3, %v18307_v57, %v3716_v1  ;;  %v4058_v30 = vsel %vm3637_vm3, %v18308_v23, %v4057_v31  ;;  %v4388_v45 = vsel %vm4312_vm10, %v18309_v4, %v4387_v44  ;;  %v18310_v53 = vrot.slane %v13291_v54, 4 }
 0x458   : > { %v3836_v8 = vadd.f32 %v3717_v10, %v3496_v6  ;;  %v13494_v48 = vmul.f32 %v18075_v7, %v13133_v51  ;;  %v18311_v19 = vrot.slane %v13319_v42, 4  ;;  %v5404_v40 = vrot.slane %v13473_v17, 5 }
 0x459   : > { %v4724_v46 = vsel %vm4648_vm4, %v18310_v53, %v4723_v35  ;;  %v13502_v34 = vsel %vm1197_vm1, %v18312_v63, %v2523_v29  ;;  %v2980_v5 = vsel %vm2779_vm12, %v2954_v9, %v2677_v16  ;;  %v5524_v26 = vadd.f32 %v5397_v59, %v5184_v60 }
 0x45a   : > { %v5065_v25 = vsel %vm4648_vm4, %v18311_v19, %v5064_v58  ;;  %v4177_v54 = vadd.f32 %v4058_v30, %v3836_v8  ;;  %v5744_v41 = vrot.slane %v13494_v48, 6  ;;  %3029 = vst.msk [vmem:[#allocation2 + $0x108] sm:$0xff] %vm2806_vm8, %v2980_v5  ;;  %v3231_v21 = vmul.f32 %v11032_v43, %v13113_v13 }
 0x45b   : > { %v3571_v42 = vmul.f32 %v11045_v12, %v13113_v13  ;;  %v3913_v22 = vmul.f32 %v11050_v61, %v13133_v51  ;;  %v13515_v18 = vmul.f32 %v11080_v39, %v13133_v51  ;;  %v13519_v59 = vmul.f32 %v17928_v11, %v13133_v51 }
 0x45c   : > { %v13521_v9 = vadd.f32 %v5737_v56, %v5524_v26  ;;  %v4507_v6 = vadd.f32 %v4388_v45, %v4177_v54  ;;  %v3158_v16 = vmul.f32 %v11027_v24, %v13054_v52  ;;  %v3380_v57 = vrot.slane %v3231_v21, 1 }
 0x45d   : > { %v3720_v10 = vrot.slane %v3571_v42, 2  ;;  %v4061_v23 = vrot.slane %v3913_v22, 2  ;;  %v4391_v30 = vrot.slane %v13515_v18, 3  ;;  %v4727_v4 = vrot.slane %v13519_v59, 4 }
 0x45e   : > { %18313 = vst [vmem:[#allocation45_spill] sm:$0xff] %v13521_v9  ;;  %5945 = vrot.lane.b32.xlu0 %v13521_v9, %s9359_s30  ;;  %v4847_v29 = vadd.f32 %v4724_v46, %v4507_v6  ;;  %v3381_v60 = vsel %vm3297_vm2, %v3376_v32, %v3380_v57  ;;  %v13532_v56 = vmul.f32 %v11092_v47, %v13227_v49  ;;  %v18314_v45 = vrot.slane %v13337_v62, 5 }
 0x45f   : > { %v13536_v52 = vmul.f32 %v11097_v20, %v13227_v49  ;;  %v18315_v53 = vrot.slane %v13365_v2, 6  ;;  %v3498_v48 = vadd.f32 %v3381_v60, %v3158_v16  ;;  %v3721_v32 = vsel %vm3637_vm3, %v3716_v1, %v3720_v10 }
 0x460   : > { %v5405_v8 = vsel %vm5329_vm5, %v18314_v45, %v5404_v40  ;;  %v5188_v19 = vadd.f32 %v5065_v25, %v4847_v29  ;;  %v4062_v63 = vsel %vm3637_vm3, %v4057_v31, %v4061_v23  ;;  %v4392_v5 = vsel %vm4312_vm10, %v4387_v44, %v4391_v30  ;;  %v2601_v25 = vpop.permute.xlu1 %2600 }
 0x461   : > { %v5745_v46 = vsel %vm5669_vm6, %v18315_v53, %v5744_v41  ;;  %v4728_v26 = vsel %vm4648_vm4, %v4723_v35, %v4727_v4  ;;  %v3838_v54 = vadd.f32 %v3721_v32, %v3498_v48  ;;  %v5068_v21 = vrot.slane %v13532_v56, 4 }
 0x462   : > { %v13553_v62 = vmul.f32 %v18075_v7, %v13227_v49  ;;  %v13557_v2 = vmul.f32 %v11032_v43, %v13133_v51  ;;  %2698 = vrot.lane.b32.xlu0 %v18286_v3, %s9366_s4  ;;  %v5528_v1 = vadd.f32 %v5405_v8, %v5188_v19  ;;  %v5408_v31 = vrot.slane %v13536_v52, 5 }
 0x463   : > { %v3160_v44 = vmul.f32 %v11027_v24, %v13113_v13  ;;  %v13566_v35 = vmul.f32 %v11045_v12, %v13133_v51  ;;  %v4179_v42 = vadd.f32 %v4062_v63, %v3838_v54  ;;  %v13572_v59 = vmul.f32 %v11050_v61, %v13227_v49 }
 0x464   : > { %v5748_v22 = vrot.slane %v13553_v62, 6  ;;  %v3384_v18 = vrot.slane %v13557_v2, 1  ;;  %v13574_v6 = vadd.f32 %v5745_v46, %v5528_v1  ;;  %v13579_v13 = vmul.f32 %v11080_v39, %v13227_v49  ;;  %v13612_v2 = vpop.permute.xlu1 %2524 }
 0x465   : > { %v3724_v16 = vrot.slane %v13566_v35, 2  ;;  %v13583_v29 = vmul.f32 %v17928_v11, %v13227_v49  ;;  %v4509_v60 = vadd.f32 %v4392_v5, %v4179_v42  ;;  %v5069_v56 = vsel %vm4648_vm4, %v5064_v58, %v5068_v21  ;;  %v2679_v5 = vpop.permute.xlu0 %2678 }
 0x466   : > { %18316 = vst [vmem:[#allocation51_spill] sm:$0xff] %v13574_v6  ;;  %v3385_v45 = vsel %vm3297_vm2, %v3380_v57, %v3384_v18  ;;  %v4065_v8 = vrot.slane %v13572_v59, 2  ;;  %5949 = vrot.lane.b32.xlu1 %v13574_v6, %s9359_s30  ;;  %v4395_v48 = vrot.slane %v13579_v13, 3  ;;  %v4924_v58 = vmul.f32 %v11092_v47, %v13256_v0 }
 0x467   : > { %v3500_v53 = vadd.f32 %v3385_v45, %v3160_v44  ;;  %v3725_v46 = vsel %vm3637_vm3, %v3720_v10, %v3724_v16  ;;  %v4731_v32 = vrot.slane %v13583_v29, 4  ;;  %v4849_v19 = vadd.f32 %v4728_v26, %v4509_v60 }
 0x468   : > { %v4066_v63 = vsel %vm3637_vm3, %v4061_v23, %v4065_v8  ;;  %v13598_v57 = vmul.f32 %v11097_v20, %v13256_v0  ;;  %v5409_v10 = vsel %vm5329_vm5, %v5404_v40, %v5408_v31  ;;  %v5749_v26 = vsel %vm5669_vm6, %v5744_v41, %v5748_v22 }
 0x469   : > { %v3840_v54 = vadd.f32 %v3725_v46, %v3500_v53  ;;  %v13610_v23 = vmul.f32 %v18075_v7, %v13256_v0  ;;  %v5190_v1 = vadd.f32 %v5069_v56, %v4849_v19  ;;  %v4396_v44 = vsel %vm4312_vm10, %v4391_v30, %v4395_v48  ;;  %v13631_v45 = vpop.permute.xlu0 %9122 }
 0x46a   : > { %v5072_v35 = vrot.slane %v4924_v58, 4  ;;  %v2955_v17 = vsel %vm2752_vm11, %v13502_v34, %v2601_v25  ;;  %v4732_v40 = vsel %vm4648_vm4, %v4727_v4, %v4731_v32  ;;  %v17628_v59 = vrot.slane %v13598_v57, 5 }
 0x46b   : > { %v4181_v42 = vadd.f32 %v4066_v63, %v3840_v54  ;;  %v2981_v41 = vsel %vm2779_vm12, %v2955_v17, %v2679_v5  ;;  %v5530_v13 = vadd.f32 %v5409_v10, %v5190_v1  ;;  %v17627_v29 = vrot.slane %v13610_v23, 6  ;;  %v13647_v10 = vpop.permute.xlu1 %2602 }
 0x46c   : > { %3031 = vst.msk [vmem:[#allocation2 + $0x118] sm:$0xff] %vm2806_vm8, %v2981_v41  ;;  %v3162_v60 = vmul.f32 %v11027_v24, %v13133_v51  ;;  %v3235_v30 = vmul.f32 %v11032_v43, %v13227_v49  ;;  %v5073_v34 = vsel %vm4648_vm4, %v5068_v21, %v5072_v35  ;;  %v3575_v4 = vmul.f32 %v11045_v12, %v13227_v49 }
 0x46d   : > { %v4511_v56 = vadd.f32 %v4396_v44, %v4181_v42  ;;  %v3917_v25 = vmul.f32 %v11050_v61, %v13256_v0  ;;  %v13633_v53 = vadd.f32 %v5749_v26, %v5530_v13  ;;  %v13637_v51 = vmul.f32 %v11080_v39, %v13256_v0 }
 0x46e   : > { %v3388_v46 = vrot.slane %v3235_v30, 1  ;;  %v13641_v19 = vmul.f32 %v17928_v11, %v13256_v0  ;;  %v3728_v63 = vrot.slane %v3575_v4, 2  ;;  %v13645_v5 = vmul.f32 %v11092_v47, %v13341_v37  ;;  %v13663_v30 = vld [vmem:[#allocation2 + $0x28] sm:$0xff] }
 0x46f   : > { %18317 = vst [vmem:[#allocation52_spill] sm:$0xff] %v13633_v53  ;;  %v4851_v21 = vadd.f32 %v4732_v40, %v4511_v56  ;;  %v4069_v58 = vrot.slane %v3917_v25, 2  ;;  %5951 = vrot.lane.b32.xlu0 %v13633_v53, %s9359_s30  ;;  %v4399_v54 = vrot.slane %v13637_v51, 3  ;;  %v13656_v44 = vmul.f32 %v11097_v20, %v13341_v37  ;;  %v13658_v40 = vpop.permute.xlu0 %2680  ;;  %v18319_v56 = vld [vmem:[#allocation137_spill] sm:$0xff] }
 0x470   : > { %v3389_v26 = vsel %vm3297_vm2, %v3384_v18, %v3388_v46  ;;  %v17626_v1 = vrot.slane %v13641_v19, 4  ;;  %v18318_v41 = vrot.slane %v12691_v14, 4  ;;  %v13667_v18 = vmul.f32 %v13663_v30, %v18319_v56 }
 0x471   : > { %v5192_v17 = vadd.f32 %v5073_v34, %v4851_v21  ;;  %v3502_v42 = vadd.f32 %v3389_v26, %v3162_v60  ;;  %v5413_v4 = vsel %vm5329_vm5, %v5408_v31, %v17628_v59  ;;  %v3729_v60 = vsel %vm3637_vm3, %v3724_v16, %v3728_v63 }
 0x472   : > { %v4810_v13 = vadd.f32 %v18318_v41, %v13395_v50  ;;  %v4070_v34 = vsel %vm3637_vm3, %v4065_v8, %v4069_v58  ;;  %v17625_v25 = vrot.slane %v13645_v5, 4  ;;  %v5753_v50 = vsel %vm5669_vm6, %v5748_v22, %v17627_v29  ;;  %v18323_v29 = vld [vmem:[#allocation99_spill] sm:$0xff] }
 0x473   : > { %v5532_v51 = vadd.f32 %v5413_v4, %v5192_v17  ;;  %v3842_v21 = vadd.f32 %v3729_v60, %v3502_v42  ;;  %v13684_v26 = vmul.f32 %v18075_v7, %v13341_v37  ;;  %v4400_v52 = vsel %vm4312_vm10, %v4395_v48, %v4399_v54  ;;  %v13702_v48 = vpop.permute.xlu1 %2526  ;;  %v13704_v41 = vpop.permute.xlu0 %2604 }
 0x474   : > { %v4736_v31 = vsel %vm4648_vm4, %v4731_v32, %v17626_v1  ;;  %v3237_v8 = vmul.f32 %v11032_v43, %v13256_v0  ;;  %v5077_v22 = vsel %vm4648_vm4, %v5072_v35, %v17625_v25  ;;  %v13700_v42 = vmul.f32 %v11045_v12, %v13256_v0  ;;  %v4525_v35 = vld [vmem:[#allocation2 + $0x1c0] sm:$0x1] }
 0x475   : > { %v13693_v17 = vadd.f32 %v5753_v50, %v5532_v51  ;;  %v4183_v62 = vadd.f32 %v4070_v34, %v3842_v21  ;;  %v3919_v4 = vmul.f32 %v11050_v61, %v13341_v37  ;;  %v13710_v60 = vmul.f32 %v11080_v39, %v13341_v37  ;;  %v18321_v50 = vld [vmem:[#allocation41_spill] sm:$0xff] }
 0x476   : > { %v3392_v32 = vrot.slane %v3237_v8, 1  ;;  %v13714_v34 = vmul.f32 %v17928_v11, %v13341_v37  ;;  %v3164_v21 = vmul.f32 %v11027_v24, %v13227_v49  ;;  %v3732_v8 = vrot.slane %v13700_v42, 2 }
 0x477   : > { %18320 = vst [vmem:[#allocation48_spill] sm:$0xff] %v13693_v17  ;;  %5953 = vrot.lane.b32.xlu1 %v13693_v17, %s9359_s30  ;;  %v4513_v51 = vadd.f32 %v4400_v52, %v4183_v62  ;;  %v4073_v1 = vrot.slane %v3919_v4, 2  ;;  %v13726_v59 = vmul.f32 %v11092_v47, %v13369_v55  ;;  %v13729_v52 = vmul.f32 %v17928_v11, %v4525_v35  ;;  %v13731_v62 = vpop.permute.xlu0 %2528 }
 0x478   : > { %v3393_v25 = vsel %vm3297_vm2, %v3388_v46, %v3392_v32  ;;  %v18322_v49 = vrot.slane %v18321_v50, 4  ;;  %v3733_v46 = vsel %vm3637_vm3, %v3728_v63, %v3732_v8  ;;  %v13742_v6 = vmul.f32 %v18323_v29, %v11092_v47  ;;  %v3104_v50 = vld [vmem:[#allocation2 + $0x1a0] sm:$0x1f] }
 0x479   : > { %v4853_v16 = vadd.f32 %v4736_v31, %v4513_v51  ;;  %v3504_v53 = vadd.f32 %v3393_v25, %v3164_v21  ;;  %v4074_v42 = vsel %vm3637_vm3, %v4069_v58, %v4073_v1  ;;  %v18324_v31 = vrot.slane %v13656_v44, 5 }
 0x47a   : > { %v13735_v17 = vadd.f32 %v18322_v49, %v4810_v13  ;;  %v18325_v35 = vrot.slane %v13598_v57, 5  ;;  %v18326_v13 = vrot.slane %v13684_v26, 6  ;;  %v18327_v21 = vrot.slane %v13610_v23, 6  ;;  %v13754_v49 = vpop.permute.xlu1 %2682 }
 0x47b   : > { %v5194_v25 = vadd.f32 %v5077_v22, %v4853_v16  ;;  %v3844_v58 = vadd.f32 %v3733_v46, %v3504_v53  ;;  %v18328_v4 = vrot.slane %v13710_v60, 3  ;;  %v13762_v57 = vmul.f32 %v11097_v20, %v13369_v55 }
 0x47c   : > { %v5417_v51 = vsel %vm5329_vm5, %v18325_v35, %v18324_v31  ;;  %v5757_v63 = vsel %vm5669_vm6, %v18327_v21, %v18326_v13  ;;  %v13766_v22 = vmul.f32 %v11032_v43, %v13341_v37  ;;  %v13770_v53 = vmul.f32 %v18075_v7, %v13369_v55 }
 0x47d   : > { %v4404_v9 = vsel %vm4312_vm10, %v4399_v54, %v18328_v4  ;;  %v5534_v23 = vadd.f32 %v5417_v51, %v5194_v25  ;;  %v4185_v31 = vadd.f32 %v4074_v42, %v3844_v58  ;;  %v13774_v46 = vmul.f32 %v11045_v12, %v13341_v37  ;;  %v13776_v54 = vpop.permute.xlu0 %2606 }
 0x47e   : > { %v18329_v4 = vrot.slane %v13714_v34, 4  ;;  %v18330_v35 = vrot.slane %v13641_v19, 4  ;;  %v17635_v21 = vrot.slane %v13766_v22, 1  ;;  %v13786_v42 = vmul.f32 %v11050_v61, %v13369_v55  ;;  %v13797_v28 = vpop.permute.xlu1 %9127 }
 0x47f   : > { %v13790_v25 = vmul.f32 %v11080_v39, %v13369_v55  ;;  %v13792_v51 = vadd.f32 %v5757_v63, %v5534_v23  ;;  %v4515_v58 = vadd.f32 %v4404_v9, %v4185_v31  ;;  %v3166_v16 = vmul.f32 %v11027_v24, %v13256_v0  ;;  %v4867_v31 = vld [vmem:[#allocation2 + $0x1d0] sm:$0x1] }
 0x480   : > { %v4740_v13 = vsel %vm4648_vm4, %v18330_v35, %v18329_v4  ;;  %v5420_v4 = vrot.slane %v13762_v57, 5  ;;  %v3397_v35 = vsel %vm3297_vm2, %v3392_v32, %v17635_v21  ;;  %v13806_v63 = vmul.f32 %v17928_v11, %v13369_v55 }
 0x481   : > { %18331 = vst [vmem:[#allocation50_spill] sm:$0xff] %v13792_v51  ;;  %5955 = vrot.lane.b32.xlu0 %v13792_v51, %s9359_s30  ;;  %v4855_v0 = vadd.f32 %v4740_v13, %v4515_v58  ;;  %v5760_v9 = vrot.slane %v13770_v53, 6  ;;  %v3506_v23 = vadd.f32 %v3397_v35, %v3166_v16  ;;  %v13813_v57 = vmul.f32 %v11092_v47, %v13419_v33  ;;  %v13815_v19 = vpop.permute.xlu0 %2530  ;;  %v3174_v35 = vld [vmem:[#allocation2 + $0x1a0] sm:$0x3f] }
 0x482   : > { %v18332_v32 = vrot.slane %v13726_v59, 4  ;;  %v18333_v21 = vrot.slane %v13645_v5, 4  ;;  %v18334_v3 = vrot.slane %v13774_v46, 2  ;;  %v18335_v53 = vrot.slane %v13786_v42, 2 }
 0x483   : > { %v13832_v5 = vmul.f32 %v11097_v20, %v13419_v33 }
 0x484   : > { %v5081_v55 = vsel %vm4648_vm4, %v18333_v21, %v18332_v32  ;;  %v3737_v13 = vsel %vm3637_vm3, %v3732_v8, %v18334_v3  ;;  %v4078_v16 = vsel %vm3637_vm3, %v4073_v1, %v18335_v53  ;;  %v3514_v21 = vld [vmem:[#allocation2 + $0x1a0] sm:$0x7f]  ;;  %v3856_v32 = vld [vmem:[#allocation2 + $0x1b0] sm:$0x7f]  ;;  %v2930_v3 = vsel %vm1197_vm1, %v18336_v27, %v13612_v2  ;;  %v13849_v27 = vpop.permute.xlu1 %2684 }
 0x485   : > { %v5196_v51 = vadd.f32 %v5081_v55, %v4855_v0  ;;  %v3846_v38 = vadd.f32 %v3737_v13, %v3506_v23  ;;  %v18337_v8 = vrot.slane %v13656_v44, 5  ;;  %v13842_v0 = vmul.f32 %v18075_v7, %v13419_v33  ;;  %v13851_v2 = vpop.permute.xlu0 %2686 }
 0x486   : > { %v4934_v23 = vmul.f32 %v11092_v47, %v4867_v31  ;;  %v18338_v13 = vrot.slane %v13684_v26, 6  ;;  %v18339_v44 = vrot.slane %v13790_v25, 3  ;;  %v3241_v47 = vmul.f32 %v11032_v43, %v3174_v35 }
 0x487   : > { %v5421_v1 = vsel %vm5329_vm5, %v18337_v8, %v5420_v4  ;;  %v4187_v15 = vadd.f32 %v4078_v16, %v3846_v38  ;;  %v18340_v8 = vrot.slane %v13710_v60, 3  ;;  %v3581_v26 = vmul.f32 %v11045_v12, %v3514_v21 }
 0x488   : > { %v5536_v55 = vadd.f32 %v5421_v1, %v5196_v51  ;;  %v5761_v53 = vsel %vm5669_vm6, %v18338_v13, %v5760_v9  ;;  %v3923_v51 = vmul.f32 %v11050_v61, %v3856_v32  ;;  %v18342_v16 = vrot.slane %v13806_v63, 4  ;;  %v5206_v61 = vld [vmem:[#allocation2 + $0x1d0] sm:$0x3] }
 0x489   : > { %v4408_v56 = vsel %vm4312_vm10, %v18340_v8, %v18339_v44  ;;  %v18343_v1 = vrot.slane %v13714_v34, 4  ;;  %v5424_v58 = vrot.slane %v13832_v5, 5  ;;  %v5764_v60 = vrot.slane %v13842_v0, 6  ;;  %v5546_v8 = vld [vmem:[#allocation2 + $0x1d0] sm:$0x7] }
 0x48a   : > { %v13861_v38 = vadd.f32 %v5761_v53, %v5536_v55  ;;  %v4517_v31 = vadd.f32 %v4408_v56, %v4187_v15  ;;  %v3170_v44 = vmul.f32 %v11027_v24, %v3104_v50  ;;  %v3400_v43 = vrot.slane %v3241_v47, 1  ;;  %v18366_v0 = vld [vmem:[#allocation138_spill] sm:$0xff] }
 0x48b   : > { %v4744_v13 = vsel %vm4648_vm4, %v18343_v1, %v18342_v16  ;;  %v13873_v12 = vmul.f32 %v17928_v11, %v13419_v33  ;;  %v2956_v15 = vsel %vm2752_vm11, %v2930_v3, %v13647_v10  ;;  %v18344_v34 = vrot.slane %v13813_v57, 4  ;;  %v2609_v16 = vpop.permute.xlu1 %2608  ;;  %v13897_v1 = vpop.permute.xlu0 %9132 }
 0x48c   : > { %18341 = vst [vmem:[#allocation114_spill] sm:$0xff] %v13861_v38  ;;  %5957 = vrot.lane.b32.xlu1 %v13861_v38, %s9359_s30  ;;  %v4857_v56 = vadd.f32 %v4744_v13, %v4517_v31  ;;  %v18345_v35 = vrot.slane %v13726_v59, 4  ;;  %v13886_v50 = vmul.f32 %v18323_v29, %v11097_v20  ;;  %v3510_v11 = vadd.f32 %v3400_v43, %v3170_v44  ;;  %v18346_v59 = vld [vmem:[#allocation29_spill] sm:$0xff] }
 0x48d   : > { %v3740_v32 = vrot.slane %v3581_v26, 2  ;;  %v4081_v55 = vrot.slane %v3923_v51, 2  ;;  %v4258_v53 = vmul.f32 %v11080_v39, %v13419_v33  ;;  %v5425_v10 = vsel %vm5329_vm5, %v5420_v4, %v5424_v58  ;;  %18347 = vst [vmem:[#allocation116_spill] sm:$0xff] %v13897_v1 }
 0x48e   : > { %v5085_v21 = vsel %vm4648_vm4, %v18345_v35, %v18344_v34  ;;  %v2931_v3 = vsel %vm1197_vm1, %v18346_v59, %v13702_v48  ;;  %v5273_v31 = vmul.f32 %v11097_v20, %v5206_v61  ;;  %v5765_v26 = vsel %vm5669_vm6, %v5760_v9, %v5764_v60 }
 0x48f   : > { %v5198_v47 = vadd.f32 %v5085_v21, %v4857_v56  ;;  %v3850_v39 = vadd.f32 %v3740_v32, %v3510_v11  ;;  %v4747_v33 = vrot.slane %v13873_v12, 4  ;;  %v4751_v51 = vrot.slane %v13729_v52, 4 }
 0x490   : > { %v5092_v4 = vrot.slane %v4934_v23, 4  ;;  %v5613_v44 = vmul.f32 %v18075_v7, %v5546_v8  ;;  %v3168_v48 = vmul.f32 %v11027_v24, %v13341_v37  ;;  %v4411_v61 = vrot.slane %v4258_v53, 3  ;;  %v2533_v8 = vpop.permute.xlu1 %2532 }
 0x491   : > { %v5538_v13 = vadd.f32 %v5425_v10, %v5198_v47  ;;  %v4191_v20 = vadd.f32 %v4081_v55, %v3850_v39  ;;  %v5611_v56 = vmul.f32 %v18323_v29, %v18075_v7  ;;  %v18348_v34 = vrot.slane %v13766_v22, 1  ;;  %v2689_v47 = vpop.permute.xlu0 %2688 }
 0x492   : > { %v5088_v52 = vrot.slane %v13742_v6, 4  ;;  %v5432_v12 = vrot.slane %v5273_v31, 5  ;;  %v5428_v11 = vrot.slane %v13886_v50, 5  ;;  %v18350_v24 = vrot.slane %v13774_v46, 2  ;;  %v18352_v31 = vld [vmem:[#allocation26_spill] sm:$0xff] }
 0x493   : > { %v3401_v9 = vsel %vm3297_vm2, %v18348_v34, %v3400_v43  ;;  %v13912_v35 = vadd.f32 %v5765_v26, %v5538_v13  ;;  %v4521_v21 = vadd.f32 %v4411_v61, %v4191_v20  ;;  %v18351_v53 = vrot.slane %v13786_v42, 2  ;;  %v18356_v20 = vld [vmem:[#allocation86_spill] sm:$0xff] }
 0x494   : > { %v3508_v23 = vadd.f32 %v3401_v9, %v3168_v48  ;;  %v3741_v37 = vsel %vm3637_vm3, %v18350_v24, %v3740_v32  ;;  %v4752_v29 = vsel %vm4648_vm4, %v4747_v33, %v4751_v51  ;;  %v5093_v6 = vsel %vm4648_vm4, %v5088_v52, %v5092_v4  ;;  %v18359_v24 = vld [vmem:[#allocation136_spill] sm:$0xff] }
 0x495   : > { %18349 = vst [vmem:[#allocation109_spill] sm:$0xff] %v13912_v35  ;;  %v4082_v7 = vsel %vm3637_vm3, %v18351_v53, %v4081_v55  ;;  %5959 = vrot.lane.b32.xlu0 %v13912_v35, %s9359_s30  ;;  %v5772_v22 = vrot.slane %v5613_v44, 6  ;;  %v4861_v50 = vadd.f32 %v4752_v29, %v4521_v21  ;;  %v5768_v10 = vrot.slane %v5611_v56, 6  ;;  %v5912_v21 = vpop.permute.xlu0 %5911 }
 0x496   : > { %v3848_v43 = vadd.f32 %v3741_v37, %v3508_v23  ;;  %v2982_v46 = vsel %vm2779_vm12, %v2956_v15, %v13658_v40  ;;  %v2957_v42 = vsel %vm2752_vm11, %v2931_v3, %v13704_v41  ;;  %v5433_v32 = vsel %vm5329_vm5, %v5428_v11, %v5432_v12  ;;  %v18354_v15 = vld [vmem:[#allocation44_spill] sm:$0xff]  ;;  %v2611_v23 = vpop.permute.xlu1 %2610 }
 0x497   : > { %3033 = vst.msk [vmem:[#allocation2 + $0x128] sm:$0xff] %vm2806_vm8, %v2982_v46  ;;  %v2983_v59 = vsel %vm2779_vm12, %v2957_v42, %v13754_v49  ;;  %v2932_v26 = vsel %vm1197_vm1, %v18352_v31, %v13731_v62  ;;  %v5202_v39 = vadd.f32 %v5093_v6, %v4861_v50  ;;  %v18353_v51 = vrot.slane %v13790_v25, 3  ;;  %v18362_v6 = vld [vmem:[#allocation30_spill] sm:$0xff] }
 0x498   : > { %v4189_v55 = vadd.f32 %v4082_v7, %v3848_v43  ;;  %3035 = vst.msk [vmem:[#allocation2 + $0x138] sm:$0xff] %vm2806_vm8, %v2983_v59  ;;  %v2958_v41 = vsel %vm2752_vm11, %v2932_v26, %v13776_v54  ;;  %v5671_v3 = vrot.slane %v18354_v15, 6  ;;  %v5773_v13 = vsel %vm5669_vm6, %v5768_v10, %v5772_v22  ;;  %v18357_v54 = vld [vmem:[#allocation42_spill] sm:$0xff]  ;;  %v13975_v43 = vld [vmem:[#allocation2 + $0x38] sm:$0xff]  ;;  %v14002_v59 = vld [vmem:[#allocation2 + $0x48] sm:$0xff] }
 0x499   : > { %v4412_v40 = vsel %vm4312_vm10, %v18353_v51, %v4411_v61  ;;  %v2984_v49 = vsel %vm2779_vm12, %v2958_v41, %v13849_v27  ;;  %v3306_v62 = vrot.slane %v13667_v18, 1  ;;  %v5542_v44 = vadd.f32 %v5433_v32, %v5202_v39  ;;  %v13997_v32 = vld [vmem:[%s17433_s7] ss:$0 sm:$0xff]  ;;  %v18367_v26 = vld [vmem:[#allocation139_spill] sm:$0xff] }
 0x49a   : > { %v4519_v4 = vadd.f32 %v4412_v40, %v4189_v55  ;;  %v18355_v25 = vrot.slane %v13806_v63, 4  ;;  %v2933_v61 = vsel %vm1197_vm1, %v18356_v20, %v13815_v19  ;;  %3037 = vst.msk [vmem:[#allocation2 + $0x148] sm:$0xff] %vm2806_vm8, %v2984_v49  ;;  %v18358_v56 = vrot.slane %v18357_v54, 5  ;;  %v9342_v63 = vld [vmem:[#allocation2 + $0x18] sm:$0xff]  ;;  %v18369_v40 = vld [vmem:[#allocation144_spill] sm:$0xff] }
 0x49b   : > { %v9125_v27 = vunpack.i.h.bf16 %v13631_v45  ;;  %v2959_v12 = vsel %vm2752_vm11, %v2933_v61, %v2609_v16  ;;  %v13961_v37 = vadd.f32 %v5773_v13, %v5542_v44  ;;  %v18361_v19 = vrot.slane %v13813_v57, 4  ;;  %v18363_v57 = vld [vmem:[#allocation38_spill] sm:$0xff]  ;;  %v18371_v49 = vld [vmem:[#allocation155_spill] sm:$0xff]  ;;  %v18372_v44 = vld [vmem:[#allocation140_spill] sm:$0xff] }
 0x49c   : > { %v4748_v48 = vsel %vm4648_vm4, %v18355_v25, %v4747_v33  ;;  %v5491_v34 = vadd.f32 %v18358_v56, %v13735_v17  ;;  %v3121_v33 = vmul.f32 %v9342_v63, %v18359_v24  ;;  %v9124_v7 = vunpack.i.l.bf16 %v13631_v45  ;;  %v18370_v13 = vld [vmem:[#allocation146_spill] sm:$0xff]  ;;  %v18374_v56 = vld [vmem:[#allocation96_spill] sm:$0xff] }
 0x49d   : > { %v4859_v9 = vadd.f32 %v4748_v48, %v4519_v4  ;;  %18360 = vst [vmem:[#allocation112_spill] sm:$0xff] %v13961_v37  ;;  %v5089_v53 = vsel %vm4648_vm4, %v18361_v19, %v5088_v52  ;;  %v2985_v17 = vsel %vm2779_vm12, %v2959_v12, %v13851_v2  ;;  %v5429_v16 = vsel %vm5329_vm5, %v5424_v58, %v5428_v11  ;;  %v18365_v11 = vld [vmem:[#allocation32_spill] sm:$0xff] }
 0x49e   : > { %3039 = vst.msk [vmem:[#allocation2 + $0x158] sm:$0xff] %vm2806_vm8, %v2985_v17  ;;  %v2934_v22 = vsel %vm1197_vm1, %v18362_v6, %v2533_v8  ;;  %v18364_v52 = vrot.slane %v18363_v57, 1  ;;  %5963 = vrot.lane.b32.xlu0 %v13961_v37, %s9359_s30  ;;  %v5769_v58 = vsel %vm5669_vm6, %v5764_v60, %v5768_v10  ;;  %v5831_v2 = vadd.f32 %v5671_v3, %v5491_v34  ;;  %v18377_v19 = vld [vmem:[#allocation36_spill] sm:$0xff] }
 0x49f   : > { %v5200_v29 = vadd.f32 %v5089_v53, %v4859_v9  ;;  %v2960_v5 = vsel %vm2752_vm11, %v2934_v22, %v2611_v23  ;;  %v5992_v8 = vadd.f32 %v5912_v21, %v18365_v11  ;;  %v13991_v46 = vrot.slane %v9125_v27, 3  ;;  %v18376_v23 = vld [vmem:[#allocation147_spill] sm:$0xff]  ;;  %v18379_v17 = vld [vmem:[#allocation148_spill] sm:$0xff]  ;;  %v18386_v11 = vld [vmem:[#allocation150_spill] sm:$0xff] }
 0x4a0   : > { %v3307_v45 = vsel %vm3297_vm2, %v18364_v52, %v3306_v62  ;;  %v2986_v42 = vsel %vm2779_vm12, %v2960_v5, %v2689_v47  ;;  %v3534_v60 = vmul.f32 %v13663_v30, %v18366_v0  ;;  %v6305_v10 = vrot.slane %v9124_v7, 3  ;;  %v18382_v22 = vld [vmem:[#allocation143_spill] sm:$0xff] }
 0x4a1   : > { %v5540_v50 = vadd.f32 %v5429_v16, %v5200_v29  ;;  %3041 = vst.msk [vmem:[#allocation2 + $0x168] sm:$0xff] %vm2806_vm8, %v2986_v42  ;;  %v6019_v55 = vadd.f32 %v5992_v8, %v5831_v2  ;;  %v3461_v31 = vadd.f32 %v3307_v45, %v3121_v33  ;;  %v3876_v39 = vmul.f32 %v18367_v26, %v13975_v43  ;;  %v18380_v16 = vld [vmem:[#allocation154_spill] sm:$0xff] }
 0x4a2   : > { %v3646_v47 = vrot.slane %v3534_v60, 2  ;;  %v4211_v41 = vmul.f32 %v18369_v40, %v13975_v43  ;;  %v4543_v4 = vmul.f32 %v18370_v13, %v13975_v43  ;;  %v14015_v25 = vsel %vm4312_vm10, %v18372_v44, %v18371_v49  ;;  %v5914_v44 = vpop.permute.xlu1 %5913 }
 0x4a3   : > { %v14006_v51 = vadd.f32 %v5769_v58, %v5540_v50  ;;  %18373 = vst [vmem:[#allocation54_spill] sm:$0xff] %v14015_v25  ;;  %v9130_v48 = vunpack.i.h.bf16 %v13797_v28  ;;  %v14019_v20 = vadd.f32 %v13997_v32, %v6019_v55  ;;  %v3987_v61 = vrot.slane %v3876_v39, 2  ;;  %v18389_v39 = vld [vmem:[#allocation137_spill] sm:$0xff] }
 0x4a4   : > { %v18375_v34 = vrot.slane %v18374_v56, 2  ;;  %v4317_v27 = vrot.slane %v4211_v41, 3  ;;  %v4653_v12 = vrot.slane %v4543_v4, 4  ;;  %v14028_v21 = vmul.f32 %v18376_v23, %v14002_v59 }
 0x4a5   : > { %18368 = vst [vmem:[#allocation53_spill] sm:$0xff] %v14006_v51  ;;  %5961 = vrot.lane.b32.xlu1 %v14006_v51, %s9359_s30  ;;  %v6107_v63 = vmin.f32 %v14019_v20, 0.0  ;;  %v18378_v53 = vrot.slane %v18377_v19, 2  ;;  %v14036_v29 = vmul.f32 %v18379_v17, %v14002_v59  ;;  %v14041_v6 = vsel %vm4312_vm10, %v18371_v49, %v18380_v16  ;;  %v18390_v19 = vld [vmem:[#allocation41_spill] sm:$0xff] }
 0x4a6   : > { %v3647_v9 = vsel %vm3637_vm3, %v18375_v34, %v3646_v47  ;;  %18381 = vst [vmem:[#allocation60_spill] sm:$0xff] %v14041_v6  ;;  %v14045_v57 = vsel %vm4312_vm10, %v18382_v22, %v6305_v10  ;;  %v14049_v52 = vsel %vm4312_vm10, %v6305_v10, %v13991_v46  ;;  %v14052_v58 = vrot.slane %v9130_v48, 3  ;;  %v18392_v16 = vld [vmem:[#allocation17_spill] sm:$0xff] }
 0x4a7   : > { %v3801_v33 = vadd.f32 %v3647_v9, %v3461_v31  ;;  %v3988_v7 = vsel %vm3637_vm3, %v18378_v53, %v3987_v61  ;;  %18383 = vst [vmem:[#allocation66_spill] sm:$0xff] %v14045_v57  ;;  %18384 = vst [vmem:[#allocation12_spill] sm:$0xff] %v14049_v52  ;;  %v6134_v5 = vmul.f32 1.442695, %v6107_v63  ;;  %v14056_v8 = vmul.f32 %v18386_v11, %v14002_v59  ;;  %v14065_v31 = vld [vmem:[#allocation2 + $0x58] sm:$0xff] }
 0x4a8   : > { %18385 = vst [vmem:[#allocation72_spill] sm:$0xff] %v14052_v58  ;;  %v18387_v50 = vrot.slane %v12667_v36, 3  ;;  %v18388_v60 = vrot.slane %v12691_v14, 4  ;;  %v4994_v10 = vrot.slane %v14028_v21, 4  ;;  %v3196_v41 = vmul.f32 %v18389_v39, %v13975_v43 }
 0x4a9   : > { %v4142_v2 = vadd.f32 %v3988_v7, %v3801_v33  ;;  %9249 = vpow2.f32 %v6134_v5  ;;  %v5334_v49 = vrot.slane %v14036_v29, 5  ;;  %v3536_v36 = vmul.f32 %v18366_v0, %v13975_v43 }
 0x4aa   : > { %v4318_v42 = vsel %vm4312_vm10, %v18387_v50, %v4317_v27  ;;  %v4654_v55 = vsel %vm4648_vm4, %v18388_v60, %v4653_v12  ;;  %v3310_v48 = vrot.slane %v3196_v41, 1  ;;  %v3878_v14 = vmul.f32 %v18367_v26, %v14002_v59 }
 0x4ab   : > { %v4472_v4 = vadd.f32 %v4318_v42, %v4142_v2  ;;  %v14076_v56 = vmul.f32 %v18369_v40, %v14002_v59  ;;  %v14080_v34 = vmul.f32 %v18370_v13, %v14002_v59  ;;  %v3123_v21 = vmul.f32 %v13663_v30, %v18359_v24 }
 0x4ac   : > { %v3650_v63 = vrot.slane %v3536_v36, 2  ;;  %v14086_v33 = vmul.f32 %v18376_v23, %v14065_v31  ;;  %v18391_v53 = vrot.slane %v18390_v19, 4  ;;  %v5674_v29 = vrot.slane %v14056_v8, 6 }
 0x4ad   : > { %v4812_v9 = vadd.f32 %v4654_v55, %v4472_v4  ;;  %v5993_v22 = vadd.f32 %v5914_v44, %v18392_v16  ;;  %v3311_v5 = vsel %vm3297_vm2, %v3306_v62, %v3310_v48  ;;  %v18393_v30 = vrot.slane %v18357_v54, 5 }
 0x4ae   : > { %v4995_v7 = vsel %vm4648_vm4, %v18391_v53, %v4994_v10  ;;  %v3463_v42 = vadd.f32 %v3311_v5, %v3123_v21  ;;  %v14101_v60 = vmul.f32 %v18379_v17, %v14065_v31  ;;  %v3651_v55 = vsel %vm3637_vm3, %v3646_v47, %v3650_v63 }
 0x4af   : > { %v5153_v2 = vadd.f32 %v4995_v7, %v4812_v9  ;;  %v5335_v50 = vsel %vm5329_vm5, %v18393_v30, %v5334_v49  ;;  %v3991_v41 = vrot.slane %v3878_v14, 2  ;;  %v4321_v8 = vrot.slane %v14076_v56, 3 }
 0x4b0   : > { %v4657_v4 = vrot.slane %v14080_v34, 4  ;;  %v5675_v62 = vsel %vm5669_vm6, %v5671_v3, %v5674_v29  ;;  %v3803_v54 = vadd.f32 %v3651_v55, %v3463_v42  ;;  %v4998_v44 = vrot.slane %v14086_v33, 4  ;;  %v5916_v42 = vpop.permute.xlu0 %5915 }
 0x4b1   : > { %v5493_v18 = vadd.f32 %v5335_v50, %v5153_v2  ;;  %v3992_v36 = vsel %vm3637_vm3, %v3987_v61, %v3991_v41  ;;  %v4322_v9 = vsel %vm4312_vm10, %v4317_v27, %v4321_v8  ;;  %v14115_v47 = vmul.f32 %v18389_v39, %v14002_v59 }
 0x4b2   : > { %v4658_v21 = vsel %vm4648_vm4, %v4653_v12, %v4657_v4  ;;  %vm6080_vm7 = vcmp.gt.f32.partialorder %v14019_v20, 0.0  ;;  %v4144_v56 = vadd.f32 %v3992_v36, %v3803_v54  ;;  %v14120_v15 = vmul.f32 %v18386_v11, %v14065_v31 }
 0x4b3   : > { %v5833_v14 = vadd.f32 %v5675_v62, %v5493_v18  ;;  %v14124_v3 = vmul.f32 %v18366_v0, %v14002_v59  ;;  %v5338_v61 = vrot.slane %v14101_v60, 5  ;;  %v3314_v27 = vrot.slane %v14115_v47, 1  ;;  %v9250_v33 = vpop.eup %9249  ;;  %v14152_v18 = vld [vmem:[#allocation2 + $0x68] sm:$0xff] }
 0x4b4   : > { %v14130_v12 = vmul.f32 %v18367_v26, %v14065_v31  ;;  %v14134_v34 = vmul.f32 %v18369_v40, %v14065_v31  ;;  %v4474_v53 = vadd.f32 %v4322_v9, %v4144_v56  ;;  %v3125_v7 = vmul.f32 %v18359_v24, %v13975_v43 }
 0x4b5   : > { %v6020_v19 = vadd.f32 %v5993_v22, %v5833_v14  ;;  %v14140_v16 = vmul.f32 %v18370_v13, %v14065_v31  ;;  %v4999_v5 = vsel %vm4648_vm4, %v4994_v10, %v4998_v44  ;;  %v3315_v2 = vsel %vm3297_vm2, %v3310_v48, %v3314_v27 }
 0x4b6   : > { %v3654_v30 = vrot.slane %v14124_v3, 2  ;;  %v3995_v50 = vrot.slane %v14130_v12, 2  ;;  %v4814_v55 = vadd.f32 %v4658_v21, %v4474_v53  ;;  %v5678_v43 = vrot.slane %v14120_v15, 6  ;;  %v18394_v15 = vld [vmem:[#allocation16_spill] sm:$0xff] }
 0x4b7   : > { %v14149_v22 = vadd.f32 %v13997_v32, %v6020_v19  ;;  %v3465_v62 = vadd.f32 %v3315_v2, %v3125_v7  ;;  %v8632_v54 = vadd.f32 -1.0, %v9250_v33  ;;  %v5339_v10 = vsel %vm5329_vm5, %v5334_v49, %v5338_v61 }
 0x4b8   : > { %v3655_v48 = vsel %vm3637_vm3, %v3650_v63, %v3654_v30  ;;  %v4325_v36 = vrot.slane %v14134_v34, 3  ;;  %v5155_v14 = vadd.f32 %v4999_v5, %v4814_v55  ;;  %v3996_v56 = vsel %vm3637_vm3, %v3991_v41, %v3995_v50 }
 0x4b9   : > { %v6108_v9 = vmin.f32 %v14149_v22, 0.0  ;;  %v4661_v21 = vrot.slane %v14140_v16, 4  ;;  %v5994_v3 = vadd.f32 %v5916_v42, %v18394_v15  ;;  %v3805_v12 = vadd.f32 %v3655_v48, %v3465_v62  ;;  %v14186_v48 = vld [vmem:[#allocation2 + $0x78] sm:$0xff] }
 0x4ba   : > { %v14165_v33 = vmul.f32 %v18376_v23, %v14152_v18  ;;  %v14169_v49 = vmul.f32 %v18379_v17, %v14152_v18  ;;  %v5495_v19 = vadd.f32 %v5339_v10, %v5155_v14  ;;  %v5679_v53 = vsel %vm5669_vm6, %v5674_v29, %v5678_v43  ;;  %v5918_v14 = vpop.permute.xlu1 %5917 }
 0x4bb   : > { %v6136_v63 = vmul.f32 1.442695, %v6108_v9  ;;  %v14174_v41 = vmul.f32 %v18386_v11, %v14152_v18  ;;  %v6215_v7 = vsel %vm6080_vm7, %v14019_v20, %v8632_v54  ;;  %v4146_v16 = vadd.f32 %v3996_v56, %v3805_v12 }
 0x4bc   : > { %v4326_v5 = vsel %vm4312_vm10, %v4321_v8, %v4325_v36  ;;  %v5002_v2 = vrot.slane %v14165_v33, 4  ;;  %v5835_v42 = vadd.f32 %v5679_v53, %v5495_v19  ;;  %v4662_v55 = vsel %vm4648_vm4, %v4657_v4, %v4661_v21 }
 0x4bd   : > { %9251 = vpow2.f32 %v6136_v63  ;;  %v5342_v29 = vrot.slane %v14169_v49, 5  ;;  %v4476_v62 = vadd.f32 %v4326_v5, %v4146_v16  ;;  %v5682_v10 = vrot.slane %v14174_v41, 6  ;;  %v18395_v16 = vld [vmem:[#allocation18_spill] sm:$0xff] }
 0x4be   : > { %v3127_v20 = vmul.f32 %v18359_v24, %v14002_v59  ;;  %v14192_v54 = vmul.f32 %v18389_v39, %v14065_v31  ;;  %v6021_v8 = vadd.f32 %v5994_v3, %v5835_v42  ;;  %v5003_v9 = vsel %vm4648_vm4, %v4998_v44, %v5002_v2 }
 0x4bf   : > { %v14197_v4 = vmul.f32 %v18366_v0, %v14065_v31  ;;  %v14201_v56 = vmul.f32 %v18367_v26, %v14152_v18  ;;  %v4816_v15 = vadd.f32 %v4662_v55, %v4476_v62  ;;  %v14206_v59 = vmul.f32 %v18369_v40, %v14152_v18 }
 0x4c0   : > { %v17646_v12 = vrot.slane %v14192_v54, 1  ;;  %v14210_v3 = vmul.f32 %v18370_v13, %v14152_v18  ;;  %v14213_v44 = vadd.f32 %v13997_v32, %v6021_v8  ;;  %v14219_v63 = vmul.f32 %v18376_v23, %v14186_v48 }
 0x4c1   : > { %v17641_v33 = vrot.slane %v14197_v4, 2  ;;  %v17640_v49 = vrot.slane %v14201_v56, 2  ;;  %v5157_v19 = vadd.f32 %v5003_v9, %v4816_v15  ;;  %v5343_v53 = vsel %vm5329_vm5, %v5338_v61, %v5342_v29 }
 0x4c2   : > { %v5995_v5 = vadd.f32 %v5918_v14, %v18395_v16  ;;  %v3319_v42 = vsel %vm3297_vm2, %v3314_v27, %v17646_v12  ;;  %v6109_v55 = vmin.f32 %v14213_v44, 0.0  ;;  %v17645_v8 = vrot.slane %v14206_v59, 3  ;;  %v5920_v14 = vpop.permute.xlu0 %5919  ;;  %v2535_v12 = vpop.permute.xlu1 %2534 }
 0x4c3   : > { %v3467_v62 = vadd.f32 %v3319_v42, %v3127_v20  ;;  %v17644_v45 = vrot.slane %v14210_v3, 4  ;;  %v5497_v9 = vadd.f32 %v5343_v53, %v5157_v19  ;;  %v5683_v60 = vsel %vm5669_vm6, %v5678_v43, %v5682_v10  ;;  %v18396_v53 = vld [vmem:[#allocation141_spill] sm:$0xff] }
 0x4c4   : > { %v3659_v61 = vsel %vm3637_vm3, %v3654_v30, %v17641_v33  ;;  %v4000_v47 = vsel %vm3637_vm3, %v3995_v50, %v17640_v49  ;;  %v6138_v27 = vmul.f32 1.442695, %v6109_v55  ;;  %v17643_v15 = vrot.slane %v14219_v63, 4 }
 0x4c5   : > { %v3807_v20 = vadd.f32 %v3659_v61, %v3467_v62  ;;  %v14245_v19 = vmul.f32 %v18379_v17, %v14186_v48  ;;  %v14248_v16 = vmul.f32 %v18396_v53, %v6215_v7  ;;  %vm6081_vm9 = vcmp.gt.f32.partialorder %v14149_v22, 0.0 }
 0x4c6   : > { %v5837_v43 = vadd.f32 %v5683_v60, %v5497_v9  ;;  %v14253_v30 = vmul.f32 %v18386_v11, %v14186_v48  ;;  %v4330_v55 = vsel %vm4312_vm10, %v4325_v36, %v17645_v8  ;;  %v4666_v7 = vsel %vm4648_vm4, %v4661_v21, %v17644_v45  ;;  %v18397_v60 = vld [vmem:[#allocation21_spill] sm:$0xff] }
 0x4c7   : > { %v9252_v50 = vpop.eup %9251  ;;  %v4148_v42 = vadd.f32 %v4000_v47, %v3807_v20  ;;  %v17642_v62 = vrot.slane %v14245_v19, 5  ;;  %9253 = vpow2.f32 %v6138_v27  ;;  %v5996_v49 = vadd.f32 %v5920_v14, %v18397_v60  ;;  %v18398_v14 = vld [vmem:[#allocation151_spill] sm:$0xff] }
 0x4c8   : > { %v8633_v61 = vadd.f32 -1.0, %v9252_v50  ;;  %v6022_v9 = vadd.f32 %v5995_v5, %v5837_v43  ;;  %v5007_v47 = vsel %vm4648_vm4, %v5002_v2, %v17643_v15  ;;  %v17648_v34 = vrot.slane %v14253_v30, 6  ;;  %v14289_v50 = vld [vmem:[#allocation2 + $0x88] sm:$0xff] }
 0x4c9   : > { %v4478_v33 = vadd.f32 %v4330_v55, %v4148_v42  ;;  %v14271_v36 = vmul.f32 %v18389_v39, %v14152_v18  ;;  %v5347_v5 = vsel %vm5329_vm5, %v5342_v29, %v17642_v62  ;;  %v14284_v2 = vmul.f32 %v18389_v39, %v14186_v48 }
 0x4ca   : > { %v6216_v21 = vsel %vm6081_vm9, %v14149_v22, %v8633_v61  ;;  %v14277_v27 = vadd.f32 %v13997_v32, %v6022_v9  ;;  %v3131_v22 = vmul.f32 %v18359_v24, %v14152_v18  ;;  %v14295_v42 = vmul.f32 %v18366_v0, %v14152_v18 }
 0x4cb   : > { %v14287_v20 = vmul.f32 %v18398_v14, %v6216_v21  ;;  %v4818_v43 = vadd.f32 %v4666_v7, %v4478_v33  ;;  %v17649_v29 = vrot.slane %v14271_v36, 1  ;;  %v17647_v61 = vrot.slane %v14284_v2, 1 }
 0x4cc   : > { %v6110_v55 = vmin.f32 %v14277_v27, 0.0  ;;  %v14302_v9 = vmul.f32 %v18366_v0, %v14186_v48  ;;  %v17651_v60 = vrot.slane %v14295_v42, 2  ;;  %v14311_v18 = vmul.f32 %v18367_v26, %v14186_v48 }
 0x4cd   : > { %18399 = vst [vmem:[#allocation79_spill] sm:$0xff] %v14287_v20  ;;  %v14306_v33 = vpack.c.bf16 %v14287_v20, %v14248_v16  ;;  %v5159_v7 = vadd.f32 %v5007_v47, %v4818_v43  ;;  %v3327_v62 = vsel %vm3297_vm2, %v17649_v29, %v17647_v61  ;;  %v14321_v45 = vmul.f32 %v18367_v26, %v14289_v50 }
 0x4ce   : > { %v6140_v21 = vmul.f32 1.442695, %v6110_v55  ;;  %v17650_v15 = vrot.slane %v14302_v9, 2  ;;  %v5687_v43 = vsel %vm5669_vm6, %v5682_v10, %v17648_v34  ;;  %v3471_v55 = vadd.f32 %v3327_v62, %v3131_v22  ;;  %v14343_v62 = vld [vmem:[#allocation2 + $0x98] sm:$0xff] }
 0x4cf   : > { %18400 = vst [vmem:[#allocation13_spill] sm:$0xff] %v14306_v33  ;;  %v5499_v47 = vadd.f32 %v5347_v5, %v5159_v7  ;;  %v14330_v8 = vmul.f32 %v18369_v40, %v14186_v48  ;;  %v4003_v5 = vrot.slane %v14311_v18, 2  ;;  %v17653_v7 = vrot.slane %v14321_v45, 2 }
 0x4d0   : > { %v3667_v61 = vsel %vm3637_vm3, %v17651_v60, %v17650_v15  ;;  %v14341_v41 = vmul.f32 %v18369_v40, %v14289_v50  ;;  %9255 = vpow2.f32 %v6140_v21  ;;  %v14347_v34 = vmul.f32 %v18370_v13, %v14186_v48 }
 0x4d1   : > { %v5839_v10 = vadd.f32 %v5687_v43, %v5499_v47  ;;  %v3811_v22 = vadd.f32 %v3667_v61, %v3471_v55  ;;  %v9254_v29 = vpop.eup %9253  ;;  %v4008_v18 = vsel %vm3637_vm3, %v4003_v5, %v17653_v7  ;;  %v4333_v15 = vrot.slane %v14330_v8, 3 }
 0x4d2   : > { %v17656_v60 = vrot.slane %v14341_v41, 3  ;;  %v14356_v21 = vmul.f32 %v18370_v13, %v14289_v50  ;;  %v18401_v47 = vunpack.i.l.bf16 %v13797_v28  ;;  %v4893_v33 = vmul.f32 %v18376_v23, %v14289_v50  ;;  %v5924_v28 = vpop.permute.xlu1 %5923 }
 0x4d3   : > { %v6023_v43 = vadd.f32 %v5996_v49, %v5839_v10  ;;  %v4152_v55 = vadd.f32 %v4008_v18, %v3811_v22  ;;  %v4669_v8 = vrot.slane %v14347_v34, 4  ;;  %v14369_v51 = vmul.f32 %v18376_v23, %v14343_v62 }
 0x4d4   : > { %v6309_v61 = vrot.slane %v18401_v47, 3  ;;  %v4338_v7 = vsel %vm4312_vm10, %v4333_v15, %v17656_v60  ;;  %v17657_v37 = vrot.slane %v14356_v21, 4  ;;  %v5010_v22 = vrot.slane %v4893_v33, 4 }
 0x4d5   : > { %18402 = vst [vmem:[#allocation81_spill] sm:$0xff] %v14369_v51  ;;  %v14373_v49 = vadd.f32 %v13997_v32, %v6023_v43  ;;  %v4482_v10 = vadd.f32 %v4338_v7, %v4152_v55  ;;  %v17662_v47 = vrot.slane %v14369_v51, 4  ;;  %v14381_v34 = vmul.f32 %v18379_v17, %v14289_v50 }
 0x4d6   : > { %v4674_v18 = vsel %vm4648_vm4, %v4669_v8, %v17657_v37  ;;  %v14385_v60 = vmul.f32 %v18379_v17, %v14343_v62  ;;  %v9134_v43 = vunpack.i.l.bf16 %v13897_v1  ;;  %v14391_v55 = vmul.f32 %v18386_v11, %v14289_v50 }
 0x4d7   : > { %v6111_v7 = vmin.f32 %v14373_v49, 0.0  ;;  %v4822_v33 = vadd.f32 %v4674_v18, %v4482_v10  ;;  %v5015_v37 = vsel %vm4648_vm4, %v5010_v22, %v17662_v47  ;;  %v17667_v35 = vrot.slane %v14381_v34, 5  ;;  %v18407_v10 = vld [vmem:[#allocation22_spill] sm:$0xff] }
 0x4d8   : > { %v17666_v38 = vrot.slane %v14385_v60, 5  ;;  %v14400_v14 = vmul.f32 %v18386_v11, %v14343_v62  ;;  %v8634_v53 = vadd.f32 -1.0, %v9254_v29  ;;  %v3129_v20 = vmul.f32 %v18359_v24, %v14065_v31 }
 0x4d9   : > { %v6142_v1 = vmul.f32 1.442695, %v6111_v7  ;;  %v5163_v52 = vadd.f32 %v5015_v37, %v4822_v33  ;;  %v18403_v57 = vrot.slane %v14271_v36, 1  ;;  %v18404_v51 = vrot.slane %v14192_v54, 1  ;;  %v18410_v36 = vld [vmem:[#allocation88_spill] sm:$0xff] }
 0x4da   : > { %v5355_v18 = vsel %vm5329_vm5, %v17667_v35, %v17666_v38  ;;  %v9256_v37 = vpop.eup %9255  ;;  %v14418_v7 = vsel %vm4312_vm10, %v13991_v46, %v6309_v61  ;;  %v14422_v33 = vsel %vm4312_vm10, %v6309_v61, %v14052_v58  ;;  %v2613_v38 = vpop.permute.xlu0 %2612  ;;  %v5998_v47 = vadd.f32 %v5924_v28, %v18407_v10 }
 0x4db   : > { %v3323_v29 = vsel %vm3297_vm2, %v18404_v51, %v18403_v57  ;;  %18405 = vst [vmem:[#allocation92_spill] sm:$0xff] %v14418_v7  ;;  %18406 = vst [vmem:[#allocation100_spill] sm:$0xff] %v14422_v33  ;;  %v5503_v35 = vadd.f32 %v5355_v18, %v5163_v52  ;;  %vm6082_vm13 = vcmp.gt.f32.partialorder %v14213_v44, 0.0  ;;  %9257 = vpow2.f32 %v6142_v1  ;;  %v2691_v46 = vpop.permute.xlu1 %2690 }
 0x4dc   : > { %v18408_v31 = vrot.slane %v14400_v14, 6  ;;  %v18409_v51 = vrot.slane %v14391_v55, 6  ;;  %v3469_v54 = vadd.f32 %v3323_v29, %v3129_v20  ;;  %v2935_v7 = vsel %vm1197_vm1, %v18410_v36, %v2535_v12 }
 0x4dd   : > { %v18411_v58 = vrot.slane %v14295_v42, 2  ;;  %v18412_v52 = vrot.slane %v14197_v4, 2  ;;  %v18413_v1 = vrot.slane %v14201_v56, 2  ;;  %v14441_v18 = vrot.slane %v9134_v43, 3  ;;  %v14453_v56 = vld [vmem:[#allocation2 + $0xa8] sm:$0xff] }
 0x4de   : > { %v5695_v57 = vsel %vm5669_vm6, %v18409_v51, %v18408_v31  ;;  %v14444_v31 = vsel %vm6082_vm13, %v14213_v44, %v8634_v53  ;;  %v2961_v20 = vsel %vm2752_vm11, %v2935_v7, %v2613_v38  ;;  %v14447_v12 = vadd.f32 -1.0, %v9256_v37 }
 0x4df   : > { %v5843_v61 = vadd.f32 %v5695_v57, %v5503_v35  ;;  %v3663_v28 = vsel %vm3637_vm3, %v18412_v52, %v18411_v58  ;;  %v4004_v10 = vsel %vm3637_vm3, %v18413_v1, %v4003_v5  ;;  %18414 = vst [vmem:[#allocation106_spill] sm:$0xff] %v14441_v18  ;;  %v18415_v42 = vrot.slane %v14206_v59, 3  ;;  %v5922_v57 = vpop.permute.xlu0 %5921 }
 0x4e0   : > { %v3809_v29 = vadd.f32 %v3663_v28, %v3469_v54  ;;  %v2987_v58 = vsel %vm2779_vm12, %v2961_v20, %v2691_v46  ;;  %v18416_v43 = vrot.slane %v14210_v3, 4  ;;  %v18417_v53 = vrot.slane %v14219_v63, 4 }
 0x4e1   : > { %v6025_v35 = vadd.f32 %v5998_v47, %v5843_v61  ;;  %v4334_v4 = vsel %vm4312_vm10, %v18415_v42, %v4333_v15  ;;  %3043 = vst.msk [vmem:[#allocation2 + $0x178] sm:$0xff] %vm2806_vm8, %v2987_v58  ;;  %v14464_v59 = vmul.f32 %v18389_v39, %v14289_v50  ;;  %v14471_v47 = vmul.f32 %v18389_v39, %v14343_v62 }
 0x4e2   : > { %v4150_v5 = vadd.f32 %v4004_v10, %v3809_v29  ;;  %v4670_v44 = vsel %vm4648_vm4, %v18416_v43, %v4669_v8  ;;  %v5011_v38 = vsel %vm4648_vm4, %v18417_v53, %v5010_v22  ;;  %v14475_v3 = vmul.f32 %v18366_v0, %v14289_v50  ;;  %v18420_v43 = vld [vmem:[#allocation19_spill] sm:$0xff] }
 0x4e3   : > { %v14467_v15 = vadd.f32 %v13997_v32, %v6025_v35  ;;  %v14479_v63 = vmul.f32 %v18366_v0, %v14343_v62  ;;  %v3135_v22 = vmul.f32 %v18359_v24, %v14289_v50  ;;  %v14485_v37 = vmul.f32 %v18367_v26, %v14343_v62 }
 0x4e4   : > { %v4480_v8 = vadd.f32 %v4334_v4, %v4150_v5  ;;  %v14489_v7 = vmul.f32 %v18367_v26, %v14453_v56  ;;  %v3330_v54 = vrot.slane %v14464_v59, 1  ;;  %v17674_v46 = vrot.slane %v14471_v47, 1  ;;  %v14516_v59 = vld [vmem:[#allocation2 + $0xb8] sm:$0xff] }
 0x4e5   : > { %v6113_v51 = vmin.f32 %v14467_v15, 0.0  ;;  %v17677_v36 = vrot.slane %v14475_v3, 2  ;;  %v17673_v50 = vrot.slane %v14479_v63, 2  ;;  %v17676_v52 = vrot.slane %v14485_v37, 2  ;;  %v9258_v35 = vpop.eup %9257 }
 0x4e6   : > { %v4820_v61 = vadd.f32 %v4670_v44, %v4480_v8  ;;  %v17672_v28 = vrot.slane %v14489_v7, 2  ;;  %v3335_v10 = vsel %vm3297_vm2, %v3330_v54, %v17674_v46  ;;  %v14503_v20 = vmul.f32 %v18369_v40, %v14343_v62 }
 0x4e7   : > { %v6146_v1 = vmul.f32 1.442695, %v6113_v51  ;;  %v14507_v29 = vmul.f32 %v18369_v40, %v14453_v56  ;;  %vm6083_vm14 = vcmp.gt.f32.partialorder %v14277_v27, 0.0  ;;  %v18418_v4 = vrot.slane %v14381_v34, 5 }
 0x4e8   : > { %v5161_v42 = vadd.f32 %v5011_v38, %v4820_v61  ;;  %v18419_v58 = vrot.slane %v14245_v19, 5  ;;  %v5997_v44 = vadd.f32 %v5922_v57, %v18420_v43  ;;  %v3475_v53 = vadd.f32 %v3335_v10, %v3135_v22 }
 0x4e9   : > { %9259 = vpow2.f32 %v6146_v1  ;;  %v3675_v8 = vsel %vm3637_vm3, %v17677_v36, %v17673_v50  ;;  %v4016_v19 = vsel %vm3637_vm3, %v17676_v52, %v17672_v28  ;;  %v17670_v34 = vrot.slane %v14507_v29, 3 }
 0x4ea   : > { %v5351_v5 = vsel %vm5329_vm5, %v18419_v58, %v18418_v4  ;;  %v3815_v51 = vadd.f32 %v3675_v8, %v3475_v53  ;;  %v4341_v22 = vrot.slane %v14503_v20, 3  ;;  %v4555_v57 = vmul.f32 %v18370_v13, %v14343_v62 }
 0x4eb   : > { %v5501_v38 = vadd.f32 %v5351_v5, %v5161_v42  ;;  %v8636_v61 = vadd.f32 -1.0, %v9258_v35  ;;  %v18421_v1 = vrot.slane %v14391_v55, 6  ;;  %v18422_v10 = vrot.slane %v14253_v30, 6 }
 0x4ec   : > { %v14539_v58 = vmul.f32 %v18370_v13, %v14453_v56  ;;  %v4897_v42 = vmul.f32 %v18376_v23, %v14453_v56  ;;  %v4156_v43 = vadd.f32 %v4016_v19, %v3815_v51  ;;  %v4346_v20 = vsel %vm4312_vm10, %v4341_v22, %v17670_v34 }
 0x4ed   : > { %v5691_v4 = vsel %vm5669_vm6, %v18422_v10, %v18421_v1  ;;  %v14548_v55 = vmul.f32 %v18376_v23, %v14516_v59  ;;  %v4677_v30 = vrot.slane %v4555_v57, 4  ;;  %v5236_v53 = vmul.f32 %v18379_v17, %v14453_v56 }
 0x4ee   : > { %v5841_v5 = vadd.f32 %v5691_v4, %v5501_v38  ;;  %v17671_v35 = vrot.slane %v14539_v58, 4  ;;  %v14555_v8 = vmul.f32 %v18379_v17, %v14516_v59  ;;  %v4486_v19 = vadd.f32 %v4346_v20, %v4156_v43  ;;  %v5928_v43 = vpop.permute.xlu1 %5927 }
 0x4ef   : > { %v5018_v51 = vrot.slane %v4897_v42, 4  ;;  %v17675_v1 = vrot.slane %v14548_v55, 4  ;;  %v14564_v4 = vmul.f32 %v18386_v11, %v14453_v56  ;;  %v14568_v34 = vmul.f32 %v18386_v11, %v14516_v59 }
 0x4f0   : > { %v6024_v38 = vadd.f32 %v5997_v44, %v5841_v5  ;;  %v4682_v10 = vsel %vm4648_vm4, %v4677_v30, %v17671_v35  ;;  %v5362_v57 = vrot.slane %v14555_v8, 5  ;;  %vm6084_vm15 = vcmp.gt.f32.partialorder %v14373_v49, 0.0  ;;  %v2537_v35 = vpop.permute.xlu0 %2536 }
 0x4f1   : > { %v4826_v42 = vadd.f32 %v4682_v10, %v4486_v19  ;;  %v5023_v5 = vsel %vm4648_vm4, %v5018_v51, %v17675_v1  ;;  %v6218_v20 = vsel %vm6083_vm14, %v14277_v27, %v14447_v12  ;;  %v5358_v28 = vrot.slane %v5236_v53, 5  ;;  %v18424_v53 = vld [vmem:[#allocation34_spill] sm:$0xff] }
 0x4f2   : > { %v14572_v44 = vadd.f32 %v13997_v32, %v6024_v38  ;;  %v3133_v46 = vmul.f32 %v18359_v24, %v14186_v48  ;;  %v6219_v38 = vsel %vm6084_vm15, %v14373_v49, %v8636_v61  ;;  %v18423_v1 = vrot.slane %v14284_v2, 1 }
 0x4f3   : > { %v5167_v10 = vadd.f32 %v5023_v5, %v4826_v42  ;;  %v9260_v36 = vpop.eup %9259  ;;  %v5363_v27 = vsel %vm5329_vm5, %v5358_v28, %v5362_v57  ;;  %v5698_v12 = vrot.slane %v14564_v4, 6  ;;  %v6000_v50 = vadd.f32 %v5928_v43, %v18424_v53 }
 0x4f4   : > { %v6112_v19 = vmin.f32 %v14572_v44, 0.0  ;;  %v3331_v52 = vsel %vm3297_vm2, %v18423_v1, %v3330_v54  ;;  %v18425_v49 = vrot.slane %v14475_v3, 2  ;;  %v18426_v61 = vrot.slane %v14302_v9, 2 }
 0x4f5   : > { %v3473_v18 = vadd.f32 %v3331_v52, %v3133_v46  ;;  %v5507_v33 = vadd.f32 %v5363_v27, %v5167_v10  ;;  %v18427_v54 = vrot.slane %v14485_v37, 2  ;;  %v18428_v1 = vrot.slane %v14321_v45, 2  ;;  %v18430_v37 = vld [vmem:[#allocation27_spill] sm:$0xff]  ;;  %v5926_v27 = vpop.permute.xlu0 %5925 }
 0x4f6   : > { %v6144_v48 = vmul.f32 1.442695, %v6112_v19  ;;  %v3671_v2 = vsel %vm3637_vm3, %v18426_v61, %v18425_v49  ;;  %v6557_v5 = vrot.slane %v14248_v16, 4  ;;  %v14607_v4 = vmul.f32 %v14015_v25, %v14444_v31  ;;  %v18431_v19 = vld [vmem:[#allocation78_spill] sm:$0xff] }
 0x4f7   : > { %v4012_v42 = vsel %vm3637_vm3, %v18428_v1, %v18427_v54  ;;  %v18429_v46 = vrot.slane %v14568_v34, 6  ;;  %v3813_v52 = vadd.f32 %v3671_v2, %v3473_v18  ;;  %v14613_v9 = vmul.f32 %v14041_v6, %v6218_v20 }
 0x4f8   : > { %9261 = vpow2.f32 %v6144_v48  ;;  %v2936_v45 = vsel %vm1197_vm1, %v18430_v37, %v2537_v35  ;;  %v14618_v10 = vmul.f32 %v18431_v19, %v6219_v38  ;;  %vm6086_vm7 = vcmp.gt.f32.partialorder %v14467_v15, 0.0  ;;  %v18434_v38 = vld [vmem:[#allocation81_spill] sm:$0xff] }
 0x4f9   : > { %v5703_v3 = vsel %vm5669_vm6, %v5698_v12, %v18429_v46  ;;  %v8638_v31 = vadd.f32 -1.0, %v9260_v36  ;;  %v4154_v53 = vadd.f32 %v4012_v42, %v3813_v52  ;;  %v18432_v61 = vrot.slane %v14341_v41, 3  ;;  %v14637_v41 = vld [vmem:[#allocation2 + $0xc8] sm:$0xff] }
 0x4fa   : > { %v5847_v43 = vadd.f32 %v5703_v3, %v5507_v33  ;;  %v18433_v20 = vrot.slane %v14356_v21, 4  ;;  %v14629_v33 = vmul.f32 %v18389_v39, %v14453_v56  ;;  %v18435_v2 = vrot.slane %v18434_v38, 4 }
 0x4fb   : > { %v4342_v18 = vsel %vm4312_vm10, %v18432_v61, %v4341_v22  ;;  %v18436_v54 = vrot.slane %v14385_v60, 5  ;;  %v14641_v21 = vmul.f32 %v18366_v0, %v14453_v56  ;;  %vm6085_vm9 = vcmp.gt.f32.partialorder %v14572_v44, 0.0  ;;  %v2615_v61 = vpop.permute.xlu0 %2614 }
 0x4fc   : > { %v6027_v49 = vadd.f32 %v6000_v50, %v5847_v43  ;;  %v4678_v48 = vsel %vm4648_vm4, %v18433_v20, %v4677_v30  ;;  %v4484_v35 = vadd.f32 %v4342_v18, %v4154_v53  ;;  %v5019_v36 = vsel %vm4648_vm4, %v18435_v2, %v5018_v51 }
 0x4fd   : > { %v5359_v50 = vsel %vm5329_vm5, %v18436_v54, %v5358_v28  ;;  %v3338_v30 = vrot.slane %v14629_v33, 1  ;;  %v14650_v51 = vmul.f32 %v18367_v26, %v14516_v59  ;;  %v14654_v60 = vmul.f32 %v18369_v40, %v14516_v59  ;;  %v14680_v33 = vpop.permute.xlu1 %6292 }
 0x4fe   : > { %v14645_v22 = vadd.f32 %v13997_v32, %v6027_v49  ;;  %v4824_v28 = vadd.f32 %v4678_v48, %v4484_v35  ;;  %v3137_v1 = vmul.f32 %v18359_v24, %v14343_v62  ;;  %v3678_v42 = vrot.slane %v14641_v21, 2 }
 0x4ff   : > { %v14661_v46 = vmul.f32 %v18370_v13, %v14516_v59  ;;  %v18437_v52 = vrot.slane %v14471_v47, 1  ;;  %v4019_v43 = vrot.slane %v14650_v51, 2  ;;  %v14670_v53 = vmul.f32 %v18376_v23, %v14637_v41 }
 0x500   : > { %v6115_v3 = vmin.f32 %v14645_v22, 0.0  ;;  %v14675_v62 = vsel %vm6086_vm7, %v14467_v15, %v8638_v31  ;;  %v5165_v49 = vadd.f32 %v5019_v36, %v4824_v28  ;;  %v18438_v20 = vrot.slane %v14479_v63, 2  ;;  %v18440_v31 = vld [vmem:[#allocation94_spill] sm:$0xff] }
 0x501   : > { %v3339_v37 = vsel %vm3297_vm2, %v18437_v52, %v3338_v30  ;;  %v18439_v35 = vrot.slane %v14489_v7, 2  ;;  %v4349_v2 = vrot.slane %v14654_v60, 3  ;;  %v4685_v54 = vrot.slane %v14661_v46, 4 }
 0x502   : > { %v3477_v18 = vadd.f32 %v3339_v37, %v3137_v1  ;;  %v3679_v47 = vsel %vm3637_vm3, %v18438_v20, %v3678_v42  ;;  %v6150_v48 = vmul.f32 1.442695, %v6115_v3  ;;  %v5505_v15 = vadd.f32 %v5359_v50, %v5165_v49  ;;  %v9262_v51 = vpop.eup %9261 }
 0x503   : > { %v4020_v38 = vsel %vm3637_vm3, %v18439_v35, %v4019_v43  ;;  %v5999_v36 = vadd.f32 %v5926_v27, %v18440_v31  ;;  %v14690_v63 = vmul.f32 %v18379_v17, %v14637_v41  ;;  %v18441_v28 = vrot.slane %v14400_v14, 6 }
 0x504   : > { %v3817_v21 = vadd.f32 %v3679_v47, %v3477_v18  ;;  %v2962_v7 = vsel %vm2752_vm11, %v2936_v45, %v2615_v61  ;;  %v5026_v3 = vrot.slane %v14670_v53, 4  ;;  %v14699_v60 = vmul.f32 %v18386_v11, %v14637_v41 }
 0x505   : > { %v5699_v1 = vsel %vm5669_vm6, %v18441_v28, %v5698_v12  ;;  %v8637_v50 = vadd.f32 -1.0, %v9262_v51  ;;  %9263 = vpow2.f32 %v6150_v48  ;;  %v18442_v37 = vrot.slane %v14507_v29, 3  ;;  %v18445_v48 = vld [vmem:[#allocation153_spill] sm:$0xff]  ;;  %v14744_v28 = vld [vmem:[#allocation2 + $0xd8] sm:$0xff] }
 0x506   : > { %v5845_v27 = vadd.f32 %v5699_v1, %v5505_v15  ;;  %v4158_v52 = vadd.f32 %v4020_v38, %v3817_v21  ;;  %v18443_v14 = vrot.slane %v14539_v58, 4  ;;  %v18444_v45 = vrot.slane %v14548_v55, 4  ;;  %v5930_v55 = vpop.permute.xlu1 %5929 }
 0x507   : > { %v4350_v49 = vsel %vm4312_vm10, %v18442_v37, %v4349_v2  ;;  %v14716_v18 = vmul.f32 %v18389_v39, %v14516_v59  ;;  %v6220_v29 = vsel %vm6085_vm9, %v14572_v44, %v8637_v50  ;;  %v5366_v58 = vrot.slane %v14690_v63, 5 }
 0x508   : > { %v4686_v12 = vsel %vm4648_vm4, %v18443_v14, %v4685_v54  ;;  %v5027_v61 = vsel %vm4648_vm4, %v18444_v45, %v5026_v3  ;;  %v6026_v20 = vadd.f32 %v5999_v36, %v5845_v27  ;;  %v4488_v47 = vadd.f32 %v4350_v49, %v4158_v52  ;;  %v18447_v14 = vld [vmem:[#allocation37_spill] sm:$0xff] }
 0x509   : > { %v14723_v35 = vmul.f32 %v18445_v48, %v6220_v29  ;;  %v5706_v38 = vrot.slane %v14699_v60, 6  ;;  %v17692_v15 = vrot.slane %v14716_v18, 1  ;;  %v14729_v31 = vmul.f32 %v18366_v0, %v14516_v59 }
 0x50a   : > { %v14732_v21 = vadd.f32 %v13997_v32, %v6026_v20  ;;  %v4828_v44 = vadd.f32 %v4686_v12, %v4488_v47  ;;  %v3139_v36 = vmul.f32 %v18359_v24, %v14453_v56  ;;  %v14738_v63 = vmul.f32 %v18367_v26, %v14637_v41 }
 0x50b   : > { %v14742_v51 = vpack.c.bf16 %v14723_v35, %v14618_v10  ;;  %v3343_v1 = vsel %vm3297_vm2, %v3338_v30, %v17692_v15  ;;  %v17682_v60 = vrot.slane %v14729_v31, 2  ;;  %v14752_v50 = vmul.f32 %v18369_v40, %v14637_v41 }
 0x50c   : > { %v6114_v56 = vmin.f32 %v14732_v21, 0.0  ;;  %v5169_v27 = vadd.f32 %v5027_v61, %v4828_v44  ;;  %v3479_v52 = vadd.f32 %v3343_v1, %v3139_v36  ;;  %v14757_v37 = vmul.f32 %v18370_v13, %v14637_v41  ;;  %v2693_v36 = vpop.permute.xlu1 %2692 }
 0x50d   : > { %18446 = vst [vmem:[#allocation113_spill] sm:$0xff] %v14742_v51  ;;  %v5367_v49 = vsel %vm5329_vm5, %v5362_v57, %v5366_v58  ;;  %v6001_v30 = vadd.f32 %v5930_v55, %v18447_v14  ;;  %v3683_v12 = vsel %vm3637_vm3, %v3678_v42, %v17682_v60  ;;  %v17681_v45 = vrot.slane %v14738_v63, 2 }
 0x50e   : > { %v6148_v29 = vmul.f32 1.442695, %v6114_v56  ;;  %v5509_v20 = vadd.f32 %v5367_v49, %v5169_v27  ;;  %v3819_v61 = vadd.f32 %v3683_v12, %v3479_v52  ;;  %v14769_v47 = vmul.f32 %v18376_v23, %v14744_v28  ;;  %v5932_v27 = vpop.permute.xlu0 %5931 }
 0x50f   : > { %v18448_v44 = vrot.slane %v14568_v34, 6  ;;  %v4024_v57 = vsel %vm3637_vm3, %v4019_v43, %v17681_v45  ;;  %v17680_v55 = vrot.slane %v14752_v50, 3  ;;  %v14780_v42 = vmul.f32 %v18379_v17, %v14744_v28  ;;  %v9264_v1 = vpop.eup %9263  ;;  %v18451_v45 = vld [vmem:[#allocation35_spill] sm:$0xff] }
 0x510   : > { %9265 = vpow2.f32 %v6148_v29  ;;  %v4160_v52 = vadd.f32 %v4024_v57, %v3819_v61  ;;  %v17690_v34 = vrot.slane %v14757_v37, 4  ;;  %v17687_v43 = vrot.slane %v14769_v47, 4 }
 0x511   : > { %v5707_v8 = vsel %vm5669_vm6, %v18448_v44, %v5706_v38  ;;  %v4354_v49 = vsel %vm4312_vm10, %v4349_v2, %v17680_v55  ;;  %v17686_v14 = vrot.slane %v14780_v42, 5  ;;  %v14790_v12 = vmul.f32 %v18386_v11, %v14744_v28  ;;  %v18449_v44 = vld [vmem:[#allocation66_spill] sm:$0xff] }
 0x512   : > { %v5849_v56 = vadd.f32 %v5707_v8, %v5509_v20  ;;  %v14794_v29 = vmul.f32 %v18449_v44, %v14675_v62  ;;  %v4490_v61 = vadd.f32 %v4354_v49, %v4160_v52  ;;  %v2988_v8 = vsel %vm2779_vm12, %v2962_v7, %v2693_v36  ;;  %v18452_v7 = vld [vmem:[#allocation79_spill] sm:$0xff] }
 0x513   : > { %v8640_v57 = vadd.f32 -1.0, %v9264_v1  ;;  %v4690_v2 = vsel %vm4648_vm4, %v4685_v54, %v17690_v34  ;;  %v17683_v55 = vrot.slane %v14790_v12, 6  ;;  %v6002_v60 = vadd.f32 %v5932_v27, %v18451_v45  ;;  %3045 = vst.msk [vmem:[#allocation2 + $0x188] sm:$0xff] %vm2806_vm8, %v2988_v8  ;;  %v14832_v27 = vld [vmem:[#allocation2 + $0xe8] sm:$0xff] }
 0x514   : > { %18450 = vst [vmem:[#allocation123_spill] sm:$0xff] %v14794_v29  ;;  %v6028_v20 = vadd.f32 %v6001_v30, %v5849_v56  ;;  %vm6087_vm13 = vcmp.gt.f32.partialorder %v14732_v21, 0.0  ;;  %v4830_v30 = vadd.f32 %v4690_v2, %v4490_v61  ;;  %v5031_v46 = vsel %vm4648_vm4, %v5026_v3, %v17687_v43 }
 0x515   : > { %v6558_v54 = vrot.slane %v18452_v7, 4  ;;  %v5371_v45 = vsel %vm5329_vm5, %v5366_v58, %v17686_v14  ;;  %v5711_v36 = vsel %vm5669_vm6, %v5706_v38, %v17683_v55  ;;  %vm6636_vm14 = vcmask 1040384   ;;  %v14901_v55 = vld [vmem:[#allocation2 + $0xf8] sm:$0xff] }
 0x516   : > { %v14807_v62 = vadd.f32 %v13997_v32, %v6028_v20  ;;  %v17688_v32 = vrot.slane %v14607_v4, 4  ;;  %vm6088_vm15 = vcmp.gt.f32.partialorder %v14645_v22, 0.0  ;;  %v5171_v53 = vadd.f32 %v5031_v46, %v4830_v30 }
 0x517   : > { %v6559_v3 = vsel %vm4648_vm4, %v6557_v5, %v6558_v54  ;;  %v3143_v56 = vmul.f32 %v18359_v24, %v14637_v41  ;;  %v14836_v52 = vmul.f32 %v18389_v39, %v14637_v41  ;;  %v14840_v49 = vmul.f32 %v18389_v39, %v14744_v28 }
 0x518   : > { %v6116_v1 = vmin.f32 %v14807_v62, 0.0  ;;  %v6561_v58 = vsel %vm4648_vm4, %v6558_v54, %v17688_v32  ;;  %v6637_v38 = vsel %vm6636_vm14, 0.0, %v6559_v3  ;;  %v5511_v5 = vadd.f32 %v5371_v45, %v5171_v53 }
 0x519   : > { %v6638_v20 = vpack.c.bf16 %v6561_v58, %v6637_v38  ;;  %v14844_v61 = vmul.f32 %v18366_v0, %v14637_v41  ;;  %v17694_v8 = vrot.slane %v14836_v52, 1  ;;  %v17685_v2 = vrot.slane %v14840_v49, 1 }
 0x51a   : > { %v6152_v16 = vmul.f32 1.442695, %v6116_v1  ;;  %v14850_v30 = vmul.f32 %v18366_v0, %v14744_v28  ;;  %v14854_v46 = vmul.f32 %v18367_v26, %v14744_v28  ;;  %v9266_v7 = vpop.eup %9265  ;;  %v5851_v54 = vadd.f32 %v5711_v36, %v5511_v5 }
 0x51b   : > { %6664 = vrot.lane.b32.xlu1 %v6638_v20, %s9359_s30  ;;  %v17691_v41 = vrot.slane %v14844_v61, 2  ;;  %v14860_v45 = vmul.f32 %v18367_v26, %v14832_v27  ;;  %v8639_v1 = vadd.f32 -1.0, %v9266_v7  ;;  %v3351_v53 = vsel %vm3297_vm2, %v17694_v8, %v17685_v2 }
 0x51c   : > { %9267 = vpow2.f32 %v6152_v16  ;;  %v17684_v3 = vrot.slane %v14850_v30, 2  ;;  %v4027_v58 = vrot.slane %v14854_v46, 2  ;;  %v6029_v36 = vadd.f32 %v6002_v60, %v5851_v54  ;;  %v18453_v46 = vld [vmem:[#allocation12_spill] sm:$0xff] }
 0x51d   : > { %v3483_v38 = vadd.f32 %v3351_v53, %v3143_v56  ;;  %v17689_v16 = vrot.slane %v14860_v45, 2  ;;  %v14872_v5 = vmul.f32 %v18369_v40, %v14744_v28  ;;  %v6222_v20 = vsel %vm6087_vm13, %v14732_v21, %v8639_v1  ;;  %v14896_v21 = vld [vmem:[%s17433_s7] ss:$0 sm:$0xff]  ;;  %v2539_v53 = vpop.permute.xlu0 %2538 }
 0x51e   : > { %v3691_v7 = vsel %vm3637_vm3, %v17691_v41, %v17684_v3  ;;  %v14884_v60 = vmul.f32 %v18369_v40, %v14832_v27  ;;  %v14888_v56 = vmul.f32 %v18370_v13, %v14744_v28  ;;  %v14891_v54 = vmul.f32 %v18453_v46, %v6222_v20 }
 0x51f   : > { %v14899_v1 = vadd.f32 %v14896_v21, %v6029_v36  ;;  %v3823_v3 = vadd.f32 %v3691_v7, %v3483_v38  ;;  %v4032_v2 = vsel %vm3637_vm3, %v4027_v58, %v17689_v16  ;;  %v6223_v20 = vsel %vm6088_vm15, %v14645_v22, %v8640_v57 }
 0x520   : > { %18454 = vst [vmem:[#allocation14_spill] sm:$0xff] %v14891_v54  ;;  %v4357_v14 = vrot.slane %v14872_v5, 3  ;;  %v17693_v43 = vrot.slane %v14884_v60, 3  ;;  %v14913_v36 = vmul.f32 %v18370_v13, %v14832_v27  ;;  %v14917_v32 = vpack.c.bf16 %v14891_v54, %v14794_v29  ;;  %v18460_v54 = vld [vmem:[#allocation39_spill] sm:$0xff] }
 0x521   : > { %v6117_v38 = vmin.f32 %v14899_v1, 0.0  ;;  %v4164_v7 = vadd.f32 %v4032_v2, %v3823_v3  ;;  %v4693_v16 = vrot.slane %v14888_v56, 4  ;;  %v4905_v5 = vmul.f32 %v18376_v23, %v14832_v27  ;;  %v14951_v19 = vpop.permute.xlu0 %5933 }
 0x522   : > { %18455 = vst [vmem:[#allocation126_spill] sm:$0xff] %v14917_v32  ;;  %v4362_v22 = vsel %vm4312_vm10, %v4357_v14, %v17693_v43  ;;  %v17697_v57 = vrot.slane %v14913_v36, 4  ;;  %v14929_v34 = vmul.f32 %v18376_v23, %v14901_v55  ;;  %v14933_v2 = vmul.f32 %v18379_v17, %v14832_v27 }
 0x523   : > { %v6154_v41 = vmul.f32 1.442695, %v6117_v38  ;;  %v4494_v15 = vadd.f32 %v4362_v22, %v4164_v7  ;;  %v14937_v3 = vmul.f32 %v18379_v17, %v14901_v55  ;;  %v5034_v43 = vrot.slane %v4905_v5, 4  ;;  %v5936_v38 = vpop.permute.xlu1 %5935  ;;  %v18456_v22 = vld [vmem:[#allocation92_spill] sm:$0xff] }
 0x524   : > { %v4698_v56 = vsel %vm4648_vm4, %v4693_v16, %v17697_v57  ;;  %v17699_v8 = vrot.slane %v14929_v34, 4  ;;  %v14945_v32 = vmul.f32 %v18386_v11, %v14832_v27  ;;  %v14948_v51 = vmul.f32 %v18456_v22, %v6223_v20 }
 0x525   : > { %9269 = vpow2.f32 %v6154_v41  ;;  %v4834_v46 = vadd.f32 %v4698_v56, %v4494_v15  ;;  %v17704_v44 = vrot.slane %v14937_v3, 5  ;;  %v5374_v57 = vrot.slane %v14933_v2, 5 }
 0x526   : > { %v9268_v7 = vpop.eup %9267  ;;  %v5039_v5 = vsel %vm4648_vm4, %v5034_v43, %v17699_v8  ;;  %v14959_v25 = vmul.f32 %v18386_v11, %v14901_v55  ;;  %vm6089_vm7 = vcmp.gt.f32.partialorder %v14807_v62, 0.0  ;;  %v3141_v41 = vmul.f32 %v18359_v24, %v14516_v59 }
 0x527   : > { %v8641_v48 = vadd.f32 -1.0, %v9268_v7  ;;  %v5175_v20 = vadd.f32 %v5039_v5, %v4834_v46  ;;  %v5379_v7 = vsel %vm5329_vm5, %v5374_v57, %v17704_v44  ;;  %v18457_v8 = vrot.slane %v14836_v52, 1  ;;  %v18459_v46 = vld [vmem:[#allocation100_spill] sm:$0xff] }
 0x528   : > { %v17705_v2 = vrot.slane %v14959_v25, 6  ;;  %v18458_v22 = vrot.slane %v14716_v18, 1  ;;  %v6004_v59 = vadd.f32 %v5936_v38, %v18460_v54  ;;  %v18462_v44 = vrot.slane %v14844_v61, 2  ;;  %v2695_v61 = vpop.permute.xlu0 %2694 }
 0x529   : > { %v6224_v56 = vsel %vm6089_vm7, %v14807_v62, %v8641_v48  ;;  %v5515_v15 = vadd.f32 %v5379_v7, %v5175_v20  ;;  %v18461_v48 = vrot.slane %v14945_v32, 6  ;;  %v18463_v52 = vrot.slane %v14729_v31, 2  ;;  %v2617_v20 = vpop.permute.xlu1 %2616  ;;  %v18469_v31 = vld [vmem:[#allocation72_spill] sm:$0xff] }
 0x52a   : > { %v3347_v6 = vsel %vm3297_vm2, %v18458_v22, %v18457_v8  ;;  %v14976_v5 = vmul.f32 %v18459_v46, %v6224_v56  ;;  %v18464_v8 = vrot.slane %v14738_v63, 2  ;;  %v18465_v56 = vld [vmem:[#allocation116_spill] sm:$0xff]  ;;  %vm6090_vm9 = vcmp.gt.f32.partialorder %v14899_v1, 0.0 }
 0x52b   : > { %v3481_v29 = vadd.f32 %v3347_v6, %v3141_v41  ;;  %v5719_v62 = vsel %vm5669_vm6, %v18461_v48, %v17705_v2  ;;  %v3687_v18 = vsel %vm3637_vm3, %v18463_v52, %v18462_v44  ;;  %v18466_v54 = vunpack.i.h.bf16 %v18465_v56  ;;  %v18468_v48 = vld [vmem:[#allocation106_spill] sm:$0xff]  ;;  %v18471_v63 = vld [vmem:[#allocation28_spill] sm:$0xff] }
 0x52c   : > { %v4028_v22 = vsel %vm3637_vm3, %v18464_v8, %v4027_v58  ;;  %v14998_v38 = vpack.c.bf16 %v14976_v5, %v14948_v51  ;;  %v5855_v41 = vadd.f32 %v5719_v62, %v5515_v15  ;;  %v15003_v44 = vsel %vm4312_vm10, %v18469_v31, %v18468_v48 }
 0x52d   : > { %v14994_v6 = vrot.slane %v18466_v54, 3  ;;  %v3821_v7 = vadd.f32 %v3687_v18, %v3481_v29  ;;  %18470 = vst [vmem:[#allocation149_spill] sm:$0xff] %v15003_v44  ;;  %v2937_v58 = vsel %vm1197_vm1, %v18471_v63, %v2539_v53  ;;  %v18472_v52 = vrot.slane %v14752_v50, 3 }
 0x52e   : > { %18467 = vst [vmem:[#allocation145_spill] sm:$0xff] %v14998_v38  ;;  %v6562_v56 = vrot.slane %v14613_v9, 4  ;;  %v6031_v54 = vadd.f32 %v6004_v59, %v5855_v41  ;;  %v17707_v15 = vrot.slane %v14618_v10, 4  ;;  %v2963_v29 = vsel %vm2752_vm11, %v2937_v58, %v2617_v20 }
 0x52f   : > { %v4358_v8 = vsel %vm4312_vm10, %v18472_v52, %v4357_v14  ;;  %v4162_v2 = vadd.f32 %v4028_v22, %v3821_v7  ;;  %v18473_v62 = vrot.slane %v14757_v37, 4  ;;  %v18474_v31 = vrot.slane %v14607_v4, 4  ;;  %v9270_v59 = vpop.eup %9269 }
 0x530   : > { %v2989_v50 = vsel %vm2779_vm12, %v2963_v29, %v2695_v61  ;;  %v15022_v14 = vmul.f32 %v18389_v39, %v14832_v27  ;;  %v15025_v22 = vadd.f32 %v14896_v21, %v6031_v54  ;;  %v6565_v37 = vsel %vm4648_vm4, %v6562_v56, %v17707_v15  ;;  %v15055_v54 = vld [vmem:[#allocation2 + $0x108] sm:$0xff] }
 0x531   : > { %v4694_v18 = vsel %vm4648_vm4, %v18473_v62, %v4693_v16  ;;  %v6563_v53 = vsel %vm4648_vm4, %v18474_v31, %v6562_v56  ;;  %v4492_v41 = vadd.f32 %v4358_v8, %v4162_v2  ;;  %3047 = vst.msk [vmem:[#allocation2 + $0x198] sm:$0xff] %vm2806_vm8, %v2989_v50  ;;  %v15033_v16 = vmul.f32 %v18366_v0, %v14832_v27 }
 0x532   : > { %v18475_v20 = vrot.slane %v14769_v47, 4  ;;  %v6639_v61 = vpack.c.bf16 %v6565_v37, %v6563_v53  ;;  %v3354_v63 = vrot.slane %v15022_v14, 1  ;;  %v15041_v2 = vmul.f32 %v18367_v26, %v14901_v55 }
 0x533   : > { %v15046_v58 = vsel %vm4312_vm10, %v18468_v48, %v14994_v6  ;;  %v4832_v52 = vadd.f32 %v4694_v18, %v4492_v41  ;;  %v3145_v8 = vmul.f32 %v18359_v24, %v14744_v28  ;;  %v3694_v47 = vrot.slane %v15033_v16, 2 }
 0x534   : > { %v5035_v7 = vsel %vm4648_vm4, %v18475_v20, %v5034_v43  ;;  %18476 = vst [vmem:[#allocation120_spill] sm:$0xff] %v15046_v58  ;;  %v18477_v43 = vrot.slane %v14780_v42, 5  ;;  %6666 = vrot.lane.b32.xlu0 %v6639_v61, %s9359_s30  ;;  %v18478_v29 = vrot.slane %v14840_v49, 1  ;;  %v4035_v48 = vrot.slane %v15041_v2, 2 }
 0x535   : > { %v15063_v18 = vmul.f32 %v18369_v40, %v14901_v55  ;;  %v8642_v28 = vadd.f32 -1.0, %v9270_v59  ;;  %v6119_v31 = vmin.f32 %v15025_v22, 0.0  ;;  %v5173_v42 = vadd.f32 %v5035_v7, %v4832_v52  ;;  %v18481_v59 = vld [vmem:[#allocation46_spill] sm:$0xff] }
 0x536   : > { %v5375_v56 = vsel %vm5329_vm5, %v18477_v43, %v5374_v57  ;;  %v3355_v62 = vsel %vm3297_vm2, %v18478_v29, %v3354_v63  ;;  %v18479_v57 = vrot.slane %v14850_v30, 2  ;;  %v18480_v14 = vrot.slane %v14860_v45, 2 }
 0x537   : > { %v3485_v53 = vadd.f32 %v3355_v62, %v3145_v8  ;;  %v4365_v41 = vrot.slane %v15063_v18, 3  ;;  %v15075_v37 = vmul.f32 %v18370_v13, %v14901_v55  ;;  %v5513_v16 = vadd.f32 %v5375_v56, %v5173_v42 }
 0x538   : > { %v3695_v50 = vsel %vm3637_vm3, %v18479_v57, %v3694_v47  ;;  %v4036_v49 = vsel %vm3637_vm3, %v18480_v14, %v4035_v48  ;;  %v6003_v20 = vadd.f32 %v14951_v19, %v18481_v59  ;;  %v15081_v30 = vmul.f32 %v18376_v23, %v15055_v54 }
 0x539   : > { %v3825_v7 = vadd.f32 %v3695_v50, %v3485_v53  ;;  %v18482_v61 = vrot.slane %v14945_v32, 6  ;;  %v18483_v45 = vrot.slane %v14790_v12, 6  ;;  %v4701_v52 = vrot.slane %v15075_v37, 4 }
 0x53a   : > { %v15091_v8 = vmul.f32 %v18379_v17, %v15055_v54  ;;  %v15095_v19 = vmul.f32 %v18386_v11, %v15055_v54  ;;  %v5042_v32 = vrot.slane %v15081_v30, 4  ;;  %v6225_v12 = vsel %vm6090_vm9, %v14899_v1, %v8642_v28  ;;  %v5938_v30 = vpop.permute.xlu1 %5937 }
 0x53b   : > { %v5715_v2 = vsel %vm5669_vm6, %v18483_v45, %v18482_v61  ;;  %v4166_v56 = vadd.f32 %v4036_v49, %v3825_v7  ;;  %v6158_v29 = vmul.f32 1.442695, %v6119_v31  ;;  %v18484_v62 = vrot.slane %v14884_v60, 3 }
 0x53c   : > { %v5853_v43 = vadd.f32 %v5715_v2, %v5513_v16  ;;  %v18485_v53 = vrot.slane %v14913_v36, 4  ;;  %v5382_v49 = vrot.slane %v15091_v8, 5  ;;  %v15113_v1 = vmul.f32 %v18389_v39, %v14901_v55  ;;  %v15119_v16 = vld [vmem:[#allocation2 + $0x118] sm:$0xff] }
 0x53d   : > { %v4366_v42 = vsel %vm4312_vm10, %v18484_v62, %v4365_v41  ;;  %v18486_v28 = vrot.slane %v14929_v34, 4  ;;  %v5722_v31 = vrot.slane %v15095_v19, 6  ;;  %v15123_v36 = vmul.f32 %v18366_v0, %v14901_v55 }
 0x53e   : > { %v4702_v57 = vsel %vm4648_vm4, %v18485_v53, %v4701_v52  ;;  %v6030_v50 = vadd.f32 %v6003_v20, %v5853_v43  ;;  %v4496_v14 = vadd.f32 %v4366_v42, %v4166_v56  ;;  %v15127_v59 = vmul.f32 %v18367_v26, %v15055_v54 }
 0x53f   : > { %v5043_v60 = vsel %vm4648_vm4, %v18486_v28, %v5042_v32  ;;  %v17706_v34 = vrot.slane %v15113_v1, 1  ;;  %v15135_v61 = vmul.f32 %v18369_v40, %v15055_v54  ;;  %v3147_v45 = vmul.f32 %v18359_v24, %v14832_v27 }
 0x540   : > { %v15130_v20 = vadd.f32 %v14896_v21, %v6030_v50  ;;  %v4836_v7 = vadd.f32 %v4702_v57, %v4496_v14  ;;  %v17719_v2 = vrot.slane %v15123_v36, 2  ;;  %v17717_v8 = vrot.slane %v15127_v59, 2  ;;  %v18488_v57 = vld [vmem:[#allocation40_spill] sm:$0xff] }
 0x541   : > { %v15143_v19 = vmul.f32 %v18370_v13, %v15055_v54  ;;  %v3359_v62 = vsel %vm3297_vm2, %v3354_v63, %v17706_v34  ;;  %v15151_v42 = vmul.f32 %v18376_v23, %v15119_v16  ;;  %v18487_v27 = vrot.slane %v14937_v3, 5 }
 0x542   : > { %v6118_v43 = vmin.f32 %v15130_v20, 0.0  ;;  %v5177_v56 = vadd.f32 %v5043_v60, %v4836_v7  ;;  %v6005_v50 = vadd.f32 %v5938_v30, %v18488_v57  ;;  %v3487_v14 = vadd.f32 %v3359_v62, %v3147_v45  ;;  %v5940_v57 = vpop.permute.xlu0 %5939 }
 0x543   : > { %v5383_v53 = vsel %vm5329_vm5, %v18487_v27, %v5382_v49  ;;  %v3699_v28 = vsel %vm3637_vm3, %v3694_v47, %v17719_v2  ;;  %v4040_v63 = vsel %vm3637_vm3, %v4035_v48, %v17717_v8  ;;  %v17715_v34 = vrot.slane %v15135_v61, 3 }
 0x544   : > { %v6156_v60 = vmul.f32 1.442695, %v6118_v43  ;;  %v5517_v7 = vadd.f32 %v5383_v53, %v5177_v56  ;;  %9271 = vpow2.f32 %v6158_v29  ;;  %v18489_v3 = vrot.slane %v14959_v25, 6 }
 0x545   : > { %v3827_v15 = vadd.f32 %v3699_v28, %v3487_v14  ;;  %v15169_v30 = vmul.f32 %v18379_v17, %v15119_v16  ;;  %v17712_v45 = vrot.slane %v15143_v19, 4  ;;  %v17711_v43 = vrot.slane %v15151_v42, 4 }
 0x546   : > { %v5723_v27 = vsel %vm5669_vm6, %v18489_v3, %v5722_v31  ;;  %9273 = vpow2.f32 %v6156_v60  ;;  %v15175_v48 = vpack.c.bf16 %v14613_v9, %v14607_v4  ;;  %v15180_v56 = vmul.f32 %v18386_v11, %v15119_v16  ;;  %v18493_v60 = vld [vmem:[#allocation123_spill] sm:$0xff] }
 0x547   : > { %v5857_v47 = vadd.f32 %v5723_v27, %v5517_v7  ;;  %v4168_v29 = vadd.f32 %v4040_v63, %v3827_v15  ;;  %v17709_v25 = vrot.slane %v15169_v30, 5  ;;  %v15183_v62 = vrot.slane %v14680_v33, 3  ;;  %v18495_v3 = vld [vmem:[#allocation47_spill] sm:$0xff] }
 0x548   : > { %18490 = vst [vmem:[#allocation128_spill] sm:$0xff] %v15175_v48  ;;  %v4370_v14 = vsel %vm4312_vm10, %v4365_v41, %v17715_v34  ;;  %v6566_v4 = vrot.slane %v14723_v35, 4  ;;  %v15192_v9 = vmul.f32 %v15003_v44, %v6225_v12  ;;  %v17708_v28 = vrot.slane %v15180_v56, 6 }
 0x549   : > { %18491 = vst [vmem:[#allocation133_spill] sm:$0xff] %v15183_v62  ;;  %v6032_v53 = vadd.f32 %v6005_v50, %v5857_v47  ;;  %v4498_v15 = vadd.f32 %v4370_v14, %v4168_v29  ;;  %v17710_v7 = vrot.slane %v18493_v60, 4  ;;  %vm6091_vm13 = vcmp.gt.f32.partialorder %v15130_v20, 0.0 }
 0x54a   : > { %18492 = vst [vmem:[#allocation5_spill] sm:$0xff] %v15192_v9  ;;  %v4706_v18 = vsel %vm4648_vm4, %v4701_v52, %v17712_v45  ;;  %v5047_v35 = vsel %vm4648_vm4, %v5042_v32, %v17711_v43  ;;  %v18494_v41 = vrot.slane %v14618_v10, 4  ;;  %v5387_v63 = vsel %vm5329_vm5, %v5382_v49, %v17709_v25  ;;  %v15218_v52 = vld [vmem:[#allocation2 + $0x128] sm:$0xff]  ;;  %v15267_v43 = vld [vmem:[#allocation2 + $0x138] sm:$0xff] }
 0x54b   : > { %v15198_v33 = vadd.f32 %v14896_v21, %v6032_v53  ;;  %v4838_v50 = vadd.f32 %v4706_v18, %v4498_v15  ;;  %v6006_v27 = vadd.f32 %v5940_v57, %v18495_v3  ;;  %v6569_v37 = vsel %vm4648_vm4, %v6566_v4, %v17710_v7 }
 0x54c   : > { %v6567_v12 = vsel %vm4648_vm4, %v18494_v41, %v6566_v4  ;;  %v5727_v10 = vsel %vm5669_vm6, %v5722_v31, %v17708_v28  ;;  %v3151_v29 = vmul.f32 %v18359_v24, %v15055_v54  ;;  %vm6092_vm14 = vcmp.gt.f32.partialorder %v15025_v22, 0.0 }
 0x54d   : > { %v6120_v47 = vmin.f32 %v15198_v33, 0.0  ;;  %v6640_v32 = vpack.c.bf16 %v6569_v37, %v6567_v12  ;;  %v5179_v49 = vadd.f32 %v5047_v35, %v4838_v50  ;;  %v15229_v53 = vmul.f32 %v18389_v39, %v15055_v54 }
 0x54e   : > { %v15233_v57 = vmul.f32 %v18389_v39, %v15119_v16  ;;  %v15237_v14 = vmul.f32 %v18366_v0, %v15055_v54  ;;  %v15242_v4 = vmul.f32 %v18366_v0, %v15119_v16  ;;  %v15246_v15 = vmul.f32 %v18367_v26, %v15119_v16  ;;  %v9272_v35 = vpop.eup %9271 }
 0x54f   : > { %v6160_v31 = vmul.f32 1.442695, %v6120_v47  ;;  %6668 = vrot.lane.b32.xlu1 %v6640_v32, %s9359_s30  ;;  %v15250_v18 = vmul.f32 %v18367_v26, %v15218_v52  ;;  %v5519_v41 = vadd.f32 %v5387_v63, %v5179_v49  ;;  %v17721_v54 = vrot.slane %v15229_v53, 1 }
 0x550   : > { %v17713_v12 = vrot.slane %v15233_v57, 1  ;;  %v17720_v50 = vrot.slane %v15237_v14, 2  ;;  %v9274_v3 = vpop.eup %9273  ;;  %v17714_v37 = vrot.slane %v15242_v4, 2  ;;  %v17718_v47 = vrot.slane %v15246_v15, 2 }
 0x551   : > { %9275 = vpow2.f32 %v6160_v31  ;;  %v17716_v32 = vrot.slane %v15250_v18, 2  ;;  %v8643_v28 = vadd.f32 -1.0, %v9274_v3  ;;  %v5859_v25 = vadd.f32 %v5727_v10, %v5519_v41  ;;  %v2541_v31 = vpop.permute.xlu1 %2540 }
 0x552   : > { %v3367_v63 = vsel %vm3297_vm2, %v17721_v54, %v17713_v12  ;;  %v15265_v49 = vmul.f32 %v18369_v40, %v15119_v16  ;;  %v8644_v7 = vadd.f32 -1.0, %v9272_v35  ;;  %v3707_v10 = vsel %vm3637_vm3, %v17720_v50, %v17714_v37 }
 0x553   : > { %v3491_v45 = vadd.f32 %v3367_v63, %v3151_v29  ;;  %v15276_v41 = vmul.f32 %v18369_v40, %v15218_v52  ;;  %v6226_v3 = vsel %vm6091_vm13, %v15130_v20, %v8643_v28  ;;  %v6033_v12 = vadd.f32 %v6006_v27, %v5859_v25 }
 0x554   : > { %v4048_v29 = vsel %vm3637_vm3, %v17718_v47, %v17716_v32  ;;  %v15288_v35 = vmul.f32 %v18370_v13, %v15119_v16  ;;  %v15291_v63 = vmul.f32 %v15046_v58, %v6226_v3  ;;  %v15296_v20 = vmul.f32 %v18370_v13, %v15218_v52 }
 0x555   : > { %v3831_v37 = vadd.f32 %v3707_v10, %v3491_v45  ;;  %v17722_v34 = vrot.slane %v15276_v41, 3  ;;  %v15299_v25 = vadd.f32 %v14896_v21, %v6033_v12  ;;  %v4373_v28 = vrot.slane %v15265_v49, 3 }
 0x556   : > { %18496 = vst [vmem:[#allocation6_spill] sm:$0xff] %v15291_v63  ;;  %v4913_v27 = vmul.f32 %v18376_v23, %v15218_v52  ;;  %v15306_v32 = vmul.f32 %v18376_v23, %v15267_v43  ;;  %v6227_v45 = vsel %vm6092_vm14, %v15025_v22, %v8644_v7  ;;  %v15313_v10 = vpack.c.bf16 %v15291_v63, %v15192_v9 }
 0x557   : > { %v4172_v3 = vadd.f32 %v4048_v29, %v3831_v37  ;;  %v4709_v12 = vrot.slane %v15288_v35, 4  ;;  %v6121_v49 = vmin.f32 %v15299_v25, 0.0  ;;  %v4378_v8 = vsel %vm4312_vm10, %v4373_v28, %v17722_v34  ;;  %v5944_v37 = vpop.permute.xlu1 %5943  ;;  %v18499_v34 = vld [vmem:[#allocation141_spill] sm:$0xff] }
 0x558   : > { %18497 = vst [vmem:[#allocation15_spill] sm:$0xff] %v15313_v10  ;;  %v17725_v47 = vrot.slane %v15296_v20, 4  ;;  %v5050_v2 = vrot.slane %v4913_v27, 4  ;;  %v15324_v22 = vmul.f32 %v18379_v17, %v15218_v52  ;;  %v15328_v7 = vmul.f32 %v18379_v17, %v15267_v43 }
 0x559   : > { %v4502_v50 = vadd.f32 %v4378_v8, %v4172_v3  ;;  %v15333_v29 = vsel %vm4312_vm10, %v14994_v6, %v15183_v62  ;;  %v15340_v35 = vmul.f32 %v18386_v11, %v15218_v52  ;;  %v15344_v27 = vmul.f32 %v18386_v11, %v15267_v43 }
 0x55a   : > { %18498 = vst [vmem:[#allocation131_spill] sm:$0xff] %v15333_v29  ;;  %v4714_v8 = vsel %vm4648_vm4, %v4709_v12, %v17725_v47  ;;  %v6319_v54 = vsel %vm4312_vm10, %v15183_v62, %v18499_v34  ;;  %v18500_v6 = vrot.slane %v15306_v32, 4  ;;  %v17735_v47 = vrot.slane %v15328_v7, 5 }
 0x55b   : > { %v9276_v3 = vpop.eup %9275  ;;  %v4842_v10 = vadd.f32 %v4714_v8, %v4502_v50  ;;  %v15354_v58 = vmul.f32 %v15333_v29, %v6227_v45  ;;  %v5390_v48 = vrot.slane %v15324_v22, 5  ;;  %vm6093_vm15 = vcmp.gt.f32.partialorder %v15198_v33, 0.0  ;;  %v2619_v8 = vpop.permute.xlu0 %2618 }
 0x55c   : > { %v5055_v38 = vsel %vm4648_vm4, %v5050_v2, %v18500_v6  ;;  %v8645_v44 = vadd.f32 -1.0, %v9276_v3  ;;  %v6162_v63 = vmul.f32 1.442695, %v6121_v49  ;;  %v3149_v34 = vmul.f32 %v18359_v24, %v14901_v55 }
 0x55d   : > { %18501 = vst [vmem:[#allocation134_spill] sm:$0xff] %v15354_v58  ;;  %v5183_v9 = vadd.f32 %v5055_v38, %v4842_v10  ;;  %v5395_v45 = vsel %vm5329_vm5, %v5390_v48, %v17735_v47  ;;  %v5730_v3 = vrot.slane %v15340_v35, 6  ;;  %v18502_v22 = vrot.slane %v15229_v53, 1  ;;  %v18504_v10 = vld [vmem:[#allocation49_spill] sm:$0xff] }
 0x55e   : > { %v6228_v50 = vsel %vm6093_vm15, %v15198_v33, %v8645_v44  ;;  %v18503_v6 = vrot.slane %v15113_v1, 1  ;;  %v6008_v55 = vadd.f32 %v5944_v37, %v18504_v10  ;;  %v2697_v44 = vpop.permute.xlu1 %2696  ;;  %v18505_v33 = vld [vmem:[#allocation31_spill] sm:$0xff]  ;;  %v18506_v47 = vrot.slane %v15344_v27, 6 }
 0x55f   : > { %v15371_v49 = vmul.f32 %v6319_v54, %v6228_v50  ;;  %v5523_v38 = vadd.f32 %v5395_v45, %v5183_v9  ;;  %v2938_v29 = vsel %vm1197_vm1, %v18505_v33, %v2541_v31  ;;  %v18507_v53 = vrot.slane %v15237_v14, 2 }
 0x560   : > { %v3363_v46 = vsel %vm3297_vm2, %v18503_v6, %v18502_v22  ;;  %v5735_v35 = vsel %vm5669_vm6, %v5730_v3, %v18506_v47  ;;  %v18508_v1 = vrot.slane %v15123_v36, 2  ;;  %v18509_v54 = vrot.slane %v15246_v15, 2  ;;  %v18513_v15 = vld [vmem:[#allocation14_spill] sm:$0xff] }
 0x561   : > { %v3489_v62 = vadd.f32 %v3363_v46, %v3149_v34  ;;  %v18510_v9 = vrot.slane %v15127_v59, 2  ;;  %v15391_v37 = vpack.c.bf16 %v15371_v49, %v15354_v58  ;;  %v2964_v31 = vsel %vm2752_vm11, %v2938_v29, %v2619_v8 }
 0x562   : > { %v3703_v22 = vsel %vm3637_vm3, %v18508_v1, %v18507_v53  ;;  %v5863_v34 = vadd.f32 %v5735_v35, %v5523_v38  ;;  %9277 = vpow2.f32 %v6162_v63  ;;  %v18512_v14 = vrot.slane %v15135_v61, 3 }
 0x563   : > { %v4044_v46 = vsel %vm3637_vm3, %v18510_v9, %v18509_v54  ;;  %18511 = vst [vmem:[#allocation7_spill] sm:$0xff] %v15391_v37  ;;  %v3829_v47 = vadd.f32 %v3703_v22, %v3489_v62  ;;  %v2990_v50 = vsel %vm2779_vm12, %v2964_v31, %v2697_v44  ;;  %v6570_v45 = vrot.slane %v18513_v15, 4  ;;  %v15436_v9 = vld [vmem:[#allocation2 + $0x148] sm:$0xff] }
 0x564   : > { %v4374_v36 = vsel %vm4312_vm10, %v18512_v14, %v4373_v28  ;;  %v6035_v59 = vadd.f32 %v6008_v55, %v5863_v34  ;;  %v18514_v10 = vrot.slane %v15143_v19, 4  ;;  %3049 = vst.msk [vmem:[#allocation2 + $0x1a8] sm:$0xff] %vm2806_vm8, %v2990_v50  ;;  %v17742_v29 = vrot.slane %v14948_v51, 4 }
 0x565   : > { %v4170_v6 = vadd.f32 %v4044_v46, %v3829_v47  ;;  %v18515_v62 = vrot.slane %v15151_v42, 4  ;;  %v18516_v63 = vrot.slane %v18493_v60, 4  ;;  %v15412_v8 = vmul.f32 %v18389_v39, %v15218_v52  ;;  %v5942_v60 = vpop.permute.xlu0 %5941 }
 0x566   : > { %v4710_v33 = vsel %vm4648_vm4, %v18514_v10, %v4709_v12  ;;  %v15416_v19 = vmul.f32 %v18389_v39, %v15267_v43  ;;  %v15419_v12 = vadd.f32 %v14896_v21, %v6035_v59  ;;  %v15426_v42 = vmul.f32 %v18366_v0, %v15218_v52  ;;  %v18519_v10 = vld [vmem:[#allocation104_spill] sm:$0xff] }
 0x567   : > { %v5051_v61 = vsel %vm4648_vm4, %v18515_v62, %v5050_v2  ;;  %v6571_v28 = vsel %vm4648_vm4, %v18516_v63, %v6570_v45  ;;  %v4500_v38 = vadd.f32 %v4374_v36, %v4170_v6  ;;  %v6573_v2 = vsel %vm4648_vm4, %v6570_v45, %v17742_v29 }
 0x568   : > { %v6641_v55 = vpack.c.bf16 %v6573_v2, %v6571_v28  ;;  %v17744_v44 = vrot.slane %v15412_v8, 1  ;;  %v17741_v35 = vrot.slane %v15416_v19, 1  ;;  %v15432_v53 = vmul.f32 %v18366_v0, %v15267_v43 }
 0x569   : > { %v6123_v22 = vmin.f32 %v15419_v12, 0.0  ;;  %v4840_v54 = vadd.f32 %v4710_v33, %v4500_v38  ;;  %v3155_v46 = vmul.f32 %v18359_v24, %v15218_v52  ;;  %v17743_v34 = vrot.slane %v15426_v42, 2  ;;  %v2543_v28 = vpop.permute.xlu0 %2542 }
 0x56a   : > { %6670 = vrot.lane.b32.xlu0 %v6641_v55, %s9359_s30  ;;  %v3375_v31 = vsel %vm3297_vm2, %v17744_v44, %v17741_v35  ;;  %v17739_v47 = vrot.slane %v15432_v53, 2  ;;  %v15450_v14 = vmul.f32 %v18367_v26, %v15267_v43  ;;  %v18517_v52 = vrot.slane %v15169_v30, 5 }
 0x56b   : > { %v6166_v36 = vmul.f32 1.442695, %v6123_v22  ;;  %v5181_v50 = vadd.f32 %v5051_v61, %v4840_v54  ;;  %v3495_v45 = vadd.f32 %v3375_v31, %v3155_v46  ;;  %v18518_v59 = vrot.slane %v15180_v56, 6 }
 0x56c   : > { %v5391_v15 = vsel %vm5329_vm5, %v18517_v52, %v5390_v48  ;;  %v6007_v33 = vadd.f32 %v5942_v60, %v18519_v10  ;;  %v3715_v62 = vsel %vm3637_vm3, %v17743_v34, %v17739_v47  ;;  %v15466_v61 = vmul.f32 %v18367_v26, %v15436_v9  ;;  %v15468_v48 = vld [vmem:[#allocation2 + $0x158] sm:$0xff]  ;;  %v9278_v63 = vpop.eup %9277  ;;  %v18522_v47 = vld [vmem:[#allocation33_spill] sm:$0xff] }
 0x56d   : > { %v5731_v6 = vsel %vm5669_vm6, %v18518_v59, %v5730_v3  ;;  %9279 = vpow2.f32 %v6166_v36  ;;  %v5521_v30 = vadd.f32 %v5391_v15, %v5181_v50  ;;  %v4051_v56 = vrot.slane %v15450_v14, 2 }
 0x56e   : > { %v15473_v3 = vmul.f32 %v18369_v40, %v15267_v43  ;;  %v3835_v38 = vadd.f32 %v3715_v62, %v3495_v45  ;;  %v17737_v2 = vrot.slane %v15466_v61, 2  ;;  %v15478_v60 = vmul.f32 %v18369_v40, %v15436_v9 }
 0x56f   : > { %v4575_v55 = vmul.f32 %v18370_v13, %v15267_v43  ;;  %v5861_v22 = vadd.f32 %v5731_v6, %v5521_v30  ;;  %v15485_v46 = vmul.f32 %v18370_v13, %v15436_v9  ;;  %v4917_v31 = vmul.f32 %v18376_v23, %v15436_v9 }
 0x570   : > { %v4381_v54 = vrot.slane %v15473_v3, 3  ;;  %v4056_v14 = vsel %vm3637_vm3, %v4051_v56, %v17737_v2  ;;  %v17736_v36 = vrot.slane %v15478_v60, 3  ;;  %v15495_v52 = vmul.f32 %v18376_v23, %v15468_v48 }
 0x571   : > { %18520 = vst [vmem:[#allocation8_spill] sm:$0xff] %v15485_v46  ;;  %v4717_v50 = vrot.slane %v4575_v55, 4  ;;  %v6034_v15 = vadd.f32 %v6007_v33, %v5861_v22  ;;  %v4176_v45 = vadd.f32 %v4056_v14, %v3835_v38  ;;  %v17738_v59 = vrot.slane %v15485_v46, 4 }
 0x572   : > { %18521 = vst [vmem:[#allocation74_spill] sm:$0xff] %v15495_v52  ;;  %v5058_v6 = vrot.slane %v4917_v31, 4  ;;  %v4386_v10 = vsel %vm4312_vm10, %v4381_v54, %v17736_v36  ;;  %v17740_v62 = vrot.slane %v15495_v52, 4  ;;  %v15504_v30 = vmul.f32 %v18379_v17, %v15436_v9  ;;  %v5948_v31 = vpop.permute.xlu1 %5947  ;;  %v18526_v52 = vld [vmem:[#allocation43_spill] sm:$0xff] }
 0x573   : > { %v15508_v3 = vmul.f32 %v18379_v17, %v15468_v48  ;;  %v8646_v55 = vadd.f32 -1.0, %v9278_v63  ;;  %v15511_v33 = vadd.f32 %v14896_v21, %v6034_v15  ;;  %v4506_v38 = vadd.f32 %v4386_v10, %v4176_v45  ;;  %v5946_v15 = vpop.permute.xlu0 %5945 }
 0x574   : > { %v4722_v22 = vsel %vm4648_vm4, %v4717_v50, %v17738_v59  ;;  %v5063_v14 = vsel %vm4648_vm4, %v5058_v6, %v17740_v62  ;;  %v15522_v2 = vmul.f32 %v18386_v11, %v15436_v9  ;;  %v15526_v63 = vmul.f32 %v18386_v11, %v15468_v48 }
 0x575   : > { %vm6094_vm7 = vcmp.gt.f32.partialorder %v15299_v25, 0.0  ;;  %v6122_v10 = vmin.f32 %v15511_v33, 0.0  ;;  %v4846_v59 = vadd.f32 %v4722_v22, %v4506_v38  ;;  %v2939_v62 = vsel %vm1197_vm1, %v18522_v47, %v2543_v28 }
 0x576   : > { %v5398_v35 = vrot.slane %v15504_v30, 5  ;;  %v3153_v1 = vmul.f32 %v18359_v24, %v15119_v16  ;;  %v6229_v36 = vsel %vm6094_vm7, %v15299_v25, %v8646_v55  ;;  %v18523_v37 = vrot.slane %v15412_v8, 1 }
 0x577   : > { %v9280_v34 = vpop.eup %9279  ;;  %v6164_v44 = vmul.f32 1.442695, %v6122_v10  ;;  %v5187_v45 = vadd.f32 %v5063_v14, %v4846_v59  ;;  %v18524_v58 = vrot.slane %v15233_v57, 1  ;;  %v18525_v47 = vrot.slane %v15508_v3, 5 }
 0x578   : > { %v8648_v22 = vadd.f32 -1.0, %v9280_v34  ;;  %v5738_v30 = vrot.slane %v15522_v2, 6  ;;  %v6010_v46 = vadd.f32 %v5948_v31, %v18526_v52  ;;  %v18527_v25 = vrot.slane %v15426_v42, 2  ;;  %v18530_v34 = vld [vmem:[#allocation151_spill] sm:$0xff]  ;;  %v2699_v42 = vpop.permute.xlu0 %2698 }
 0x579   : > { %v3371_v38 = vsel %vm3297_vm2, %v18524_v58, %v18523_v37  ;;  %v5403_v28 = vsel %vm5329_vm5, %v5398_v35, %v18525_v47  ;;  %v18528_v59 = vrot.slane %v15242_v4, 2  ;;  %v18529_v57 = vrot.slane %v15250_v18, 2  ;;  %v2621_v37 = vpop.permute.xlu1 %2620 }
 0x57a   : > { %v3493_v29 = vadd.f32 %v3371_v38, %v3153_v1  ;;  %v5527_v16 = vadd.f32 %v5403_v28, %v5187_v45  ;;  %v15557_v55 = vmul.f32 %v18530_v34, %v6229_v36  ;;  %vm6096_vm9 = vcmp.gt.f32.partialorder %v15419_v12, 0.0  ;;  %v18534_v38 = vld [vmem:[#allocation5_spill] sm:$0xff] }
 0x57b   : > { %v3711_v8 = vsel %vm3637_vm3, %v18528_v59, %v18527_v25  ;;  %v4052_v58 = vsel %vm3637_vm3, %v18529_v57, %v4051_v56  ;;  %v18531_v1 = vrot.slane %v15526_v63, 6  ;;  %9281 = vpow2.f32 %v6164_v44 }
 0x57c   : > { %v3833_v52 = vadd.f32 %v3711_v8, %v3493_v29  ;;  %v18532_v31 = vrot.slane %v15276_v41, 3  ;;  %v18533_v56 = vrot.slane %v15296_v20, 4  ;;  %v6231_v36 = vsel %vm6096_vm9, %v15419_v12, %v8648_v22 }
 0x57d   : > { %v5743_v2 = vsel %vm5669_vm6, %v5738_v30, %v18531_v1  ;;  %v2965_v10 = vsel %vm2752_vm11, %v2939_v62, %v2621_v37  ;;  %v6576_v47 = vrot.slane %v18534_v38, 4  ;;  %v18535_v29 = vrot.slane %v15306_v32, 4  ;;  %v15617_v1 = vld [vmem:[#allocation2 + $0x168] sm:$0xff]  ;;  %v18560_v38 = vld [vmem:[#allocation78_spill] sm:$0xff] }
 0x57e   : > { %v5867_v4 = vadd.f32 %v5743_v2, %v5527_v16  ;;  %v4382_v18 = vsel %vm4312_vm10, %v18532_v31, %v4381_v54  ;;  %v4718_v14 = vsel %vm4648_vm4, %v18533_v56, %v4717_v50  ;;  %v4174_v45 = vadd.f32 %v4052_v58, %v3833_v52 }
 0x57f   : > { %v5059_v44 = vsel %vm4648_vm4, %v18535_v29, %v5058_v6  ;;  %v18536_v41 = vrot.slane %v14976_v5, 4  ;;  %v18537_v54 = vrot.slane %v14948_v51, 4  ;;  %v2991_v50 = vsel %vm2779_vm12, %v2965_v10, %v2699_v42 }
 0x580   : > { %v6037_v28 = vadd.f32 %v6010_v46, %v5867_v4  ;;  %v4504_v16 = vadd.f32 %v4382_v18, %v4174_v45  ;;  %3051 = vst.msk [vmem:[#allocation2 + $0x1b8] sm:$0xff] %vm2806_vm8, %v2991_v50  ;;  %v15589_v32 = vmul.f32 %v18389_v39, %v15436_v9  ;;  %v15593_v51 = vmul.f32 %v18366_v0, %v15436_v9  ;;  %v18541_v18 = vld [vmem:[#allocation45_spill] sm:$0xff] }
 0x581   : > { %v6575_v20 = vsel %vm4648_vm4, %v18537_v54, %v18536_v41  ;;  %v18538_v12 = vmov %v18536_v41  ;;  %v15600_v22 = vmul.f32 %v18367_v26, %v15468_v48  ;;  %v15604_v5 = vmul.f32 %v18369_v40, %v15468_v48 }
 0x582   : > { %v6577_v62 = vsel %vm4648_vm4, %v18538_v12, %v6576_v47  ;;  %v15596_v46 = vadd.f32 %v14896_v21, %v6037_v28  ;;  %v4844_v25 = vadd.f32 %v4718_v14, %v4504_v16  ;;  %v3378_v59 = vrot.slane %v15589_v32, 1  ;;  %v18546_v32 = vld [vmem:[#allocation60_spill] sm:$0xff] }
 0x583   : > { %v6642_v6 = vpack.c.bf16 %v6577_v62, %v6575_v20  ;;  %v3718_v8 = vrot.slane %v15593_v51, 2  ;;  %v15610_v57 = vmul.f32 %v18370_v13, %v15468_v48  ;;  %v18539_v37 = vrot.slane %v15328_v7, 5 }
 0x584   : > { %v6125_v58 = vmin.f32 %v15596_v46, 0.0  ;;  %v3157_v2 = vmul.f32 %v18359_v24, %v15267_v43  ;;  %v4059_v52 = vrot.slane %v15600_v22, 2  ;;  %v5185_v42 = vadd.f32 %v5059_v44, %v4844_v25 }
 0x585   : > { %v5399_v34 = vsel %vm5329_vm5, %v18539_v37, %v5398_v35  ;;  %6672 = vrot.lane.b32.xlu1 %v6642_v6, %s9359_s30  ;;  %v18540_v4 = vrot.slane %v15344_v27, 6  ;;  %v6009_v56 = vadd.f32 %v5946_v15, %v18541_v18  ;;  %v18542_v7 = vrot.slane %v15416_v19, 1  ;;  %v9282_v15 = vpop.eup %9281 }
 0x586   : > { %v6170_v14 = vmul.f32 1.442695, %v6125_v58  ;;  %v18543_v10 = vrot.slane %v15432_v53, 2  ;;  %v4389_v43 = vrot.slane %v15604_v5, 3  ;;  %v5525_v29 = vadd.f32 %v5399_v34, %v5185_v42 }
 0x587   : > { %v5739_v31 = vsel %vm5669_vm6, %v18540_v4, %v5738_v30  ;;  %v3379_v35 = vsel %vm3297_vm2, %v18542_v7, %v3378_v59  ;;  %v18544_v44 = vrot.slane %v15466_v61, 2  ;;  %v4725_v30 = vrot.slane %v15610_v57, 4  ;;  %v18545_v61 = vld [vmem:[#allocation6_spill] sm:$0xff] }
 0x588   : > { %v3497_v45 = vadd.f32 %v3379_v35, %v3157_v2  ;;  %v3719_v28 = vsel %vm3637_vm3, %v18543_v10, %v3718_v8  ;;  %v15639_v19 = vmul.f32 %v18376_v23, %v15617_v1  ;;  %9283 = vpow2.f32 %v6170_v14 }
 0x589   : > { %v4060_v27 = vsel %vm3637_vm3, %v18544_v44, %v4059_v52  ;;  %v15643_v53 = vmul.f32 %v18379_v17, %v15617_v1  ;;  %v15647_v54 = vmul.f32 %v18386_v11, %v15617_v1  ;;  %v6578_v20 = vrot.slane %v18545_v61, 4 }
 0x58a   : > { %v3837_v41 = vadd.f32 %v3719_v28, %v3497_v45  ;;  %v5865_v16 = vadd.f32 %v5739_v31, %v5525_v29  ;;  %v5066_v12 = vrot.slane %v15639_v19, 4  ;;  %v15654_v51 = vmul.f32 %v18546_v32, %v6231_v36  ;;  %v18548_v36 = vld [vmem:[#allocation8_spill] sm:$0xff]  ;;  %v15686_v29 = vld [vmem:[#allocation2 + $0x178] sm:$0xff] }
 0x58b   : > { %v18547_v22 = vrot.slane %v15478_v60, 3  ;;  %v8647_v58 = vadd.f32 -1.0, %v9282_v15  ;;  %v5406_v34 = vrot.slane %v15643_v53, 5  ;;  %v15664_v2 = vmul.f32 %v18389_v39, %v15468_v48  ;;  %v18550_v60 = vld [vmem:[#allocation74_spill] sm:$0xff] }
 0x58c   : > { %v4178_v6 = vadd.f32 %v4060_v27, %v3837_v41  ;;  %v6036_v37 = vadd.f32 %v6009_v56, %v5865_v16  ;;  %vm6095_vm11 = vcmp.gt.f32.partialorder %v15511_v33, 0.0  ;;  %v18549_v4 = vrot.slane %v18548_v36, 4  ;;  %v5950_v16 = vpop.permute.xlu1 %5949 }
 0x58d   : > { %v4390_v25 = vsel %vm4312_vm10, %v18547_v22, %v4389_v43  ;;  %v18551_v18 = vrot.slane %v18550_v60, 4  ;;  %v5746_v56 = vrot.slane %v15647_v54, 6  ;;  %v3159_v14 = vmul.f32 %v18359_v24, %v15436_v9 }
 0x58e   : > { %v4508_v42 = vadd.f32 %v4390_v25, %v4178_v6  ;;  %v4726_v31 = vsel %vm4648_vm4, %v18549_v4, %v4725_v30  ;;  %v15677_v35 = vadd.f32 %v14896_v21, %v6036_v37  ;;  %v3382_v45 = vrot.slane %v15664_v2, 1 }
 0x58f   : > { %v5067_v7 = vsel %vm4648_vm4, %v18551_v18, %v5066_v12  ;;  %v15684_v10 = vmul.f32 %v18366_v0, %v15468_v48  ;;  %v15690_v44 = vmul.f32 %v18367_v26, %v15617_v1  ;;  %v15694_v27 = vmul.f32 %v18369_v40, %v15617_v1 }
 0x590   : > { %v4848_v28 = vadd.f32 %v4726_v31, %v4508_v42  ;;  %v15698_v9 = vmul.f32 %v18370_v13, %v15617_v1  ;;  %v6124_v19 = vmin.f32 %v15677_v35, 0.0  ;;  %v18552_v15 = vrot.slane %v15508_v3, 5 }
 0x591   : > { %v3383_v32 = vsel %vm3297_vm2, %v3378_v59, %v3382_v45  ;;  %v3722_v6 = vrot.slane %v15684_v10, 2  ;;  %v4063_v37 = vrot.slane %v15690_v44, 2  ;;  %v4393_v2 = vrot.slane %v15694_v27, 3  ;;  %v18553_v59 = vld [vmem:[#allocation51_spill] sm:$0xff] }
 0x592   : > { %v5407_v41 = vsel %vm5329_vm5, %v18552_v15, %v5406_v34  ;;  %v5189_v22 = vadd.f32 %v5067_v7, %v4848_v28  ;;  %v3499_v25 = vadd.f32 %v3383_v32, %v3159_v14  ;;  %v6168_v42 = vmul.f32 1.442695, %v6124_v19  ;;  %v9284_v31 = vpop.eup %9283 }
 0x593   : > { %v3723_v36 = vsel %vm3637_vm3, %v3718_v8, %v3722_v6  ;;  %v4729_v4 = vrot.slane %v15698_v9, 4  ;;  %v15714_v3 = vmul.f32 %v18376_v23, %v15686_v29  ;;  %v6011_v18 = vadd.f32 %v5950_v16, %v18553_v59 }
 0x594   : > { %v5529_v60 = vadd.f32 %v5407_v41, %v5189_v22  ;;  %v3839_v10 = vadd.f32 %v3723_v36, %v3499_v25  ;;  %v4064_v7 = vsel %vm3637_vm3, %v4059_v52, %v4063_v37  ;;  %v8650_v14 = vadd.f32 -1.0, %v9284_v31  ;;  %v5952_v25 = vpop.permute.xlu0 %5951 }
 0x595   : > { %9285 = vpow2.f32 %v6168_v42  ;;  %v18554_v28 = vrot.slane %v15526_v63, 6  ;;  %v5070_v44 = vrot.slane %v15714_v3, 4  ;;  %v15726_v41 = vmul.f32 %v18379_v17, %v15686_v29 }
 0x596   : > { %v4180_v15 = vadd.f32 %v4064_v7, %v3839_v10  ;;  %v15730_v16 = vmul.f32 %v18386_v11, %v15686_v29  ;;  %v6230_v52 = vsel %vm6095_vm11, %v15511_v33, %v8647_v58  ;;  %vm6098_vm12 = vcmp.gt.f32.partialorder %v15596_v46, 0.0 }
 0x597   : > { %v5747_v8 = vsel %vm5669_vm6, %v18554_v28, %v5746_v56  ;;  %v4394_v63 = vsel %vm4312_vm10, %v4389_v43, %v4393_v2  ;;  %v4730_v32 = vsel %vm4648_vm4, %v4725_v30, %v4729_v4  ;;  %v5071_v33 = vsel %vm4648_vm4, %v5066_v12, %v5070_v44  ;;  %v18555_v30 = vld [vmem:[#allocation54_spill] sm:$0xff] }
 0x598   : > { %v5869_v19 = vadd.f32 %v5747_v8, %v5529_v60  ;;  %v4510_v42 = vadd.f32 %v4394_v63, %v4180_v15  ;;  %v5410_v58 = vrot.slane %v15726_v41, 5  ;;  %v5750_v36 = vrot.slane %v15730_v16, 6  ;;  %v15775_v63 = vld [vmem:[#allocation2 + $0x188] sm:$0xff] }
 0x599   : > { %v15753_v5 = vmul.f32 %v18389_v39, %v15617_v1  ;;  %v15757_v57 = vmul.f32 %v18366_v0, %v15617_v1  ;;  %v15761_v43 = vmul.f32 %v18367_v26, %v15686_v29  ;;  %v15764_v31 = vmul.f32 %v18555_v30, %v6230_v52 }
 0x59a   : > { %v6038_v22 = vadd.f32 %v6011_v18, %v5869_v19  ;;  %v6233_v12 = vsel %vm6098_vm12, %v15596_v46, %v8650_v14  ;;  %v4850_v59 = vadd.f32 %v4730_v32, %v4510_v42  ;;  %v18556_v18 = vld [vmem:[#allocation52_spill] sm:$0xff]  ;;  %v3161_v46 = vmul.f32 %v18359_v24, %v15468_v48 }
 0x59b   : > { %v6012_v10 = vadd.f32 %v5952_v25, %v18556_v18  ;;  %v3386_v7 = vrot.slane %v15753_v5, 1  ;;  %v3726_v28 = vrot.slane %v15757_v57, 2  ;;  %v4067_v8 = vrot.slane %v15761_v43, 2 }
 0x59c   : > { %v15768_v60 = vadd.f32 %v14896_v21, %v6038_v22  ;;  %v5191_v15 = vadd.f32 %v5071_v33, %v4850_v59  ;;  %v15781_v21 = vmul.f32 %v18369_v40, %v15686_v29  ;;  %v5411_v14 = vsel %vm5329_vm5, %v5406_v34, %v5410_v58 }
 0x59d   : > { %v5751_v52 = vsel %vm5669_vm6, %v5746_v56, %v5750_v36  ;;  %v3387_v48 = vsel %vm3297_vm2, %v3382_v45, %v3386_v7  ;;  %v15798_v32 = vmul.f32 %v18370_v13, %v15686_v29  ;;  %v3727_v53 = vsel %vm3637_vm3, %v3722_v6, %v3726_v28 }
 0x59e   : > { %v6126_v19 = vmin.f32 %v15768_v60, 0.0  ;;  %v5531_v25 = vadd.f32 %v5411_v14, %v5191_v15  ;;  %v3501_v42 = vadd.f32 %v3387_v48, %v3161_v46  ;;  %v4068_v54 = vsel %vm3637_vm3, %v4063_v37, %v4067_v8 }
 0x59f   : > { %v9286_v34 = vpop.eup %9285  ;;  %v4397_v56 = vrot.slane %v15781_v21, 3  ;;  %v4733_v45 = vrot.slane %v15798_v32, 4  ;;  %v15810_v33 = vmul.f32 %v18376_v23, %v15775_v63  ;;  %v15816_v15 = vmul.f32 %v18379_v17, %v15775_v63 }
 0x5a0   : > { %v6172_v22 = vmul.f32 1.442695, %v6126_v19  ;;  %v8649_v30 = vadd.f32 -1.0, %v9286_v34  ;;  %v5871_v59 = vadd.f32 %v5751_v52, %v5531_v25  ;;  %v3841_v18 = vadd.f32 %v3727_v53, %v3501_v42  ;;  %v15840_v34 = vld [vmem:[%s17433_s7] ss:$0 sm:$0xff] }
 0x5a1   : > { %v5074_v6 = vrot.slane %v15810_v33, 4  ;;  %v15820_v37 = vmul.f32 %v18386_v11, %v15775_v63  ;;  %v15824_v46 = vpack.c.bf16 %v15764_v31, %v15557_v55  ;;  %vm6097_vm13 = vcmp.gt.f32.partialorder %v15677_v35, 0.0 }
 0x5a2   : > { %9287 = vpow2.f32 %v6172_v22  ;;  %v6039_v14 = vadd.f32 %v6012_v10, %v5871_v59  ;;  %v4182_v52 = vadd.f32 %v4068_v54, %v3841_v18  ;;  %v18557_v22 = vld [vmem:[#allocation153_spill] sm:$0xff]  ;;  %v6232_v42 = vsel %vm6097_vm13, %v15677_v35, %v8649_v30  ;;  %v18558_v59 = vld [vmem:[#allocation134_spill] sm:$0xff]  ;;  %v15867_v18 = vld [vmem:[#allocation2 + $0x198] sm:$0xff] }
 0x5a3   : > { %v15829_v25 = vmul.f32 %v18557_v22, %v6233_v12  ;;  %v4398_v53 = vsel %vm4312_vm10, %v4393_v2, %v4397_v56  ;;  %v4734_v35 = vsel %vm4648_vm4, %v4729_v4, %v4733_v45  ;;  %v6579_v27 = vsel %vm4648_vm4, %v6576_v47, %v6578_v20 }
 0x5a4   : > { %v15843_v10 = vadd.f32 %v15840_v34, %v6039_v14  ;;  %v4512_v54 = vadd.f32 %v4398_v53, %v4182_v52  ;;  %v5075_v2 = vsel %vm4648_vm4, %v5070_v44, %v5074_v6  ;;  %v5414_v12 = vrot.slane %v15816_v15, 5  ;;  %v5954_v44 = vpop.permute.xlu1 %5953 }
 0x5a5   : > { %v5754_v30 = vrot.slane %v15820_v37, 6  ;;  %v18559_v9 = vrot.slane %v18558_v59, 4  ;;  %v15870_v47 = vmul.f32 %v18560_v38, %v6232_v42  ;;  %v3236_v22 = vmul.f32 %v18389_v39, %v15686_v29 }
 0x5a6   : > { %v6127_v14 = vmin.f32 %v15843_v10, 0.0  ;;  %v4852_v3 = vadd.f32 %v4734_v35, %v4512_v54  ;;  %v15877_v53 = vmul.f32 %v18366_v0, %v15686_v29  ;;  %v15881_v61 = vmul.f32 %v18367_v26, %v15775_v63 }
 0x5a7   : > { %v6581_v4 = vsel %vm4648_vm4, %v6578_v20, %v18559_v9  ;;  %v15885_v20 = vmul.f32 %v18369_v40, %v15775_v63  ;;  %v15890_v54 = vmul.f32 %v18370_v13, %v15775_v63  ;;  %v15894_v35 = vmul.f32 %v18376_v23, %v15867_v18 }
 0x5a8   : > { %v6643_v52 = vpack.c.bf16 %v6581_v4, %v6579_v27  ;;  %v6174_v42 = vmul.f32 1.442695, %v6127_v14  ;;  %v5193_v9 = vadd.f32 %v5075_v2, %v4852_v3  ;;  %v5415_v27 = vsel %vm5329_vm5, %v5410_v58, %v5414_v12 }
 0x5a9   : > { %v3390_v4 = vrot.slane %v3236_v22, 1  ;;  %v3730_v38 = vrot.slane %v15877_v53, 2  ;;  %v4071_v2 = vrot.slane %v15881_v61, 2  ;;  %v3163_v48 = vmul.f32 %v18359_v24, %v15617_v1 }
 0x5aa   : > { %6674 = vrot.lane.b32.xlu0 %v6643_v52, %s9359_s30  ;;  %9289 = vpow2.f32 %v6174_v42  ;;  %v5533_v3 = vadd.f32 %v5415_v27, %v5193_v9  ;;  %v18561_v52 = vld [vmem:[#allocation48_spill] sm:$0xff]  ;;  %v5755_v41 = vsel %vm5669_vm6, %v5750_v36, %v5754_v30  ;;  %v4401_v22 = vrot.slane %v15885_v20, 3 }
 0x5ab   : > { %v6013_v19 = vadd.f32 %v5954_v44, %v18561_v52  ;;  %v3391_v58 = vsel %vm3297_vm2, %v3386_v7, %v3390_v4  ;;  %v4737_v53 = vrot.slane %v15890_v54, 4  ;;  %v5078_v9 = vrot.slane %v15894_v35, 4  ;;  %v16042_v35 = vld [vmem:[#allocation2 + $0x1b8] sm:$0xff] }
 0x5ac   : > { %v9288_v14 = vpop.eup %9287  ;;  %v5873_v42 = vadd.f32 %v5755_v41, %v5533_v3  ;;  %v3503_v44 = vadd.f32 %v3391_v58, %v3163_v48  ;;  %v3731_v1 = vsel %vm3637_vm3, %v3726_v28, %v3730_v38  ;;  %v4072_v16 = vsel %vm3637_vm3, %v4067_v8, %v4071_v2 }
 0x5ad   : > { %v8651_v61 = vadd.f32 -1.0, %v9288_v14  ;;  %v15925_v36 = vmul.f32 %v18379_v17, %v15867_v18  ;;  %v15929_v5 = vmul.f32 %v18386_v11, %v15867_v18  ;;  %vm6099_vm14 = vcmp.gt.f32.partialorder %v15768_v60, 0.0 }
 0x5ae   : > { %v6040_v48 = vadd.f32 %v6013_v19, %v5873_v42  ;;  %v3843_v57 = vadd.f32 %v3731_v1, %v3503_v44  ;;  %v15935_v28 = vpack.c.bf16 %v15870_v47, %v15654_v51  ;;  %v4402_v43 = vsel %vm4312_vm10, %v4397_v56, %v4401_v22 }
 0x5af   : > { %v4738_v8 = vsel %vm4648_vm4, %v4733_v45, %v4737_v53  ;;  %v15947_v20 = vmul.f32 %v18389_v39, %v15775_v63  ;;  %v6234_v19 = vsel %vm6099_vm14, %v15768_v60, %v8651_v61  ;;  %v5079_v21 = vsel %vm4648_vm4, %v5074_v6, %v5078_v9 }
 0x5b0   : > { %v15951_v27 = vadd.f32 %v15840_v34, %v6040_v48  ;;  %v4184_v14 = vadd.f32 %v4072_v16, %v3843_v57  ;;  %v5418_v32 = vrot.slane %v15925_v36, 5  ;;  %v5758_v56 = vrot.slane %v15929_v5, 6  ;;  %v3855_v48 = vld [vmem:[#allocation2 + $0x1a8] sm:$0xff] }
 0x5b1   : > { %v3394_v45 = vrot.slane %v15947_v20, 1  ;;  %v15963_v3 = vmul.f32 %v18366_v0, %v15775_v63  ;;  %v3165_v41 = vmul.f32 %v18359_v24, %v15686_v29  ;;  %v15970_v33 = vmul.f32 %v18367_v26, %v15867_v18  ;;  %v5956_v20 = vpop.permute.xlu0 %5955 }
 0x5b2   : > { %v6128_v60 = vmin.f32 %v15951_v27, 0.0  ;;  %v4514_v52 = vadd.f32 %v4402_v43, %v4184_v14  ;;  %v15976_v61 = vmul.f32 %v18369_v40, %v15867_v18  ;;  %v15980_v42 = vmul.f32 %v18370_v13, %v15867_v18 }
 0x5b3   : > { %v3395_v6 = vsel %vm3297_vm2, %v3390_v4, %v3394_v45  ;;  %v3734_v58 = vrot.slane %v15963_v3, 2  ;;  %v4075_v57 = vrot.slane %v15970_v33, 2  ;;  %vm6100_vm15 = vcmp.gt.f32.partialorder %v15843_v10, 0.0 }
 0x5b4   : > { %v9290_v44 = vpop.eup %9289  ;;  %v6176_v1 = vmul.f32 1.442695, %v6128_v60  ;;  %v4854_v16 = vadd.f32 %v4738_v8, %v4514_v52  ;;  %v3505_v29 = vadd.f32 %v3395_v6, %v3165_v41  ;;  %v4405_v14 = vrot.slane %v15976_v61, 3  ;;  %v18562_v8 = vld [vmem:[#allocation66_spill] sm:$0xff] }
 0x5b5   : > { %v8652_v43 = vadd.f32 -1.0, %v9290_v44  ;;  %v3735_v4 = vsel %vm3637_vm3, %v3730_v38, %v3734_v58  ;;  %v4741_v7 = vrot.slane %v15980_v42, 4  ;;  %v4076_v60 = vsel %vm3637_vm3, %v4071_v2, %v4075_v57  ;;  %v18563_v6 = vld [vmem:[#allocation50_spill] sm:$0xff] }
 0x5b6   : > { %9291 = vpow2.f32 %v6176_v1  ;;  %v5195_v62 = vadd.f32 %v5079_v21, %v4854_v16  ;;  %v3845_v50 = vadd.f32 %v3735_v4, %v3505_v29  ;;  %v15990_v52 = vmul.f32 %v18562_v8, %v6234_v19 }
 0x5b7   : > { %v5419_v38 = vsel %vm5329_vm5, %v5414_v12, %v5418_v32  ;;  %v15999_v41 = vmul.f32 %v18376_v23, %v3855_v48  ;;  %v6014_v21 = vadd.f32 %v5956_v20, %v18563_v6  ;;  %v16003_v2 = vmul.f32 %v18379_v17, %v3855_v48 }
 0x5b8   : > { %v5535_v33 = vadd.f32 %v5419_v38, %v5195_v62  ;;  %v4186_v44 = vadd.f32 %v4076_v60, %v3845_v50  ;;  %v5759_v19 = vsel %vm5669_vm6, %v5754_v30, %v5758_v56  ;;  %v4406_v15 = vsel %vm4312_vm10, %v4401_v22, %v4405_v14  ;;  %v5958_v30 = vpop.permute.xlu1 %5957 }
 0x5b9   : > { %v5082_v12 = vrot.slane %v15999_v41, 4  ;;  %v16015_v62 = vmul.f32 %v18386_v11, %v3855_v48  ;;  %v6235_v50 = vsel %vm6100_vm15, %v15843_v10, %v8652_v43  ;;  %vm6101_vm7 = vcmp.gt.f32.partialorder %v15951_v27, 0.0 }
 0x5ba   : > { %v5875_v1 = vadd.f32 %v5759_v19, %v5535_v33  ;;  %v4516_v16 = vadd.f32 %v4406_v15, %v4186_v44  ;;  %v4742_v37 = vsel %vm4648_vm4, %v4737_v53, %v4741_v7  ;;  %v5422_v29 = vrot.slane %v16003_v2, 5 }
 0x5bb   : > { %v5083_v22 = vsel %vm4648_vm4, %v5078_v9, %v5082_v12  ;;  %v16032_v10 = vmul.f32 %v18389_v39, %v15867_v18  ;;  %v16036_v43 = vmul.f32 %v18366_v0, %v15867_v18  ;;  %v5762_v53 = vrot.slane %v16015_v62, 6  ;;  %v18564_v9 = vld [vmem:[#allocation114_spill] sm:$0xff] }
 0x5bc   : > { %v6041_v54 = vadd.f32 %v6014_v21, %v5875_v1  ;;  %v4856_v20 = vadd.f32 %v4742_v37, %v4516_v16  ;;  %v16040_v4 = vmul.f32 %v18367_v26, %v3855_v48  ;;  %v6015_v60 = vadd.f32 %v5958_v30, %v18564_v9  ;;  %v18565_v9 = vld [vmem:[#allocation12_spill] sm:$0xff] }
 0x5bd   : > { %v3398_v8 = vrot.slane %v16032_v10, 1  ;;  %v3738_v38 = vrot.slane %v16036_v43, 2  ;;  %v16048_v33 = vmul.f32 %v18369_v40, %v3855_v48  ;;  %v3167_v44 = vmul.f32 %v18359_v24, %v15775_v63 }
 0x5be   : > { %v16051_v6 = vadd.f32 %v15840_v34, %v6041_v54  ;;  %v5197_v21 = vadd.f32 %v5083_v22, %v4856_v20  ;;  %v4079_v19 = vrot.slane %v16040_v4, 2  ;;  %v5423_v15 = vsel %vm5329_vm5, %v5418_v32, %v5422_v29 }
 0x5bf   : > { %v3399_v1 = vsel %vm3297_vm2, %v3394_v45, %v3398_v8  ;;  %v16065_v16 = vmul.f32 %v18370_v13, %v3855_v48  ;;  %v16069_v37 = vmul.f32 %v18376_v23, %v16042_v35  ;;  %v5763_v36 = vsel %vm5669_vm6, %v5758_v56, %v5762_v53 }
 0x5c0   : > { %v9292_v63 = vpop.eup %9291  ;;  %v6129_v30 = vmin.f32 %v16051_v6, 0.0  ;;  %v5537_v22 = vadd.f32 %v5423_v15, %v5197_v21  ;;  %v3507_v32 = vadd.f32 %v3399_v1, %v3167_v44  ;;  %v3739_v45 = vsel %vm3637_vm3, %v3734_v58, %v3738_v38 }
 0x5c1   : > { %v8653_v54 = vadd.f32 -1.0, %v9292_v63  ;;  %v4080_v48 = vsel %vm3637_vm3, %v4075_v57, %v4079_v19  ;;  %v4409_v20 = vrot.slane %v16048_v33, 3  ;;  %v16087_v21 = vmul.f32 %v18565_v9, %v6235_v50 }
 0x5c2   : > { %v6178_v5 = vmul.f32 1.442695, %v6129_v30  ;;  %v5877_v15 = vadd.f32 %v5763_v36, %v5537_v22  ;;  %v3847_v56 = vadd.f32 %v3739_v45, %v3507_v32  ;;  %v4745_v3 = vrot.slane %v16065_v16, 4  ;;  %v3175_v30 = vld [vmem:[#allocation2 + $0x1a8] sm:$0x3f] }
 0x5c3   : > { %v6236_v44 = vsel %vm6101_vm7, %v15951_v27, %v8653_v54  ;;  %v5086_v58 = vrot.slane %v16069_v37, 4  ;;  %v16096_v1 = vmul.f32 %v18379_v17, %v16042_v35  ;;  %v16100_v50 = vmul.f32 %v18386_v11, %v16042_v35  ;;  %v3515_v32 = vld [vmem:[#allocation2 + $0x1a8] sm:$0x7f] }
 0x5c4   : > { %9293 = vpow2.f32 %v6178_v5  ;;  %v6042_v57 = vadd.f32 %v6015_v60, %v5877_v15  ;;  %v4188_v63 = vadd.f32 %v4080_v48, %v3847_v56  ;;  %v6590_v22 = vrot.slane %v15870_v47, 4  ;;  %v3857_v5 = vld [vmem:[#allocation2 + $0x1b8] sm:$0x7f]  ;;  %v18566_v15 = vld [vmem:[#allocation92_spill] sm:$0xff] }
 0x5c5   : > { %v16105_v27 = vpack.c.bf16 %v15990_v52, %v15829_v25  ;;  %v4410_v36 = vsel %vm4312_vm10, %v4405_v14, %v4409_v20  ;;  %v5426_v60 = vrot.slane %v16096_v1, 5  ;;  %v6594_v54 = vrot.slane %v15990_v52, 4  ;;  %v18583_v52 = vld [vmem:[#allocation128_spill] sm:$0xff] }
 0x5c6   : > { %v6596_v45 = vrot.slane %v16087_v21, 4  ;;  %v16116_v48 = vadd.f32 %v15840_v34, %v6042_v57  ;;  %v4518_v9 = vadd.f32 %v4410_v36, %v4188_v63  ;;  %v16119_v56 = vmul.f32 %v18566_v15, %v6236_v44  ;;  %v5960_v15 = vpop.permute.xlu0 %5959 }
 0x5c7   : > { %v4746_v61 = vsel %vm4648_vm4, %v4741_v7, %v4745_v3  ;;  %v5087_v14 = vsel %vm4648_vm4, %v5082_v12, %v5086_v58  ;;  %v16132_v57 = vmul.f32 %v18389_v39, %v3175_v30  ;;  %vm6102_vm9 = vcmp.gt.f32.partialorder %v16051_v6, 0.0  ;;  %v4866_v7 = vld [vmem:[#allocation2 + $0x1c8] sm:$0xff] }
 0x5c8   : > { %v6130_v44 = vmin.f32 %v16116_v48, 0.0  ;;  %v4858_v63 = vadd.f32 %v4746_v61, %v4518_v9  ;;  %v5766_v36 = vrot.slane %v16100_v50, 6  ;;  %v16138_v42 = vmul.f32 %v18366_v0, %v3515_v32 }
 0x5c9   : > { %v5427_v41 = vsel %vm5329_vm5, %v5422_v29, %v5426_v60  ;;  %v3402_v39 = vrot.slane %v16132_v57, 1  ;;  %v16147_v12 = vmul.f32 %v18367_v26, %v3857_v5  ;;  %v16151_v30 = vmul.f32 %v18369_v40, %v16042_v35 }
 0x5ca   : > { %v6180_v9 = vmul.f32 1.442695, %v6130_v44  ;;  %v5199_v0 = vadd.f32 %v5087_v14, %v4858_v63  ;;  %v3169_v32 = vmul.f32 %v18359_v24, %v15867_v18  ;;  %v3742_v61 = vrot.slane %v16138_v42, 2 }
 0x5cb   : > { %v3403_v2 = vsel %vm3297_vm2, %v3398_v8, %v3402_v39  ;;  %v4083_v26 = vrot.slane %v16147_v12, 2  ;;  %v16164_v40 = vmul.f32 %v18370_v13, %v16042_v35  ;;  %v16167_v29 = vmul.f32 %v18376_v23, %v4866_v7  ;;  %v18567_v8 = vld [vmem:[#allocation109_spill] sm:$0xff] }
 0x5cc   : > { %9295 = vpow2.f32 %v6180_v9  ;;  %v5539_v5 = vadd.f32 %v5427_v41, %v5199_v0  ;;  %v3509_v18 = vadd.f32 %v3403_v2, %v3169_v32  ;;  %v4413_v14 = vrot.slane %v16151_v30, 3  ;;  %v4868_v32 = vld [vmem:[#allocation2 + $0x1d8] sm:$0x1] }
 0x5cd   : > { %v5767_v10 = vsel %vm5669_vm6, %v5762_v53, %v5766_v36  ;;  %v6016_v44 = vadd.f32 %v5960_v15, %v18567_v8  ;;  %v3743_v35 = vsel %vm3637_vm3, %v3738_v38, %v3742_v61  ;;  %v4084_v63 = vsel %vm3637_vm3, %v4079_v19, %v4083_v26  ;;  %v4526_v15 = vld [vmem:[#allocation2 + $0x1c8] sm:$0x1] }
 0x5ce   : > { %v9294_v41 = vpop.eup %9293  ;;  %v5879_v9 = vadd.f32 %v5767_v10, %v5539_v5  ;;  %v3849_v0 = vadd.f32 %v3743_v35, %v3509_v18  ;;  %v16187_v62 = vmul.f32 %v18379_v17, %v4866_v7  ;;  %v16190_v53 = vmul.f32 %v18386_v11, %v4866_v7  ;;  %v5962_v35 = vpop.permute.xlu1 %5961 }
 0x5cf   : > { %v16194_v43 = vpack.c.bf16 %v16119_v56, %v16087_v21  ;;  %v8654_v38 = vadd.f32 -1.0, %v9294_v41  ;;  %v4749_v4 = vrot.slane %v16164_v40, 4  ;;  %v5090_v19 = vrot.slane %v16167_v29, 4  ;;  %v5207_v41 = vld [vmem:[#allocation2 + $0x1d8] sm:$0x3] }
 0x5d0   : > { %v6043_v2 = vadd.f32 %v6016_v44, %v5879_v9  ;;  %v4190_v5 = vadd.f32 %v4084_v63, %v3849_v0  ;;  %v4414_v7 = vsel %vm4312_vm10, %v4409_v20, %v4413_v14  ;;  %v18568_v18 = vrot.slane %v15371_v49, 4  ;;  %v18572_v49 = vld [vmem:[#allocation100_spill] sm:$0xff] }
 0x5d1   : > { %v18569_v10 = vrot.slane %v18558_v59, 4  ;;  %v6237_v40 = vsel %vm6102_vm9, %v16051_v6, %v8654_v38  ;;  %v18570_v29 = vrot.slane %v15557_v55, 4  ;;  %v4593_v33 = vmul.f32 %v18370_v13, %v4526_v15  ;;  %v5547_v38 = vld [vmem:[#allocation2 + $0x1d8] sm:$0x7] }
 0x5d2   : > { %v18571_v44 = vmov %v18568_v18  ;;  %v4935_v20 = vmul.f32 %v18376_v23, %v4868_v32  ;;  %vm6103_vm11 = vcmp.gt.f32.partialorder %v16116_v48, 0.0  ;;  %v16220_v59 = vadd.f32 %v15840_v34, %v6043_v2 }
 0x5d3   : > { %v6583_v8 = vsel %vm4648_vm4, %v18569_v10, %v18568_v18  ;;  %v6585_v63 = vsel %vm4648_vm4, %v18571_v44, %v18570_v29  ;;  %v4520_v9 = vadd.f32 %v4414_v7, %v4190_v5  ;;  %v5430_v6 = vrot.slane %v16187_v62, 5  ;;  %v3105_v18 = vld [vmem:[#allocation2 + $0x1a8] sm:$0x1f] }
 0x5d4   : > { %v5770_v0 = vrot.slane %v16190_v53, 6  ;;  %v16225_v10 = vmul.f32 %v18572_v49, %v6237_v40  ;;  %v4750_v13 = vsel %vm4648_vm4, %v4745_v3, %v4749_v4  ;;  %v5091_v23 = vsel %vm4648_vm4, %v5086_v58, %v5090_v19  ;;  %v18573_v62 = vld [vmem:[#allocation53_spill] sm:$0xff]  ;;  %v18578_v49 = vld [vmem:[#allocation112_spill] sm:$0xff] }
 0x5d5   : > { %v6644_v15 = vpack.c.bf16 %v6585_v63, %v6583_v8  ;;  %v6131_v32 = vmin.f32 %v16220_v59, 0.0  ;;  %v4860_v2 = vadd.f32 %v4750_v13, %v4520_v9  ;;  %v6017_v5 = vadd.f32 %v5962_v35, %v18573_v62  ;;  %v18582_v62 = vld [vmem:[#allocation13_spill] sm:$0xff] }
 0x5d6   : > { %v4753_v53 = vrot.slane %v4593_v33, 4  ;;  %v5094_v7 = vrot.slane %v4935_v20, 4  ;;  %v5274_v40 = vmul.f32 %v18379_v17, %v5207_v41  ;;  %v5614_v16 = vmul.f32 %v18386_v11, %v5547_v38  ;;  %v9296_v29 = vpop.eup %9295  ;;  %v5964_v17 = vpop.permute.xlu0 %5963 }
 0x5d7   : > { %6676 = vrot.lane.b32.xlu1 %v6644_v15, %s9359_s30  ;;  %v3171_v3 = vmul.f32 %v18359_v24, %v3105_v18  ;;  %v6182_v37 = vmul.f32 1.442695, %v6131_v32  ;;  %v5201_v44 = vadd.f32 %v5091_v23, %v4860_v2  ;;  %v5431_v58 = vsel %vm5329_vm5, %v5426_v60, %v5430_v6 }
 0x5d8   : > { %v5771_v8 = vsel %vm5669_vm6, %v5766_v36, %v5770_v0  ;;  %v6600_v35 = vrot.slane %v16225_v10, 4  ;;  %v8655_v63 = vadd.f32 -1.0, %v9296_v29  ;;  %v5434_v33 = vrot.slane %v5274_v40, 5 }
 0x5d9   : > { %v3511_v11 = vadd.f32 %v3402_v39, %v3171_v3  ;;  %9297 = vpow2.f32 %v6182_v37  ;;  %v5541_v24 = vadd.f32 %v5431_v58, %v5201_v44  ;;  %v18574_v20 = vrot.slane %v15764_v31, 4  ;;  %v6717_v3 = vld [vmem:[#allocation3] sm:$0xf8] }
 0x5da   : > { %v18575_v1 = vrot.slane %v15557_v55, 4  ;;  %v18576_v50 = vrot.slane %v15654_v51, 4  ;;  %v5095_v9 = vsel %vm4648_vm4, %v5090_v19, %v5094_v7  ;;  %v5774_v38 = vrot.slane %v5614_v16, 6 }
 0x5db   : > { %v18577_v36 = vmov %v18574_v20  ;;  %v3851_v57 = vadd.f32 %v3742_v61, %v3511_v11  ;;  %v4754_v39 = vsel %vm4648_vm4, %v4749_v4, %v4753_v53  ;;  %v5881_v18 = vadd.f32 %v5771_v8, %v5541_v24 }
 0x5dc   : > { %v6587_v60 = vsel %vm4648_vm4, %v18575_v1, %v18574_v20  ;;  %v6589_v41 = vsel %vm4648_vm4, %v18577_v36, %v18576_v50  ;;  %v16263_v13 = vadd.f32 %v5964_v17, %v18578_v49  ;;  %v18579_v23 = vmov %v18576_v50  ;;  %v18586_v20 = vld [vmem:[#allocation126_spill] sm:$0xff]  ;;  %v9157_v50 = vld [vmem:[%s17434_s8 + $0x40] sm:$0xff]  }
 0x5dd   : > { %v6645_v55 = vpack.c.bf16 %v6589_v41, %v6587_v60  ;;  %v6591_v31 = vsel %vm4648_vm4, %v18579_v23, %v6590_v22  ;;  %v6238_v19 = vsel %vm6103_vm11, %v16116_v48, %v8655_v63  ;;  %v4192_v42 = vadd.f32 %v4083_v26, %v3851_v57  ;;  %v9158_v36 = vld [vmem:[%s17434_s8] sm:$0xff]   ;;  %v6665_v57 = vpop.permute.xlu1 %6664  ;;  %8751 = vmatprep.subr.bf16.mxu1 %v9157_v50 }
 0x5de   : > { %v18580_v61 = vrot.slane %v15829_v25, 4  ;;  %v6597_v51 = vsel %vm4648_vm4, %v6594_v54, %v6596_v45  ;;  %vm6104_vm12 = vcmp.gt.f32.partialorder %v16220_v59, 0.0  ;;  %v6044_v15 = vadd.f32 %v6017_v5, %v5881_v18  ;;  %v9159_v18 = vld [vmem:[%s17434_s8 + $0x48] sm:$0xff]   ;;  %8752 = vmatpush3.bf16.msra.mxu1 %v9158_v36 }
 0x5df   : > { %v5435_v48 = vsel %vm5329_vm5, %v5430_v6, %v5434_v33  ;;  %6678 = vrot.lane.b32.xlu0 %v6645_v55, %s9359_s30  ;;  %v5775_v26 = vsel %vm5669_vm6, %v5770_v0, %v5774_v38  ;;  %v4522_v32 = vadd.f32 %v4413_v14, %v4192_v42  ;;  %v6380_v53 = vshrl.u32 %v18582_v62, 16  ;;  %v18585_v14 = vld [vmem:[#allocation113_spill] sm:$0xff]  ;;  %8753 = vmatprep.subr.bf16.mxu1 %v9159_v18 }
 0x5e0   : > { %v6593_v4 = vsel %vm4648_vm4, %v6590_v22, %v18580_v61  ;;  %v18581_v47 = vmov %v18580_v61  ;;  %v16298_v5 = vadd.f32 %v15840_v34, %v6044_v15  ;;  %v6383_v6 = vshll.u32 %v18582_v62, 16  ;;  %v9160_v61 = vld [vmem:[%s17434_s8 + $0x8] sm:$0xff]  }
 0x5e1   : > { %v6646_v12 = vpack.c.bf16 %v6593_v4, %v6591_v31  ;;  %v6595_v22 = vsel %vm4648_vm4, %v18581_v47, %v6594_v54  ;;  %v6388_v7 = vshrl.u32 %v18583_v52, 16  ;;  %v6391_v25 = vshll.u32 %v18583_v52, 16  ;;  %v18584_v54 = vld [vmem:[#allocation149_spill] sm:$0xff]  ;;  %v9161_v47 = vld [vmem:[%s17434_s8 + $0x50] sm:$0xff]  }
 0x5e2   : > { %v6647_v2 = vpack.c.bf16 %v6597_v51, %v6595_v22  ;;  %v16305_v40 = vmul.f32 %v18584_v54, %v6238_v19  ;;  %v4862_v0 = vadd.f32 %v4754_v39, %v4522_v32  ;;  %v6382_v30 = vrot.slane %v6380_v53, 2  ;;  %v18587_v22 = vld [vmem:[#allocation120_spill] sm:$0xff]  ;;  %v18588_v62 = vld [vmem:[#allocation145_spill] sm:$0xff]  ;;  %8754 = vmatpush3.bf16.msra.mxu1 %v9160_v61 }
 0x5e3   : > { %6680 = vrot.lane.b32.xlu1 %v6646_v12, %s9359_s30  ;;  %v6397_v16 = vshrl.u32 %v18585_v14, 16  ;;  %v6132_v29 = vmin.f32 %v16298_v5, 0.0  ;;  %vm6378_vm13 = vsmask.f32 5376  ;;  %v6385_v37 = vrot.slane %v6383_v6, 3  ;;  %v9298_v17 = vpop.eup %9297  ;;  %8755 = vmatprep.subr.bf16.mxu1 %v9161_v47 }
 0x5e4   : > { %6682 = vrot.lane.b32.xlu0 %v6647_v2, %s9359_s30  ;;  %v6390_v44 = vrot.slane %v6388_v7, 2  ;;  %v5203_v58 = vadd.f32 %v5095_v9, %v4862_v0  ;;  %v6393_v8 = vrot.slane %v6391_v25, 3  ;;  %v6400_v33 = vshll.u32 %v18585_v14, 16  ;;  %v16337_v12 = vld [vmem:[#allocation3] sm:$0xf0]  ;;  %v6669_v2 = vpop.permute.xlu1 %6668  ;;  %v18589_v7 = vld [vmem:[#allocation15_spill] sm:$0xff] }
 0x5e5   : > { %v6399_v63 = vrot.slane %v6397_v16, 2  ;;  %v6184_v11 = vmul.f32 1.442695, %v6132_v29  ;;  %v6386_v24 = vor.u32 %v6385_v37, %v6382_v30  ;;  %v6406_v1 = vshrl.u32 %v18586_v20, 16  ;;  %v9162_v16 = vld [vmem:[%s17434_s8 + $0x10] sm:$0xff]   ;;  %v18590_v37 = vld [vmem:[#allocation7_spill] sm:$0xff] }
 0x5e6   : > { %v6409_v60 = vshll.u32 %v18586_v20, 16  ;;  %v8656_v41 = vadd.f32 -1.0, %v9298_v17  ;;  %v5543_v9 = vadd.f32 %v5435_v48, %v5203_v58  ;;  %v6394_v38 = vor.u32 %v6393_v8, %v6390_v44  ;;  %v9163_v58 = vld [vmem:[%s17434_s8 + $0x58] sm:$0xff]   ;;  %8756 = vmatpush3.bf16.msra.mxu1 %v9162_v16 }
 0x5e7   : > { %6766 = vrot.lane.b32.xlu1 %v6717_v3, %s9359_s30  ;;  %v6402_v39 = vrot.slane %v6400_v33, 3  ;;  %9299 = vpow2.f32 %v6184_v11  ;;  %vm6703_vm14 = vcmask 1048064   ;;  %v6408_v49 = vrot.slane %v6406_v1, 2  ;;  %8757 = vmatprep.subr.bf16.mxu1 %v9163_v58 }
 0x5e8   : > { %v6411_v55 = vrot.slane %v6409_v60, 3  ;;  %v6239_v23 = vsel %vm6104_vm12, %v16220_v59, %v8656_v41  ;;  %v5883_v31 = vadd.f32 %v5775_v26, %v5543_v9  ;;  %v6395_v19 = vsel %vm6378_vm13, %v6386_v24, %v6394_v38  ;;  %v6667_v59 = vpop.permute.xlu0 %6666  ;;  %v9164_v41 = vld [vmem:[%s17434_s8 + $0x18] sm:$0xff]  }
 0x5e9   : > { %v6403_v42 = vor.u32 %v6402_v39, %v6399_v63  ;;  %v6598_v4 = vrot.slane %v16119_v56, 4  ;;  %v16333_v51 = vpack.c.bf16 %v16305_v40, %v16225_v10  ;;  %v6602_v15 = vrot.slane %v16305_v40, 4  ;;  %6517 = vst.msk [vmem:[#allocation3 + $0x8] sm:$0xff] %vm2806_vm8, %v6395_v19 }
 0x5ea   : > { %v6412_v48 = vor.u32 %v6411_v55, %v6408_v49  ;;  %v16343_v26 = vmul.f32 %v18587_v22, %v6239_v23  ;;  %v6045_v56 = vadd.f32 %v16263_v13, %v5883_v31  ;;  %6704 = vst.msk [vmem:[#allocation3 + $0x8] sm:$0xff] %vm6703_vm14, %v6665_v57  ;;  %v6415_v53 = vshrl.u32 %v18588_v62, 16  ;;  %8758 = vmatpush3.bf16.msra.mxu1 %v9164_v41  ;;  %v9170_v41 = vld [vmem:[%s17434_s8 + $0x30] sm:$0xff]  }
 0x5eb   : > { %v6404_v32 = vsel %vm6378_vm13, %v6394_v38, %v6403_v42  ;;  %vm6105_vm15 = vcmp.gt.f32.partialorder %v16298_v5, 0.0  ;;  %v16355_v52 = vsel %vm4648_vm4, %v6598_v4, %v6600_v35  ;;  %v6418_v13 = vshll.u32 %v18588_v62, 16 }
 0x5ec   : > { %6518 = vst.msk [vmem:[#allocation3 + $0x10] sm:$0xff] %vm2806_vm8, %v6404_v32  ;;  %v6413_v6 = vsel %vm6378_vm13, %v6403_v42, %v6412_v48  ;;  %v6424_v25 = vshrl.u32 %v18589_v7, 16  ;;  %v16360_v54 = vadd.f32 %v15840_v34, %v6045_v56  ;;  %v6797_v0 = vrot.slane %v16337_v12, 1  ;;  %v6671_v1 = vpop.permute.xlu0 %6670  ;;  %v9166_v56 = vld [vmem:[%s17434_s8 + $0x20] sm:$0xff]   ;;  %v18591_v32 = vld [vmem:[#allocation131_spill] sm:$0xff] }
 0x5ed   : > { %6705 = vst.msk [vmem:[#allocation3 + $0x10] sm:$0xff] %vm6703_vm14, %v6667_v59  ;;  %v6417_v30 = vrot.slane %v6415_v53, 2  ;;  %v6427_v14 = vshll.u32 %v18589_v7, 16  ;;  %v16373_v34 = vsel %vm4648_vm4, %v6596_v45, %v6598_v4  ;;  %v6420_v3 = vrot.slane %v6418_v13, 3 }
 0x5ee   : > { %6519 = vst.msk [vmem:[#allocation3 + $0x18] sm:$0xff] %vm2806_vm8, %v6413_v6  ;;  %v6426_v29 = vrot.slane %v6424_v25, 2  ;;  %v6433_v44 = vshrl.u32 %v18590_v37, 16  ;;  %v6604_v8 = vrot.slane %v16343_v26, 4  ;;  %v6133_v63 = vmin.f32 %v16360_v54, 0.0  ;;  %v9167_v6 = vld [vmem:[%s17434_s8 + $0x68] sm:$0xff]  }
 0x5ef   : > { %6706 = vst.msk [vmem:[#allocation3 + $0x18] sm:$0xff] %vm6703_vm14, %v6669_v2  ;;  %v6648_v33 = vpack.c.bf16 %v16355_v52, %v16373_v34  ;;  %v6429_v21 = vrot.slane %v6427_v14, 3  ;;  %v6421_v17 = vor.u32 %v6420_v3, %v6417_v30  ;;  %v6436_v11 = vshll.u32 %v18590_v37, 16 }
 0x5f0   : > { %v6435_v45 = vrot.slane %v6433_v44, 2  ;;  %v6442_v24 = vshrl.u32 %v15824_v46, 16  ;;  %v6186_v20 = vmul.f32 1.442695, %v6133_v63  ;;  %v6445_v50 = vshll.u32 %v15824_v46, 16  ;;  %v9165_v46 = vld [vmem:[%s17434_s8 + $0x60] sm:$0xff]  }
 0x5f1   : > { %v6430_v60 = vor.u32 %v6429_v21, %v6426_v29  ;;  %v6451_v36 = vshrl.u32 %v15935_v28, 16  ;;  %v9300_v9 = vpop.eup %9299  ;;  %v16390_v38 = vld [vmem:[#allocation3 + $0x8] sm:$0xff]  ;;  %v6422_v57 = vsel %vm6378_vm13, %v6412_v48, %v6421_v17  ;;  %v6438_v39 = vrot.slane %v6436_v11, 3  ;;  %8759 = vmatprep.subr.bf16.mxu1 %v9165_v46 }
 0x5f2   : > { %v6444_v18 = vrot.slane %v6442_v24, 2  ;;  %v6454_v49 = vshll.u32 %v15935_v28, 16  ;;  %v8657_v55 = vadd.f32 -1.0, %v9300_v9  ;;  %9301 = vpow2.f32 %v6186_v20  ;;  %6520 = vst.msk [vmem:[#allocation3 + $0x20] sm:$0xff] %vm2806_vm8, %v6422_v57  ;;  %8760 = vmatpush3.bf16.msra.mxu1 %v9166_v56  ;;  %v16469_v52 = vld [vmem:[#allocation3 + $0x8] sm:$0xfe] }
 0x5f3   : > { %v6798_v23 = vrot.slane %v16390_v38, 1  ;;  %v6431_v31 = vsel %vm6378_vm13, %v6421_v17, %v6430_v60  ;;  %6707 = vst.msk [vmem:[#allocation3 + $0x20] sm:$0xff] %vm6703_vm14, %v6671_v1  ;;  %v6439_v28 = vor.u32 %v6438_v39, %v6435_v45  ;;  %v6447_v42 = vrot.slane %v6445_v50, 3  ;;  %8761 = vmatprep.subr.bf16.mxu1 %v9167_v6  ;;  %v9171_v39 = vld [vmem:[%s17434_s8 + $0x78] sm:$0xff]  }
 0x5f4   : > { %v16400_v19 = vld [vmem:[#allocation3 + $0x10] sm:$0xff]  ;;  %6521 = vst.msk [vmem:[#allocation3 + $0x28] sm:$0xff] %vm2806_vm8, %v6431_v31  ;;  %v6453_v61 = vrot.slane %v6451_v36, 2  ;;  %v6456_v4 = vrot.slane %v6454_v49, 3  ;;  %v6240_v59 = vsel %vm6105_vm15, %v16298_v5, %v8657_v55  ;;  %v6460_v22 = vshrl.u32 %v16105_v27, 16 }
 0x5f5   : > { %v6799_v48 = vsel %vm3297_vm2, %v6797_v0, %v6798_v23  ;;  %v6800_v12 = vrot.slane %v16400_v19, 1  ;;  %v16416_v2 = vmul.f32 %v18591_v32, %v6240_v59  ;;  %v6440_v62 = vsel %vm6378_vm13, %v6430_v60, %v6439_v28 }
 0x5f6   : > { %v16409_v47 = vld [vmem:[#allocation3 + $0x18] sm:$0xff]  ;;  %6824 = vrot.lane.b32.xlu1 %v6799_v48, %s9359_s30  ;;  %v6448_v53 = vor.u32 %v6447_v42, %v6444_v18  ;;  %6522 = vst.msk [vmem:[#allocation3 + $0x30] sm:$0xff] %vm2806_vm8, %v6440_v62  ;;  %v6457_v7 = vor.u32 %v6456_v4, %v6453_v61  ;;  %v6462_v25 = vrot.slane %v6460_v22, 2  ;;  %v6463_v0 = vshll.u32 %v16105_v27, 16  ;;  %v18592_v4 = vld [vmem:[#allocation133_spill] sm:$0xff] }
 0x5f7   : > { %v6802_v5 = vrot.slane %v16409_v47, 1  ;;  %v6801_v13 = vsel %vm3297_vm2, %v6798_v23, %v6800_v12  ;;  %vm6106_vm7 = vcmp.gt.f32.partialorder %v16360_v54, 0.0  ;;  %v16434_v30 = vsel %vm4648_vm4, %v6600_v35, %v6602_v15  ;;  %v9168_v35 = vld [vmem:[%s17434_s8 + $0x28] sm:$0xff]   ;;  %v6673_v34 = vpop.permute.xlu1 %6672 }
 0x5f8   : > { %6826 = vrot.lane.b32.xlu0 %v6801_v13, %s9359_s30  ;;  %v16441_v14 = vsel %vm4648_vm4, %v6602_v15, %v6604_v8  ;;  %v6449_v27 = vsel %vm6378_vm13, %v6439_v28, %v6448_v53  ;;  %v6458_v16 = vsel %vm6378_vm13, %v6448_v53, %v6457_v7  ;;  %v6465_v3 = vrot.slane %v6463_v0, 3  ;;  %6708 = vst.msk [vmem:[#allocation3 + $0x28] sm:$0xff] %vm6703_vm14, %v6673_v34 }
 0x5f9   : > { %6523 = vst.msk [vmem:[#allocation3 + $0x38] sm:$0xff] %vm2806_vm8, %v6449_v27  ;;  %v6469_v29 = vshrl.u32 %v16194_v43, 16  ;;  %v6472_v10 = vshll.u32 %v16194_v43, 16  ;;  %v16453_v40 = vpack.c.bf16 %v16416_v2, %v16343_v26  ;;  %v6606_v15 = vrot.slane %v16416_v2, 4  ;;  %6524 = vst.msk [vmem:[#allocation3 + $0x40] sm:$0xff] %vm2806_vm8, %v6458_v16  ;;  %v9169_v43 = vld [vmem:[%s17434_s8 + $0x70] sm:$0xff]   ;;  %8762 = vmatpush3.bf16.msra.mxu1 %v9168_v35 }
 0x5fa   : > { %6684 = vrot.lane.b32.xlu1 %v6648_v33, %s9359_s30  ;;  %v6478_v37 = vshrl.u32 %v16333_v51, 16  ;;  %v6481_v44 = vshll.u32 %v16333_v51, 16  ;;  %v6803_v58 = vsel %vm3297_vm2, %v6800_v12, %v6802_v5  ;;  %v16467_v63 = vld [vmem:[#allocation3 + $0x20] sm:$0xff]  ;;  %v6466_v21 = vor.u32 %v6465_v3, %v6462_v25  ;;  %8763 = vmatprep.subr.bf16.mxu1 %v9169_v43  ;;  %v9172_v12 = vld [vmem:[%s17434_s8 + $0x38] sm:$0xff]  }
 0x5fb   : > { %v6471_v17 = vrot.slane %v6469_v29, 2  ;;  %v6474_v45 = vrot.slane %v6472_v10, 3  ;;  %v6804_v33 = vrot.slane %v16467_v63, 1  ;;  %v16475_v11 = vrot.slane %v16390_v38, 5  ;;  %v16549_v43 = vld [vmem:[#allocation2] sm:$0xff] }
 0x5fc   : > { %6768 = vrot.lane.b32.xlu0 %v16390_v38, %s9359_s30  ;;  %v6480_v24 = vrot.slane %v6478_v37, 2  ;;  %v6483_v51 = vrot.slane %v6481_v44, 3  ;;  %v9302_v20 = vpop.eup %9301  ;;  %v6467_v1 = vsel %vm6378_vm13, %v6457_v7, %v6466_v21  ;;  %v6855_v50 = vrot.slane %v16400_v19, 5 }
 0x5fd   : > { %v6475_v60 = vor.u32 %v6474_v45, %v6471_v17  ;;  %v6895_v36 = vrot.slane %v16400_v19, 6  ;;  %v8658_v9 = vadd.f32 -1.0, %v9302_v20  ;;  %6525 = vst.msk [vmem:[#allocation3 + $0x48] sm:$0xff] %vm2806_vm8, %v6467_v1  ;;  %v17751_v57 = vrot.slane %v16469_v52, 6  ;;  %8764 = vmatpush3.bf16.msra.mxu1 %v9170_v41 }
 0x5fe   : > { %6770 = vrot.lane.b32.xlu1 %v16400_v19, %s9359_s30  ;;  %v6484_v38 = vor.u32 %v6483_v51, %v6480_v24  ;;  %v6857_v18 = vrot.slane %v16409_v47, 5  ;;  %v6805_v49 = vsel %vm3297_vm2, %v6802_v5, %v6804_v33  ;;  %v6897_v55 = vrot.slane %v16409_v47, 6  ;;  %8765 = vmatprep.subr.bf16.mxu1 %v9171_v39 }
 0x5ff   : > { %v6476_v46 = vsel %vm6378_vm13, %v6466_v21, %v6475_v60  ;;  %v6487_v23 = vshrl.u32 %v16453_v40, 16  ;;  %v6241_v31 = vsel %vm6106_vm7, %v16360_v54, %v8658_v9  ;;  %v6649_v28 = vpack.c.bf16 %v16441_v14, %v16434_v30  ;;  %v16533_v25 = vld [vmem:[#allocation3 + $0x28] sm:$0xff] }
 0x600   : > { %6828 = vrot.lane.b32.xlu0 %v6803_v58, %s9359_s30  ;;  %6526 = vst.msk [vmem:[#allocation3 + $0x50] sm:$0xff] %vm2806_vm8, %v6476_v46  ;;  %v6485_v42 = vsel %vm6378_vm13, %v6475_v60, %v6484_v38  ;;  %v16507_v61 = vsel %vm5329_vm5, %v6855_v50, %v6857_v18  ;;  %v6361_v59 = vmul.f32 %v18592_v4, %v6241_v31  ;;  %v6490_v32 = vshll.u32 %v16453_v40, 16 }
 0x601   : > { %6527 = vst.msk [vmem:[#allocation3 + $0x58] sm:$0xff] %vm2806_vm8, %v6485_v42  ;;  %v16513_v48 = vsel %vm5329_vm5, %v16475_v11, %v6855_v50  ;;  %v6896_v54 = vsel %vm5669_vm6, %v17751_v57, %v6895_v36  ;;  %v6898_v22 = vsel %vm5669_vm6, %v6895_v36, %v6897_v55  ;;  %v6489_v56 = vrot.slane %v6487_v23, 2  ;;  %8766 = vmatpush3.bf16.msra.mxu1 %v9172_v12 }
 0x602   : > { %6830 = vrot.lane.b32.xlu1 %v6805_v49, %s9359_s30  ;;  %v6859_v5 = vrot.slane %v16467_v63, 5  ;;  %v6899_v62 = vrot.slane %v16467_v63, 6  ;;  %v6377_v53 = vpack.c.bf16 %v6361_v59, %v6361_v59  ;;  %v6608_v6 = vrot.slane %v6361_v59, 4  ;;  %9024 = vmatprep.subr.bf16.mxu1 %v16549_v43 }
 0x603   : > { %v6607_v13 = vsel %vm4648_vm4, %v6604_v8, %v6606_v15  ;;  %v6927_v7 = vrot.slane %v16409_v47, 2  ;;  %v16537_v0 = vsel %vm2806_vm8, %v16513_v48, %v6896_v54  ;;  %v6492_v30 = vrot.slane %v6490_v32, 3 }
 0x604   : > { %6686 = vrot.lane.b32.xlu0 %v6649_v28, %s9359_s30  ;;  %v16540_v14 = vsel %vm5329_vm5, %v6857_v18, %v6859_v5  ;;  %v6900_v27 = vsel %vm5669_vm6, %v6897_v55, %v6899_v62  ;;  %v6609_v26 = vsel %vm4648_vm4, %v6606_v15, %v6608_v6  ;;  %v6806_v8 = vrot.slane %v16533_v25, 1 }
 0x605   : > { %v6496_v16 = vshrl.u32 %v6377_v53, 16  ;;  %v6925_v3 = vrot.slane %v16400_v19, 2  ;;  %v6650_v29 = vpack.c.bf16 %v6609_v26, %v6607_v13  ;;  %v6493_v10 = vor.u32 %v6492_v30, %v6489_v56 }
 0x606   : > { %v6499_v35 = vshll.u32 %v6377_v53, 16  ;;  %v6861_v40 = vrot.slane %v16533_v25, 5  ;;  %v6901_v2 = vrot.slane %v16533_v25, 6  ;;  %v6983_v44 = vrot.slane %v16400_v19, 3 }
 0x607   : > { %v6498_v37 = vrot.slane %v6496_v16, 2  ;;  %v16556_v15 = vsel %vm3637_vm3, %v6925_v3, %v6927_v7  ;;  %6688 = vrot.lane.b32.xlu1 %v6650_v29, %s9359_s30  ;;  %v6494_v58 = vsel %vm6378_vm13, %v6484_v38, %v6493_v10  ;;  %v6985_v45 = vrot.slane %v16409_v47, 3 }
 0x608   : > { %6772 = vrot.lane.b32.xlu0 %v16409_v47, %s9359_s30  ;;  %v6501_v21 = vrot.slane %v6499_v35, 3  ;;  %v16564_v17 = vsel %vm5329_vm5, %v6859_v5, %v6861_v40  ;;  %v6807_v34 = vsel %vm3297_vm2, %v6804_v33, %v6806_v8  ;;  %v7098_v24 = vsel %vm2806_vm8, %v16507_v61, %v6898_v22  ;;  %6528 = vst.msk [vmem:[#allocation3 + $0x60] sm:$0xff] %vm2806_vm8, %v6494_v58 }
 0x609   : > { %v6902_v51 = vsel %vm5669_vm6, %v6899_v62, %v6901_v2  ;;  %v6987_v20 = vrot.slane %v16467_v63, 3  ;;  %v7100_v1 = vsel %vm2806_vm8, %v16540_v14, %v6900_v27  ;;  %v16580_v47 = vsel %vm4312_vm10, %v6983_v44, %v6985_v45 }
 0x60a   : > { %v6502_v60 = vor.u32 %v6501_v21, %v6498_v37  ;;  %v6989_v33 = vrot.slane %v16533_v25, 3  ;;  %v7102_v50 = vsel %vm2806_vm8, %v16564_v17, %v6902_v51  ;;  %v6929_v41 = vrot.slane %v16467_v63, 2  ;;  %v9173_v51 = vld [vmem:[%s17434_s8 + $0xc0] sm:$0xff]  }
 0x60b   : > { %v16586_v36 = vsel %vm4312_vm10, %v6985_v45, %v6987_v20  ;;  %6774 = vrot.lane.b32.xlu1 %v16467_v63, %s9359_s30  ;;  %v6931_v39 = vrot.slane %v16533_v25, 2  ;;  %v17750_v18 = vrot.slane %v16537_v0, 3  ;;  %v7282_v46 = vrot.slane %v7098_v24, 3  ;;  %8845 = vmatprep.subr.bf16.mxu0 %v9173_v51 }
 0x60c   : > { %6832 = vrot.lane.b32.xlu0 %v6807_v34, %s9359_s30  ;;  %v6503_v9 = vsel %vm6378_vm13, %v6493_v10, %v6502_v60  ;;  %v16594_v38 = vsel %vm4312_vm10, %v6987_v20, %v6989_v33  ;;  %v16600_v49 = vsel %vm3637_vm3, %v6927_v7, %v6929_v41  ;;  %v7292_v55 = vrot.slane %v7100_v1, 3  ;;  %v9174_v20 = vld [vmem:[%s17434_s8 + $0x80] sm:$0xff]  }
 0x60d   : > { %6529 = vst.msk [vmem:[#allocation3 + $0x68] sm:$0xff] %vm2806_vm8, %v6503_v9  ;;  %v16603_v23 = vsel %vm3637_vm3, %v6929_v41, %v6931_v39  ;;  %v7302_v63 = vrot.slane %v7102_v50, 3  ;;  %v16608_v31 = vsel %vm4312_vm10, %v17750_v18, %v7282_v46  ;;  %8846 = vmatpush3.bf16.msra.mxu0 %v9174_v20  ;;  %v9189_v18 = vld [vmem:[%s17434_s8 + $0xb0] sm:$0xff]  }
 0x60e   : > { %v16611_v28 = vsel %vm4312_vm10, %v7282_v46, %v7292_v55 }
 0x60f   : > { %6776 = vrot.lane.b32.xlu1 %v16533_v25, %s9359_s30  ;;  %v16616_v42 = vsel %vm4312_vm10, %v7292_v55, %v7302_v63 }
 0x61c   : > { %v6675_v4 = vpop.permute.xlu0 %6674 }
 0x61d   : > { %6709 = vst.msk [vmem:[#allocation3 + $0x30] sm:$0xff] %vm6703_vm14, %v6675_v4 }
 0x624   : > { %v6723_v59 = vld [vmem:[#allocation3 + $0x30] sm:$0xff] }
 0x625   : > { %v6808_v54 = vrot.slane %v6723_v59, 1  ;;  %6778 = vrot.lane.b32.xlu1 %v6723_v59, %s9359_s30  ;;  %v6863_v12 = vrot.slane %v6723_v59, 5  ;;  %v6903_v22 = vrot.slane %v6723_v59, 6  ;;  %v6991_v56 = vrot.slane %v6723_v59, 3 }
 0x626   : > { %v6933_v32 = vrot.slane %v6723_v59, 2 }
 0x627   : > { %v6809_v5 = vsel %vm3297_vm2, %v6806_v8, %v6808_v54  ;;  %v16622_v62 = vsel %vm5329_vm5, %v6861_v40, %v6863_v12  ;;  %v6904_v53 = vsel %vm5669_vm6, %v6901_v2, %v6903_v22  ;;  %v16626_v6 = vsel %vm4312_vm10, %v6989_v33, %v6991_v56 }
 0x628   : > { %6834 = vrot.lane.b32.xlu0 %v6809_v5, %s9359_s30  ;;  %v7104_v13 = vsel %vm2806_vm8, %v16622_v62, %v6904_v53  ;;  %v16632_v7 = vsel %vm3637_vm3, %v6931_v39, %v6933_v32 }
 0x629   : > { %v7312_v25 = vrot.slane %v7104_v13, 3 }
 0x62b   : > { %v16635_v30 = vsel %vm4312_vm10, %v7302_v63, %v7312_v25 }
 0x649   : > { %v6677_v27 = vpop.permute.xlu1 %6676 }
 0x64a   : > { %6710 = vst.msk [vmem:[#allocation3 + $0x38] sm:$0xff] %vm6703_vm14, %v6677_v27 }
 0x651   : > { %v6679_v26 = vpop.permute.xlu0 %6678  ;;  %v6724_v8 = vld [vmem:[#allocation3 + $0x38] sm:$0xff] }
 0x652   : > { %6711 = vst.msk [vmem:[#allocation3 + $0x40] sm:$0xff] %vm6703_vm14, %v6679_v26  ;;  %v6810_v16 = vrot.slane %v6724_v8, 1  ;;  %v6865_v29 = vrot.slane %v6724_v8, 5  ;;  %6780 = vrot.lane.b32.xlu1 %v6724_v8, %s9359_s30  ;;  %v6905_v35 = vrot.slane %v6724_v8, 6  ;;  %v6993_v40 = vrot.slane %v6724_v8, 3 }
 0x653   : > { %v6935_v37 = vrot.slane %v6724_v8, 2 }
 0x654   : > { %v6811_v2 = vsel %vm3297_vm2, %v6808_v54, %v6810_v16  ;;  %v16643_v21 = vsel %vm5329_vm5, %v6863_v12, %v6865_v29  ;;  %v6906_v45 = vsel %vm5669_vm6, %v6903_v22, %v6905_v35  ;;  %v16647_v34 = vsel %vm4312_vm10, %v6991_v56, %v6993_v40 }
 0x655   : > { %v6681_v10 = vpop.permute.xlu1 %6680  ;;  %6836 = vrot.lane.b32.xlu0 %v6811_v2, %s9359_s30  ;;  %v7106_v24 = vsel %vm2806_vm8, %v16643_v21, %v6906_v45  ;;  %v16660_v1 = vsel %vm3637_vm3, %v6933_v32, %v6935_v37 }
 0x656   : > { %6712 = vst.msk [vmem:[#allocation3 + $0x48] sm:$0xff] %vm6703_vm14, %v6681_v10  ;;  %v6683_v58 = vpop.permute.xlu0 %6682  ;;  %v7322_v60 = vrot.slane %v7106_v24, 3 }
 0x657   : > { %6713 = vst.msk [vmem:[#allocation3 + $0x50] sm:$0xff] %vm6703_vm14, %v6683_v58 }
 0x658   : > { %v16663_v50 = vsel %vm4312_vm10, %v7312_v25, %v7322_v60 }
 0x659   : > { %v6725_v33 = vld [vmem:[#allocation3 + $0x40] sm:$0xff]  ;;  %v6767_v24 = vpop.permute.xlu1 %6766 }
 0x65a   : > { %v6812_v41 = vrot.slane %v6725_v33, 1  ;;  %v6867_v9 = vrot.slane %v6725_v33, 5  ;;  %6782 = vrot.lane.b32.xlu1 %v6725_v33, %s9359_s30  ;;  %v6907_v39 = vrot.slane %v6725_v33, 6  ;;  %v6995_v46 = vrot.slane %v6725_v33, 3 }
 0x65b   : > { %v6937_v63 = vrot.slane %v6725_v33, 2 }
 0x65c   : > { %v6813_v4 = vsel %vm3297_vm2, %v6810_v16, %v6812_v41  ;;  %v16668_v12 = vsel %vm5329_vm5, %v6865_v29, %v6867_v9  ;;  %v6908_v56 = vsel %vm5669_vm6, %v6905_v35, %v6907_v39  ;;  %v16675_v5 = vsel %vm4312_vm10, %v6993_v40, %v6995_v46  ;;  %v9176_v35 = vld [vmem:[%s17434_s8 + $0xc8] sm:$0xff]  }
 0x65d   : > { %v6726_v55 = vld [vmem:[#allocation3 + $0x48] sm:$0xff]  ;;  %6838 = vrot.lane.b32.xlu0 %v6813_v4, %s9359_s30  ;;  %v7108_v26 = vsel %vm2806_vm8, %v16668_v12, %v6908_v56  ;;  %v16705_v45 = vsel %vm3637_vm3, %v6935_v37, %v6937_v63  ;;  %8847 = vmatprep.subr.bf16.mxu0 %v9176_v35 }
 0x65e   : > { %v6814_v59 = vrot.slane %v6726_v55, 1  ;;  %v6869_v54 = vrot.slane %v6726_v55, 5  ;;  %v16671_v22 = vld [vmem:[#allocation3 + $0x50] sm:$0xff]  ;;  %v6909_v32 = vrot.slane %v6726_v55, 6  ;;  %v6997_v53 = vrot.slane %v6726_v55, 3  ;;  %6784 = vrot.lane.b32.xlu1 %v6726_v55, %s9359_s30  ;;  %v9177_v40 = vld [vmem:[%s17434_s8 + $0x88] sm:$0xff]  }
 0x65f   : > { %v6816_v25 = vrot.slane %v16671_v22, 1  ;;  %v6871_v27 = vrot.slane %v16671_v22, 5  ;;  %v6911_v10 = vrot.slane %v16671_v22, 6  ;;  %v17753_v20 = vrot.slane %v16671_v22, 3  ;;  %8848 = vmatpush3.bf16.msra.mxu0 %v9177_v40  ;;  %v9182_v40 = vld [vmem:[%s17434_s8 + $0x98] sm:$0xff]  }
 0x660   : > { %v6815_v13 = vsel %vm3297_vm2, %v6812_v41, %v6814_v59  ;;  %v16684_v8 = vsel %vm5329_vm5, %v6867_v9, %v6869_v54  ;;  %v6910_v16 = vsel %vm5669_vm6, %v6907_v39, %v6909_v32  ;;  %v16688_v29 = vsel %vm4312_vm10, %v6995_v46, %v6997_v53 }
 0x661   : > { %v7110_v2 = vsel %vm2806_vm8, %v16684_v8, %v6910_v16  ;;  %v16702_v58 = vsel %vm5329_vm5, %v6869_v54, %v6871_v27  ;;  %6840 = vrot.lane.b32.xlu0 %v6815_v13, %s9359_s30  ;;  %v6912_v51 = vsel %vm5669_vm6, %v6909_v32, %v6911_v10  ;;  %v6939_v33 = vrot.slane %v6726_v55, 2  ;;  %v9179_v13 = vld [vmem:[%s17434_s8 + $0x90] sm:$0xff]  }
 0x662   : > { %v17752_v41 = vrot.slane %v16671_v22, 2  ;;  %6786 = vrot.lane.b32.xlu1 %v16671_v22, %s9359_s30  ;;  %v6817_v37 = vsel %vm3297_vm2, %v6814_v59, %v6816_v25  ;;  %v16720_v9 = vsel %vm2806_vm8, %v16702_v58, %v6912_v51  ;;  %v7332_v39 = vrot.slane %v7108_v26, 3  ;;  %v9181_v26 = vld [vmem:[%s17434_s8 + $0xd8] sm:$0xff]   ;;  %v9183_v51 = vld [vmem:[%s17434_s8 + $0xe0] sm:$0xff]  }
 0x663   : > { %v7342_v46 = vrot.slane %v7110_v2, 3  ;;  %v16725_v55 = vsel %vm4312_vm10, %v6997_v53, %v17753_v20  ;;  %v16728_v4 = vsel %vm3637_vm3, %v6937_v63, %v6939_v33  ;;  %v7352_v59 = vrot.slane %v16720_v9, 3  ;;  %v9178_v53 = vld [vmem:[%s17434_s8 + $0xd0] sm:$0xff]  }
 0x664   : > { %v16733_v54 = vsel %vm3637_vm3, %v6939_v33, %v17752_v41  ;;  %v16737_v56 = vsel %vm4312_vm10, %v7322_v60, %v7332_v39  ;;  %8849 = vmatprep.subr.bf16.mxu0 %v9178_v53 }
 0x665   : > { %v16740_v32 = vsel %vm4312_vm10, %v7332_v39, %v7342_v46  ;;  %6842 = vrot.lane.b32.xlu0 %v6817_v37, %s9359_s30  ;;  %v16746_v63 = vsel %vm4312_vm10, %v7342_v46, %v7352_v59  ;;  %8850 = vmatpush3.bf16.msra.mxu0 %v9179_v13  ;;  %v9184_v13 = vld [vmem:[%s17434_s8 + $0xa0] sm:$0xff]  }
 0x666   : > { %8851 = vmatprep.subr.bf16.mxu0 %v9181_v26  ;;  %v9175_v26 = vld [vmem:[%s17434_s8 + $0x100] sm:$0xff]  }
 0x668   : > { %v6825_v60 = vpop.permute.xlu1 %6824 }
 0x669   : > { %v7053_v16 = vsel %vm2806_vm8, %v6825_v60, %v16475_v11  ;;  %8852 = vmatpush3.bf16.msra.mxu0 %v9182_v40  ;;  %v7263_v60 = vrot.slane %v6767_v24, 3  ;;  %v9187_v24 = vld [vmem:[%s17434_s8 + $0xa8] sm:$0xff]  }
 0x66a   : > { %v6827_v35 = vpop.permute.xlu0 %6826  ;;  %v7266_v33 = vrot.slane %v7053_v16, 3  ;;  %8853 = vmatprep.subr.bf16.mxu0 %v9183_v51  ;;  %v9186_v16 = vld [vmem:[%s17434_s8 + $0xe8] sm:$0xff]  }
 0x66b   : > { %v7056_v2 = vsel %vm2806_vm8, %v6827_v35, %v16513_v48  ;;  %v9180_v51 = vld [vmem:[%s17434_s8 + $0x108] sm:$0xff]  }
 0x66c   : > { %v6685_v37 = vpop.permute.xlu1 %6684  ;;  %v7267_v39 = vrot.slane %v7056_v2, 3 }
 0x66d   : > { %6714 = vst.msk [vmem:[#allocation3 + $0x58] sm:$0xff] %vm6703_vm14, %v6685_v37  ;;  %8854 = vmatpush3.bf16.msra.mxu0 %v9184_v13 }
 0x66e   : > { %v6769_v46 = vpop.permute.xlu0 %6768  ;;  %v7268_v53 = vsel %vm4312_vm10, %v7266_v33, %v7267_v39  ;;  %8855 = vmatprep.subr.bf16.mxu0 %v9186_v16  ;;  %v9188_v16 = vld [vmem:[%s17434_s8 + $0xf0] sm:$0xff]  }
 0x66f   : > { %v7264_v48 = vrot.slane %v6769_v46, 3  ;;  %7737 = vmatprep.mubr.bf16.mxu1 %v7268_v53 }
 0x670   : > { %v16778_v35 = vpop.permute.xlu1 %6770 }
 0x671   : > { %v7265_v40 = vsel %vm4312_vm10, %v7263_v60, %v7264_v48  ;;  %v7278_v37 = vrot.slane %v16778_v35, 3  ;;  %8856 = vmatpush3.bf16.msra.mxu0 %v9187_v24 }
 0x672   : > { %7738 = vmatmul.mubr.bf16.vlgmr.msra.gmra.mrb[0].mxu1 %v7265_v40  ;;  %v6829_v2 = vpop.permute.xlu0 %6828  ;;  %8857 = vmatprep.subr.bf16.mxu0 %v9188_v16 }
 0x673   : > { %v7059_v33 = vsel %vm2806_vm8, %v6829_v2, %v16507_v61  ;;  %9025 = vmatpush3.bf16.msra.mxu1 %v9175_v26 }
 0x674   : > { %v7280_v46 = vrot.slane %v7059_v33, 3  ;;  %v16790_v53 = vld [vmem:[#allocation3 + $0x58] sm:$0xff]  ;;  %v6831_v60 = vpop.permute.xlu1 %6830  ;;  %9026 = vmatprep.subr.bf16.mxu1 %v16549_v43 }
 0x675   : > { %v6818_v13 = vrot.slane %v16790_v53, 1  ;;  %v6873_v40 = vrot.slane %v16790_v53, 5  ;;  %6788 = vrot.lane.b32.xlu1 %v16790_v53, %s9359_s30  ;;  %v7062_v61 = vsel %vm2806_vm8, %v6831_v60, %v16540_v14  ;;  %v6913_v26 = vrot.slane %v16790_v53, 6  ;;  %v9185_v60 = vld [vmem:[%s17434_s8 + $0x110] sm:$0xff]   ;;  %8858 = vmatpush3.bf16.msra.mxu0 %v9189_v18 }
 0x676   : > { %v6687_v35 = vpop.permute.xlu0 %6686  ;;  %v7281_v2 = vsel %vm4312_vm10, %v7267_v39, %v7280_v46  ;;  %v7290_v33 = vrot.slane %v7062_v61, 3 }
 0x677   : > { %6715 = vst.msk [vmem:[#allocation3 + $0x60] sm:$0xff] %vm6703_vm14, %v6687_v35  ;;  %v6819_v14 = vsel %vm3297_vm2, %v6816_v25, %v6818_v13  ;;  %7745 = vmatprep.mubr.bf16.mxu1 %v7281_v2  ;;  %9027 = vmatpush3.bf16.msra.mxu1 %v9180_v51  ;;  %v16817_v39 = vsel %vm5329_vm5, %v6871_v27, %v6873_v40 }
 0x678   : > { %v6914_v24 = vsel %vm5669_vm6, %v6911_v10, %v6913_v26  ;;  %6844 = vrot.lane.b32.xlu0 %v6819_v14, %s9359_s30  ;;  %v7291_v61 = vsel %vm4312_vm10, %v7280_v46, %v7290_v33  ;;  %9028 = vmatprep.subr.bf16.mxu1 %v16549_v43  ;;  %v7279_v25 = vsel %vm4312_vm10, %v7264_v48, %v7278_v37  ;;  %v9191_v10 = vld [vmem:[%s17434_s8 + $0xf8] sm:$0xff]  }
 0x679   : > { %v7114_v51 = vsel %vm2806_vm8, %v16817_v39, %v6914_v24  ;;  %v6689_v27 = vpop.permute.xlu1 %6688  ;;  %v9192_v46 = vld [vmem:[%s17434_s8 + $0xb8] sm:$0xff]   ;;  %8859 = vmatprep.subr.bf16.mxu0 %v9191_v10 }
 0x67a   : > { %7746 = vmatmul.mubr.bf16.gmra.mrb[4].mxu1 %v7279_v25  ;;  %v6773_v35 = vpop.permute.xlu0 %6772  ;;  %v7362_v2 = vrot.slane %v7114_v51, 3  ;;  %6716 = vst.msk [vmem:[#allocation3 + $0x68] sm:$0xff] %vm6703_vm14, %v6689_v27  ;;  %v9190_v48 = vld [vmem:[%s17434_s8 + $0x118] sm:$0xff]   ;;  %8860 = vmatpush3.bf16.msra.mxu0 %v9192_v46 }
 0x67b   : > { %7753 = vmatprep.mubr.bf16.mxu1 %v7291_v61  ;;  %9029 = vmatpush3.bf16.msra.mxu1 %v9185_v60  ;;  %v7288_v16 = vrot.slane %v6773_v35, 3 }
 0x67c   : > { %9030 = vmatprep.subr.bf16.mxu1 %v16549_v43  ;;  %v16842_v18 = vsel %vm4312_vm10, %v7352_v59, %v7362_v2 }
 0x67d   : > { %v7289_v35 = vsel %vm4312_vm10, %v7278_v37, %v7288_v16  ;;  %v6775_v10 = vpop.permute.xlu1 %6774  ;;  %v6747_v37 = vld [vmem:[#allocation3 + $0x70] sm:$0x1] }
 0x67e   : > { %v16844_v14 = vld [vmem:[#allocation3 + $0x60] sm:$0xff]  ;;  %v6833_v24 = vpop.permute.xlu0 %6832 }
 0x67f   : > { %v6820_v61 = vrot.slane %v16844_v14, 1  ;;  %v6875_v60 = vrot.slane %v16844_v14, 5  ;;  %6790 = vrot.lane.b32.xlu1 %v16844_v14, %s9359_s30  ;;  %v16852_v25 = vsel %vm2806_vm8, %v6833_v24, %v16564_v17  ;;  %9031 = vmatpush3.bf16.msra.mxu1 %v9190_v48  ;;  %v6915_v59 = vrot.slane %v16844_v14, 6 }
 0x680   : > { %v7300_v9 = vrot.slane %v16852_v25, 3 }
 0x681   : > { %v6821_v51 = vsel %vm3297_vm2, %v6818_v13, %v6820_v61  ;;  %v16859_v27 = vsel %vm5329_vm5, %v6873_v40, %v6875_v60  ;;  %v6730_v17 = vld [vmem:[#allocation3 + $0x68] sm:$0x7]  ;;  %v6916_v40 = vsel %vm5669_vm6, %v6913_v26, %v6915_v59 }
 0x682   : > { %6846 = vrot.lane.b32.xlu0 %v6821_v51, %s9359_s30  ;;  %7754 = vmatmul.mubr.bf16.gmra.mrb[8].mxu1 %v7289_v35  ;;  %v7301_v46 = vsel %vm4312_vm10, %v7290_v33, %v7300_v9  ;;  %v6732_v24 = vld [vmem:[#allocation3 + $0x68] sm:$0xf]  ;;  %v6919_v51 = vrot.slane %v6747_v37, 6  ;;  %v7298_v35 = vrot.slane %v6775_v10, 3  ;;  %v6748_v10 = vld [vmem:[#allocation3 + $0x8] sm:$0xe0] }
 0x683   : > { %v16863_v48 = vld [vmem:[#allocation3 + $0x68] sm:$0xff]  ;;  %7761 = vmatprep.mubr.bf16.mxu1 %v7301_v46  ;;  %6792 = vrot.lane.b32.xlu1 %v6730_v17, %s9359_s30  ;;  %v6822_v25 = vrot.slane %v6732_v24, 1  ;;  %v7116_v46 = vsel %vm2806_vm8, %v16859_v27, %v6916_v40 }
 0x684   : > { %v6917_v13 = vrot.slane %v16863_v48, 6  ;;  %v16869_v57 = vrot.slane %v16863_v48, 5  ;;  %v7372_v24 = vrot.slane %v7116_v46, 3  ;;  %v7299_v40 = vsel %vm4312_vm10, %v7288_v16, %v7298_v35 }
 0x685   : > { %v6823_v33 = vsel %vm3297_vm2, %v6820_v61, %v6822_v25 }
 0x686   : > { %6848 = vrot.lane.b32.xlu0 %v6823_v33, %s9359_s30  ;;  %v16877_v17 = vsel %vm5329_vm5, %v6875_v60, %v16869_v57  ;;  %v6918_v26 = vsel %vm5669_vm6, %v6915_v59, %v6917_v13  ;;  %v6920_v37 = vsel %vm5669_vm6, %v6917_v13, %v6919_v51  ;;  %v16889_v60 = vsel %vm4312_vm10, %v7362_v2, %v7372_v24  ;;  %v6750_v51 = vld [vmem:[#allocation3 + $0x8] sm:$0xc0] }
 0x687   : > { %6953 = vrot.lane.b32.xlu1 %v16556_v15, %s9359_s30  ;;  %v7118_v61 = vsel %vm2806_vm8, %v16877_v17, %v6918_v26  ;;  %v7120_v33 = vsel %vm2806_vm8, %v16869_v57, %v6920_v37  ;;  %v6924_v15 = vrot.slane %v6748_v10, 2  ;;  %v6982_v16 = vrot.slane %v6750_v51, 3 }
 0x688   : > { %v7382_v41 = vrot.slane %v7118_v61, 3  ;;  %v7392_v20 = vrot.slane %v7120_v33, 3 }
 0x689   : > { %v6926_v2 = vsel %vm3637_vm3, %v6924_v15, %v6925_v3  ;;  %v6777_v3 = vpop.permute.xlu1 %6776 }
 0x68a   : > { %7762 = vmatmul.mubr.bf16.gmra.mrb[12].mxu1 %v7299_v40  ;;  %6850 = vrot.lane.b32.xlu0 %v6822_v25, %s9359_s30  ;;  %v16895_v59 = vsel %vm4312_vm10, %v7372_v24, %v7382_v41  ;;  %v16898_v13 = vsel %vm4312_vm10, %v7382_v41, %v7392_v20 }
 0x68b   : > { %7011 = vrot.lane.b32.xlu1 %v16580_v47, %s9359_s30  ;;  %v6984_v47 = vsel %vm4312_vm10, %v6982_v16, %v6983_v44  ;;  %v7308_v44 = vrot.slane %v6777_v3, 3 }
 0x68e   : > { %6951 = vrot.lane.b32.xlu0 %v6926_v2, %s9359_s30 }
 0x68f   : > { %7013 = vrot.lane.b32.xlu1 %v16586_v36, %s9359_s30 }
 0x692   : > { %7009 = vrot.lane.b32.xlu0 %v6984_v47, %s9359_s30 }
 0x693   : > { %7015 = vrot.lane.b32.xlu1 %v16594_v38, %s9359_s30 }
 0x696   : > { %6955 = vrot.lane.b32.xlu0 %v16600_v49, %s9359_s30  ;;  %v7309_v49 = vsel %vm4312_vm10, %v7298_v35, %v7308_v44 }
 0x697   : > { %7017 = vrot.lane.b32.xlu1 %v16626_v6, %s9359_s30 }
 0x69a   : > { %6957 = vrot.lane.b32.xlu0 %v16603_v23, %s9359_s30  ;;  %v6835_v19 = vpop.permute.xlu0 %6834  ;;  %v7001_v23 = vrot.slane %v16790_v53, 3 }
 0x69b   : > { %7019 = vrot.lane.b32.xlu1 %v16647_v34, %s9359_s30  ;;  %v7068_v36 = vsel %vm2806_vm8, %v6835_v19, %v16622_v62  ;;  %v18593_v62 = vrot.slane %v16671_v22, 3  ;;  %v6943_v34 = vrot.slane %v16790_v53, 2 }
 0x69c   : > { %v7310_v20 = vrot.slane %v7068_v36, 3 }
 0x69d   : > { %v7002_v6 = vsel %vm4312_vm10, %v18593_v62, %v7001_v23 }
 0x69e   : > { %6959 = vrot.lane.b32.xlu0 %v16632_v7, %s9359_s30  ;;  %v7311_v38 = vsel %vm4312_vm10, %v7300_v9, %v7310_v20  ;;  %v7003_v7 = vrot.slane %v16844_v14, 3  ;;  %v6947_v9 = vrot.slane %v16863_v48, 2 }
 0x69f   : > { %7021 = vrot.lane.b32.xlu1 %v16675_v5, %s9359_s30  ;;  %7769 = vmatprep.mubr.bf16.mxu1 %v7311_v38  ;;  %v7005_v5 = vrot.slane %v16863_v48, 3  ;;  %v6779_v48 = vpop.permute.xlu1 %6778 }
 0x6a0   : > { %7770 = vmatmul.mubr.bf16.gmra.mrb[16].mxu1 %v7309_v49  ;;  %v7318_v24 = vrot.slane %v6779_v48, 3 }
 0x6a2   : > { %6961 = vrot.lane.b32.xlu0 %v16660_v1, %s9359_s30  ;;  %v7004_v1 = vsel %vm4312_vm10, %v7001_v23, %v7003_v7  ;;  %v7319_v33 = vsel %vm4312_vm10, %v7308_v44, %v7318_v24 }
 0x6a3   : > { %7023 = vrot.lane.b32.xlu1 %v16688_v29, %s9359_s30  ;;  %v6751_v29 = vld [vmem:[#allocation3 + $0x70] sm:$0x3f] }
 0x6a4   : > { %v7007_v53 = vrot.slane %v6751_v29, 3 }
 0x6a6   : > { %6963 = vrot.lane.b32.xlu0 %v16705_v45, %s9359_s30  ;;  %v18594_v45 = vrot.slane %v16671_v22, 2  ;;  %v7008_v25 = vsel %vm4312_vm10, %v7005_v5, %v7007_v53  ;;  %v6749_v22 = vld [vmem:[#allocation3 + $0x70] sm:$0x1f] }
 0x6a7   : > { %7025 = vrot.lane.b32.xlu1 %v16725_v55, %s9359_s30  ;;  %v6945_v55 = vrot.slane %v16844_v14, 2  ;;  %v6949_v35 = vrot.slane %v6749_v22, 2 }
 0x6a8   : > { %v6944_v41 = vsel %vm3637_vm3, %v18594_v45, %v6943_v34 }
 0x6a9   : > { %v6948_v14 = vsel %vm3637_vm3, %v6945_v55, %v6947_v9  ;;  %v6950_v46 = vsel %vm3637_vm3, %v6947_v9, %v6949_v35 }
 0x6aa   : > { %6965 = vrot.lane.b32.xlu0 %v16728_v4, %s9359_s30  ;;  %v7006_v4 = vsel %vm4312_vm10, %v7003_v7, %v7005_v5 }
 0x6ab   : > { %7027 = vrot.lane.b32.xlu1 %v7002_v6, %s9359_s30 }
 0x6ae   : > { %6967 = vrot.lane.b32.xlu0 %v16733_v54, %s9359_s30  ;;  %v6946_v54 = vsel %vm3637_vm3, %v6943_v34, %v6945_v55 }
 0x6af   : > { %7029 = vrot.lane.b32.xlu1 %v7004_v1, %s9359_s30 }
 0x6b2   : > { %6969 = vrot.lane.b32.xlu0 %v6944_v41, %s9359_s30 }
 0x6b3   : > { %7031 = vrot.lane.b32.xlu1 %v7006_v4, %s9359_s30 }
 0x6b6   : > { %6971 = vrot.lane.b32.xlu0 %v6946_v54, %s9359_s30 }
 0x6b7   : > { %7033 = vrot.lane.b32.xlu1 %v7008_v25, %s9359_s30 }
 0x6ba   : > { %6973 = vrot.lane.b32.xlu0 %v6948_v14, %s9359_s30 }
 0x6bb   : > { %7035 = vrot.lane.b32.xlu1 %v7007_v53, %s9359_s30 }
 0x6be   : > { %6975 = vrot.lane.b32.xlu0 %v6950_v46, %s9359_s30 }
 0x6c2   : > { %6977 = vrot.lane.b32.xlu0 %v6949_v35, %s9359_s30 }
 0x6c4   : > { %v6781_v40 = vpop.permute.xlu1 %6780 }
 0x6c5   : > { %v7328_v2 = vrot.slane %v6781_v40, 3  ;;  %v18595_v40 = vrot.slane %v16469_v52, 6 }
 0x6c7   : > { %v6837_v26 = vpop.permute.xlu0 %6836  ;;  %v7329_v36 = vsel %vm4312_vm10, %v7318_v24, %v7328_v2 }
 0x6c8   : > { %v7071_v37 = vsel %vm2806_vm8, %v6837_v26, %v16643_v21 }
 0x6c9   : > { %v7320_v10 = vrot.slane %v7071_v37, 3 }
 0x6cb   : > { %v7321_v61 = vsel %vm4312_vm10, %v7310_v20, %v7320_v10 }
 0x6cc   : > { %7777 = vmatprep.mubr.bf16.mxu1 %v7321_v61  ;;  %v6783_v20 = vpop.permute.xlu1 %6782 }
 0x6cd   : > { %7778 = vmatmul.mubr.bf16.gmra.mrb[20].mxu1 %v7319_v33  ;;  %v7338_v49 = vrot.slane %v6783_v20, 3 }
 0x6cf   : > { %v6839_v15 = vpop.permute.xlu0 %6838  ;;  %v7339_v6 = vsel %vm4312_vm10, %v7328_v2, %v7338_v49 }
 0x6d0   : > { %v7074_v51 = vsel %vm2806_vm8, %v6839_v15, %v16668_v12  ;;  %v6785_v7 = vpop.permute.xlu1 %6784  ;;  %v7094_v15 = vsel %vm2806_vm8, %v16475_v11, %v18595_v40 }
 0x6d1   : > { %v7330_v16 = vrot.slane %v7074_v51, 3 }
 0x6d3   : > { %v7331_v47 = vsel %vm4312_vm10, %v7320_v10, %v7330_v16  ;;  %v6841_v3 = vpop.permute.xlu0 %6840 }
 0x6d4   : > { %7785 = vmatprep.mubr.bf16.mxu1 %v7331_v47  ;;  %v7077_v21 = vsel %vm2806_vm8, %v6841_v3, %v16684_v8  ;;  %v7348_v8 = vrot.slane %v6785_v7, 3  ;;  %v6787_v1 = vpop.permute.xlu1 %6786  ;;  %v7269_v3 = vrot.slane %v7094_v15, 3 }
 0x6d5   : > { %v7340_v19 = vrot.slane %v7077_v21, 3  ;;  %7786 = vmatmul.mubr.bf16.gmra.mrb[24].mxu1 %v7329_v36  ;;  %v7358_v29 = vrot.slane %v6787_v1, 3 }
 0x6d6   : > { %v7349_v34 = vsel %vm4312_vm10, %v7338_v49, %v7348_v8 }
 0x6d7   : > { %v7341_v44 = vsel %vm4312_vm10, %v7330_v16, %v7340_v19  ;;  %v6843_v38 = vpop.permute.xlu0 %6842  ;;  %v7359_v55 = vsel %vm4312_vm10, %v7348_v8, %v7358_v29 }
 0x6d8   : > { %7793 = vmatprep.mubr.bf16.mxu1 %v7341_v44  ;;  %v7080_v12 = vsel %vm2806_vm8, %v6843_v38, %v16702_v58 }
 0x6d9   : > { %v7350_v23 = vrot.slane %v7080_v12, 3 }
 0x6db   : > { %v7351_v62 = vsel %vm4312_vm10, %v7340_v19, %v7350_v23  ;;  %v18596_v19 = vrot.slane %v16537_v0, 3 }
 0x6dd   : > { %7794 = vmatmul.mubr.bf16.gmra.mrb[28].mxu1 %v7339_v6  ;;  %v7271_v52 = vsel %vm4312_vm10, %v7269_v3, %v18596_v19 }
 0x6de   : > { %7801 = vmatprep.mubr.bf16.mxu1 %v7351_v62 }
 0x6e5   : > { %7802 = vmatmul.mubr.bf16.gmra.mrb[32].mxu1 %v7349_v34 }
 0x6e7   : > { %v6789_v4 = vpop.permute.xlu1 %6788 }
 0x6e8   : > { %v7368_v9 = vrot.slane %v6789_v4, 3 }
 0x6ea   : > { %v6845_v5 = vpop.permute.xlu0 %6844 }
 0x6eb   : > { %v7083_v45 = vsel %vm2806_vm8, %v6845_v5, %v16817_v39  ;;  %v7369_v39 = vsel %vm4312_vm10, %v7358_v29, %v7368_v9 }
 0x6ec   : > { %v7360_v58 = vrot.slane %v7083_v45, 3 }
 0x6ee   : > { %v7361_v41 = vsel %vm4312_vm10, %v7350_v23, %v7360_v58 }
 0x6ef   : > { %7809 = vmatprep.mubr.bf16.mxu1 %v7361_v41 }
 0x6f0   : > { %7810 = vmatmul.mubr.bf16.gmra.mrb[36].mxu1 %v7359_v55 }
 0x6f1   : > { %v6791_v53 = vpop.permute.xlu1 %6790 }
 0x6f2   : > { %v7378_v10 = vrot.slane %v6791_v53, 3 }
 0x6f4   : > { %v6847_v54 = vpop.permute.xlu0 %6846  ;;  %v7379_v16 = vsel %vm4312_vm10, %v7368_v9, %v7378_v10 }
 0x6f5   : > { %v7086_v25 = vsel %vm2806_vm8, %v6847_v54, %v16859_v27  ;;  %v6793_v35 = vpop.permute.xlu1 %6792 }
 0x6f6   : > { %v7370_v22 = vrot.slane %v7086_v25, 3  ;;  %v7388_v36 = vrot.slane %v6793_v35, 3 }
 0x6f8   : > { %v7371_v14 = vsel %vm4312_vm10, %v7360_v58, %v7370_v22  ;;  %v6849_v46 = vpop.permute.xlu0 %6848  ;;  %v7389_v20 = vsel %vm4312_vm10, %v7378_v10, %v7388_v36 }
 0x6f9   : > { %7817 = vmatprep.mubr.bf16.mxu1 %v7371_v14  ;;  %v7089_v48 = vsel %vm2806_vm8, %v6849_v46, %v16877_v17  ;;  %v6954_v61 = vpop.permute.xlu1 %6953 }
 0x6fa   : > { %7818 = vmatmul.mubr.bf16.gmra.mrb[40].mxu1 %v7369_v39  ;;  %v7380_v26 = vrot.slane %v7089_v48, 3  ;;  %v7273_v2 = vrot.slane %v6954_v61, 3 }
 0x6fc   : > { %v6851_v24 = vpop.permute.xlu0 %6850  ;;  %v7381_v37 = vsel %vm4312_vm10, %v7370_v22, %v7380_v26 }
 0x6fd   : > { %v7092_v27 = vsel %vm2806_vm8, %v6851_v24, %v16869_v57  ;;  %7825 = vmatprep.mubr.bf16.mxu1 %v7381_v37  ;;  %v7012_v12 = vpop.permute.xlu1 %7011 }
 0x6fe   : > { %v7390_v33 = vrot.slane %v7092_v27, 3  ;;  %v7276_v0 = vrot.slane %v7012_v12, 3 }
 0x700   : > { %v6952_v51 = vpop.permute.xlu0 %6951  ;;  %v7391_v17 = vsel %vm4312_vm10, %v7380_v26, %v7390_v33 }
 0x701   : > { %v7272_v47 = vrot.slane %v6952_v51, 3  ;;  %v7014_v1 = vpop.permute.xlu1 %7013 }
 0x702   : > { %7826 = vmatmul.mubr.bf16.gmra.mrb[44].mxu1 %v7379_v16  ;;  %v7286_v5 = vrot.slane %v7014_v1, 3 }
 0x703   : > { %7833 = vmatprep.mubr.bf16.mxu1 %v7391_v17  ;;  %v7274_v57 = vsel %vm4312_vm10, %v7272_v47, %v7273_v2 }
 0x704   : > { %v7010_v21 = vpop.permute.xlu0 %7009  ;;  %7874 = vmatprep.mubr.bf16.mxu0 %v7274_v57  ;;  %v7287_v58 = vsel %vm4312_vm10, %v7276_v0, %v7286_v5 }
 0x705   : > { %7875 = vmatmul.mubr.bf16.vlgmr.msra.gmra.mrb[52].mxu0 %v7271_v52  ;;  %v7275_v23 = vrot.slane %v7010_v21, 3  ;;  %v7016_v41 = vpop.permute.xlu1 %7015 }
 0x706   : > { %v7296_v55 = vrot.slane %v7016_v41, 3 }
 0x707   : > { %v7277_v8 = vsel %vm4312_vm10, %v7275_v23, %v7276_v0 }
 0x708   : > { %v6956_v11 = vpop.permute.xlu0 %6955  ;;  %v7297_v54 = vsel %vm4312_vm10, %v7286_v5, %v7296_v55 }
 0x709   : > { %v7284_v44 = vrot.slane %v6956_v11, 3  ;;  %v7018_v9 = vpop.permute.xlu1 %7017 }
 0x70a   : > { %7834 = vmatmul.mubr.bf16.gmra.mrb[48].mxu1 %v7389_v20  ;;  %v7306_v25 = vrot.slane %v7018_v9, 3 }
 0x70b   : > { %v7285_v38 = vsel %vm4312_vm10, %v7273_v2, %v7284_v44  ;;  %9032 = vmatprep.mubr.msk.bf16.mxu1 %vm9356_vm0, %v16549_v43 }
 0x70c   : > { %v6958_v49 = vpop.permute.xlu0 %6957  ;;  %7882 = vmatprep.mubr.bf16.mxu0 %v7285_v38  ;;  %v7307_v35 = vsel %vm4312_vm10, %v7296_v55, %v7306_v25 }
 0x70d   : > { %v7294_v62 = vrot.slane %v6958_v49, 3  ;;  %7883 = vmatmul.mubr.bf16.gmra.mrb[56].mxu0 %v16608_v31  ;;  %v7020_v46 = vpop.permute.xlu1 %7019 }
 0x70e   : > { %v7316_v39 = vrot.slane %v7020_v46, 3 }
 0x70f   : > { %v7295_v6 = vsel %vm4312_vm10, %v7284_v44, %v7294_v62 }
 0x710   : > { %v6960_v7 = vpop.permute.xlu0 %6959  ;;  %7890 = vmatprep.mubr.bf16.mxu0 %v7295_v6  ;;  %v7317_v24 = vsel %vm4312_vm10, %v7306_v25, %v7316_v39 }
 0x711   : > { %v7304_v34 = vrot.slane %v6960_v7, 3  ;;  %v7022_v37 = vpop.permute.xlu1 %7021 }
 0x712   : > { %9033 = vmatmul.mubr.msk.bf16.vlgmr.msra.gmra.mrb[52].mxu1 %vm2806_vm8, %v7277_v8  ;;  %v7326_v10 = vrot.slane %v7022_v37, 3 }
 0x713   : > { %9036 = vmatprep.mubr.msk.bf16.mxu1 %vm9356_vm0, %v16549_v43  ;;  %v7305_v29 = vsel %vm4312_vm10, %v7294_v62, %v7304_v34 }
 0x714   : > { %v6962_v31 = vpop.permute.xlu0 %6961  ;;  %v7327_v33 = vsel %vm4312_vm10, %v7316_v39, %v7326_v10 }
 0x715   : > { %7891 = vmatmul.mubr.bf16.gmra.mrb[60].mxu0 %v16611_v28  ;;  %v7314_v45 = vrot.slane %v6962_v31, 3  ;;  %v7024_v40 = vpop.permute.xlu1 %7023 }
 0x716   : > { %7898 = vmatprep.mubr.bf16.mxu0 %v7305_v29  ;;  %v7336_v15 = vrot.slane %v7024_v40, 3 }
 0x717   : > { %v7315_v4 = vsel %vm4312_vm10, %v7304_v34, %v7314_v45 }
 0x718   : > { %v6964_v53 = vpop.permute.xlu0 %6963  ;;  %v7337_v2 = vsel %vm4312_vm10, %v7326_v10, %v7336_v15 }
 0x719   : > { %v7324_v28 = vrot.slane %v6964_v53, 3  ;;  %v7026_v16 = vpop.permute.xlu1 %7025 }
 0x71a   : > { %9037 = vmatmul.mubr.msk.bf16.gmra.mrb[56].mxu1 %vm2806_vm8, %v7287_v58  ;;  %v7346_v47 = vrot.slane %v7026_v16, 3 }
 0x71b   : > { %9040 = vmatprep.mubr.msk.bf16.mxu1 %vm9356_vm0, %v16549_v43  ;;  %v7325_v22 = vsel %vm4312_vm10, %v7314_v45, %v7324_v28 }
 0x71c   : > { %v6966_v14 = vpop.permute.xlu0 %6965  ;;  %v7347_v20 = vsel %vm4312_vm10, %v7336_v15, %v7346_v47 }
 0x71d   : > { %7899 = vmatmul.mubr.bf16.gmra.mrb[64].mxu0 %v16616_v42  ;;  %v7334_v42 = vrot.slane %v6966_v14, 3  ;;  %v7028_v44 = vpop.permute.xlu1 %7027 }
 0x71e   : > { %7906 = vmatprep.mubr.bf16.mxu0 %v7315_v4  ;;  %v7356_v38 = vrot.slane %v7028_v44, 3 }
 0x71f   : > { %v7335_v48 = vsel %vm4312_vm10, %v7324_v28, %v7334_v42 }
 0x720   : > { %v6968_v26 = vpop.permute.xlu0 %6967  ;;  %v7357_v34 = vsel %vm4312_vm10, %v7346_v47, %v7356_v38 }
 0x721   : > { %v7030_v1 = vpop.permute.xlu1 %7029 }
 0x722   : > { %9041 = vmatmul.mubr.msk.bf16.gmra.mrb[60].mxu1 %vm2806_vm8, %v7297_v54 }
 0x723   : > { %9044 = vmatprep.mubr.msk.bf16.mxu1 %vm9356_vm0, %v16549_v43 }
 0x724   : > { %v6970_v61 = vpop.permute.xlu0 %6969 }
 0x725   : > { %7907 = vmatmul.mubr.bf16.gmra.mrb[68].mxu0 %v16635_v30  ;;  %v7344_v30 = vrot.slane %v6968_v26, 3  ;;  %v7032_v54 = vpop.permute.xlu1 %7031 }
 0x726   : > { %7914 = vmatprep.mubr.bf16.mxu0 %v7325_v22 }
 0x727   : > { %v7345_v27 = vsel %vm4312_vm10, %v7334_v42, %v7344_v30 }
 0x728   : > { %v6972_v17 = vpop.permute.xlu0 %6971 }
 0x72a   : > { %9045 = vmatmul.mubr.msk.bf16.gmra.mrb[64].mxu1 %vm2806_vm8, %v7307_v35 }
 0x72b   : > { %9048 = vmatprep.mubr.msk.bf16.mxu1 %vm9356_vm0, %v16549_v43 }
 0x72d   : > { %7915 = vmatmul.mubr.bf16.gmra.mrb[72].mxu0 %v16663_v50  ;;  %v7354_v50 = vrot.slane %v6970_v61, 3 }
 0x72e   : > { %7922 = vmatprep.mubr.bf16.mxu0 %v7335_v48  ;;  %v7034_v48 = vpop.permute.xlu1 %7033 }
 0x72f   : > { %v7355_v51 = vsel %vm4312_vm10, %v7344_v30, %v7354_v50  ;;  %v7386_v26 = vrot.slane %v7034_v48, 3 }
 0x732   : > { %9049 = vmatmul.mubr.msk.bf16.gmra.mrb[68].mxu1 %vm2806_vm8, %v7317_v24  ;;  %v7036_v30 = vpop.permute.xlu1 %7035 }
 0x733   : > { %9052 = vmatprep.mubr.msk.bf16.mxu1 %vm9356_vm0, %v16549_v43  ;;  %v7396_v24 = vrot.slane %v7036_v30, 3 }
 0x735   : > { %7923 = vmatmul.mubr.bf16.gmra.mrb[76].mxu0 %v16737_v56  ;;  %v7364_v56 = vrot.slane %v6972_v17, 3  ;;  %v7397_v37 = vsel %vm4312_vm10, %v7386_v26, %v7396_v24 }
 0x736   : > { %7930 = vmatprep.mubr.bf16.mxu0 %v7345_v27 }
 0x737   : > { %v7365_v57 = vsel %vm4312_vm10, %v7354_v50, %v7364_v56 }
 0x73a   : > { %9053 = vmatmul.mubr.msk.bf16.gmra.mrb[72].mxu1 %vm2806_vm8, %v7327_v33 }
 0x73b   : > { %9056 = vmatprep.mubr.msk.bf16.mxu1 %vm9356_vm0, %v16549_v43 }
 0x73d   : > { %7931 = vmatmul.mubr.bf16.gmra.mrb[80].mxu0 %v16740_v32  ;;  %v6974_v32 = vpop.permute.xlu0 %6973 }
 0x73e   : > { %7938 = vmatprep.mubr.bf16.mxu0 %v7355_v51  ;;  %v7374_v36 = vrot.slane %v6974_v32, 3 }
 0x740   : > { %v7375_v12 = vsel %vm4312_vm10, %v7364_v56, %v7374_v36 }
 0x741   : > { %v6976_v49 = vpop.permute.xlu0 %6975 }
 0x742   : > { %9057 = vmatmul.mubr.msk.bf16.gmra.mrb[76].mxu1 %vm2806_vm8, %v7337_v2  ;;  %v7384_v7 = vrot.slane %v6976_v49, 3 }
 0x743   : > { %9060 = vmatprep.mubr.msk.bf16.mxu1 %vm9356_vm0, %v16549_v43 }
 0x744   : > { %v7385_v29 = vsel %vm4312_vm10, %v7374_v36, %v7384_v7 }
 0x745   : > { %v8767_v3 = vpop.f32.mrb[0].mxu1  ;;  %7939 = vmatmul.mubr.bf16.gmra.mrb[84].mxu0 %v16746_v63  ;;  %v6978_v31 = vpop.permute.xlu0 %6977 }
 0x746   : > { %v8768_v21 = vpop.f32.mrb[1].mxu1  ;;  %7946 = vmatprep.mubr.bf16.mxu0 %v7365_v57  ;;  %v7394_v4 = vrot.slane %v6978_v31, 3 }
 0x747   : > { %v8770_v19 = vpop.f32.mrb[2].mxu1 }
 0x748   : > { %v8771_v52 = vpop.f32.mrb[3].mxu1  ;;  %v7395_v25 = vsel %vm4312_vm10, %v7384_v7, %v7394_v4 }
 0x749   : > { %v17055_v11 = vadd.f32 %v8771_v52, %v8770_v19 }
 0x74a   : > { %9061 = vmatmul.mubr.msk.bf16.gmra.mrb[80].mxu1 %vm2806_vm8, %v7347_v20 }
 0x74b   : > { %9064 = vmatprep.mubr.msk.bf16.mxu1 %vm9356_vm0, %v16549_v43  ;;  %v9346_v43 = vld [vmem:[#allocation2] sm:$0xff] }
 0x74d   : > { %v8773_v63 = vpop.f32.mrb[4].mxu1  ;;  %7947 = vmatmul.mubr.bf16.gmra.mrb[88].mxu0 %v16842_v18  ;;  %v7366_v18 = vrot.slane %v7030_v1, 3 }
 0x74e   : > { %v8774_v23 = vpop.f32.mrb[5].mxu1  ;;  %7954 = vmatprep.mubr.bf16.mxu0 %v7375_v12 }
 0x74f   : > { %v17063_v62 = vadd.f32 %v8774_v23, %v8773_v63  ;;  %v8776_v0 = vpop.f32.mrb[6].mxu1  ;;  %v7367_v28 = vsel %vm4312_vm10, %v7356_v38, %v7366_v18 }
 0x750   : > { %v8777_v6 = vpop.f32.mrb[7].mxu1 }
 0x751   : > { %v17065_v8 = vadd.f32 %v8777_v6, %v8776_v0 }
 0x752   : > { %9065 = vmatmul.mubr.msk.bf16.gmra.mrb[84].mxu1 %vm2806_vm8, %v7357_v34 }
 0x753   : > { %9068 = vmatprep.mubr.msk.bf16.mxu1 %vm9356_vm0, %v9346_v43 }
 0x755   : > { %v8779_v5 = vpop.f32.mrb[8].mxu1  ;;  %7955 = vmatmul.mubr.bf16.gmra.mrb[92].mxu0 %v16889_v60  ;;  %v7376_v60 = vrot.slane %v7032_v54, 3 }
 0x756   : > { %v8780_v45 = vpop.f32.mrb[9].mxu1  ;;  %7962 = vmatprep.mubr.bf16.mxu0 %v7385_v29 }
 0x757   : > { %v17072_v58 = vadd.f32 %v8780_v45, %v8779_v5  ;;  %v8782_v41 = vpop.f32.mrb[10].mxu1  ;;  %v7377_v39 = vsel %vm4312_vm10, %v7366_v18, %v7376_v60 }
 0x758   : > { %v8783_v55 = vpop.f32.mrb[11].mxu1 }
 0x759   : > { %v17074_v53 = vadd.f32 %v8783_v55, %v8782_v41 }
 0x75a   : > { %9069 = vmatmul.mubr.msk.bf16.gmra.mrb[88].mxu1 %vm2806_vm8, %v7367_v28 }
 0x75b   : > { %9072 = vmatprep.mubr.msk.bf16.mxu1 %vm9356_vm0, %v9346_v43 }
 0x75d   : > { %v8785_v9 = vpop.f32.mrb[12].mxu1  ;;  %7963 = vmatmul.mubr.bf16.gmra.mrb[96].mxu0 %v16895_v59  ;;  %v7387_v59 = vsel %vm4312_vm10, %v7376_v60, %v7386_v26 }
 0x75e   : > { %v8786_v22 = vpop.f32.mrb[13].mxu1  ;;  %7970 = vmatprep.mubr.bf16.mxu0 %v7395_v25 }
 0x75f   : > { %v17081_v14 = vadd.f32 %v8786_v22, %v8785_v9  ;;  %v8788_v42 = vpop.f32.mrb[14].mxu1 }
 0x760   : > { %v8789_v35 = vpop.f32.mrb[15].mxu1 }
 0x761   : > { %v17083_v46 = vadd.f32 %v8789_v35, %v8788_v42 }
 0x762   : > { %9073 = vmatmul.mubr.msk.bf16.gmra.mrb[92].mxu1 %vm2806_vm8, %v7377_v39 }
 0x763   : > { %9076 = vmatprep.mubr.msk.bf16.mxu1 %vm9356_vm0, %v9346_v43 }
 0x765   : > { %7971 = vmatmul.mubr.bf16.gmra.mrb[100].mxu0 %v16898_v13 }
 0x76a   : > { %9077 = vmatmul.mubr.msk.bf16.gmra.mrb[96].mxu1 %vm2806_vm8, %v7387_v59 }
 0x76b   : > { %9080 = vmatprep.mubr.msk.bf16.mxu1 %vm9356_vm0, %v9346_v43 }
 0x772   : > { %9081 = vmatmul.mubr.msk.bf16.gmra.mrb[100].mxu1 %vm2806_vm8, %v7397_v37 }
 0x773   : > { %v8791_v10 = vpop.f32.mrb[16].mxu1 }
 0x774   : > { %v8792_v27 = vpop.f32.mrb[17].mxu1 }
 0x775   : > { %v17094_v61 = vadd.f32 %v8792_v27, %v8791_v10  ;;  %v8794_v50 = vpop.f32.mrb[18].mxu1 }
 0x776   : > { %v8795_v33 = vpop.f32.mrb[19].mxu1 }
 0x777   : > { %v17096_v40 = vadd.f32 %v8795_v33, %v8794_v50 }
 0x7a0   : > { %v8797_v13 = vpop.f32.mrb[20].mxu1 }
 0x7a1   : > { %v8798_v15 = vpop.f32.mrb[21].mxu1 }
 0x7a2   : > { %v17098_v51 = vadd.f32 %v8798_v15, %v8797_v13  ;;  %v8800_v17 = vpop.f32.mrb[22].mxu1 }
 0x7a3   : > { %v8801_v56 = vpop.f32.mrb[23].mxu1 }
 0x7a4   : > { %v17100_v2 = vadd.f32 %v8801_v56, %v8800_v17 }
 0x7a8   : > { %v8803_v16 = vpop.f32.mrb[24].mxu1 }
 0x7a9   : > { %v8804_v47 = vpop.f32.mrb[25].mxu1 }
 0x7aa   : > { %v8806_v3 = vpop.f32.mrb[26].mxu1 }
 0x7ab   : > { %v8807_v57 = vpop.f32.mrb[27].mxu1 }
 0x7b0   : > { %v8809_v32 = vpop.f32.mrb[28].mxu1 }
 0x7b1   : > { %v8810_v21 = vpop.f32.mrb[29].mxu1 }
 0x7b2   : > { %v17102_v19 = vadd.f32 %v8810_v21, %v8809_v32  ;;  %v8812_v52 = vpop.f32.mrb[30].mxu1 }
 0x7b3   : > { %v8813_v36 = vpop.f32.mrb[31].mxu1 }
 0x7b4   : > { %v17104_v20 = vadd.f32 %v8813_v36, %v8812_v52 }
 0x7b8   : > { %v8815_v44 = vpop.f32.mrb[32].mxu1 }
 0x7b9   : > { %v8816_v38 = vpop.f32.mrb[33].mxu1 }
 0x7ba   : > { %v17106_v63 = vadd.f32 %v8816_v38, %v8815_v44  ;;  %v8818_v12 = vpop.f32.mrb[34].mxu1 }
 0x7bb   : > { %v8819_v49 = vpop.f32.mrb[35].mxu1 }
 0x7bc   : > { %v17108_v23 = vadd.f32 %v8819_v49, %v8818_v12 }
 0x7c3   : > { %v8821_v0 = vpop.f32.mrb[36].mxu1 }
 0x7c4   : > { %v8822_v6 = vpop.f32.mrb[37].mxu1 }
 0x7c5   : > { %v17110_v7 = vadd.f32 %v8822_v6, %v8821_v0  ;;  %v8824_v34 = vpop.f32.mrb[38].mxu1 }
 0x7c6   : > { %v8825_v1 = vpop.f32.mrb[39].mxu1 }
 0x7c7   : > { %v17112_v43 = vadd.f32 %v8825_v1, %v8824_v34 }
 0x7cd   : > { %v8827_v18 = vpop.f32.mrb[40].mxu1 }
 0x7ce   : > { %v8828_v5 = vpop.f32.mrb[41].mxu1 }
 0x7cf   : > { %v17114_v29 = vadd.f32 %v8828_v5, %v8827_v18  ;;  %v8830_v31 = vpop.f32.mrb[42].mxu1 }
 0x7d0   : > { %v8831_v45 = vpop.f32.mrb[43].mxu1 }
 0x7d1   : > { %v17116_v41 = vadd.f32 %v8831_v45, %v8830_v31 }
 0x7d5   : > { %v8833_v55 = vpop.f32.mrb[44].mxu1 }
 0x7d6   : > { %v8834_v4 = vpop.f32.mrb[45].mxu1 }
 0x7d7   : > { %v17118_v28 = vadd.f32 %v8834_v4, %v8833_v55  ;;  %v8836_v54 = vpop.f32.mrb[46].mxu1 }
 0x7d8   : > { %v8837_v60 = vpop.f32.mrb[47].mxu1  ;;  %v8861_v9 = vpop.f32.mrb[52].mxu0 }
 0x7d9   : > { %v17120_v25 = vadd.f32 %v8837_v60, %v8836_v54  ;;  %v8862_v22 = vpop.f32.mrb[53].mxu0 }
 0x7da   : > { %v8864_v42 = vpop.f32.mrb[54].mxu0 }
 0x7db   : > { %v8865_v35 = vpop.f32.mrb[55].mxu0 }
 0x7dc   : > { %v8866_v39 = vadd.f32 %v8865_v35, %v8864_v42 }
 0x7dd   : > { %v8839_v48 = vpop.f32.mrb[48].mxu1 }
 0x7de   : > { %v8840_v26 = vpop.f32.mrb[49].mxu1  ;;  %v7880_v59 = vadd.f32 %v8866_v39, %v17055_v11 }
 0x7df   : > { %v17123_v30 = vadd.f32 %v8840_v26, %v8839_v48  ;;  %v8842_v24 = vpop.f32.mrb[50].mxu1 }
 0x7e0   : > { %v8843_v37 = vpop.f32.mrb[51].mxu1  ;;  %v8867_v10 = vpop.f32.mrb[56].mxu0 }
 0x7e1   : > { %v8868_v27 = vpop.f32.mrb[57].mxu0 }
 0x7e2   : > { %v8869_v50 = vadd.f32 %v8868_v27, %v8867_v10  ;;  %v8870_v33 = vpop.f32.mrb[58].mxu0 }
 0x7e3   : > { %v8871_v13 = vpop.f32.mrb[59].mxu0 }
 0x7e4   : > { %v8872_v15 = vadd.f32 %v8871_v13, %v8870_v33  ;;  %v7885_v17 = vadd.f32 %v8869_v50, %v17063_v62 }
 0x7e5   : > { %v8013_v56 = vpop.f32.mrb[52].mxu1 }
 0x7e6   : > { %v9034_v16 = vpop.f32.mrb[53].mxu1  ;;  %v7888_v47 = vadd.f32 %v8872_v15, %v17065_v8 }
 0x7e7   : > { %v8016_v3 = vpop.f32.mrb[54].mxu1 }
 0x7e8   : > { %v8017_v57 = vadd.f32 %v8016_v3, %v7880_v59  ;;  %v9035_v32 = vpop.f32.mrb[55].mxu1  ;;  %v8873_v11 = vpop.f32.mrb[60].mxu0 }
 0x7e9   : > { %v8874_v21 = vpop.f32.mrb[61].mxu0 }
 0x7ea   : > { %8117 = vst.msk [vmem:[#allocation4 + $0x8] sm:$0xff] %vm1197_vm1, %v8017_v57  ;;  %v8875_v52 = vadd.f32 %v8874_v21, %v8873_v11  ;;  %v8876_v36 = vpop.f32.mrb[62].mxu0 }
 0x7eb   : > { %v8877_v44 = vpop.f32.mrb[63].mxu0 }
 0x7ec   : > { %v8878_v38 = vadd.f32 %v8877_v44, %v8876_v36  ;;  %v7893_v12 = vadd.f32 %v8875_v52, %v17072_v58 }
 0x7ed   : > { %v8021_v49 = vpop.f32.mrb[56].mxu1 }
 0x7ee   : > { %v8022_v0 = vadd.f32 %v8021_v49, %v7885_v17  ;;  %v9038_v62 = vpop.f32.mrb[57].mxu1  ;;  %v7896_v6 = vadd.f32 %v8878_v38, %v17074_v53 }
 0x7ef   : > { %v8024_v34 = vpop.f32.mrb[58].mxu1 }
 0x7f0   : > { %8118 = vst.msk [vmem:[#allocation4 + $0x10] sm:$0xff] %vm1197_vm1, %v8022_v0  ;;  %v8025_v8 = vadd.f32 %v8024_v34, %v7888_v47  ;;  %v9039_v1 = vpop.f32.mrb[59].mxu1  ;;  %v8879_v18 = vpop.f32.mrb[64].mxu0 }
 0x7f1   : > { %v8880_v5 = vpop.f32.mrb[65].mxu0 }
 0x7f2   : > { %8119 = vst.msk [vmem:[#allocation4 + $0x18] sm:$0xff] %vm1197_vm1, %v8025_v8  ;;  %v8881_v31 = vadd.f32 %v8880_v5, %v8879_v18  ;;  %v8882_v45 = vpop.f32.mrb[66].mxu0 }
 0x7f3   : > { %v8883_v55 = vpop.f32.mrb[67].mxu0 }
 0x7f4   : > { %v8884_v4 = vadd.f32 %v8883_v55, %v8882_v45  ;;  %v7901_v58 = vadd.f32 %v8881_v31, %v17081_v14 }
 0x7f5   : > { %v8029_v54 = vpop.f32.mrb[60].mxu1 }
 0x7f6   : > { %v8030_v60 = vadd.f32 %v8029_v54, %v7893_v12  ;;  %v9042_v9 = vpop.f32.mrb[61].mxu1  ;;  %v7904_v53 = vadd.f32 %v8884_v4, %v17083_v46 }
 0x7f7   : > { %v8032_v22 = vpop.f32.mrb[62].mxu1  ;;  %v17144_v44 = vld [vmem:[#allocation4 + $0xb] sm:$0xff] }
 0x7f8   : > { %8120 = vst.msk [vmem:[#allocation4 + $0x20] sm:$0xff] %vm1197_vm1, %v8030_v60  ;;  %v8033_v42 = vadd.f32 %v8032_v22, %v7896_v6  ;;  %v9043_v35 = vpop.f32.mrb[63].mxu1  ;;  %v8885_v39 = vpop.f32.mrb[68].mxu0 }
 0x7f9   : > { %v8886_v48 = vpop.f32.mrb[69].mxu0  ;;  %v17141_v11 = vld [vmem:[#allocation4 + $0x15] sm:$0xff] }
 0x7fa   : > { %8121 = vst.msk [vmem:[#allocation4 + $0x28] sm:$0xff] %vm1197_vm1, %v8033_v42  ;;  %v8887_v26 = vadd.f32 %v8886_v48, %v8885_v39  ;;  %v8888_v59 = vpop.f32.mrb[70].mxu0 }
 0x7fb   : > { %v8889_v24 = vpop.f32.mrb[71].mxu0 }
 0x7fc   : > { %v8890_v37 = vadd.f32 %v8889_v24, %v8888_v59  ;;  %v7909_v14 = vadd.f32 %v8887_v26, %v17094_v61 }
 0x7fd   : > { %v8037_v10 = vpop.f32.mrb[64].mxu1 }
 0x7fe   : > { %v8038_v27 = vadd.f32 %v8037_v10, %v7901_v58  ;;  %v9046_v50 = vpop.f32.mrb[65].mxu1  ;;  %v7912_v46 = vadd.f32 %v8890_v37, %v17096_v40 }
 0x7ff   : > { %v8040_v33 = vpop.f32.mrb[66].mxu1  ;;  %v17146_v38 = vld [vmem:[#allocation4 + $0x1f] sm:$0xff] }
 0x800   : > { %8122 = vst.msk [vmem:[#allocation4 + $0x30] sm:$0xff] %vm1197_vm1, %v8038_v27  ;;  %v8041_v13 = vadd.f32 %v8040_v33, %v7904_v53  ;;  %v9047_v15 = vpop.f32.mrb[67].mxu1  ;;  %v8891_v17 = vpop.f32.mrb[72].mxu0  ;;  %v8155_v8 = vsel %vm1197_vm1, %v17146_v38, 0.0 }
 0x801   : > { %v8892_v56 = vpop.f32.mrb[73].mxu0 }
 0x802   : > { %8123 = vst.msk [vmem:[#allocation4 + $0x38] sm:$0xff] %vm1197_vm1, %v8041_v13  ;;  %v8893_v16 = vadd.f32 %v8892_v56, %v8891_v17  ;;  %v8894_v47 = vpop.f32.mrb[74].mxu0 }
 0x803   : > { %v8895_v3 = vpop.f32.mrb[75].mxu0 }
 0x804   : > { %v8896_v57 = vadd.f32 %v8895_v3, %v8894_v47  ;;  %v7917_v61 = vadd.f32 %v8893_v16, %v17098_v51  ;;  %v8153_v51 = vsel %vm1197_vm1, %v17141_v11, 0.0 }
 0x805   : > { %v8045_v32 = vpop.f32.mrb[68].mxu1 }
 0x806   : > { %v8046_v21 = vadd.f32 %v8045_v32, %v7909_v14  ;;  %v9050_v40 = vpop.f32.mrb[69].mxu1  ;;  %v7920_v52 = vadd.f32 %v8896_v57, %v17100_v2  ;;  %v8152_v2 = vsel %vm1197_vm1, %v17144_v44, 0.0 }
 0x807   : > { %v8048_v36 = vpop.f32.mrb[70].mxu1  ;;  %v17151_v6 = vld [vmem:[#allocation4 + $0x29] sm:$0xff]  ;;  %v8154_v18 = vadd.f32 %v8153_v51, %v8152_v2 }
 0x808   : > { %8124 = vst.msk [vmem:[#allocation4 + $0x40] sm:$0xff] %vm1197_vm1, %v8046_v21  ;;  %v8049_v12 = vadd.f32 %v8048_v36, %v7912_v46  ;;  %v9051_v49 = vpop.f32.mrb[71].mxu1  ;;  %v8897_v0 = vpop.f32.mrb[76].mxu0  ;;  %v8157_v5 = vsel %vm1197_vm1, %v17151_v6, 0.0 }
 0x809   : > { %v8898_v62 = vpop.f32.mrb[77].mxu0  ;;  %v17160_v45 = vld [vmem:[#allocation4 + $0x33] sm:$0xff]  ;;  %v8156_v55 = vadd.f32 %v8155_v8, %v8154_v18 }
 0x80a   : > { %8125 = vst.msk [vmem:[#allocation4 + $0x48] sm:$0xff] %vm1197_vm1, %v8049_v12  ;;  %v8900_v34 = vpop.f32.mrb[78].mxu0  ;;  %v8159_v35 = vsel %vm1197_vm1, %v17160_v45, 0.0 }
 0x80b   : > { %v8901_v1 = vpop.f32.mrb[79].mxu0  ;;  %v8158_v9 = vadd.f32 %v8157_v5, %v8156_v55 }
 0x80d   : > { %v8053_v31 = vpop.f32.mrb[72].mxu1  ;;  %v8160_v14 = vadd.f32 %v8159_v35, %v8158_v9 }
 0x80e   : > { %v8054_v4 = vadd.f32 %v8053_v31, %v7917_v61  ;;  %v9054_v58 = vpop.f32.mrb[73].mxu1 }
 0x80f   : > { %v8056_v54 = vpop.f32.mrb[74].mxu1  ;;  %v17162_v60 = vld [vmem:[#allocation4 + $0x3d] sm:$0xff] }
 0x810   : > { %8126 = vst.msk [vmem:[#allocation4 + $0x50] sm:$0xff] %vm1197_vm1, %v8054_v4  ;;  %v8057_v53 = vadd.f32 %v8056_v54, %v7920_v52  ;;  %v9055_v22 = vpop.f32.mrb[75].mxu1  ;;  %v8903_v42 = vpop.f32.mrb[80].mxu0  ;;  %v8161_v59 = vsel %vm1197_vm1, %v17162_v60, 0.0 }
 0x811   : > { %v8904_v39 = vpop.f32.mrb[81].mxu0  ;;  %v17170_v37 = vld [vmem:[#allocation4 + $0x47] sm:$0xff]  ;;  %v8162_v46 = vadd.f32 %v8161_v59, %v8160_v14 }
 0x812   : > { %8127 = vst.msk [vmem:[#allocation4 + $0x58] sm:$0xff] %vm1197_vm1, %v8057_v53  ;;  %v8905_v48 = vadd.f32 %v8904_v39, %v8903_v42  ;;  %v8906_v26 = vpop.f32.mrb[82].mxu0  ;;  %v8163_v15 = vsel %vm1197_vm1, %v17170_v37, 0.0 }
 0x813   : > { %v8907_v24 = vpop.f32.mrb[83].mxu0  ;;  %v8164_v57 = vadd.f32 %v8163_v15, %v8162_v46 }
 0x814   : > { %v8908_v10 = vadd.f32 %v8907_v24, %v8906_v26  ;;  %v7933_v27 = vadd.f32 %v8905_v48, %v17102_v19 }
 0x815   : > { %v8061_v50 = vpop.f32.mrb[76].mxu1 }
 0x816   : > { %v9058_v33 = vpop.f32.mrb[77].mxu1  ;;  %v7936_v13 = vadd.f32 %v8908_v10, %v17104_v20 }
 0x817   : > { %v8064_v17 = vpop.f32.mrb[78].mxu1 }
 0x818   : > { %v9059_v56 = vpop.f32.mrb[79].mxu1  ;;  %v8909_v16 = vpop.f32.mrb[84].mxu0 }
 0x819   : > { %v8910_v47 = vpop.f32.mrb[85].mxu0  ;;  %v17176_v3 = vld [vmem:[#allocation4 + $0x51] sm:$0xff] }
 0x81a   : > { %v8911_v61 = vadd.f32 %v8910_v47, %v8909_v16  ;;  %v8912_v32 = vpop.f32.mrb[86].mxu0  ;;  %v8165_v19 = vsel %vm1197_vm1, %v17176_v3, 0.0 }
 0x81b   : > { %v8913_v21 = vpop.f32.mrb[87].mxu0  ;;  %v8166_v40 = vadd.f32 %v8165_v19, %v8164_v57 }
 0x81c   : > { %v8914_v52 = vadd.f32 %v8913_v21, %v8912_v32  ;;  %v7941_v20 = vadd.f32 %v8911_v61, %v17106_v63 }
 0x81d   : > { %v8069_v36 = vpop.f32.mrb[80].mxu1  ;;  %v8167_v12 = vrot.slane %v8166_v40, 4 }
 0x81e   : > { %v8070_v49 = vadd.f32 %v8069_v36, %v7933_v27  ;;  %v9062_v0 = vpop.f32.mrb[81].mxu1  ;;  %v7944_v51 = vadd.f32 %v8914_v52, %v17108_v23 }
 0x81f   : > { %v8072_v62 = vpop.f32.mrb[82].mxu1  ;;  %v8168_v34 = vadd.f32 %v8167_v12, %v8166_v40 }
 0x820   : > { %8130 = vst.msk [vmem:[#allocation4 + $0x70] sm:$0xff] %vm1197_vm1, %v8070_v49  ;;  %v8073_v2 = vadd.f32 %v8072_v62, %v7936_v13  ;;  %v9063_v8 = vpop.f32.mrb[83].mxu1  ;;  %v8915_v1 = vpop.f32.mrb[88].mxu0 }
 0x821   : > { %v8916_v18 = vpop.f32.mrb[89].mxu0  ;;  %v8169_v5 = vrot.slane %v8168_v34, 2 }
 0x822   : > { %8131 = vst.msk [vmem:[#allocation4 + $0x78] sm:$0xff] %vm1197_vm1, %v8073_v2  ;;  %v8917_v31 = vadd.f32 %v8916_v18, %v8915_v1  ;;  %v8918_v55 = vpop.f32.mrb[90].mxu0 }
 0x823   : > { %v8919_v63 = vpop.f32.mrb[91].mxu0  ;;  %v8170_v4 = vadd.f32 %v8169_v5, %v8168_v34 }
 0x824   : > { %v8920_v58 = vadd.f32 %v8919_v63, %v8918_v55  ;;  %v7949_v54 = vadd.f32 %v8917_v31, %v17110_v7 }
 0x825   : > { %v8077_v9 = vpop.f32.mrb[84].mxu1  ;;  %v8171_v23 = vrot.slane %v8170_v4, 1 }
 0x826   : > { %v8078_v53 = vadd.f32 %v8077_v9, %v7941_v20  ;;  %v9066_v22 = vpop.f32.mrb[85].mxu1  ;;  %v7952_v42 = vadd.f32 %v8920_v58, %v17112_v43 }
 0x827   : > { %v8080_v35 = vpop.f32.mrb[86].mxu1  ;;  %v8172_v39 = vadd.f32 %v8171_v23, %v8170_v4 }
 0x828   : > { %8132 = vst.msk [vmem:[#allocation4 + $0x80] sm:$0xff] %vm1197_vm1, %v8078_v53  ;;  %v8081_v48 = vadd.f32 %v8080_v35, %v7944_v51  ;;  %v9067_v26 = vpop.f32.mrb[87].mxu1  ;;  %v8921_v59 = vpop.f32.mrb[92].mxu0 }
 0x829   : > { %v8922_v24 = vpop.f32.mrb[93].mxu0  ;;  %v8173_v14 = vmul.f32 0.015625, %v8172_v39 }
 0x82a   : > { %8133 = vst.msk [vmem:[#allocation4 + $0x88] sm:$0xff] %vm1197_vm1, %v8081_v48  ;;  %v8923_v10 = vadd.f32 %v8922_v24, %v8921_v59  ;;  %v8924_v27 = vpop.f32.mrb[94].mxu0 }
 0x82b   : > { %v8925_v7 = vpop.f32.mrb[95].mxu0  ;;  %v17189_v50 = vsub.f32 %v17144_v44, %v8173_v14  ;;  %v17192_v46 = vsub.f32 %v17141_v11, %v8173_v14  ;;  %v17195_v43 = vsub.f32 %v17146_v38, %v8173_v14  ;;  %v17199_v15 = vsub.f32 %v17151_v6, %v8173_v14 }
 0x82c   : > { %v8926_v33 = vadd.f32 %v8925_v7, %v8924_v27  ;;  %v7957_v13 = vadd.f32 %v8923_v10, %v17114_v29  ;;  %v17207_v38 = vsub.f32 %v17160_v45, %v8173_v14  ;;  %v17212_v6 = vsub.f32 %v17162_v60, %v8173_v14  ;;  %v17247_v7 = vld [vmem:[#allocation4 + $0x73] sm:$0xff] }
 0x82d   : > { %v8085_v17 = vpop.f32.mrb[88].mxu1  ;;  %v8182_v56 = vmul.f32 %v17189_v50, %v17189_v50  ;;  %v8183_v44 = vmul.f32 %v17192_v46, %v17192_v46  ;;  %v8184_v29 = vmul.f32 %v17195_v43, %v17195_v43  ;;  %v8185_v21 = vmul.f32 %v17199_v15, %v17199_v15 }
 0x82e   : > { %v8086_v16 = vadd.f32 %v8085_v17, %v7949_v54  ;;  %v9070_v47 = vpop.f32.mrb[89].mxu1  ;;  %v7960_v11 = vadd.f32 %v8926_v33, %v17116_v41  ;;  %v17221_v60 = vsub.f32 %v17170_v37, %v8173_v14  ;;  %v8186_v12 = vmul.f32 %v17207_v38, %v17207_v38 }
 0x82f   : > { %v8088_v57 = vpop.f32.mrb[90].mxu1  ;;  %v8190_v41 = vsel %vm1197_vm1, %v8182_v56, 0.0  ;;  %v8191_v45 = vsel %vm1197_vm1, %v8183_v44, 0.0  ;;  %v8193_v49 = vsel %vm1197_vm1, %v8184_v29, 0.0  ;;  %v17227_v51 = vsub.f32 %v17176_v3, %v8173_v14  ;;  %v17243_v59 = vld [vmem:[#allocation4 + $0x7d] sm:$0xff] }
 0x830   : > { %8134 = vst.msk [vmem:[#allocation4 + $0x90] sm:$0xff] %vm1197_vm1, %v8086_v16  ;;  %v8089_v61 = vadd.f32 %v8088_v57, %v7952_v42  ;;  %v9071_v32 = vpop.f32.mrb[91].mxu1  ;;  %v8927_v19 = vpop.f32.mrb[96].mxu0  ;;  %v8192_v52 = vadd.f32 %v8191_v45, %v8190_v41  ;;  %v8187_v8 = vmul.f32 %v17212_v6, %v17212_v6  ;;  %v8195_v1 = vsel %vm1197_vm1, %v8185_v21, 0.0 }
 0x831   : > { %v8928_v40 = vpop.f32.mrb[97].mxu0  ;;  %v8188_v63 = vmul.f32 %v17221_v60, %v17221_v60  ;;  %v8197_v3 = vsel %vm1197_vm1, %v8186_v12, 0.0  ;;  %v8189_v23 = vmul.f32 %v17227_v51, %v17227_v51  ;;  %v8332_v17 = vsel %vm1197_vm1, %v17243_v59, 0.0  ;;  %v17251_v16 = vld [vmem:[#allocation4 + $0x87] sm:$0xff] }
 0x832   : > { %8135 = vst.msk [vmem:[#allocation4 + $0x98] sm:$0xff] %vm1197_vm1, %v8089_v61  ;;  %v8929_v20 = vadd.f32 %v8928_v40, %v8927_v19  ;;  %v8930_v36 = vpop.f32.mrb[98].mxu0  ;;  %v8194_v62 = vadd.f32 %v8193_v49, %v8192_v52  ;;  %v8199_v53 = vsel %vm1197_vm1, %v8187_v8, 0.0  ;;  %v8334_v32 = vsel %vm1197_vm1, %v17251_v16, 0.0 }
 0x833   : > { %v8931_v0 = vpop.f32.mrb[99].mxu0  ;;  %v8201_v39 = vsel %vm1197_vm1, %v8188_v63, 0.0  ;;  %v8203_v14 = vsel %vm1197_vm1, %v8189_v23, 0.0  ;;  %v17283_v23 = vld [vmem:[%s17435_s9] sm:$0x1] }
 0x834   : > { %v8932_v34 = vadd.f32 %v8931_v0, %v8930_v36  ;;  %v7965_v2 = vadd.f32 %v8929_v20, %v17118_v28  ;;  %v8196_v18 = vadd.f32 %v8195_v1, %v8194_v62 }
 0x835   : > { %v8093_v37 = vpop.f32.mrb[92].mxu1 }
 0x836   : > { %v8094_v5 = vadd.f32 %v8093_v37, %v7957_v13  ;;  %v9074_v31 = vpop.f32.mrb[93].mxu1  ;;  %v7968_v55 = vadd.f32 %v8932_v34, %v17120_v25  ;;  %v8198_v58 = vadd.f32 %v8197_v3, %v8196_v18 }
 0x837   : > { %v8096_v4 = vpop.f32.mrb[94].mxu1 }
 0x838   : > { %8136 = vst.msk [vmem:[#allocation4 + $0xa0] sm:$0xff] %vm1197_vm1, %v8094_v5  ;;  %v8097_v28 = vadd.f32 %v8096_v4, %v7960_v11  ;;  %v9075_v54 = vpop.f32.mrb[95].mxu1  ;;  %v8933_v9 = vpop.f32.mrb[100].mxu0  ;;  %v8200_v42 = vadd.f32 %v8199_v53, %v8198_v58 }
 0x839   : > { %v8934_v22 = vpop.f32.mrb[101].mxu0  ;;  %v17256_v57 = vld [vmem:[#allocation4 + $0x91] sm:$0xff] }
 0x83a   : > { %8137 = vst.msk [vmem:[#allocation4 + $0xa8] sm:$0xff] %vm1197_vm1, %v8097_v28  ;;  %v8935_v25 = vadd.f32 %v8934_v22, %v8933_v9  ;;  %v8936_v35 = vpop.f32.mrb[102].mxu0  ;;  %v8202_v26 = vadd.f32 %v8201_v39, %v8200_v42  ;;  %v8336_v41 = vsel %vm1197_vm1, %v17256_v57, 0.0 }
 0x83b   : > { %v8937_v48 = vpop.f32.mrb[103].mxu0 }
 0x83c   : > { %v7973_v24 = vadd.f32 %v8935_v25, %v17123_v30  ;;  %v8204_v27 = vadd.f32 %v8203_v14, %v8202_v26  ;;  %v8331_v30 = vsel %vm1197_vm1, %v17247_v7, 0.0  ;;  %v18597_v25 = vld [vmem:[#allocation11_spill] sm:$0xff]  ;;  %v17290_v48 = vld [vmem:[%s17436_s10] ss:$0 sm:$0xff] }
 0x83d   : > { %v8101_v10 = vpop.f32.mrb[96].mxu1  ;;  %v8333_v61 = vadd.f32 %v8332_v17, %v8331_v30 }
 0x83e   : > { %v8102_v33 = vadd.f32 %v8101_v10, %v7965_v2  ;;  %v9078_v13 = vpop.f32.mrb[97].mxu1  ;;  %v8205_v44 = vrot.slane %v8204_v27, 4 }
 0x83f   : > { %v8104_v56 = vpop.f32.mrb[98].mxu1  ;;  %v17261_v21 = vld [vmem:[#allocation4 + $0x9b] sm:$0xff]  ;;  %v8335_v52 = vadd.f32 %v8334_v32, %v8333_v61 }
 0x840   : > { %8138 = vst.msk [vmem:[#allocation4 + $0xb0] sm:$0xff] %vm1197_vm1, %v8102_v33  ;;  %v8105_v47 = vadd.f32 %v8104_v56, %v7968_v55  ;;  %v9079_v11 = vpop.f32.mrb[99].mxu1  ;;  %v8206_v29 = vadd.f32 %v8205_v44, %v8204_v27  ;;  %v8338_v12 = vsel %vm1197_vm1, %v17261_v21, 0.0 }
 0x841   : > { %v17267_v62 = vld [vmem:[#allocation4 + $0xa5] sm:$0xff]  ;;  %v8337_v34 = vadd.f32 %v8336_v41, %v8335_v52 }
 0x842   : > { %8139 = vst.msk [vmem:[#allocation4 + $0xb8] sm:$0xff] %vm1197_vm1, %v8105_v47  ;;  %v8207_v19 = vrot.slane %v8206_v29, 2  ;;  %v8340_v18 = vsel %vm1197_vm1, %v17267_v62, 0.0 }
 0x843   : > { %v8339_v37 = vadd.f32 %v8338_v12, %v8337_v34 }
 0x844   : > { %v8208_v40 = vadd.f32 %v8207_v19, %v8206_v29 }
 0x845   : > { %v8109_v45 = vpop.f32.mrb[100].mxu1  ;;  %v8341_v63 = vadd.f32 %v8340_v18, %v8339_v37 }
 0x846   : > { %v8110_v20 = vadd.f32 %v8109_v45, %v7973_v24  ;;  %v9082_v36 = vpop.f32.mrb[101].mxu1  ;;  %v8209_v0 = vrot.slane %v8208_v40, 1 }
 0x847   : > { %v8112_v49 = vpop.f32.mrb[102].mxu1  ;;  %v17270_v1 = vld [vmem:[#allocation4 + $0xaf] sm:$0xff] }
 0x848   : > { %8140 = vst.msk [vmem:[#allocation4 + $0xc0] sm:$0xff] %vm1197_vm1, %v8110_v20  ;;  %v9083_v2 = vpop.f32.mrb[103].mxu1  ;;  %v8210_v8 = vadd.f32 %v8209_v0, %v8208_v40  ;;  %v8342_v31 = vsel %vm1197_vm1, %v17270_v1, 0.0 }
 0x849   : > { %v8343_v4 = vadd.f32 %v8342_v31, %v8341_v63 }
 0x84a   : > { %v8211_v5 = vmul.f32 0.015625, %v8210_v8 }
 0x84c   : > { %v8212_v55 = vadd.f32 1e-10, %v8211_v5 }
 0x84e   : > { %9303 = vrsqrt.f32 %v8212_v55 }
 0x84f   : > { %v17276_v3 = vld [vmem:[#allocation4 + $0xb9] sm:$0xff] }
 0x850   : > { %v8344_v58 = vsel %vm1197_vm1, %v17276_v3, 0.0 }
 0x851   : > { %v8345_v28 = vadd.f32 %v8344_v58, %v8343_v4 }
 0x853   : > { %v8346_v54 = vrot.slane %v8345_v28, 4 }
 0x855   : > { %v8347_v9 = vadd.f32 %v8346_v54, %v8345_v28 }
 0x857   : > { %v8348_v53 = vrot.slane %v8347_v9, 2 }
 0x858   : > { %v9304_v22 = vpop.eup %9303 }
 0x859   : > { %v8214_v42 = vmul.f32 %v9304_v22, %v17283_v23  ;;  %v8349_v39 = vadd.f32 %v8348_v53, %v8347_v9 }
 0x85b   : > { %v8218_v35 = vrot.slane %v8214_v42, %v18597_v25  ;;  %v8350_v17 = vrot.slane %v8349_v39, 1 }
 0x85d   : > { %v8219_v26 = vmul.f32 %v8218_v35, %v17189_v50  ;;  %v8220_v24 = vmul.f32 %v8218_v35, %v17192_v46  ;;  %v8221_v14 = vmul.f32 %v8218_v35, %v17195_v43  ;;  %v8222_v10 = vmul.f32 %v8218_v35, %v17199_v15 }
 0x85e   : > { %v8223_v50 = vmul.f32 %v8218_v35, %v17207_v38  ;;  %v8351_v11 = vadd.f32 %v8350_v17, %v8349_v39  ;;  %v8224_v61 = vmul.f32 %v8218_v35, %v17212_v6  ;;  %v8225_v38 = vmul.f32 %v8218_v35, %v17221_v60 }
 0x85f   : > { %v8233_v27 = vadd.f32 %v17290_v48, %v8219_v26  ;;  %v17298_v33 = vadd.f32 %v17290_v48, %v8220_v24  ;;  %v17301_v13 = vadd.f32 %v17290_v48, %v8221_v14  ;;  %v17304_v56 = vadd.f32 %v17290_v48, %v8222_v10 }
 0x860   : > { %v17311_v29 = vadd.f32 %v17290_v48, %v8223_v50  ;;  %v8352_v19 = vmul.f32 0.015625, %v8351_v11  ;;  %v17317_v40 = vadd.f32 %v17290_v48, %v8224_v61  ;;  %v17332_v60 = vadd.f32 %v17290_v48, %v8225_v38 }
 0x861   : > { %v8249_v44 = vmin.f32 %v8233_v27, 0.0  ;;  %v8250_v46 = vmin.f32 %v17298_v33, 0.0  ;;  %v8251_v43 = vmin.f32 %v17301_v13, 0.0  ;;  %v8252_v30 = vmin.f32 %v17304_v56, 0.0 }
 0x862   : > { %v8253_v45 = vmin.f32 %v17311_v29, 0.0  ;;  %v17320_v52 = vsub.f32 %v17247_v7, %v8352_v19  ;;  %v17323_v20 = vsub.f32 %v17243_v59, %v8352_v19  ;;  %v17326_v6 = vsub.f32 %v17251_v16, %v8352_v19 }
 0x863   : > { %v8257_v15 = vmul.f32 1.442695, %v8249_v44  ;;  %v8259_v47 = vmul.f32 1.442695, %v8250_v46  ;;  %v8261_v32 = vmul.f32 1.442695, %v8251_v43  ;;  %v17329_v36 = vsub.f32 %v17256_v57, %v8352_v19 }
 0x864   : > { %v8263_v41 = vmul.f32 1.442695, %v8252_v30  ;;  %v8226_v12 = vmul.f32 %v8218_v35, %v17227_v51  ;;  %v8361_v49 = vmul.f32 %v17320_v52, %v17320_v52  ;;  %v17338_v7 = vsub.f32 %v17261_v21, %v8352_v19 }
 0x865   : > { %9305 = vpow2.f32 %v8257_v15  ;;  %v8362_v59 = vmul.f32 %v17323_v20, %v17323_v20  ;;  %v8363_v16 = vmul.f32 %v17326_v6, %v17326_v6  ;;  %v8265_v57 = vmul.f32 1.442695, %v8253_v45 }
 0x866   : > { %9307 = vpow2.f32 %v8259_v47  ;;  %v8254_v0 = vmin.f32 %v17317_v40, 0.0  ;;  %v17346_v34 = vsub.f32 %v17267_v62, %v8352_v19  ;;  %v8364_v51 = vmul.f32 %v17329_v36, %v17329_v36 }
 0x867   : > { %9309 = vpow2.f32 %v8261_v32  ;;  %v8369_v2 = vsel %vm1197_vm1, %v8361_v49, 0.0  ;;  %v8370_v21 = vsel %vm1197_vm1, %v8362_v59, 0.0  ;;  %vm8241_vm0 = vcmp.gt.f32.partialorder %v8233_v27, 0.0 }
 0x868   : > { %9311 = vpow2.f32 %v8263_v41  ;;  %v8255_v37 = vmin.f32 %v17332_v60, 0.0  ;;  %v17354_v18 = vadd.f32 %v17290_v48, %v8226_v12  ;;  %v8371_v5 = vadd.f32 %v8370_v21, %v8369_v2 }
 0x869   : > { %v17357_v62 = vsub.f32 %v17270_v1, %v8352_v19  ;;  %v8365_v63 = vmul.f32 %v17338_v7, %v17338_v7  ;;  %v8372_v4 = vsel %vm1197_vm1, %v8363_v16, 0.0  ;;  %9313 = vpow2.f32 %v8265_v57 }
 0x86a   : > { %v8267_v58 = vmul.f32 1.442695, %v8254_v0  ;;  %v17363_v28 = vsub.f32 %v17276_v3, %v8352_v19  ;;  %v8373_v54 = vadd.f32 %v8372_v4, %v8371_v5  ;;  %v8366_v22 = vmul.f32 %v17346_v34, %v17346_v34 }
 0x86b   : > { %v8374_v42 = vsel %vm1197_vm1, %v8364_v51, 0.0  ;;  %vm8242_vm10 = vcmp.gt.f32.partialorder %v17298_v33, 0.0  ;;  %v8367_v39 = vmul.f32 %v17357_v62, %v17357_v62  ;;  %v8376_v26 = vsel %vm1197_vm1, %v8365_v63, 0.0 }
 0x86c   : > { %v8375_v35 = vadd.f32 %v8374_v42, %v8373_v54  ;;  %9315 = vpow2.f32 %v8267_v58  ;;  %v8269_v3 = vmul.f32 1.442695, %v8255_v37  ;;  %v8256_v24 = vmin.f32 %v17354_v18, 0.0 }
 0x86d   : > { %v8368_v17 = vmul.f32 %v17363_v28, %v17363_v28  ;;  %v8378_v50 = vsel %vm1197_vm1, %v8366_v22, 0.0  ;;  %v8380_v43 = vsel %vm1197_vm1, %v8367_v39, 0.0  ;;  %vm8243_vm2 = vcmp.gt.f32.partialorder %v17301_v13, 0.0 }
 0x86e   : > { %v8377_v14 = vadd.f32 %v8376_v26, %v8375_v35  ;;  %9317 = vpow2.f32 %v8269_v3  ;;  %v8271_v15 = vmul.f32 1.442695, %v8256_v24  ;;  %vm8244_vm3 = vcmp.gt.f32.partialorder %v17304_v56, 0.0 }
 0x86f   : > { %v9306_v8 = vpop.eup %9305  ;;  %vm8245_vm4 = vcmp.gt.f32.partialorder %v17311_v29, 0.0  ;;  %vm8247_vm5 = vcmp.gt.f32.partialorder %v17332_v60, 0.0  ;;  %vm8248_vm6 = vcmp.gt.f32.partialorder %v17354_v18, 0.0 }
 0x870   : > { %v9308_v31 = vpop.eup %9307  ;;  %v8709_v55 = vadd.f32 -1.0, %v9306_v8  ;;  %v8379_v46 = vadd.f32 %v8378_v50, %v8377_v14  ;;  %9319 = vpow2.f32 %v8271_v15 }
 0x871   : > { %v8710_v53 = vadd.f32 -1.0, %v9308_v31  ;;  %v9310_v1 = vpop.eup %9309 }
 0x872   : > { %v8281_v9 = vsel %vm8241_vm0, %v8233_v27, %v8709_v55  ;;  %v8711_v27 = vadd.f32 -1.0, %v9310_v1  ;;  %v9312_v44 = vpop.eup %9311  ;;  %v8381_v47 = vadd.f32 %v8380_v43, %v8379_v46 }
 0x873   : > { %8289 = vxpose.xlu0.b32.start [1/8] (short) (narrow) %v8281_v9, 16  ;;  %v8282_v10 = vsel %vm8242_vm10, %v17298_v33, %v8710_v53  ;;  %v8712_v30 = vadd.f32 -1.0, %v9312_v44  ;;  %v8382_v33 = vsel %vm1197_vm1, %v8368_v17, 0.0  ;;  %v9314_v61 = vpop.eup %9313  ;;  %vm8246_vm1 = vcmp.gt.f32.partialorder %v17317_v40, 0.0 }
 0x874   : > { %v8283_v11 = vsel %vm8243_vm2, %v17301_v13, %v8711_v27  ;;  %v8383_v32 = vadd.f32 %v8382_v33, %v8381_v47  ;;  %v8713_v41 = vadd.f32 -1.0, %v9314_v61 }
 0x875   : > { %v8284_v19 = vsel %vm8244_vm3, %v17304_v56, %v8712_v30 }
 0x876   : > { %v8384_v38 = vrot.slane %v8383_v32, 4  ;;  %v9316_v45 = vpop.eup %9315  ;;  %v8285_v13 = vsel %vm8245_vm4, %v17311_v29, %v8713_v41 }
 0x877   : > { %8290 = vxpose.xlu0.b32.cont [2/8] (short) (narrow) %v8282_v10, 16  ;;  %v8714_v59 = vadd.f32 -1.0, %v9316_v45 }
 0x878   : > { %v8385_v12 = vadd.f32 %v8384_v38, %v8383_v32  ;;  %v9318_v16 = vpop.eup %9317 }
 0x879   : > { %v8286_v51 = vsel %vm8246_vm1, %v17317_v40, %v8714_v59  ;;  %v8715_v2 = vadd.f32 -1.0, %v9318_v16 }
 0x87a   : > { %v8386_v49 = vrot.slane %v8385_v12, 2  ;;  %v9320_v56 = vpop.eup %9319 }
 0x87b   : > { %8291 = vxpose.xlu0.b32.cont [3/8] (short) (narrow) %v8283_v11, 16  ;;  %v8287_v37 = vsel %vm8247_vm5, %v17332_v60, %v8715_v2  ;;  %v8716_v5 = vadd.f32 -1.0, %v9320_v56 }
 0x87c   : > { %v8387_v57 = vadd.f32 %v8386_v49, %v8385_v12 }
 0x87d   : > { %v8288_v31 = vsel %vm8248_vm6, %v17354_v18, %v8716_v5 }
 0x87e   : > { %v8388_v0 = vrot.slane %v8387_v57, 1 }
 0x87f   : > { %8292 = vxpose.xlu0.b32.cont [4/8] (short) (narrow) %v8284_v19, 16 }
 0x880   : > { %v8389_v21 = vadd.f32 %v8388_v0, %v8387_v57 }
 0x882   : > { %v8390_v8 = vmul.f32 0.015625, %v8389_v21 }
 0x883   : > { %8293 = vxpose.xlu0.b32.cont [5/8] (short) (narrow) %v8285_v13, 16 }
 0x884   : > { %v8391_v29 = vadd.f32 1e-10, %v8390_v8 }
 0x886   : > { %9321 = vrsqrt.f32 %v8391_v29 }
 0x887   : > { %8294 = vxpose.xlu0.b32.cont [6/8] (short) (narrow) %v8286_v51, 16 }
 0x88b   : > { %8295 = vxpose.xlu0.b32.cont [7/8] (short) (narrow) %v8287_v37, 16 }
 0x88f   : > { %8296 = vxpose.xlu0.b32.end [8/8] (short) (narrow) %v8288_v31, 16 }
 0x890   : > { %v9322_v55 = vpop.eup %9321 }
 0x891   : > { %v8393_v40 = vmul.f32 %v9322_v55, %v17283_v23 }
 0x893   : > { %v8397_v63 = vrot.slane %v8393_v40, %v18597_v25 }
 0x895   : > { %v8398_v4 = vmul.f32 %v8397_v63, %v17320_v52  ;;  %v8399_v58 = vmul.f32 %v8397_v63, %v17323_v20  ;;  %v8400_v60 = vmul.f32 %v8397_v63, %v17326_v6  ;;  %v8401_v54 = vmul.f32 %v8397_v63, %v17329_v36 }
 0x896   : > { %v8405_v9 = vmul.f32 %v8397_v63, %v17363_v28  ;;  %v8402_v20 = vmul.f32 %v8397_v63, %v17338_v7  ;;  %v8403_v28 = vmul.f32 %v8397_v63, %v17346_v34  ;;  %v8404_v3 = vmul.f32 %v8397_v63, %v17357_v62 }
 0x897   : > { %v8406_v53 = vadd.f32 %v17290_v48, %v8398_v4  ;;  %v8407_v18 = vadd.f32 %v17290_v48, %v8399_v58  ;;  %v8408_v22 = vadd.f32 %v17290_v48, %v8400_v60  ;;  %v8409_v52 = vadd.f32 %v17290_v48, %v8401_v54 }
 0x898   : > { %v17402_v23 = vadd.f32 %v17290_v48, %v8405_v9  ;;  %v8410_v26 = vadd.f32 %v17290_v48, %v8402_v20  ;;  %v8411_v10 = vadd.f32 %v17290_v48, %v8403_v28  ;;  %v8412_v17 = vadd.f32 %v17290_v48, %v8404_v3 }
 0x899   : > { %v8422_v25 = vmin.f32 %v8406_v53, 0.0  ;;  %v8423_v42 = vmin.f32 %v8407_v18, 0.0  ;;  %v8424_v6 = vmin.f32 %v8408_v22, 0.0  ;;  %v8425_v39 = vmin.f32 %v8409_v52, 0.0 }
 0x89a   : > { %v8426_v14 = vmin.f32 %v8410_v26, 0.0  ;;  %v8427_v27 = vmin.f32 %v8411_v10, 0.0  ;;  %vm8414_vm9 = vcmp.gt.f32.partialorder %v8406_v53, 0.0  ;;  %v8428_v43 = vmin.f32 %v8412_v17, 0.0 }
 0x89b   : > { %v8430_v1 = vmul.f32 1.442695, %v8422_v25  ;;  %v8432_v36 = vmul.f32 1.442695, %v8423_v42  ;;  %v8434_v35 = vmul.f32 1.442695, %v8424_v6 }
 0x89c   : > { %v8436_v24 = vmul.f32 1.442695, %v8425_v39  ;;  %v8438_v7 = vmul.f32 1.442695, %v8426_v14  ;;  %v8440_v46 = vmul.f32 1.442695, %v8427_v27 }
 0x89d   : > { %9323 = vpow2.f32 %v8430_v1  ;;  %vm8415_vm11 = vcmp.gt.f32.partialorder %v8407_v18, 0.0  ;;  %v8442_v11 = vmul.f32 1.442695, %v8428_v43  ;;  %v8429_v30 = vmin.f32 %v17402_v23, 0.0 }
 0x89e   : > { %9325 = vpow2.f32 %v8432_v36  ;;  %vm8416_vm12 = vcmp.gt.f32.partialorder %v8408_v22, 0.0  ;;  %vm8417_vm13 = vcmp.gt.f32.partialorder %v8409_v52, 0.0  ;;  %vm8418_vm14 = vcmp.gt.f32.partialorder %v8410_v26, 0.0 }
 0x89f   : > { %9327 = vpow2.f32 %v8434_v35  ;;  %v8444_v48 = vmul.f32 1.442695, %v8429_v30  ;;  %vm8419_vm15 = vcmp.gt.f32.partialorder %v8411_v10, 0.0  ;;  %vm8420_vm7 = vcmp.gt.f32.partialorder %v8412_v17, 0.0 }
 0x8a0   : > { %9329 = vpow2.f32 %v8436_v24  ;;  %vm8421_vm0 = vcmp.gt.f32.partialorder %v17402_v23, 0.0 }
 0x8a1   : > { %9331 = vpow2.f32 %v8438_v7 }
 0x8a2   : > { %9333 = vpow2.f32 %v8440_v46 }
 0x8a3   : > { %9335 = vpow2.f32 %v8442_v11 }
 0x8a4   : > { %9337 = vpow2.f32 %v8444_v48 }
 0x8a7   : > { %v9324_v50 = vpop.eup %9323 }
 0x8a8   : > { %v9326_v34 = vpop.eup %9325  ;;  %v8717_v44 = vadd.f32 -1.0, %v9324_v50 }
 0x8a9   : > { %v8718_v47 = vadd.f32 -1.0, %v9326_v34  ;;  %v9328_v62 = vpop.eup %9327 }
 0x8aa   : > { %v8454_v15 = vsel %vm8414_vm9, %v8406_v53, %v8717_v44  ;;  %v8719_v61 = vadd.f32 -1.0, %v9328_v62  ;;  %v9330_v32 = vpop.eup %9329 }
 0x8ab   : > { %8462 = vxpose.xlu1.b32.start [1/8] (short) (narrow) %v8454_v15, 16  ;;  %v8455_v33 = vsel %vm8415_vm11, %v8407_v18, %v8718_v47  ;;  %v8720_v19 = vadd.f32 -1.0, %v9330_v32  ;;  %v9332_v41 = vpop.eup %9331 }
 0x8ac   : > { %v8456_v38 = vsel %vm8416_vm12, %v8408_v22, %v8719_v61  ;;  %v8721_v12 = vadd.f32 -1.0, %v9332_v41  ;;  %v9334_v49 = vpop.eup %9333 }
 0x8ad   : > { %v8457_v45 = vsel %vm8417_vm13, %v8409_v52, %v8720_v19  ;;  %v8722_v59 = vadd.f32 -1.0, %v9334_v49  ;;  %v9336_v16 = vpop.eup %9335 }
 0x8ae   : > { %v8458_v13 = vsel %vm8418_vm14, %v8410_v26, %v8721_v12  ;;  %v8723_v0 = vadd.f32 -1.0, %v9336_v16  ;;  %v9338_v51 = vpop.eup %9337 }
 0x8af   : > { %8463 = vxpose.xlu1.b32.cont [2/8] (short) (narrow) %v8455_v33, 16  ;;  %v8459_v57 = vsel %vm8419_vm15, %v8411_v10, %v8722_v59  ;;  %v8724_v56 = vadd.f32 -1.0, %v9338_v51 }
 0x8b0   : > { %v8460_v2 = vsel %vm8420_vm7, %v8412_v17, %v8723_v0 }
 0x8b1   : > { %v8461_v21 = vsel %vm8421_vm0, %v17402_v23, %v8724_v56 }
 0x8b3   : > { %8464 = vxpose.xlu1.b32.cont [3/8] (short) (narrow) %v8456_v38, 16 }
 0x8b7   : > { %8465 = vxpose.xlu1.b32.cont [4/8] (short) (narrow) %v8457_v45, 16 }
 0x8bb   : > { %8466 = vxpose.xlu1.b32.cont [5/8] (short) (narrow) %v8458_v13, 16 }
 0x8bf   : > { %8467 = vxpose.xlu1.b32.cont [6/8] (short) (narrow) %v8459_v57, 16 }
 0x8c3   : > { %8468 = vxpose.xlu1.b32.cont [7/8] (short) (narrow) %v8460_v2, 16 }
 0x8c7   : > { %8469 = vxpose.xlu1.b32.end [8/8] (short) (narrow) %v8461_v21, 16 }
 0x8f3   : > { %v8305_v8 = vpop.trf.xlu0 }
 0x8f4   : > { %8321 = vst.msk [vmem:[%s444_s16] sm:$0xff] %vm2806_vm8, %v8305_v8 }
 0x8f7   : > { %v8306_v37 = vpop.trf.xlu0 }
 0x8f8   : > { %8322 = vst.msk [vmem:[%s444_s16 + $0x8] sm:$0xff] %vm2806_vm8, %v8306_v37 }
 0x92b   : > { %v8478_v5 = vpop.trf.xlu1 }
 0x92c   : > { %8725 = vst.msk [vmem:[%s444_s16 + $0x10] sm:$0xff] %vm2806_vm8, %v8478_v5 }
 0x92f   : > { %v8479_v29 = vpop.trf.xlu1 }
 0x930   : > { %8726 = vst.msk [vmem:[%s444_s16 + $0x18] sm:$0xff] %vm2806_vm8, %v8479_v29 }
 0x931 PF: > { %s23_s23 = sadd.s32 1, %s9353_s23  }
 0x932   : > { %p20_p5 = scmp.ge.s32.totalorder %s23_s23, 4  }
 0x934   :  { %22 = sbr.rel (!%p20_p5) target bundleno = 1 (0x1), region = 111 }

</bundles_post_ra>
